<compile_context>
chip_gen: v5e
topology: v5e:2x2
jax: 0.10.0
libtpu: 0.0.40
codegen_flags: <defaults>
</compile_context>

<pallas_src>
import numpy as np
import jax
import jax.numpy as jnp
from jax import lax
from jax.experimental import pallas as pl
from jax.experimental.pallas import tpu as pltpu

# ----------------------------- model config ---------------------------------
N_CHAN = 8                 # EEG channels (height of NCHW input)
FS = 80                    # sampling rate
TEM_KLEN = 0.1
N_F = 16                   # temporal filters (chosen so N_CHAN*N_F = 128)
KT = int(FS * TEM_KLEN)    # temporal kernel length = 8
T = 128                    # time samples
B = 8                      # batch
BATCH_BLOCK = 4            # samples stacked on lanes per grid step (L = 512)
EPS = 1e-3                 # matches nn.BatchNorm2d(eps=0.001) in the module

# PyTorch 'same' padding split (extra pad goes to the end)
PAD_T_L = (KT - 1) // 2
PAD_T_R = (KT - 1) - PAD_T_L
PAD_H_L = (N_CHAN - 1) // 2
PAD_H_R = (N_CHAN - 1) - PAD_H_L


# ------------------------------- kernel --------------------------------------
def cleegn_kernel(x_ref, w1_ref, b1_ref, w2_ref, b2_ref, w3_ref, w45_ref,
                  b45_ref, mask_ref, out_ref):
    f32 = jnp.float32
    x0 = x_ref[...]                      # (n_chan, L)   L = BATCH_BLOCK * T
    masks = mask_ref[...]                # (KT, L)       per-tap validity masks

    def shift_time(y, k):
        # y[:, b*T + t] -> y[:, b*T + t + (k - PAD_T_L)] with per-sample zero pad.
        s = k - PAD_T_L
        if s == 0:
            return y                     # centered tap: mask is all-ones
        return jnp.roll(y, -s, axis=1) * masks[k:k + 1, :]

    # ---- conv1 (height matmul) + BN1 folded ----
    y1 = jnp.dot(w1_ref[...], x0, preferred_element_type=f32) + b1_ref[...]

    # ---- conv2 + BN2 folded: time-im2col stack, one (128,64)@(64,L) matmul ----
    stack1 = jnp.concatenate([shift_time(y1, k) for k in range(KT)], axis=0)
    y2 = jnp.dot(w2_ref[...], stack1, preferred_element_type=f32) + b2_ref[...]

    # ---- conv3 + BN3 folded: KT accumulating (128,128)@(128,L) matmuls ----
    y3 = jnp.dot(w3_ref[0], shift_time(y2, 0), preferred_element_type=f32)
    for k in range(1, KT):               # static unroll, LLO schedules freely
        y3 = y3 + jnp.dot(w3_ref[k], shift_time(y2, k),
                          preferred_element_type=f32)
    # (conv3 bias is folded into b45 downstream)

    # ---- conv4 + BN4 + conv5 pre-composed block-Toeplitz; full-tile store ----
    out_ref[...] = (jnp.dot(w45_ref[...], y3, preferred_element_type=f32)
                    + b45_ref[...])


# ------------------------------- wrapper --------------------------------------
def cleegn_forward(x, kparams, batch_block):
    Bn, _, n_chan, Tn = x.shape
    assert Bn % batch_block == 0, "batch must be divisible by BATCH_BLOCK"
    L = batch_block * Tn

    # Layout plumbing in the wrapper: (B,1,C,T) -> (C, B*T) lane-dense slab.
    x2d = jnp.transpose(x[:, 0, :, :], (1, 0, 2)).reshape(n_chan, Bn * Tn)

    def full_spec(p):
        nd = p.ndim
        # Grid-invariant index map: weights stay resident in VMEM (DMA'd once).
        return pl.BlockSpec(p.shape, lambda i, _nd=nd: (0,) * _nd)

    in_specs = [pl.BlockSpec((n_chan, L), lambda i: (0, i))]
    in_specs += [full_spec(p) for p in kparams]
    out_specs = pl.BlockSpec((n_chan, L), lambda i: (0, i))

    out2d = pl.pallas_call(
        cleegn_kernel,
        out_shape=jax.ShapeDtypeStruct((n_chan, Bn * Tn), jnp.float32),
        grid_spec=pltpu.PrefetchScalarGridSpec(
            num_scalar_prefetch=0,
            grid=(Bn // batch_block,),
            in_specs=in_specs,
            out_specs=out_specs),
        compiler_params=pltpu.CompilerParams(
            dimension_semantics=("parallel",)),
    )(x2d, *kparams)

    # (C, B*T) -> (B, 1, C, T)
    return jnp.transpose(out2d.reshape(n_chan, Bn, Tn), (1, 0, 2))[:, None, :, :]


# --------------------------- parameter setup ----------------------------------
def bn_init(key, n):
    k1, k2, k3, k4 = jax.random.split(key, 4)
    gamma = 1.0 + 0.1 * jax.random.normal(k1, (n,), jnp.float32)
    beta = 0.1 * jax.random.normal(k2, (n,), jnp.float32)
    mean = 0.1 * jax.random.normal(k3, (n,), jnp.float32)
    var = 1.0 + 0.1 * jnp.abs(jax.random.normal(k4, (n,), jnp.float32))
    return gamma, beta, mean, var


def init_torch_params(key):
    ks = jax.random.split(key, 14)
    nrm = lambda k, s: 0.1 * jax.random.normal(k, s, jnp.float32)
    w1 = nrm(ks[0], (N_CHAN, 1, N_CHAN, 1));   b1 = nrm(ks[1], (N_CHAN,))
    bn1 = bn_init(ks[2], 1)
    w2 = nrm(ks[3], (N_F, 1, 1, KT));          b2 = nrm(ks[4], (N_F,))
    bn2 = bn_init(ks[5], N_F)
    w3 = nrm(ks[6], (N_F, N_F, 1, KT));        b3 = nrm(ks[7], (N_F,))
    bn3 = bn_init(ks[8], N_F)
    w4 = nrm(ks[9], (N_CHAN, N_F, N_CHAN, 1)); b4 = nrm(ks[10], (N_CHAN,))
    bn4 = bn_init(ks[11], N_CHAN)
    w5 = nrm(ks[12], (1, N_CHAN, N_CHAN, 1));  b5 = nrm(ks[13], (1,))
    return (w1, b1, bn1, w2, b2, bn2, w3, b3, bn3, w4, b4, bn4, w5, b5)


def to_kernel_params(tp, batch_block):
    """Fold BN + biases into weights and build the block/Toeplitz matrices."""
    (w1, b1, bn1, w2, b2, bn2, w3, b3, bn3, w4, b4, bn4, w5, b5) = tp

    def fold(bn):
        g, be, m, v = bn
        s = g / jnp.sqrt(v + EPS)
        t = be - m * s
        return np.asarray(s), np.asarray(t)

    s1, t1 = fold(bn1)
    s2, t2 = fold(bn2)
    s3, t3 = fold(bn3)
    s4, t4 = fold(bn4)

    w1n, b1n = np.asarray(w1), np.asarray(b1)
    w2n, b2n = np.asarray(w2), np.asarray(b2)
    w3n, b3n = np.asarray(w3), np.asarray(b3)
    w4n, b4n = np.asarray(w4), np.asarray(b4)
    w5n, b5n = np.asarray(w5), np.asarray(b5)

    eye_c = np.eye(N_CHAN, dtype=np.float32)

    # conv1 + scalar BN1
    W1f = (s1[0] * w1n[:, 0, :, 0]).astype(np.float32)                 # (C, C)
    b1f = (s1[0] * b1n + t1[0]).reshape(N_CHAN, 1).astype(np.float32)

    # conv2 + BN2, block-diagonal over EEG channels; rows = (o*N_F + f)
    w2f = s2[:, None] * w2n[:, 0, 0, :]                                # (N_F, KT)
    b2f = s2 * b2n + t2
    W2blk = np.einsum('fk,oc->ofkc', w2f, eye_c).reshape(
        N_CHAN * N_F, KT * N_CHAN).astype(np.float32)                  # (128, 64)
    b2rep = np.tile(b2f, N_CHAN).reshape(N_CHAN * N_F, 1).astype(np.float32)

    # conv3 + BN3: one block-diagonal (128,128) weight per temporal tap.
    w3f = s3[:, None, None] * w3n[:, :, 0, :]                          # (N_F, N_F, KT)
    b3f = s3 * b3n + t3
    W3stk = np.einsum('fgk,oc->kofcg', w3f, eye_c).reshape(
        KT, N_CHAN * N_F, N_CHAN * N_F).astype(np.float32)             # (KT,128,128)
    b3rep = np.tile(b3f, N_CHAN)                                       # (128,)

    # conv4 + BN4 as block-Toeplitz over the height axis (rows = h*C + o).
    w4f = s4[:, None, None] * w4n[:, :, :, 0]                          # (C, N_F, C)
    b4f = s4 * b4n + t4
    W4blk = np.zeros((N_CHAN * N_CHAN, N_CHAN * N_F), np.float32)
    for h in range(N_CHAN):
        for o in range(N_CHAN):
            for cp in range(N_CHAN):
                kh = cp - h + PAD_H_L
                if 0 <= kh < N_CHAN:
                    W4blk[h * N_CHAN + o, cp * N_F:(cp + 1) * N_F] = w4f[o, :, kh]
    b4tot = W4blk @ b3rep + np.tile(b4f, N_CHAN)                       # (64,)

    # conv5 as block-Toeplitz; then pre-compose conv5 o conv4.
    w5f = w5n[0, :, :, 0]                                              # (C_in, kh)
    W5blk = np.zeros((N_CHAN, N_CHAN * N_CHAN), np.float32)
    for h in range(N_CHAN):
        for hp in range(N_CHAN):
            kh = hp - h + PAD_H_L
            if 0 <= kh < N_CHAN:
                W5blk[h, hp * N_CHAN:(hp + 1) * N_CHAN] = w5f[:, kh]
    W45 = (W5blk @ W4blk).astype(np.float32)                           # (8, 128)
    b45 = (W5blk @ b4tot + b5n[0]).reshape(N_CHAN, 1).astype(np.float32)

    # Per-tap validity masks over the stacked (batch_block * T) lane axis:
    # mask[k, b*T + t] = 1 iff 0 <= t + (k - PAD_T_L) < T.
    tt = np.tile(np.arange(T), batch_block)
    masks = np.stack([((tt + k - PAD_T_L >= 0) & (tt + k - PAD_T_L < T))
                      for k in range(KT)]).astype(np.float32)          # (KT, L)

    to_j = lambda a: jnp.asarray(a, jnp.float32)
    return (to_j(W1f), to_j(b1f), to_j(W2blk), to_j(b2rep),
            to_j(W3stk), to_j(W45), to_j(b45), to_j(masks))


# ------------------------- pure-JAX reference ---------------------------------
def cleegn_reference(x, tp):
    (w1, b1, bn1, w2, b2, bn2, w3, b3, bn3, w4, b4, bn4, w5, b5) = tp
    dn = ('NCHW', 'OIHW', 'NCHW')

    def bn(y, p):
        g, be, m, v = p
        sh = (1, -1, 1, 1)
        return ((y - m.reshape(sh)) / jnp.sqrt(v.reshape(sh) + EPS)
                * g.reshape(sh) + be.reshape(sh))

    y = lax.conv_general_dilated(x, w1, (1, 1), 'VALID', dimension_numbers=dn)
    y = y + b1.reshape(1, -1, 1, 1)
    y = jnp.transpose(y, (0, 2, 1, 3))
    y = bn(y, bn1)
    y = lax.conv_general_dilated(y, w2, (1, 1), [(0, 0), (PAD_T_L, PAD_T_R)],
                                 dimension_numbers=dn) + b2.reshape(1, -1, 1, 1)
    y = bn(y, bn2)
    y = lax.conv_general_dilated(y, w3, (1, 1), [(0, 0), (PAD_T_L, PAD_T_R)],
                                 dimension_numbers=dn) + b3.reshape(1, -1, 1, 1)
    y = bn(y, bn3)
    y = lax.conv_general_dilated(y, w4, (1, 1), [(PAD_H_L, PAD_H_R), (0, 0)],
                                 dimension_numbers=dn) + b4.reshape(1, -1, 1, 1)
    y = bn(y, bn4)
    y = lax.conv_general_dilated(y, w5, (1, 1), [(PAD_H_L, PAD_H_R), (0, 0)],
                                 dimension_numbers=dn) + b5.reshape(1, -1, 1, 1)
    return y


# --------------------------------- main ----------------------------------------
if __name__ == "__main__":
    key = jax.random.PRNGKey(0)
    kx, kp = jax.random.split(key)
    x = jax.random.normal(kx, (B, 1, N_CHAN, T), jnp.float32)

    torch_params = init_torch_params(kp)
    kernel_params = to_kernel_params(torch_params, BATCH_BLOCK)

    out = cleegn_forward(x, kernel_params, BATCH_BLOCK)
    out = jax.block_until_ready(out)
    assert out.shape == (B, 1, N_CHAN, T)

    ref = cleegn_reference(x, torch_params)
    max_err = float(jnp.max(jnp.abs(out - ref)))
    assert max_err < 2e-3, f"mismatch vs reference: {max_err}"

    print("KERNEL_OK")
</pallas_src>

<mosaic_0001>
module attributes {stable_mosaic.version = 11 : i64} {
  func.func @cleegn_kernel(%arg0: i32, %arg1: memref<8x512xf32, #tpu.memory_space<vmem>>, %arg2: memref<8x8xf32, #tpu.memory_space<vmem>>, %arg3: memref<8x1xf32, #tpu.memory_space<vmem>>, %arg4: memref<128x64xf32, #tpu.memory_space<vmem>>, %arg5: memref<128x1xf32, #tpu.memory_space<vmem>>, %arg6: memref<8x128x128xf32, #tpu.memory_space<vmem>>, %arg7: memref<8x128xf32, #tpu.memory_space<vmem>>, %arg8: memref<8x1xf32, #tpu.memory_space<vmem>>, %arg9: memref<8x512xf32, #tpu.memory_space<vmem>>, %arg10: memref<8x512xf32, #tpu.memory_space<vmem>>) attributes {dimension_semantics = [#tpu.dimension_semantics<parallel>], iteration_bounds = array<i64: 2>, scalar_prefetch = 0 : i64, scratch_operands = 0 : i64, tpu.core_type = #tpu.core_type<tc>, window_params = [{transform_indices = @transform_0, window_bounds = array<i64: 8, 512>}, {pipeline_mode = #tpu.pipeline_mode<synchronous>, transform_indices = @transform_1, window_bounds = array<i64: 8, 8>}, {pipeline_mode = #tpu.pipeline_mode<synchronous>, transform_indices = @transform_2, window_bounds = array<i64: 8, 1>}, {pipeline_mode = #tpu.pipeline_mode<synchronous>, transform_indices = @transform_3, window_bounds = array<i64: 128, 64>}, {pipeline_mode = #tpu.pipeline_mode<synchronous>, transform_indices = @transform_4, window_bounds = array<i64: 128, 1>}, {pipeline_mode = #tpu.pipeline_mode<synchronous>, transform_indices = @transform_5, window_bounds = array<i64: 8, 128, 128>}, {pipeline_mode = #tpu.pipeline_mode<synchronous>, transform_indices = @transform_6, window_bounds = array<i64: 8, 128>}, {pipeline_mode = #tpu.pipeline_mode<synchronous>, transform_indices = @transform_7, window_bounds = array<i64: 8, 1>}, {pipeline_mode = #tpu.pipeline_mode<synchronous>, transform_indices = @transform_8, window_bounds = array<i64: 8, 512>}, {transform_indices = @transform_9, window_bounds = array<i64: 8, 512>}]} {
    %c0 = arith.constant 0 : index
    %c0_0 = arith.constant 0 : index
    %0 = vector.load %arg1[%c0, %c0_0] : memref<8x512xf32, #tpu.memory_space<vmem>>, vector<8x512xf32>
    %c0_1 = arith.constant 0 : index
    %c0_2 = arith.constant 0 : index
    %1 = vector.load %arg9[%c0_1, %c0_2] : memref<8x512xf32, #tpu.memory_space<vmem>>, vector<8x512xf32>
    %c0_3 = arith.constant 0 : index
    %c0_4 = arith.constant 0 : index
    %2 = vector.load %arg2[%c0_3, %c0_4] : memref<8x8xf32, #tpu.memory_space<vmem>>, vector<8x8xf32>
    %cst = arith.constant dense<0.000000e+00> : vector<8x512xf32>
    %3 = tpu.matmul %2, %0, %cst {dimension_numbers = #tpu.dot_dimension_numbers<[1], [0], [0], [1], [0, 0, 1, 1], [], []>} : vector<8x8xf32>, vector<8x512xf32>, vector<8x512xf32> -> vector<8x512xf32>
    %c0_5 = arith.constant 0 : index
    %c0_6 = arith.constant 0 : index
    %4 = vector.load %arg3[%c0_5, %c0_6] : memref<8x1xf32, #tpu.memory_space<vmem>>, vector<8x1xf32>
    %5 = vector.broadcast %4 : vector<8x1xf32> to vector<8x512xf32>
    %6 = arith.addf %3, %5 : vector<8x512xf32>
    %7 = vector.extract_strided_slice %6 {offsets = [0, 509], sizes = [8, 3], strides = [1, 1]} : vector<8x512xf32> to vector<8x3xf32>
    %8 = vector.extract_strided_slice %6 {offsets = [0, 0], sizes = [8, 509], strides = [1, 1]} : vector<8x512xf32> to vector<8x509xf32>
    %9 = tpu.concatenate %7, %8 in 1 : vector<8x3xf32>, vector<8x509xf32> -> vector<8x512xf32>
    %10 = vector.extract_strided_slice %1 {offsets = [0, 0], sizes = [1, 512], strides = [1, 1]} : vector<8x512xf32> to vector<1x512xf32>
    %11 = vector.broadcast %10 : vector<1x512xf32> to vector<8x512xf32>
    %12 = arith.mulf %9, %11 : vector<8x512xf32>
    %13 = vector.extract_strided_slice %6 {offsets = [0, 510], sizes = [8, 2], strides = [1, 1]} : vector<8x512xf32> to vector<8x2xf32>
    %14 = vector.extract_strided_slice %6 {offsets = [0, 0], sizes = [8, 510], strides = [1, 1]} : vector<8x512xf32> to vector<8x510xf32>
    %15 = tpu.concatenate %13, %14 in 1 : vector<8x2xf32>, vector<8x510xf32> -> vector<8x512xf32>
    %16 = vector.extract_strided_slice %1 {offsets = [1, 0], sizes = [1, 512], strides = [1, 1]} : vector<8x512xf32> to vector<1x512xf32>
    %17 = vector.broadcast %16 : vector<1x512xf32> to vector<8x512xf32>
    %18 = arith.mulf %15, %17 : vector<8x512xf32>
    %19 = vector.extract_strided_slice %6 {offsets = [0, 511], sizes = [8, 1], strides = [1, 1]} : vector<8x512xf32> to vector<8x1xf32>
    %20 = vector.extract_strided_slice %6 {offsets = [0, 0], sizes = [8, 511], strides = [1, 1]} : vector<8x512xf32> to vector<8x511xf32>
    %21 = tpu.concatenate %19, %20 in 1 : vector<8x1xf32>, vector<8x511xf32> -> vector<8x512xf32>
    %22 = vector.extract_strided_slice %1 {offsets = [2, 0], sizes = [1, 512], strides = [1, 1]} : vector<8x512xf32> to vector<1x512xf32>
    %23 = vector.broadcast %22 : vector<1x512xf32> to vector<8x512xf32>
    %24 = arith.mulf %21, %23 : vector<8x512xf32>
    %25 = vector.extract_strided_slice %6 {offsets = [0, 1], sizes = [8, 511], strides = [1, 1]} : vector<8x512xf32> to vector<8x511xf32>
    %26 = vector.extract_strided_slice %6 {offsets = [0, 0], sizes = [8, 1], strides = [1, 1]} : vector<8x512xf32> to vector<8x1xf32>
    %27 = tpu.concatenate %25, %26 in 1 : vector<8x511xf32>, vector<8x1xf32> -> vector<8x512xf32>
    %28 = vector.extract_strided_slice %1 {offsets = [4, 0], sizes = [1, 512], strides = [1, 1]} : vector<8x512xf32> to vector<1x512xf32>
    %29 = vector.broadcast %28 : vector<1x512xf32> to vector<8x512xf32>
    %30 = arith.mulf %27, %29 : vector<8x512xf32>
    %31 = vector.extract_strided_slice %6 {offsets = [0, 2], sizes = [8, 510], strides = [1, 1]} : vector<8x512xf32> to vector<8x510xf32>
    %32 = vector.extract_strided_slice %6 {offsets = [0, 0], sizes = [8, 2], strides = [1, 1]} : vector<8x512xf32> to vector<8x2xf32>
    %33 = tpu.concatenate %31, %32 in 1 : vector<8x510xf32>, vector<8x2xf32> -> vector<8x512xf32>
    %34 = vector.extract_strided_slice %1 {offsets = [5, 0], sizes = [1, 512], strides = [1, 1]} : vector<8x512xf32> to vector<1x512xf32>
    %35 = vector.broadcast %34 : vector<1x512xf32> to vector<8x512xf32>
    %36 = arith.mulf %33, %35 : vector<8x512xf32>
    %37 = vector.extract_strided_slice %6 {offsets = [0, 3], sizes = [8, 509], strides = [1, 1]} : vector<8x512xf32> to vector<8x509xf32>
    %38 = vector.extract_strided_slice %6 {offsets = [0, 0], sizes = [8, 3], strides = [1, 1]} : vector<8x512xf32> to vector<8x3xf32>
    %39 = tpu.concatenate %37, %38 in 1 : vector<8x509xf32>, vector<8x3xf32> -> vector<8x512xf32>
    %40 = vector.extract_strided_slice %1 {offsets = [6, 0], sizes = [1, 512], strides = [1, 1]} : vector<8x512xf32> to vector<1x512xf32>
    %41 = vector.broadcast %40 : vector<1x512xf32> to vector<8x512xf32>
    %42 = arith.mulf %39, %41 : vector<8x512xf32>
    %43 = vector.extract_strided_slice %6 {offsets = [0, 4], sizes = [8, 508], strides = [1, 1]} : vector<8x512xf32> to vector<8x508xf32>
    %44 = vector.extract_strided_slice %6 {offsets = [0, 0], sizes = [8, 4], strides = [1, 1]} : vector<8x512xf32> to vector<8x4xf32>
    %45 = tpu.concatenate %43, %44 in 1 : vector<8x508xf32>, vector<8x4xf32> -> vector<8x512xf32>
    %46 = vector.extract_strided_slice %1 {offsets = [7, 0], sizes = [1, 512], strides = [1, 1]} : vector<8x512xf32> to vector<1x512xf32>
    %47 = vector.broadcast %46 : vector<1x512xf32> to vector<8x512xf32>
    %48 = arith.mulf %45, %47 : vector<8x512xf32>
    %49 = tpu.concatenate %12, %18, %24, %6, %30, %36, %42, %48 in 0 : vector<8x512xf32>, vector<8x512xf32>, vector<8x512xf32>, vector<8x512xf32>, vector<8x512xf32>, vector<8x512xf32>, vector<8x512xf32>, vector<8x512xf32> -> vector<64x512xf32>
    %c0_7 = arith.constant 0 : index
    %c0_8 = arith.constant 0 : index
    %50 = vector.load %arg4[%c0_7, %c0_8] : memref<128x64xf32, #tpu.memory_space<vmem>>, vector<128x64xf32>
    %cst_9 = arith.constant dense<0.000000e+00> : vector<128x512xf32>
    %51 = tpu.matmul %50, %49, %cst_9 {dimension_numbers = #tpu.dot_dimension_numbers<[1], [0], [0], [1], [0, 0, 1, 1], [], []>} : vector<128x64xf32>, vector<64x512xf32>, vector<128x512xf32> -> vector<128x512xf32>
    %c0_10 = arith.constant 0 : index
    %c0_11 = arith.constant 0 : index
    %52 = vector.load %arg5[%c0_10, %c0_11] : memref<128x1xf32, #tpu.memory_space<vmem>>, vector<128x1xf32>
    %53 = vector.broadcast %52 : vector<128x1xf32> to vector<128x512xf32>
    %54 = arith.addf %51, %53 : vector<128x512xf32>
    %c0_12 = arith.constant 0 : index
    %c0_13 = arith.constant 0 : index
    %c0_14 = arith.constant 0 : index
    %55 = vector.load %arg6[%c0_12, %c0_13, %c0_14] : memref<8x128x128xf32, #tpu.memory_space<vmem>>, vector<1x128x128xf32>
    %56 = vector.shape_cast %55 : vector<1x128x128xf32> to vector<128x128xf32>
    %57 = vector.extract_strided_slice %54 {offsets = [0, 509], sizes = [128, 3], strides = [1, 1]} : vector<128x512xf32> to vector<128x3xf32>
    %58 = vector.extract_strided_slice %54 {offsets = [0, 0], sizes = [128, 509], strides = [1, 1]} : vector<128x512xf32> to vector<128x509xf32>
    %59 = tpu.concatenate %57, %58 in 1 : vector<128x3xf32>, vector<128x509xf32> -> vector<128x512xf32>
    %60 = vector.extract_strided_slice %1 {offsets = [0, 0], sizes = [1, 512], strides = [1, 1]} : vector<8x512xf32> to vector<1x512xf32>
    %61 = vector.broadcast %60 : vector<1x512xf32> to vector<128x512xf32>
    %62 = arith.mulf %59, %61 : vector<128x512xf32>
    %cst_15 = arith.constant dense<0.000000e+00> : vector<128x512xf32>
    %63 = tpu.matmul %56, %62, %cst_15 {dimension_numbers = #tpu.dot_dimension_numbers<[1], [0], [0], [1], [0, 0, 1, 1], [], []>} : vector<128x128xf32>, vector<128x512xf32>, vector<128x512xf32> -> vector<128x512xf32>
    %c1 = arith.constant 1 : index
    %c0_16 = arith.constant 0 : index
    %c0_17 = arith.constant 0 : index
    %64 = vector.load %arg6[%c1, %c0_16, %c0_17] : memref<8x128x128xf32, #tpu.memory_space<vmem>>, vector<1x128x128xf32>
    %65 = vector.shape_cast %64 : vector<1x128x128xf32> to vector<128x128xf32>
    %66 = vector.extract_strided_slice %54 {offsets = [0, 510], sizes = [128, 2], strides = [1, 1]} : vector<128x512xf32> to vector<128x2xf32>
    %67 = vector.extract_strided_slice %54 {offsets = [0, 0], sizes = [128, 510], strides = [1, 1]} : vector<128x512xf32> to vector<128x510xf32>
    %68 = tpu.concatenate %66, %67 in 1 : vector<128x2xf32>, vector<128x510xf32> -> vector<128x512xf32>
    %69 = vector.extract_strided_slice %1 {offsets = [1, 0], sizes = [1, 512], strides = [1, 1]} : vector<8x512xf32> to vector<1x512xf32>
    %70 = vector.broadcast %69 : vector<1x512xf32> to vector<128x512xf32>
    %71 = arith.mulf %68, %70 : vector<128x512xf32>
    %cst_18 = arith.constant dense<0.000000e+00> : vector<128x512xf32>
    %72 = tpu.matmul %65, %71, %cst_18 {dimension_numbers = #tpu.dot_dimension_numbers<[1], [0], [0], [1], [0, 0, 1, 1], [], []>} : vector<128x128xf32>, vector<128x512xf32>, vector<128x512xf32> -> vector<128x512xf32>
    %73 = arith.addf %63, %72 : vector<128x512xf32>
    %c2 = arith.constant 2 : index
    %c0_19 = arith.constant 0 : index
    %c0_20 = arith.constant 0 : index
    %74 = vector.load %arg6[%c2, %c0_19, %c0_20] : memref<8x128x128xf32, #tpu.memory_space<vmem>>, vector<1x128x128xf32>
    %75 = vector.shape_cast %74 : vector<1x128x128xf32> to vector<128x128xf32>
    %76 = vector.extract_strided_slice %54 {offsets = [0, 511], sizes = [128, 1], strides = [1, 1]} : vector<128x512xf32> to vector<128x1xf32>
    %77 = vector.extract_strided_slice %54 {offsets = [0, 0], sizes = [128, 511], strides = [1, 1]} : vector<128x512xf32> to vector<128x511xf32>
    %78 = tpu.concatenate %76, %77 in 1 : vector<128x1xf32>, vector<128x511xf32> -> vector<128x512xf32>
    %79 = vector.extract_strided_slice %1 {offsets = [2, 0], sizes = [1, 512], strides = [1, 1]} : vector<8x512xf32> to vector<1x512xf32>
    %80 = vector.broadcast %79 : vector<1x512xf32> to vector<128x512xf32>
    %81 = arith.mulf %78, %80 : vector<128x512xf32>
    %cst_21 = arith.constant dense<0.000000e+00> : vector<128x512xf32>
    %82 = tpu.matmul %75, %81, %cst_21 {dimension_numbers = #tpu.dot_dimension_numbers<[1], [0], [0], [1], [0, 0, 1, 1], [], []>} : vector<128x128xf32>, vector<128x512xf32>, vector<128x512xf32> -> vector<128x512xf32>
    %83 = arith.addf %73, %82 : vector<128x512xf32>
    %c3 = arith.constant 3 : index
    %c0_22 = arith.constant 0 : index
    %c0_23 = arith.constant 0 : index
    %84 = vector.load %arg6[%c3, %c0_22, %c0_23] : memref<8x128x128xf32, #tpu.memory_space<vmem>>, vector<1x128x128xf32>
    %85 = vector.shape_cast %84 : vector<1x128x128xf32> to vector<128x128xf32>
    %cst_24 = arith.constant dense<0.000000e+00> : vector<128x512xf32>
    %86 = tpu.matmul %85, %54, %cst_24 {dimension_numbers = #tpu.dot_dimension_numbers<[1], [0], [0], [1], [0, 0, 1, 1], [], []>} : vector<128x128xf32>, vector<128x512xf32>, vector<128x512xf32> -> vector<128x512xf32>
    %87 = arith.addf %83, %86 : vector<128x512xf32>
    %c4 = arith.constant 4 : index
    %c0_25 = arith.constant 0 : index
    %c0_26 = arith.constant 0 : index
    %88 = vector.load %arg6[%c4, %c0_25, %c0_26] : memref<8x128x128xf32, #tpu.memory_space<vmem>>, vector<1x128x128xf32>
    %89 = vector.shape_cast %88 : vector<1x128x128xf32> to vector<128x128xf32>
    %90 = vector.extract_strided_slice %54 {offsets = [0, 1], sizes = [128, 511], strides = [1, 1]} : vector<128x512xf32> to vector<128x511xf32>
    %91 = vector.extract_strided_slice %54 {offsets = [0, 0], sizes = [128, 1], strides = [1, 1]} : vector<128x512xf32> to vector<128x1xf32>
    %92 = tpu.concatenate %90, %91 in 1 : vector<128x511xf32>, vector<128x1xf32> -> vector<128x512xf32>
    %93 = vector.extract_strided_slice %1 {offsets = [4, 0], sizes = [1, 512], strides = [1, 1]} : vector<8x512xf32> to vector<1x512xf32>
    %94 = vector.broadcast %93 : vector<1x512xf32> to vector<128x512xf32>
    %95 = arith.mulf %92, %94 : vector<128x512xf32>
    %cst_27 = arith.constant dense<0.000000e+00> : vector<128x512xf32>
    %96 = tpu.matmul %89, %95, %cst_27 {dimension_numbers = #tpu.dot_dimension_numbers<[1], [0], [0], [1], [0, 0, 1, 1], [], []>} : vector<128x128xf32>, vector<128x512xf32>, vector<128x512xf32> -> vector<128x512xf32>
    %97 = arith.addf %87, %96 : vector<128x512xf32>
    %c5 = arith.constant 5 : index
    %c0_28 = arith.constant 0 : index
    %c0_29 = arith.constant 0 : index
    %98 = vector.load %arg6[%c5, %c0_28, %c0_29] : memref<8x128x128xf32, #tpu.memory_space<vmem>>, vector<1x128x128xf32>
    %99 = vector.shape_cast %98 : vector<1x128x128xf32> to vector<128x128xf32>
    %100 = vector.extract_strided_slice %54 {offsets = [0, 2], sizes = [128, 510], strides = [1, 1]} : vector<128x512xf32> to vector<128x510xf32>
    %101 = vector.extract_strided_slice %54 {offsets = [0, 0], sizes = [128, 2], strides = [1, 1]} : vector<128x512xf32> to vector<128x2xf32>
    %102 = tpu.concatenate %100, %101 in 1 : vector<128x510xf32>, vector<128x2xf32> -> vector<128x512xf32>
    %103 = vector.extract_strided_slice %1 {offsets = [5, 0], sizes = [1, 512], strides = [1, 1]} : vector<8x512xf32> to vector<1x512xf32>
    %104 = vector.broadcast %103 : vector<1x512xf32> to vector<128x512xf32>
    %105 = arith.mulf %102, %104 : vector<128x512xf32>
    %cst_30 = arith.constant dense<0.000000e+00> : vector<128x512xf32>
    %106 = tpu.matmul %99, %105, %cst_30 {dimension_numbers = #tpu.dot_dimension_numbers<[1], [0], [0], [1], [0, 0, 1, 1], [], []>} : vector<128x128xf32>, vector<128x512xf32>, vector<128x512xf32> -> vector<128x512xf32>
    %107 = arith.addf %97, %106 : vector<128x512xf32>
    %c6 = arith.constant 6 : index
    %c0_31 = arith.constant 0 : index
    %c0_32 = arith.constant 0 : index
    %108 = vector.load %arg6[%c6, %c0_31, %c0_32] : memref<8x128x128xf32, #tpu.memory_space<vmem>>, vector<1x128x128xf32>
    %109 = vector.shape_cast %108 : vector<1x128x128xf32> to vector<128x128xf32>
    %110 = vector.extract_strided_slice %54 {offsets = [0, 3], sizes = [128, 509], strides = [1, 1]} : vector<128x512xf32> to vector<128x509xf32>
    %111 = vector.extract_strided_slice %54 {offsets = [0, 0], sizes = [128, 3], strides = [1, 1]} : vector<128x512xf32> to vector<128x3xf32>
    %112 = tpu.concatenate %110, %111 in 1 : vector<128x509xf32>, vector<128x3xf32> -> vector<128x512xf32>
    %113 = vector.extract_strided_slice %1 {offsets = [6, 0], sizes = [1, 512], strides = [1, 1]} : vector<8x512xf32> to vector<1x512xf32>
    %114 = vector.broadcast %113 : vector<1x512xf32> to vector<128x512xf32>
    %115 = arith.mulf %112, %114 : vector<128x512xf32>
    %cst_33 = arith.constant dense<0.000000e+00> : vector<128x512xf32>
    %116 = tpu.matmul %109, %115, %cst_33 {dimension_numbers = #tpu.dot_dimension_numbers<[1], [0], [0], [1], [0, 0, 1, 1], [], []>} : vector<128x128xf32>, vector<128x512xf32>, vector<128x512xf32> -> vector<128x512xf32>
    %117 = arith.addf %107, %116 : vector<128x512xf32>
    %c7 = arith.constant 7 : index
    %c0_34 = arith.constant 0 : index
    %c0_35 = arith.constant 0 : index
    %118 = vector.load %arg6[%c7, %c0_34, %c0_35] : memref<8x128x128xf32, #tpu.memory_space<vmem>>, vector<1x128x128xf32>
    %119 = vector.shape_cast %118 : vector<1x128x128xf32> to vector<128x128xf32>
    %120 = vector.extract_strided_slice %54 {offsets = [0, 4], sizes = [128, 508], strides = [1, 1]} : vector<128x512xf32> to vector<128x508xf32>
    %121 = vector.extract_strided_slice %54 {offsets = [0, 0], sizes = [128, 4], strides = [1, 1]} : vector<128x512xf32> to vector<128x4xf32>
    %122 = tpu.concatenate %120, %121 in 1 : vector<128x508xf32>, vector<128x4xf32> -> vector<128x512xf32>
    %123 = vector.extract_strided_slice %1 {offsets = [7, 0], sizes = [1, 512], strides = [1, 1]} : vector<8x512xf32> to vector<1x512xf32>
    %124 = vector.broadcast %123 : vector<1x512xf32> to vector<128x512xf32>
    %125 = arith.mulf %122, %124 : vector<128x512xf32>
    %cst_36 = arith.constant dense<0.000000e+00> : vector<128x512xf32>
    %126 = tpu.matmul %119, %125, %cst_36 {dimension_numbers = #tpu.dot_dimension_numbers<[1], [0], [0], [1], [0, 0, 1, 1], [], []>} : vector<128x128xf32>, vector<128x512xf32>, vector<128x512xf32> -> vector<128x512xf32>
    %127 = arith.addf %117, %126 : vector<128x512xf32>
    %c0_37 = arith.constant 0 : index
    %c0_38 = arith.constant 0 : index
    %128 = vector.load %arg7[%c0_37, %c0_38] : memref<8x128xf32, #tpu.memory_space<vmem>>, vector<8x128xf32>
    %cst_39 = arith.constant dense<0.000000e+00> : vector<8x512xf32>
    %129 = tpu.matmul %128, %127, %cst_39 {dimension_numbers = #tpu.dot_dimension_numbers<[1], [0], [0], [1], [0, 0, 1, 1], [], []>} : vector<8x128xf32>, vector<128x512xf32>, vector<8x512xf32> -> vector<8x512xf32>
    %c0_40 = arith.constant 0 : index
    %c0_41 = arith.constant 0 : index
    %130 = vector.load %arg8[%c0_40, %c0_41] : memref<8x1xf32, #tpu.memory_space<vmem>>, vector<8x1xf32>
    %131 = vector.broadcast %130 : vector<8x1xf32> to vector<8x512xf32>
    %132 = arith.addf %129, %131 : vector<8x512xf32>
    %c0_42 = arith.constant 0 : index
    %c0_43 = arith.constant 0 : index
    %133 = vector.load %arg10[%c0_42, %c0_43] : memref<8x512xf32, #tpu.memory_space<vmem>>, vector<8x512xf32>
    tpu.vector_store %arg10[%c0_42, %c0_43], %132 {strides = array<i32>} : memref<8x512xf32, #tpu.memory_space<vmem>>, vector<8x512xf32>,
    return
  }
  func.func @transform_0(%arg0: i32) -> (i32, i32) {
    %c0_i32 = arith.constant 0 : i32
    %c0_i32_0 = arith.constant 0 : i32
    return %c0_i32, %arg0 : i32, i32
  }
  func.func @transform_1(%arg0: i32) -> (i32, i32) {
    %c0_i32 = arith.constant 0 : i32
    %c0_i32_0 = arith.constant 0 : i32
    %c0_i32_1 = arith.constant 0 : i32
    return %c0_i32, %c0_i32_0 : i32, i32
  }
  func.func @transform_2(%arg0: i32) -> (i32, i32) {
    %c0_i32 = arith.constant 0 : i32
    %c0_i32_0 = arith.constant 0 : i32
    %c0_i32_1 = arith.constant 0 : i32
    return %c0_i32, %c0_i32_0 : i32, i32
  }
  func.func @transform_3(%arg0: i32) -> (i32, i32) {
    %c0_i32 = arith.constant 0 : i32
    %c0_i32_0 = arith.constant 0 : i32
    %c0_i32_1 = arith.constant 0 : i32
    return %c0_i32, %c0_i32_0 : i32, i32
  }
  func.func @transform_4(%arg0: i32) -> (i32, i32) {
    %c0_i32 = arith.constant 0 : i32
    %c0_i32_0 = arith.constant 0 : i32
    %c0_i32_1 = arith.constant 0 : i32
    return %c0_i32, %c0_i32_0 : i32, i32
  }
  func.func @transform_5(%arg0: i32) -> (i32, i32, i32) {
    %c0_i32 = arith.constant 0 : i32
    %c0_i32_0 = arith.constant 0 : i32
    %c0_i32_1 = arith.constant 0 : i32
    %c0_i32_2 = arith.constant 0 : i32
    return %c0_i32, %c0_i32_0, %c0_i32_1 : i32, i32, i32
  }
  func.func @transform_6(%arg0: i32) -> (i32, i32) {
    %c0_i32 = arith.constant 0 : i32
    %c0_i32_0 = arith.constant 0 : i32
    %c0_i32_1 = arith.constant 0 : i32
    return %c0_i32, %c0_i32_0 : i32, i32
  }
  func.func @transform_7(%arg0: i32) -> (i32, i32) {
    %c0_i32 = arith.constant 0 : i32
    %c0_i32_0 = arith.constant 0 : i32
    %c0_i32_1 = arith.constant 0 : i32
    return %c0_i32, %c0_i32_0 : i32, i32
  }
  func.func @transform_8(%arg0: i32) -> (i32, i32) {
    %c0_i32 = arith.constant 0 : i32
    %c0_i32_0 = arith.constant 0 : i32
    %c0_i32_1 = arith.constant 0 : i32
    return %c0_i32, %c0_i32_0 : i32, i32
  }
  func.func @transform_9(%arg0: i32) -> (i32, i32) {
    %c0_i32 = arith.constant 0 : i32
    %c0_i32_0 = arith.constant 0 : i32
    return %c0_i32, %arg0 : i32, i32
  }
}

</mosaic_0001>

<bundles_post_ra>
// kernel: tpu_custom_call.1
= control target key start
LH: loop header
LB: loop body
LE: loop exit
PB: predicated region body
PF: predicated region fallthrough
CT: control target
= control target key end

     0   :  { %14 = vsyncpa [#allocation3], 0  ;;  %s12046_s0 = inlined_call_operand.vmem [shape: f32[8,1024], index: 0, kind: input, shape index: {}]   ;;  %s12047_s1 = inlined_call_operand.vmem [shape: f32[8,8], index: 1, kind: input, shape index: {}]   ;;  %s12048_s2 = inlined_call_operand.vmem [shape: f32[8,1], index: 2, kind: input, shape index: {}]   ;;  %s12049_s3 = inlined_call_operand.vmem [shape: f32[128,64], index: 3, kind: input, shape index: {}]   ;;  %s12050_s4 = inlined_call_operand.vmem [shape: f32[128,1], index: 4, kind: input, shape index: {}]   ;;  %s12051_s5 = inlined_call_operand.hbm [shape: f32[8,128,128], index: 5, kind: input, shape index: {}]   ;;  %s12052_s6 = inlined_call_operand.vmem [shape: f32[8,128], index: 6, kind: input, shape index: {}]   ;;  %s12053_s7 = inlined_call_operand.vmem [shape: f32[8,1], index: 7, kind: input, shape index: {}]   ;;  %s12054_s8 = inlined_call_operand.vmem [shape: f32[8,512], index: 8, kind: input, shape index: {}]   ;;  %s12055_s9 = inlined_call_operand.hbm [shape: f32[8,1024], index: 9, kind: output, shape index: {}]  }
   0x1   :  { %15 = vsyncpa [#allocation4], 0 }
   0x2   :  { %17 = vsyncpa [#allocation4 + $0x1], 0  ;;  %s6556_s30 = smov 0   ;;  %s6558_s10 = smov 0  }
   0x3   :  { %s6560_s11 = smov 0   ;;  %s6562_s12 = smov 0  }
   0x4 LB: > { %s6577_s13 = sadd.s32 4294967295, %s6493_s12   ;;  %s6251_s14 = sadd.s32 4294967294, %s6493_s12   ;;  %s6493_s12 = sphi %s6562_s12, %s13628_s12   ;;  %s6489_s11 = sphi %s6560_s11, %s13627_s11   ;;  %s6485_s10 = sphi %s6558_s10, %s13626_s10   ;;  %s6481_s30 = sphi %s6556_s30, %s13625_s30  }
   0x5   : > { %s6581_s15 = sadd.s32 1, %s6493_s12   ;;  %s224_s16 = sadd.s32 1, %s6489_s11 }
   0x6   : > { %s221_s17 = ssub.s32 %s6493_s12, %s6581_s15  ;;  %p234_p0 = scmp.ne.s32.totalorder %s6489_s11, %s6485_s10 }
   0x7   : > { %p222_p1 = scmp.eq.s32.totalorder %s221_s17, 0  ;;  %p235_p2 = scmp.eq.s32.totalorder %s6577_s13, 1 }
   0x8   : > { %p240_p3 = scmp.ne.s32.totalorder %s6485_s10, %s6481_s30  ;;  %p241_p4 = scmp.eq.s32.totalorder %s6251_s14, 1 }
   0x9   : > { %s6592_s18 = scalar_select %p222_p1, %s6489_s11, %s224_s16  }
   0xa   : > { %p6594_p5 = por %p235_p2, %p234_p0  ;;  %p6598_p6 = por %p241_p4, %p240_p3 }
   0xb   : > { %p6252_p7 = scmp.ge.s32.totalorder %s6493_s12, 1  ;;  %p248_p8 = scmp.lt.s32.totalorder %s6493_s12, 3 }
   0xc   : > { %p6348_p9 = scmp.eq.s32.totalorder %s6577_s13, 0  ;;  %s271_s23 = sshll.u32 %s12051_s5, 4  ;;  %s272_s23 = int_to_ptr.hbm [resolvable:$true] %s271_s23 }
   0xd   : > { %p249_p10 = pnand %p6252_p7, %p248_p8  ;;  %s6495_s24 = smov [#allocation2]  }
   0xe   : > { %s273_s25 = sshll.u32 %s6495_s24, 4  ;;  %s6496_s26 = smov 128   ;;  %s274_s25 = int_to_ptr.vmem [resolvable:$true] %s273_s25 }
   0xf   : > { %p6340_p11 = pneg %p249_p10  ;;  %s6497_s27 = smov 8  }
  0x10   : > { %307 = sbr.rel (%p249_p10) target bundleno = 2233 (0x8b9), region = 56 }
  0x11   : > { %p6341_p12 = pnand %p6348_p9, %p6340_p11 }
  0x13   : > { %6343 = dma.hbm_to_vmem [thread:$0]  (!%p6341_p12), %s272_s23, 16384, %s274_s25, [#allocation3], %s6496_s26, %s6496_s26, %s6497_s27  }
  0x15   : > { %6472 = dma.done.wait (%p6348_p9), [#allocation3], 16384  }
  0x16   : > { %6474 = vsyncadd (%p6348_p9), [#allocation3], 4294950912  ;;  %s6258_s28 = sshll.u32 %s6577_s13, 2  ;;  %v6498_v0 = vmov 0   ;;  %vm366_vm0 = vcmask 64512   ;;  %v359_v5 = vld [vmem:[%s12047_s1] sm:$0xff] }
  0x17   : > { %p345_p13 = scmp.lt.s32.totalorder %s6258_s28, 7  ;;  %6394 = vset.pattern.permute.xlu0 %v6498_v0  ;;  %6395 = vset.pattern.permute.xlu2 %v6498_v0  ;;  %v360_v6 = vld [vmem:[%s12048_s2] sm:$0xff]  ;;  %s12060_s25 = smov 126   ;;  %v653_v16 = vld [vmem:[%s12050_s4 + $0x8] sm:$0xff]  ;;  %v666_v17 = vld [vmem:[%s12050_s4 + $0x70] sm:$0xff]  ;;  %vm618_vm1 = vcmask 1014784  }
  0x18   : > { %6396 = vset.pattern.permute.xlu1 %v6498_v0  ;;  %363 = vperm.xlu0 %6394, %v360_v6   ;;  %s12058_s26 = smov 125   ;;  %s12056_s27 = smov 124   ;;  %v663_v18 = vld [vmem:[%s12050_s4 + $0x58] sm:$0xff]  ;;  %v660_v19 = vld [vmem:[%s12050_s4 + $0x40] sm:$0xff]  ;;  %v657_v21 = vld [vmem:[%s12050_s4 + $0x28] sm:$0xff]  ;;  %vm592_vm2 = vcmask 1022976  }
  0x19   : > { %s13630_s28 = smov (!%p345_p13, %s6258_s28), 7  ;;  %s6504_s14 = smov 3   ;;  %v6718_v29 = vld [vmem:[%s12054_s8] sm:$0xff]  ;;  %vm566_vm3 = vcmask 1031168   ;;  %v667_v45 = vld [vmem:[%s12050_s4 + $0x78] sm:$0xff]  ;;  %vm540_vm4 = vcmask 1039360  }
  0x1a   : > { %s6259_s29 = sshll.u32 %s13630_s28, 3  ;;  %s6502_s28 = smov 127   ;;  %v6721_v30 = vperm.slane %v6718_v29, 7  ;;  %v6724_v32 = vperm.slane %v6718_v29, 6  ;;  %v6734_v37 = vperm.slane %v6718_v29, 5  ;;  %v652_v40 = vld [vmem:[%s12050_s4] sm:$0xff] }
  0x1b   : > { %s348_s17 = scalar_lea.vmem %s12046_s0, %s6259_s29  ;;  %s6503_s29 = smov 2   ;;  %v6753_v46 = vperm.slane %v6718_v29, 4  ;;  %v654_v51 = vld [vmem:[%s12050_s4 + $0x10] sm:$0xff]  ;;  %v664_v53 = vld [vmem:[%s12050_s4 + $0x60] sm:$0xff]  ;;  %v665_v56 = vld [vmem:[%s12050_s4 + $0x68] sm:$0xff]  ;;  %vm515_vm5 = vcmask 7168  }
  0x1c   : > { %v351_v1 = vld [vmem:[%s348_s17] sm:$0xff]  ;;  %v352_v2 = vld [vmem:[%s348_s17 + $0x8] sm:$0xff]  ;;  %v353_v3 = vld [vmem:[%s348_s17 + $0x10] sm:$0xff]  ;;  %s6505_s16 = smov 1   ;;  %12379 = vst [vmem:[#allocation8_spill] sm:$0xff] %v6721_v30  ;;  %vm489_vm6 = vcmask 15360  }
  0x1d   : > { %385 = vmatpush.msra.mxu0 %v351_v1  ;;  %405 = vmatpush.msra.mxu1 %v352_v2  ;;  %v354_v4 = vld [vmem:[%s348_s17 + $0x18] sm:$0xff]  ;;  %12380 = vst [vmem:[#allocation9_spill] sm:$0xff] %v6724_v32  ;;  %v356_v58 = vld [vmem:[%s12054_s8 + $0x8] sm:$0xff]  ;;  %v662_v2 = vld [vmem:[%s12050_s4 + $0x50] sm:$0xff]  ;;  %vm463_vm7 = vcmask 23552   ;;  %vm748_vm8 = vcmask 523264  }
  0x1e   : > { %425 = vmatpush.msra.mxu2 %v353_v3  ;;  %445 = vmatpush.msra.mxu3 %v354_v4  ;;  %12381 = vst [vmem:[#allocation10_spill] sm:$0xff] %v6734_v37  ;;  %v661_v59 = vld [vmem:[%s12050_s4 + $0x48] sm:$0xff]  ;;  %v6784_v60 = vperm.slane %v356_v58, 7  ;;  %v6786_v62 = vperm.slane %v356_v58, 6  ;;  %v6797_v4 = vperm.slane %v356_v58, 5  ;;  %s6333_s22 = sshll.u32 %s6577_s13, 5 }
  0x1f   : > { %6260 = vmatmul.msk.f32.vlgmr.msra.gmra.mxu0 %vm366_vm0, %v359_v5  ;;  %6261 = vmatmul.msk.f32.vlgmr.msra.gmra.mxu1 %vm366_vm0, %v359_v5  ;;  %12382 = vst [vmem:[#allocation11_spill] sm:$0xff] %v6753_v46 }
  0x20   : > { %6262 = vmatmul.msk.f32.vlgmr.msra.gmra.mxu2 %vm366_vm0, %v359_v5  ;;  %6263 = vmatmul.msk.f32.vlgmr.msra.gmra.mxu3 %vm366_vm0, %v359_v5  ;;  %12383 = vst [vmem:[#allocation12_spill] sm:$0xff] %v6784_v60 }
  0x21   : > { %12384 = vst [vmem:[#allocation13_spill] sm:$0xff] %v6786_v62 }
  0x22   : > { %12385 = vst [vmem:[#allocation14_spill] sm:$0xff] %v6797_v4 }
  0x8a   : > { %v364_v7 = vpop.permute.xlu0 %363 }
  0x9c   : > { %v387_v8 = vpop.f32.mrf.mxu0  ;;  %v407_v10 = vpop.f32.mrf.mxu1 }
  0x9d   : > { %v6624_v9 = vadd.f32 %v387_v8, %v364_v7  ;;  %v6632_v11 = vadd.f32 %v407_v10, %v364_v7  ;;  %v6804_v8 = vperm.slane %v356_v58, 4  ;;  %v6814_v10 = vld [vmem:[%s12054_s8 + $0x18] sm:$0xff] }
  0x9f   : > { %558 = vrot.lane.b32.xlu1 %v6624_v9, %s12060_s25  ;;  %584 = vrot.lane.b32.xlu2 %v6624_v9, %s12058_s26  ;;  %12386 = vst [vmem:[#allocation15_spill] sm:$0xff] %v6804_v8 }
  0xa0   : > { %610 = vrot.lane.b32.xlu0 %v6624_v9, %s12056_s27 }
  0xa3   : > { %v427_v12 = vpop.f32.mrf.mxu2  ;;  %v447_v13 = vpop.f32.mrf.mxu3 }
  0xa4   : > { %v6652_v14 = vadd.f32 %v427_v12, %v364_v7  ;;  %v6654_v15 = vadd.f32 %v447_v13, %v364_v7  ;;  %v6818_v13 = vperm.slane %v356_v58, 2 }
  0xa6   : > { %12387 = vst [vmem:[#allocation16_spill] sm:$0xff] %v6818_v13 }
  0xa7   : > { %532 = vrot.lane.b32.xlu1 %v6624_v9, %s6502_s28  ;;  %586 = vrot.lane.b32.xlu2 %v6632_v11, %s12058_s26 }
  0xa8   : > { %560 = vrot.lane.b32.xlu0 %v6632_v11, %s12060_s25 }
  0xaf   : > { %612 = vrot.lane.b32.xlu1 %v6632_v11, %s12056_s27  ;;  %485 = vrot.lane.b32.xlu2 %v6632_v11, %s6503_s29 }
  0xb0   : > { %459 = vrot.lane.b32.xlu0 %v6632_v11, %s6504_s14 }
  0xb7   : > { %511 = vrot.lane.b32.xlu1 %v6632_v11, %s6505_s16  ;;  %509 = vrot.lane.b32.xlu2 %v6624_v9, %s6505_s16 }
  0xb8   : > { %483 = vrot.lane.b32.xlu0 %v6624_v9, %s6503_s29 }
  0xbf   : > { %534 = vrot.lane.b32.xlu1 %v6632_v11, %s6502_s28  ;;  %588 = vrot.lane.b32.xlu2 %v6652_v14, %s12058_s26 }
  0xc0   : > { %590 = vrot.lane.b32.xlu0 %v6654_v15, %s12058_s26  ;;  %s341_s26 = sand.u32 1, %s6485_s10  }
  0xc1   : > { %s6164_s13 = scalar_lea.sflag [#allocation4], %s341_s26 }
  0xc7   : > { %457 = vrot.lane.b32.xlu1 %v6624_v9, %s6504_s14  ;;  %562 = vrot.lane.b32.xlu2 %v6652_v14, %s12060_s25 }
  0xc8   : > { %564 = vrot.lane.b32.xlu0 %v6654_v15, %s12060_s25 }
  0xcf   : > { %614 = vrot.lane.b32.xlu1 %v6652_v14, %s12056_s27  ;;  %536 = vrot.lane.b32.xlu2 %v6652_v14, %s6502_s28 }
  0xd0   : > { %538 = vrot.lane.b32.xlu0 %v6654_v15, %s6502_s28 }
  0xd7   : > { %616 = vrot.lane.b32.xlu1 %v6654_v15, %s12056_s27  ;;  %513 = vrot.lane.b32.xlu2 %v6652_v14, %s6505_s16  ;;  %s6257_s27 = sshll.u32 %s341_s26, 5 }
  0xd8   : > { %506 = vrot.lane.b32.xlu0 %v6654_v15, %s6505_s16 }
  0xdf   : > { %480 = vrot.lane.b32.xlu1 %v6654_v15, %s6503_s29  ;;  %451 = vrot.lane.b32.xlu2 %v6654_v15, %s6504_s14 }
  0xe0   : > { %487 = vrot.lane.b32.xlu0 %v6652_v14, %s6503_s29 }
  0xe7   : > { %461 = vrot.lane.b32.xlu1 %v6652_v14, %s6504_s14  ;;  %670 = vperm.xlu2 %6395, %v652_v40  }
  0xe8   : > { %675 = vperm.xlu0 %6394, %v653_v16   ;;  %v658_v16 = vld [vmem:[%s12050_s4 + $0x30] sm:$0xff] }
  0xef   : > { %745 = vperm.xlu2 %6395, %v667_v45   ;;  %680 = vperm.xlu1 %6396, %v654_v51  }
  0xf0   : > { %740 = vperm.xlu0 %6394, %v666_v17  }
  0xf7   : > { %730 = vperm.xlu2 %6395, %v664_v53   ;;  %735 = vperm.xlu1 %6396, %v665_v56  }
  0xf8   : > { %725 = vperm.xlu0 %6394, %v663_v18  }
  0xf9   : > { %v6700_v20 = vpop.permute.xlu2 %584 }
  0xff   : > { %715 = vperm.xlu2 %6395, %v661_v59   ;;  %720 = vperm.xlu1 %6396, %v662_v2  }
 0x100   : > { %710 = vperm.xlu0 %6394, %v660_v19   ;;  %v6828_v19 = vperm.slane %v6814_v10, 7 }
 0x101   : > { %v587_v22 = vpop.permute.xlu2 %586 }
 0x102   : > { %v593_v35 = vsel %vm592_vm2, %v6700_v20, %v587_v22  ;;  %12389 = vst [vmem:[#allocation18_spill] sm:$0xff] %v6828_v19 }
 0x103   : > { %v606_v39 = vmul.f32 %v6724_v32, %v593_v35 }
 0x107   : > { %700 = vperm.xlu2 %6395, %v658_v16  }
 0x108   : > { %695 = vperm.xlu0 %6394, %v657_v21   ;;  %v6831_v21 = vperm.slane %v6718_v29, 2 }
 0x109   : > { %v6709_v25 = vpop.permute.xlu2 %485 }
 0x10a   : > { %12390 = vst [vmem:[#allocation19_spill] sm:$0xff] %v6831_v21 }
 0x111   : > { %v6705_v23 = vpop.permute.xlu1 %558  ;;  %v6713_v28 = vpop.permute.xlu2 %509 }
 0x112   : > { %v6707_v24 = vpop.permute.xlu0 %610 }
 0x119   : > { %v6711_v26 = vpop.permute.xlu1 %532  ;;  %v6742_v41 = vpop.permute.xlu2 %588 }
 0x11a   : > { %v561_v27 = vpop.permute.xlu0 %560  ;;  %v594_v1 = vsel %vm592_vm2, %v587_v22, %v6742_v41 }
 0x11b   : > { %v567_v38 = vsel %vm566_vm3, %v6705_v23, %v561_v27  ;;  %v607_v7 = vmul.f32 %v6786_v62, %v594_v1  ;;  %v6893_v1 = vperm.slane %v6814_v10, 4 }
 0x11c   : > { %v580_v42 = vmul.f32 %v6734_v37, %v567_v38  ;;  %v6846_v38 = vperm.slane %v6814_v10, 5 }
 0x11d   : > { %12398 = vst [vmem:[#allocation27_spill] sm:$0xff] %v6893_v1 }
 0x11e   : > { %12395 = vst [vmem:[#allocation24_spill] sm:$0xff] %v6846_v38 }
 0x121   : > { %v613_v31 = vpop.permute.xlu1 %612  ;;  %v6755_v47 = vpop.permute.xlu2 %562 }
 0x122   : > { %v6726_v33 = vpop.permute.xlu0 %459  ;;  %v619_v34 = vsel %vm618_vm1, %v6707_v24, %v613_v31  ;;  %v568_v5 = vsel %vm566_vm3, %v561_v27, %v6755_v47  ;;  %v6837_v27 = vperm.slane %v6814_v10, 6 }
 0x123   : > { %v632_v36 = vmul.f32 %v6721_v30, %v619_v34  ;;  %v581_v17 = vmul.f32 %v6797_v4, %v568_v5 }
 0x124   : > { %12392 = vst [vmem:[#allocation21_spill] sm:$0xff] %v6837_v27 }
 0x125   : > { %805 = vmatpush.msrb.mxu0 %v632_v36 }
 0x127   : > { %806 = vmatpush.msrb.mxu0 %v606_v39 }
 0x129   : > { %v6745_v43 = vpop.permute.xlu1 %511  ;;  %807 = vmatpush.msrb.mxu0 %v580_v42  ;;  %v6776_v57 = vpop.permute.xlu2 %536 }
 0x12a   : > { %v6747_v44 = vpop.permute.xlu0 %483  ;;  %v516_v45 = vsel %vm515_vm5, %v6713_v28, %v6745_v43 }
 0x131   : > { %v535_v48 = vpop.permute.xlu1 %534  ;;  %v6801_v6 = vpop.permute.xlu2 %513 }
 0x132   : > { %v6757_v49 = vpop.permute.xlu0 %590  ;;  %v541_v50 = vsel %vm540_vm4, %v6711_v26, %v535_v48  ;;  %v542_v12 = vsel %vm540_vm4, %v535_v48, %v6776_v57 }
 0x133   : > { %v554_v52 = vmul.f32 %v6753_v46, %v541_v50  ;;  %v555_v35 = vmul.f32 %v6804_v8, %v542_v12  ;;  %v595_v48 = vsel %vm592_vm2, %v6742_v41, %v6757_v49  ;;  %v659_v50 = vld [vmem:[%s12050_s4 + $0x38] sm:$0xff]  ;;  %v601_v53 = vsel %vm592_vm2, %v6757_v49, %v6700_v20 }
 0x134   : > { %v490_v41 = vsel %vm489_vm6, %v6747_v44, %v6709_v25  ;;  %705 = vperm.xlu1 %6396, %v659_v50   ;;  %v6908_v12 = vperm.slane %v6718_v29, 0 }
 0x135   : > { %808 = vmatpush.msrb.mxu0 %v554_v52 }
 0x136   : > { %12399 = vst [vmem:[#allocation28_spill] sm:$0xff] %v6908_v12 }
 0x137   : > { %809 = vmatpush.msrb.mxu0 %v6624_v9  ;;  %v6809_v9 = vld [vmem:[%s12054_s8 + $0x10] sm:$0xff] }
 0x138   : > { %v6825_v18 = vperm.slane %v6809_v9, 7  ;;  %v6834_v22 = vperm.slane %v6809_v9, 6  ;;  %v6843_v36 = vperm.slane %v6809_v9, 5  ;;  %v6911_v16 = vperm.slane %v6809_v9, 2 }
 0x139   : > { %v6769_v54 = vpop.permute.xlu1 %457 }
 0x13a   : > { %v6771_v55 = vpop.permute.xlu0 %564  ;;  %12388 = vst [vmem:[#allocation17_spill] sm:$0xff] %v6825_v18  ;;  %v608_v20 = vmul.f32 %v6834_v22, %v595_v48  ;;  %v517_v48 = vsel %vm515_vm5, %v6745_v43, %v6801_v6 }
 0x13b   : > { %12391 = vst [vmem:[#allocation20_spill] sm:$0xff] %v6834_v22  ;;  %v569_v59 = vsel %vm566_vm3, %v6755_v47, %v6771_v55  ;;  %v575_v49 = vsel %vm566_vm3, %v6771_v55, %v6705_v23  ;;  %v609_v47 = vmul.f32 %v6837_v27, %v601_v53  ;;  %v655_v23 = vld [vmem:[%s12050_s4 + $0x18] sm:$0xff]  ;;  %v452_v55 = vpop.permute.xlu2 %451 }
 0x13c   : > { %12394 = vst [vmem:[#allocation23_spill] sm:$0xff] %v6843_v36  ;;  %685 = vperm.xlu2 %6395, %v655_v23   ;;  %v643_v23 = vld [vmem:[%s12049_s3 + $0x38] sm:$0xff] }
 0x13d   : > { %12400 = vst [vmem:[#allocation29_spill] sm:$0xff] %v6911_v16 }
 0x141   : > { %v615_v61 = vpop.permute.xlu1 %614 }
 0x142   : > { %v6788_v63 = vpop.permute.xlu0 %538  ;;  %v620_v0 = vsel %vm618_vm1, %v613_v31, %v615_v61  ;;  %v6839_v31 = vperm.slane %v356_v58, 1 }
 0x143   : > { %v633_v3 = vmul.f32 %v6784_v60, %v620_v0  ;;  %v6883_v0 = vperm.slane %v6809_v9, 4  ;;  %v549_v5 = vsel %vm540_vm4, %v6788_v63, %v6711_v26 }
 0x144   : > { %12393 = vst [vmem:[#allocation22_spill] sm:$0xff] %v6839_v31  ;;  %v503_v2 = vmul.f32 %v6839_v31, %v490_v41 }
 0x145   : > { %870 = vmatpush.msrb.mxu1 %v633_v3  ;;  %12397 = vst [vmem:[#allocation26_spill] sm:$0xff] %v6883_v0  ;;  %v582_v3 = vmul.f32 %v6843_v36, %v569_v59 }
 0x147   : > { %871 = vmatpush.msrb.mxu1 %v607_v7  ;;  %v583_v7 = vmul.f32 %v6846_v38, %v575_v49  ;;  %v639_v49 = vld [vmem:[%s12049_s3 + $0x18] sm:$0xff] }
 0x149   : > { %v617_v34 = vpop.permute.xlu1 %616  ;;  %872 = vmatpush.msrb.mxu1 %v581_v17 }
 0x14a   : > { %v507_v39 = vpop.permute.xlu0 %506  ;;  %v621_v40 = vsel %vm618_vm1, %v615_v61, %v617_v34  ;;  %v627_v42 = vsel %vm618_vm1, %v617_v34, %v6707_v24  ;;  %v6874_v61 = vperm.slane %v356_v58, 0  ;;  %v543_v58 = vsel %vm540_vm4, %v6776_v57, %v6788_v63  ;;  %v636_v63 = vld [vmem:[%s12049_s3] sm:$0xff] }
 0x14b   : > { %873 = vmatpush.msrb.mxu1 %v555_v35  ;;  %v523_v51 = vsel %vm515_vm5, %v507_v39, %v6713_v28  ;;  %v634_v52 = vmul.f32 %v6825_v18, %v621_v40  ;;  %v635_v24 = vmul.f32 %v6828_v19, %v627_v42  ;;  %v529_v28 = vmul.f32 %v6818_v13, %v516_v45 }
 0x14c   : > { %v528_v56 = vmul.f32 %v6831_v21, %v523_v51  ;;  %12396 = vst [vmem:[#allocation25_spill] sm:$0xff] %v6874_v61  ;;  %v6904_v57 = vperm.slane %v6718_v29, 1  ;;  %v556_v26 = vmul.f32 %v6883_v0, %v543_v58  ;;  %v6919_v35 = vperm.slane %v6814_v10, 2  ;;  %v642_v58 = vld [vmem:[%s12049_s3 + $0x30] sm:$0xff] }
 0x14d   : > { %874 = vmatpush.msrb.mxu1 %v6632_v11  ;;  %935 = vmatpush.msrb.mxu2 %v634_v52  ;;  %v464_v11 = vsel %vm463_vm7, %v6769_v54, %v6726_v33  ;;  %v557_v40 = vmul.f32 %v6893_v1, %v549_v5  ;;  %v471_v45 = vsel %vm463_vm7, %v452_v55, %v6769_v54  ;;  %v6933_v52 = vperm.slane %v6809_v9, 1  ;;  %v647_v5 = vld [vmem:[%s12049_s3 + $0x58] sm:$0xff] }
 0x14e   : > { %810 = vmatpush.msrb.mxu0 %v528_v56  ;;  %1000 = vmatpush.msrb.mxu3 %v635_v24  ;;  %v477_v34 = vmul.f32 %v6874_v61, %v464_v11  ;;  %12401 = vst [vmem:[#allocation30_spill] sm:$0xff] %v6919_v35  ;;  %v518_v51 = vsel %vm515_vm5, %v6801_v6, %v507_v39  ;;  %v6942_v54 = vperm.slane %v6814_v10, 1  ;;  %v6952_v56 = vperm.slane %v6809_v9, 0  ;;  %v641_v11 = vld [vmem:[%s12049_s3 + $0x28] sm:$0xff] }
 0x14f   : > { %875 = vmatpush.msrb.mxu1 %v529_v28  ;;  %936 = vmatpush.msrb.mxu2 %v608_v20  ;;  %12402 = vst [vmem:[#allocation31_spill] sm:$0xff] %v6933_v52  ;;  %v476_v6 = vmul.f32 %v6908_v12, %v471_v45  ;;  %v530_v39 = vmul.f32 %v6911_v16, %v517_v48 }
 0x150   : > { %1001 = vmatpush.msrb.mxu3 %v609_v47  ;;  %12403 = vst [vmem:[#allocation32_spill] sm:$0xff] %v6942_v54  ;;  %v531_v53 = vmul.f32 %v6919_v35, %v518_v51  ;;  %v640_v47 = vld [vmem:[%s12049_s3 + $0x20] sm:$0xff] }
 0x151   : > { %v481_v17 = vpop.permute.xlu1 %480  ;;  %876 = vmatpush.msrb.mxu1 %v503_v2  ;;  %937 = vmatpush.msrb.mxu2 %v582_v3  ;;  %12404 = vst [vmem:[#allocation33_spill] sm:$0xff] %v6952_v56  ;;  %v645_v2 = vld [vmem:[%s12049_s3 + $0x48] sm:$0xff]  ;;  %v646_v3 = vld [vmem:[%s12049_s3 + $0x50] sm:$0xff] }
 0x152   : > { %1002 = vmatpush.msrb.mxu3 %v583_v7  ;;  %v488_v29 = vpop.permute.xlu0 %487  ;;  %v497_v42 = vsel %vm489_vm6, %v481_v17, %v6747_v44  ;;  %v656_v44 = vld [vmem:[%s12050_s4 + $0x20] sm:$0xff] }
 0x153   : > { %877 = vmatpush.msrb.mxu1 %v477_v34  ;;  %938 = vmatpush.msrb.mxu2 %v556_v26  ;;  %v502_v50 = vmul.f32 %v6904_v57, %v497_v42  ;;  %v491_v43 = vsel %vm489_vm6, %v6709_v25, %v488_v29  ;;  %v492_v24 = vsel %vm489_vm6, %v488_v29, %v481_v17  ;;  %v648_v7 = vld [vmem:[%s12049_s3 + $0x60] sm:$0xff]  ;;  %v649_v17 = vld [vmem:[%s12049_s3 + $0x68] sm:$0xff]  ;;  %v671_v34 = vpop.permute.xlu2 %670  ;;  %v650_v26 = vld [vmem:[%s12049_s3 + $0x70] sm:$0xff] }
 0x154   : > { %1003 = vmatpush.msrb.mxu3 %v557_v40  ;;  %6280 = vmatmul.msk.f32.vlgmr.msrb.gmra.mxu1 %vm748_vm8, %v636_v63  ;;  %v504_v25 = vmul.f32 %v6933_v52, %v491_v43  ;;  %v505_v41 = vmul.f32 %v6942_v54, %v492_v24 }
 0x155   : > { %811 = vmatpush.msrb.mxu0 %v502_v50  ;;  %939 = vmatpush.msrb.mxu2 %v6652_v14  ;;  %v6955_v14 = vperm.slane %v6814_v10, 0 }
 0x156   : > { %1004 = vmatpush.msrb.mxu3 %v6654_v15  ;;  %690 = vperm.xlu1 %6396, %v656_v44   ;;  %v637_v15 = vld [vmem:[%s12049_s3 + $0x8] sm:$0xff] }
 0x157   : > { %812 = vmatpush.msrb.mxu0 %v476_v6  ;;  %940 = vmatpush.msrb.mxu2 %v530_v39  ;;  %12405 = vst [vmem:[#allocation34_spill] sm:$0xff] %v6955_v14 }
 0x158   : > { %1005 = vmatpush.msrb.mxu3 %v531_v53  ;;  %6264 = vmatmul.msk.f32.vlgmr.msrb.gmra.mxu0 %vm748_vm8, %v636_v63 }
 0x159   : > { %v462_v59 = vpop.permute.xlu1 %461  ;;  %941 = vmatpush.msrb.mxu2 %v504_v25 }
 0x15a   : > { %1006 = vmatpush.msrb.mxu3 %v505_v41  ;;  %v465_v28 = vsel %vm463_vm7, %v6726_v33, %v462_v59  ;;  %v466_v9 = vsel %vm463_vm7, %v462_v59, %v452_v55  ;;  %v638_v33 = vld [vmem:[%s12049_s3 + $0x10] sm:$0xff]  ;;  %v644_v55 = vld [vmem:[%s12049_s3 + $0x40] sm:$0xff]  ;;  %v676_v44 = vpop.permute.xlu0 %675 }
 0x15b   : > { %v478_v10 = vmul.f32 %v6952_v56, %v465_v28  ;;  %v479_v20 = vmul.f32 %v6955_v14, %v466_v9  ;;  %v7065_v29 = vpop.permute.xlu2 %745 }
 0x15c   : > { %6281 = vmatmul.msk.f32.gmra.mxu1 %vm748_vm8, %v637_v15 }
 0x15d   : > { %942 = vmatpush.msrb.mxu2 %v478_v10  ;;  %1007 = vmatpush.msrb.mxu3 %v479_v20 }
 0x15e   : > { %6296 = vmatmul.msk.f32.vlgmr.msrb.gmra.mxu2 %vm748_vm8, %v636_v63  ;;  %6312 = vmatmul.msk.f32.vlgmr.msrb.gmra.mxu3 %vm748_vm8, %v636_v63  ;;  %v651_v63 = vld [vmem:[%s12049_s3 + $0x78] sm:$0xff] }
 0x160   : > { %6265 = vmatmul.msk.f32.gmra.mxu0 %vm748_vm8, %v637_v15 }
 0x161   : > { %v681_v48 = vpop.permute.xlu1 %680 }
 0x162   : > { %v7099_v9 = vpop.permute.xlu0 %740 }
 0x163   : > { %v7073_v45 = vpop.permute.xlu2 %730 }
 0x164   : > { %6282 = vmatmul.msk.f32.gmra.mxu1 %vm748_vm8, %v638_v33 }
 0x166   : > { %6297 = vmatmul.msk.f32.gmra.mxu2 %vm748_vm8, %v637_v15  ;;  %6313 = vmatmul.msk.f32.gmra.mxu3 %vm748_vm8, %v637_v15 }
 0x168   : > { %6266 = vmatmul.msk.f32.gmra.mxu0 %vm748_vm8, %v638_v33 }
 0x169   : > { %v7087_v24 = vpop.permute.xlu1 %735 }
 0x16b   : > { %v7083_v6 = vpop.permute.xlu2 %715 }
 0x16c   : > { %6283 = vmatmul.msk.f32.gmra.mxu1 %vm748_vm8, %v639_v49 }
 0x16e   : > { %6298 = vmatmul.msk.f32.gmra.mxu2 %vm748_vm8, %v638_v33  ;;  %6314 = vmatmul.msk.f32.gmra.mxu3 %vm748_vm8, %v638_v33 }
 0x170   : > { %6267 = vmatmul.msk.f32.gmra.mxu0 %vm748_vm8, %v639_v49 }
 0x171   : > { %v7107_v33 = vpop.permute.xlu1 %720 }
 0x173   : > { %v7101_v20 = vpop.permute.xlu2 %700 }
 0x174   : > { %6284 = vmatmul.msk.f32.gmra.mxu1 %vm748_vm8, %v640_v47 }
 0x176   : > { %6299 = vmatmul.msk.f32.gmra.mxu2 %vm748_vm8, %v639_v49  ;;  %6315 = vmatmul.msk.f32.gmra.mxu3 %vm748_vm8, %v639_v49 }
 0x178   : > { %6268 = vmatmul.msk.f32.gmra.mxu0 %vm748_vm8, %v640_v47 }
 0x17c   : > { %6285 = vmatmul.msk.f32.gmra.mxu1 %vm748_vm8, %v641_v11 }
 0x17e   : > { %6300 = vmatmul.msk.f32.gmra.mxu2 %vm748_vm8, %v640_v47  ;;  %6316 = vmatmul.msk.f32.gmra.mxu3 %vm748_vm8, %v640_v47 }
 0x180   : > { %6269 = vmatmul.msk.f32.gmra.mxu0 %vm748_vm8, %v641_v11 }
 0x184   : > { %6286 = vmatmul.msk.f32.gmra.mxu1 %vm748_vm8, %v642_v58 }
 0x186   : > { %6301 = vmatmul.msk.f32.gmra.mxu2 %vm748_vm8, %v641_v11  ;;  %6317 = vmatmul.msk.f32.gmra.mxu3 %vm748_vm8, %v641_v11 }
 0x188   : > { %6270 = vmatmul.msk.f32.gmra.mxu0 %vm748_vm8, %v642_v58 }
 0x18c   : > { %6287 = vmatmul.msk.f32.gmra.mxu1 %vm748_vm8, %v643_v23 }
 0x18e   : > { %6302 = vmatmul.msk.f32.gmra.mxu2 %vm748_vm8, %v642_v58  ;;  %6318 = vmatmul.msk.f32.gmra.mxu3 %vm748_vm8, %v642_v58 }
 0x190   : > { %6271 = vmatmul.msk.f32.gmra.mxu0 %vm748_vm8, %v643_v23 }
 0x194   : > { %6288 = vmatmul.msk.f32.gmra.mxu1 %vm748_vm8, %v644_v55 }
 0x196   : > { %6303 = vmatmul.msk.f32.gmra.mxu2 %vm748_vm8, %v643_v23  ;;  %6319 = vmatmul.msk.f32.gmra.mxu3 %vm748_vm8, %v643_v23 }
 0x198   : > { %6272 = vmatmul.msk.f32.gmra.mxu0 %vm748_vm8, %v644_v55 }
 0x19c   : > { %6289 = vmatmul.msk.f32.gmra.mxu1 %vm748_vm8, %v645_v2 }
 0x19e   : > { %6304 = vmatmul.msk.f32.gmra.mxu2 %vm748_vm8, %v644_v55  ;;  %6320 = vmatmul.msk.f32.gmra.mxu3 %vm748_vm8, %v644_v55 }
 0x1a0   : > { %6273 = vmatmul.msk.f32.gmra.mxu0 %vm748_vm8, %v645_v2 }
 0x1a4   : > { %6290 = vmatmul.msk.f32.gmra.mxu1 %vm748_vm8, %v646_v3 }
 0x1a6   : > { %6305 = vmatmul.msk.f32.gmra.mxu2 %vm748_vm8, %v645_v2  ;;  %6321 = vmatmul.msk.f32.gmra.mxu3 %vm748_vm8, %v645_v2  ;;  %v7121_v2 = vpop.permute.xlu0 %725 }
 0x1a8   : > { %6274 = vmatmul.msk.f32.gmra.mxu0 %vm748_vm8, %v646_v3 }
 0x1ac   : > { %6291 = vmatmul.msk.f32.gmra.mxu1 %vm748_vm8, %v647_v5 }
 0x1ae   : > { %6306 = vmatmul.msk.f32.gmra.mxu2 %vm748_vm8, %v646_v3  ;;  %6322 = vmatmul.msk.f32.gmra.mxu3 %vm748_vm8, %v646_v3 }
 0x1b0   : > { %6275 = vmatmul.msk.f32.gmra.mxu0 %vm748_vm8, %v647_v5 }
 0x1b4   : > { %6292 = vmatmul.msk.f32.gmra.mxu1 %vm748_vm8, %v648_v7 }
 0x1b6   : > { %6307 = vmatmul.msk.f32.gmra.mxu2 %vm748_vm8, %v647_v5  ;;  %6323 = vmatmul.msk.f32.gmra.mxu3 %vm748_vm8, %v647_v5  ;;  %v686_v5 = vpop.permute.xlu2 %685 }
 0x1b8   : > { %6276 = vmatmul.msk.f32.gmra.mxu0 %vm748_vm8, %v648_v7 }
 0x1bc   : > { %6293 = vmatmul.msk.f32.gmra.mxu1 %vm748_vm8, %v649_v17 }
 0x1be   : > { %6308 = vmatmul.msk.f32.gmra.mxu2 %vm748_vm8, %v648_v7  ;;  %6324 = vmatmul.msk.f32.gmra.mxu3 %vm748_vm8, %v648_v7  ;;  %v7123_v7 = vpop.permute.xlu1 %705 }
 0x1c0   : > { %6277 = vmatmul.msk.f32.gmra.mxu0 %vm748_vm8, %v649_v17 }
 0x1c4   : > { %6294 = vmatmul.msk.f32.gmra.mxu1 %vm748_vm8, %v650_v26 }
 0x1c6   : > { %6309 = vmatmul.msk.f32.gmra.mxu2 %vm748_vm8, %v649_v17  ;;  %6325 = vmatmul.msk.f32.gmra.mxu3 %vm748_vm8, %v649_v17 }
 0x1c8   : > { %6278 = vmatmul.msk.f32.gmra.mxu0 %vm748_vm8, %v650_v26 }
 0x1cc   : > { %6295 = vmatmul.msk.f32.gmra.mxu1 %vm748_vm8, %v651_v63 }
 0x1ce   : > { %6310 = vmatmul.msk.f32.gmra.mxu2 %vm748_vm8, %v650_v26  ;;  %6326 = vmatmul.msk.f32.gmra.mxu3 %vm748_vm8, %v650_v26 }
 0x1d0   : > { %6279 = vmatmul.msk.f32.gmra.mxu0 %vm748_vm8, %v651_v63 }
 0x1d1   : > { %v879_v40 = vpop.f32.mrf.mxu1 }
 0x1d2   : > { %v7071_v42 = vadd.f32 %v879_v40, %v671_v34 }
 0x1d4   : > { %12406 = vst [vmem:[#allocation35_spill] sm:$0xff] %v7071_v42  ;;  %1540 = vrot.lane.b32.xlu1 %v7071_v42, %s6503_s29 }
 0x1d5   : > { %v814_v50 = vpop.f32.mrf.mxu0 }
 0x1d6   : > { %v7077_v51 = vadd.f32 %v814_v50, %v671_v34  ;;  %6311 = vmatmul.msk.f32.gmra.mxu2 %vm748_vm8, %v651_v63  ;;  %6327 = vmatmul.msk.f32.gmra.mxu3 %vm748_vm8, %v651_v63 }
 0x1d8   : > { %12407 = vst [vmem:[#allocation36_spill] sm:$0xff] %v7077_v51  ;;  %1538 = vrot.lane.b32.xlu0 %v7077_v51, %s6503_s29 }
 0x1d9   : > { %v882_v10 = vpop.f32.mrf.mxu1 }
 0x1da   : > { %v7109_v47 = vadd.f32 %v882_v10, %v676_v44 }
 0x1dc   : > { %12412 = vst [vmem:[#allocation41_spill] sm:$0xff] %v7109_v47 }
 0x1dd   : > { %v817_v43 = vpop.f32.mrf.mxu0 }
 0x1de   : > { %v7085_v39 = vadd.f32 %v817_v43, %v676_v44 }
 0x1e0   : > { %12408 = vst [vmem:[#allocation37_spill] sm:$0xff] %v7085_v39  ;;  %1544 = vrot.lane.b32.xlu2 %v7085_v39, %s6503_s29 }
 0x1e1   : > { %v944_v53 = vpop.f32.mrf.mxu2  ;;  %v1009_v25 = vpop.f32.mrf.mxu3 }
 0x1e2   : > { %v7091_v41 = vadd.f32 %v1009_v25, %v671_v34  ;;  %v7095_v15 = vadd.f32 %v944_v53, %v671_v34  ;;  %v885_v3 = vpop.f32.mrf.mxu1  ;;  %v691_v25 = vpop.permute.xlu1 %690 }
 0x1e3   : > { %v7129_v26 = vadd.f32 %v885_v3, %v681_v48 }
 0x1e4   : > { %12409 = vst [vmem:[#allocation38_spill] sm:$0xff] %v7091_v41  ;;  %1490 = vrot.lane.b32.xlu0 %v7091_v41, %s6503_s29 }
 0x1e5   : > { %v820_v59 = vpop.f32.mrf.mxu0  ;;  %12410 = vst [vmem:[#allocation39_spill] sm:$0xff] %v7095_v15 }
 0x1e6   : > { %v7097_v28 = vadd.f32 %v820_v59, %v681_v48  ;;  %12416 = vst [vmem:[#allocation45_spill] sm:$0xff] %v7129_v26 }
 0x1e8   : > { %12411 = vst [vmem:[#allocation40_spill] sm:$0xff] %v7097_v28  ;;  %1550 = vrot.lane.b32.xlu1 %v7097_v28, %s6503_s29  ;;  %1542 = vrot.lane.b32.xlu2 %v7095_v15, %s6503_s29 }
 0x1e9   : > { %v1012_v49 = vpop.f32.mrf.mxu3  ;;  %v947_v11 = vpop.f32.mrf.mxu2 }
 0x1ea   : > { %v7113_v58 = vadd.f32 %v947_v11, %v676_v44  ;;  %v7115_v23 = vadd.f32 %v1012_v49, %v676_v44  ;;  %v7137_v44 = vpop.permute.xlu0 %710  ;;  %v888_v43 = vpop.f32.mrf.mxu1 }
 0x1eb   : > { %v7143_v59 = vadd.f32 %v888_v43, %v686_v5 }
 0x1ec   : > { %1546 = vrot.lane.b32.xlu0 %v7109_v47, %s6503_s29  ;;  %12413 = vst [vmem:[#allocation42_spill] sm:$0xff] %v7113_v58 }
 0x1ed   : > { %12414 = vst [vmem:[#allocation43_spill] sm:$0xff] %v7115_v23  ;;  %v823_v55 = vpop.f32.mrf.mxu0 }
 0x1ee   : > { %v7125_v17 = vadd.f32 %v823_v55, %v686_v5  ;;  %12419 = vst [vmem:[#allocation48_spill] sm:$0xff] %v7143_v59 }
 0x1f0   : > { %1548 = vrot.lane.b32.xlu1 %v7113_v58, %s6503_s29  ;;  %1492 = vrot.lane.b32.xlu2 %v7115_v23, %s6503_s29  ;;  %12415 = vst [vmem:[#allocation44_spill] sm:$0xff] %v7125_v17 }
 0x1f1   : > { %v1015_v34 = vpop.f32.mrf.mxu3  ;;  %v950_v40 = vpop.f32.mrf.mxu2 }
 0x1f2   : > { %v7131_v63 = vadd.f32 %v1015_v34, %v681_v48  ;;  %v7139_v53 = vadd.f32 %v950_v40, %v681_v48  ;;  %v696_v3 = vpop.permute.xlu0 %695 }
 0x1f4   : > { %1556 = vrot.lane.b32.xlu0 %v7125_v17, %s6503_s29  ;;  %12417 = vst [vmem:[#allocation46_spill] sm:$0xff] %v7131_v63 }
 0x1f5   : > { %v826_v50 = vpop.f32.mrf.mxu0  ;;  %12418 = vst [vmem:[#allocation47_spill] sm:$0xff] %v7139_v53 }
 0x1f6   : > { %v7145_v10 = vadd.f32 %v826_v50, %v691_v25  ;;  %v891_v50 = vpop.f32.mrf.mxu1 }
 0x1f7   : > { %v7163_v60 = vadd.f32 %v891_v50, %v691_v25 }
 0x1f8   : > { %1494 = vrot.lane.b32.xlu1 %v7131_v63, %s6503_s29  ;;  %1552 = vrot.lane.b32.xlu2 %v7129_v26, %s6503_s29  ;;  %12420 = vst [vmem:[#allocation49_spill] sm:$0xff] %v7145_v10 }
 0x1f9   : > { %v1018_v49 = vpop.f32.mrf.mxu3  ;;  %v953_v11 = vpop.f32.mrf.mxu2  ;;  %12424 = vst [vmem:[#allocation53_spill] sm:$0xff] %v7163_v60 }
 0x1fa   : > { %v7151_v55 = vadd.f32 %v1018_v49, %v686_v5  ;;  %v7155_v34 = vadd.f32 %v953_v11, %v686_v5 }
 0x1fc   : > { %1554 = vrot.lane.b32.xlu0 %v7139_v53, %s6503_s29  ;;  %12421 = vst [vmem:[#allocation50_spill] sm:$0xff] %v7151_v55 }
 0x1fd   : > { %v829_v48 = vpop.f32.mrf.mxu0  ;;  %12422 = vst [vmem:[#allocation51_spill] sm:$0xff] %v7155_v34 }
 0x1fe   : > { %v7157_v40 = vadd.f32 %v829_v48, %v696_v3  ;;  %v894_v48 = vpop.f32.mrf.mxu1 }
 0x1ff   : > { %v7180_v19 = vadd.f32 %v894_v48, %v696_v3 }
 0x200   : > { %1558 = vrot.lane.b32.xlu1 %v7143_v59, %s6503_s29  ;;  %1562 = vrot.lane.b32.xlu2 %v7145_v10, %s6503_s29  ;;  %12423 = vst [vmem:[#allocation52_spill] sm:$0xff] %v7157_v40 }
 0x201   : > { %v1021_v43 = vpop.f32.mrf.mxu3  ;;  %v956_v49 = vpop.f32.mrf.mxu2  ;;  %12428 = vst [vmem:[#allocation57_spill] sm:$0xff] %v7180_v19 }
 0x202   : > { %v7167_v30 = vadd.f32 %v956_v49, %v691_v25  ;;  %v7169_v5 = vadd.f32 %v1021_v43, %v691_v25 }
 0x204   : > { %1496 = vrot.lane.b32.xlu0 %v7151_v55, %s6503_s29  ;;  %12425 = vst [vmem:[#allocation54_spill] sm:$0xff] %v7167_v30 }
 0x205   : > { %12426 = vst [vmem:[#allocation55_spill] sm:$0xff] %v7169_v5  ;;  %v832_v11 = vpop.f32.mrf.mxu0 }
 0x206   : > { %v7176_v18 = vadd.f32 %v832_v11, %v7101_v20  ;;  %v897_v43 = vpop.f32.mrf.mxu1 }
 0x207   : > { %v7193_v11 = vadd.f32 %v897_v43, %v7101_v20 }
 0x208   : > { %1560 = vrot.lane.b32.xlu2 %v7155_v34, %s6503_s29  ;;  %1568 = vrot.lane.b32.xlu1 %v7157_v40, %s6503_s29  ;;  %12427 = vst [vmem:[#allocation56_spill] sm:$0xff] %v7176_v18 }
 0x209   : > { %v1024_v50 = vpop.f32.mrf.mxu3  ;;  %v959_v25 = vpop.f32.mrf.mxu2  ;;  %12431 = vst [vmem:[#allocation60_spill] sm:$0xff] %v7193_v11 }
 0x20a   : > { %v7182_v49 = vadd.f32 %v1024_v50, %v696_v3  ;;  %v7188_v62 = vadd.f32 %v959_v25, %v696_v3 }
 0x20c   : > { %1564 = vrot.lane.b32.xlu0 %v7163_v60, %s6503_s29  ;;  %12429 = vst [vmem:[#allocation58_spill] sm:$0xff] %v7182_v49 }
 0x20d   : > { %12430 = vst [vmem:[#allocation59_spill] sm:$0xff] %v7188_v62  ;;  %v835_v50 = vpop.f32.mrf.mxu0 }
 0x20e   : > { %v7205_v3 = vadd.f32 %v835_v50, %v7123_v7  ;;  %v900_v43 = vpop.f32.mrf.mxu1 }
 0x210   : > { %1498 = vrot.lane.b32.xlu2 %v7169_v5, %s6503_s29  ;;  %1566 = vrot.lane.b32.xlu1 %v7167_v30, %s6503_s29  ;;  %12433 = vst [vmem:[#allocation62_spill] sm:$0xff] %v7205_v3 }
 0x211   : > { %v1027_v48 = vpop.f32.mrf.mxu3  ;;  %v962_v25 = vpop.f32.mrf.mxu2 }
 0x212   : > { %v7200_v32 = vadd.f32 %v1027_v48, %v7101_v20  ;;  %v7212_v27 = vadd.f32 %v962_v25, %v7101_v20  ;;  %v7217_v48 = vadd.f32 %v900_v43, %v7123_v7 }
 0x214   : > { %1574 = vrot.lane.b32.xlu0 %v7176_v18, %s6503_s29  ;;  %12432 = vst [vmem:[#allocation61_spill] sm:$0xff] %v7200_v32 }
 0x215   : > { %12434 = vst [vmem:[#allocation63_spill] sm:$0xff] %v7212_v27  ;;  %v838_v50 = vpop.f32.mrf.mxu0 }
 0x216   : > { %12435 = vst [vmem:[#allocation64_spill] sm:$0xff] %v7217_v48  ;;  %v7226_v20 = vadd.f32 %v838_v50, %v7137_v44  ;;  %v903_v50 = vpop.f32.mrf.mxu1 }
 0x217   : > { %v7249_v38 = vadd.f32 %v903_v50, %v7137_v44 }
 0x218   : > { %1570 = vrot.lane.b32.xlu2 %v7180_v19, %s6503_s29  ;;  %1500 = vrot.lane.b32.xlu1 %v7182_v49, %s6503_s29  ;;  %12436 = vst [vmem:[#allocation65_spill] sm:$0xff] %v7226_v20 }
 0x219   : > { %v1030_v22 = vpop.f32.mrf.mxu3  ;;  %v965_v4 = vpop.f32.mrf.mxu2  ;;  %12440 = vst [vmem:[#allocation69_spill] sm:$0xff] %v7249_v38 }
 0x21a   : > { %v7229_v25 = vadd.f32 %v1030_v22, %v7123_v7  ;;  %v7240_v37 = vadd.f32 %v965_v4, %v7123_v7 }
 0x21c   : > { %1572 = vrot.lane.b32.xlu0 %v7188_v62, %s6503_s29  ;;  %12437 = vst [vmem:[#allocation66_spill] sm:$0xff] %v7229_v25 }
 0x21d   : > { %12438 = vst [vmem:[#allocation67_spill] sm:$0xff] %v7240_v37  ;;  %v841_v4 = vpop.f32.mrf.mxu0 }
 0x21e   : > { %v7263_v46 = vadd.f32 %v841_v4, %v7083_v6  ;;  %v906_v4 = vpop.f32.mrf.mxu1 }
 0x21f   : > { %v7283_v16 = vadd.f32 %v906_v4, %v7083_v6 }
 0x220   : > { %1223 = vrot.lane.b32.xlu2 %v7193_v11, %s6504_s14  ;;  %1576 = vrot.lane.b32.xlu1 %v7193_v11, %s6503_s29  ;;  %12442 = vst [vmem:[#allocation71_spill] sm:$0xff] %v7263_v46 }
 0x221   : > { %v1033_v36 = vpop.f32.mrf.mxu3  ;;  %v968_v50 = vpop.f32.mrf.mxu2  ;;  %12447 = vst [vmem:[#allocation76_spill] sm:$0xff] %v7283_v16 }
 0x222   : > { %v7254_v8 = vadd.f32 %v1033_v36, %v7137_v44  ;;  %v7268_v0 = vadd.f32 %v968_v50, %v7137_v44 }
 0x224   : > { %1502 = vrot.lane.b32.xlu0 %v7200_v32, %s6503_s29  ;;  %12441 = vst [vmem:[#allocation70_spill] sm:$0xff] %v7254_v8 }
 0x225   : > { %12443 = vst [vmem:[#allocation72_spill] sm:$0xff] %v7268_v0  ;;  %v844_v14 = vpop.f32.mrf.mxu0 }
 0x226   : > { %v7301_v4 = vadd.f32 %v844_v14, %v7107_v33 }
 0x228   : > { %1580 = vrot.lane.b32.xlu2 %v7205_v3, %s6503_s29  ;;  %1101 = vrot.lane.b32.xlu1 %v7200_v32, %s6504_s14  ;;  %12450 = vst [vmem:[#allocation79_spill] sm:$0xff] %v7301_v4 }
 0x229   : > { %v1036_v50 = vpop.f32.mrf.mxu3 }
 0x22a   : > { %v7294_v56 = vadd.f32 %v1036_v50, %v7083_v6  ;;  %v909_v50 = vpop.f32.mrf.mxu1 }
 0x22b   : > { %v7319_v14 = vadd.f32 %v909_v50, %v7107_v33 }
 0x22c   : > { %1225 = vrot.lane.b32.xlu0 %v7212_v27, %s6504_s14  ;;  %12449 = vst [vmem:[#allocation78_spill] sm:$0xff] %v7294_v56 }
 0x22d   : > { %12455 = vst [vmem:[#allocation84_spill] sm:$0xff] %v7319_v14 }
 0x230   : > { %1578 = vrot.lane.b32.xlu2 %v7212_v27, %s6503_s29  ;;  %1229 = vrot.lane.b32.xlu1 %v7217_v48, %s6504_s14  ;;  %v971_v27 = vpop.f32.mrf.mxu2 }
 0x231   : > { %v7312_v32 = vadd.f32 %v971_v27, %v7083_v6  ;;  %v847_v27 = vpop.f32.mrf.mxu0 }
 0x232   : > { %v7337_v50 = vadd.f32 %v847_v27, %v7121_v2 }
 0x233   : > { %12453 = vst [vmem:[#allocation82_spill] sm:$0xff] %v7312_v32 }
 0x234   : > { %1582 = vrot.lane.b32.xlu0 %v7217_v48, %s6503_s29  ;;  %v1039_v48 = vpop.f32.mrf.mxu3  ;;  %12458 = vst [vmem:[#allocation87_spill] sm:$0xff] %v7337_v50 }
 0x235   : > { %v7330_v6 = vadd.f32 %v1039_v48, %v7107_v33 }
 0x237   : > { %12457 = vst [vmem:[#allocation86_spill] sm:$0xff] %v7330_v6 }
 0x238   : > { %1504 = vrot.lane.b32.xlu2 %v7229_v25, %s6503_s29  ;;  %1586 = vrot.lane.b32.xlu1 %v7226_v20, %s6503_s29 }
 0x23a   : > { %v7235_v43 = vpop.permute.xlu2 %1544 }
 0x23c   : > { %1103 = vrot.lane.b32.xlu0 %v7229_v25, %s6504_s14 }
 0x240   : > { %1231 = vrot.lane.b32.xlu2 %v7240_v37, %s6504_s14  ;;  %1584 = vrot.lane.b32.xlu1 %v7240_v37, %s6503_s29 }
 0x242   : > { %v7246_v22 = vpop.permute.xlu2 %1542 }
 0x243   : > { %12439 = vst [vmem:[#allocation68_spill] sm:$0xff] %v7246_v22 }
 0x244   : > { %1235 = vrot.lane.b32.xlu0 %v7249_v38, %s6504_s14 }
 0x246   : > { %v7276_v1 = vpop.permute.xlu1 %1540 }
 0x247   : > { %12445 = vst [vmem:[#allocation74_spill] sm:$0xff] %v7276_v1 }
 0x248   : > { %1588 = vrot.lane.b32.xlu2 %v7249_v38, %s6503_s29  ;;  %1506 = vrot.lane.b32.xlu1 %v7254_v8, %s6503_s29  ;;  %v974_v38 = vpop.f32.mrf.mxu2 }
 0x249   : > { %v7348_v48 = vadd.f32 %v974_v38, %v7107_v33 }
 0x24a   : > { %v7260_v7 = vpop.permute.xlu2 %1492  ;;  %v7270_v36 = vpop.permute.xlu0 %1538 }
 0x24b   : > { %12444 = vst [vmem:[#allocation73_spill] sm:$0xff] %v7270_v36 }
 0x24c   : > { %1592 = vrot.lane.b32.xlu0 %v7263_v46, %s6503_s29  ;;  %12461 = vst [vmem:[#allocation90_spill] sm:$0xff] %v7348_v48 }
 0x250   : > { %1105 = vrot.lane.b32.xlu2 %v7254_v8, %s6504_s14  ;;  %1237 = vrot.lane.b32.xlu1 %v7268_v0, %s6504_s14 }
 0x252   : > { %v7278_v35 = vpop.permute.xlu2 %1552 }
 0x253   : > { %12446 = vst [vmem:[#allocation75_spill] sm:$0xff] %v7278_v35  ;;  %v850_v35 = vpop.f32.mrf.mxu0 }
 0x254   : > { %1590 = vrot.lane.b32.xlu0 %v7268_v0, %s6503_s29  ;;  %v7363_v38 = vadd.f32 %v850_v35, %v7073_v45  ;;  %v977_v35 = vpop.f32.mrf.mxu2 }
 0x256   : > { %v7285_v44 = vpop.permute.xlu0 %1490  ;;  %12464 = vst [vmem:[#allocation93_spill] sm:$0xff] %v7363_v38 }
 0x257   : > { %12448 = vst [vmem:[#allocation77_spill] sm:$0xff] %v7285_v44 }
 0x258   : > { %1241 = vrot.lane.b32.xlu2 %v7283_v16, %s6504_s14  ;;  %1594 = vrot.lane.b32.xlu1 %v7283_v16, %s6503_s29  ;;  %v912_v16 = vpop.f32.mrf.mxu1 }
 0x259   : > { %v7370_v44 = vadd.f32 %v912_v16, %v7121_v2  ;;  %v7388_v16 = vadd.f32 %v977_v35, %v7121_v2 }
 0x25a   : > { %v7291_v21 = vpop.permute.xlu1 %1550  ;;  %v7296_v12 = vpop.permute.xlu2 %1562 }
 0x25b   : > { %12466 = vst [vmem:[#allocation95_spill] sm:$0xff] %v7370_v44  ;;  %v853_v35 = vpop.f32.mrf.mxu0 }
 0x25c   : > { %1508 = vrot.lane.b32.xlu0 %v7294_v56, %s6503_s29  ;;  %12470 = vst [vmem:[#allocation99_spill] sm:$0xff] %v7388_v16 }
 0x25e   : > { %v7303_v13 = vpop.permute.xlu0 %1546 }
 0x25f   : > { %12451 = vst [vmem:[#allocation80_spill] sm:$0xff] %v7303_v13 }
 0x260   : > { %1598 = vrot.lane.b32.xlu2 %v7301_v4, %s6503_s29  ;;  %1107 = vrot.lane.b32.xlu1 %v7294_v56, %s6504_s14 }
 0x262   : > { %v7309_v11 = vpop.permute.xlu1 %1548  ;;  %v7314_v37 = vpop.permute.xlu2 %1560 }
 0x263   : > { %12452 = vst [vmem:[#allocation81_spill] sm:$0xff] %v7309_v11 }
 0x264   : > { %12454 = vst [vmem:[#allocation83_spill] sm:$0xff] %v7314_v37  ;;  %1243 = vrot.lane.b32.xlu0 %v7312_v32, %s6504_s14 }
 0x266   : > { %v7321_v25 = vpop.permute.xlu0 %1556 }
 0x267   : > { %12456 = vst [vmem:[#allocation85_spill] sm:$0xff] %v7321_v25 }
 0x268   : > { %1596 = vrot.lane.b32.xlu2 %v7312_v32, %s6503_s29  ;;  %1600 = vrot.lane.b32.xlu1 %v7319_v14, %s6503_s29 }
 0x26a   : > { %v7327_v61 = vpop.permute.xlu1 %1494  ;;  %v7332_v8 = vpop.permute.xlu2 %1498 }
 0x26c   : > { %1510 = vrot.lane.b32.xlu0 %v7330_v6, %s6503_s29 }
 0x26e   : > { %v7339_v1 = vpop.permute.xlu0 %1554 }
 0x26f   : > { %12459 = vst [vmem:[#allocation88_spill] sm:$0xff] %v7339_v1 }
 0x270   : > { %1247 = vrot.lane.b32.xlu2 %v7319_v14, %s6504_s14  ;;  %1604 = vrot.lane.b32.xlu1 %v7337_v50, %s6503_s29 }
 0x272   : > { %v7345_v0 = vpop.permute.xlu1 %1558  ;;  %v7350_v13 = vpop.permute.xlu2 %1570 }
 0x273   : > { %12460 = vst [vmem:[#allocation89_spill] sm:$0xff] %v7345_v0  ;;  %v1042_v0 = vpop.f32.mrf.mxu3 }
 0x274   : > { %12462 = vst [vmem:[#allocation91_spill] sm:$0xff] %v7350_v13  ;;  %1249 = vrot.lane.b32.xlu0 %v7348_v48, %s6504_s14 }
 0x276   : > { %v7354_v27 = vpop.permute.xlu0 %1496 }
 0x277   : > { %12463 = vst [vmem:[#allocation92_spill] sm:$0xff] %v7354_v27 }
 0x278   : > { %1602 = vrot.lane.b32.xlu2 %v7348_v48, %s6503_s29  ;;  %1109 = vrot.lane.b32.xlu1 %v7330_v6, %s6504_s14 }
 0x27a   : > { %v7360_v22 = vpop.permute.xlu1 %1568  ;;  %v7365_v33 = vpop.permute.xlu2 %1223 }
 0x27b   : > { %12465 = vst [vmem:[#allocation94_spill] sm:$0xff] %v7365_v33  ;;  %v7381_v33 = vadd.f32 %v1042_v0, %v7121_v2  ;;  %v915_v0 = vpop.f32.mrf.mxu1  ;;  %v1045_v25 = vpop.f32.mrf.mxu3 }
 0x27c   : > { %1610 = vrot.lane.b32.xlu0 %v7363_v38, %s6503_s29  ;;  %v7403_v1 = vadd.f32 %v915_v0, %v7073_v45 }
 0x27d   : > { %12469 = vst [vmem:[#allocation98_spill] sm:$0xff] %v7381_v33 }
 0x27e   : > { %v7372_v36 = vpop.permute.xlu0 %1564  ;;  %12473 = vst [vmem:[#allocation102_spill] sm:$0xff] %v7403_v1 }
 0x27f   : > { %12467 = vst [vmem:[#allocation96_spill] sm:$0xff] %v7372_v36 }
 0x280   : > { %1253 = vrot.lane.b32.xlu2 %v7370_v44, %s6504_s14  ;;  %1606 = vrot.lane.b32.xlu1 %v7370_v44, %s6503_s29 }
 0x282   : > { %v7378_v11 = vpop.permute.xlu1 %1566  ;;  %v7383_v32 = vpop.permute.xlu2 %1580 }
 0x283   : > { %12468 = vst [vmem:[#allocation97_spill] sm:$0xff] %v7378_v11  ;;  %v7414_v11 = vadd.f32 %v853_v35, %v7087_v24  ;;  %v7429_v35 = vadd.f32 %v1045_v25, %v7073_v45  ;;  %v918_v25 = vpop.f32.mrf.mxu1 }
 0x284   : > { %1512 = vrot.lane.b32.xlu0 %v7381_v33, %s6503_s29 }
 0x285   : > { %12476 = vst [vmem:[#allocation105_spill] sm:$0xff] %v7414_v11 }
 0x286   : > { %v7390_v36 = vpop.permute.xlu0 %1574  ;;  %12479 = vst [vmem:[#allocation108_spill] sm:$0xff] %v7429_v35 }
 0x287   : > { %12471 = vst [vmem:[#allocation100_spill] sm:$0xff] %v7390_v36 }
 0x288   : > { %1608 = vrot.lane.b32.xlu2 %v7388_v16, %s6503_s29  ;;  %1257 = vrot.lane.b32.xlu1 %v7363_v38, %s6504_s14 }
 0x28a   : > { %v7396_v37 = vpop.permute.xlu1 %1500  ;;  %v7398_v13 = vpop.permute.xlu2 %1578 }
 0x28b   : > { %12472 = vst [vmem:[#allocation101_spill] sm:$0xff] %v7398_v13 }
 0x28c   : > { %1255 = vrot.lane.b32.xlu0 %v7388_v16, %s6504_s14 }
 0x28e   : > { %v7405_v2 = vpop.permute.xlu0 %1572 }
 0x28f   : > { %12474 = vst [vmem:[#allocation103_spill] sm:$0xff] %v7405_v2 }
 0x290   : > { %1259 = vrot.lane.b32.xlu2 %v7403_v1, %s6504_s14  ;;  %1111 = vrot.lane.b32.xlu1 %v7381_v33, %s6504_s14 }
 0x292   : > { %v7411_v38 = vpop.permute.xlu1 %1576  ;;  %v7416_v27 = vpop.permute.xlu2 %1504 }
 0x293   : > { %12475 = vst [vmem:[#allocation104_spill] sm:$0xff] %v7411_v38  ;;  %v980_v38 = vpop.f32.mrf.mxu2 }
 0x294   : > { %1263 = vrot.lane.b32.xlu0 %v7414_v11, %s6504_s14  ;;  %v7436_v13 = vadd.f32 %v980_v38, %v7073_v45  ;;  %v1048_v38 = vpop.f32.mrf.mxu3 }
 0x296   : > { %v7420_v0 = vpop.permute.xlu0 %1502  ;;  %12481 = vst [vmem:[#allocation110_spill] sm:$0xff] %v7436_v13 }
 0x297   : > { %12477 = vst [vmem:[#allocation106_spill] sm:$0xff] %v7420_v0 }
 0x298   : > { %1616 = vrot.lane.b32.xlu2 %v7414_v11, %s6503_s29  ;;  %1612 = vrot.lane.b32.xlu1 %v7403_v1, %s6503_s29 }
 0x29a   : > { %v7426_v14 = vpop.permute.xlu1 %1101  ;;  %v7431_v2 = vpop.permute.xlu2 %1231 }
 0x29b   : > { %12478 = vst [vmem:[#allocation107_spill] sm:$0xff] %v7426_v14  ;;  %v983_v0 = vpop.f32.mrf.mxu2 }
 0x29c   : > { %12480 = vst [vmem:[#allocation109_spill] sm:$0xff] %v7431_v2  ;;  %1514 = vrot.lane.b32.xlu0 %v7429_v35, %s6503_s29  ;;  %v7451_v2 = vadd.f32 %v918_v25, %v7087_v24  ;;  %v1051_v6 = vpop.f32.mrf.mxu3 }
 0x29d   : > { %v7513_v52 = vadd.f32 %v1051_v6, %v7099_v9 }
 0x29e   : > { %v7438_v48 = vpop.permute.xlu0 %1225  ;;  %12485 = vst [vmem:[#allocation114_spill] sm:$0xff] %v7451_v2 }
 0x29f   : > { %12482 = vst [vmem:[#allocation111_spill] sm:$0xff] %v7438_v48 }
 0x2a0   : > { %1614 = vrot.lane.b32.xlu2 %v7436_v13, %s6503_s29  ;;  %1113 = vrot.lane.b32.xlu1 %v7429_v35, %s6504_s14  ;;  %12500 = vst [vmem:[#allocation129_spill] sm:$0xff] %v7513_v52 }
 0x2a2   : > { %v7444_v14 = vpop.permute.xlu1 %1229  ;;  %v7446_v11 = vpop.permute.xlu2 %1588 }
 0x2a3   : > { %12483 = vst [vmem:[#allocation112_spill] sm:$0xff] %v7444_v14  ;;  %v856_v14 = vpop.f32.mrf.mxu0 }
 0x2a4   : > { %12484 = vst [vmem:[#allocation113_spill] sm:$0xff] %v7446_v11  ;;  %1261 = vrot.lane.b32.xlu0 %v7436_v13, %s6504_s14  ;;  %v7462_v11 = vadd.f32 %v1048_v38, %v7087_v24  ;;  %v7469_v25 = vadd.f32 %v856_v14, %v7099_v9  ;;  %v7480_v38 = vadd.f32 %v983_v0, %v7087_v24 }
 0x2a6   : > { %v7453_v45 = vpop.permute.xlu0 %1582  ;;  %12487 = vst [vmem:[#allocation116_spill] sm:$0xff] %v7462_v11 }
 0x2a7   : > { %12486 = vst [vmem:[#allocation115_spill] sm:$0xff] %v7453_v45 }
 0x2a8   : > { %1265 = vrot.lane.b32.xlu2 %v7451_v2, %s6504_s14  ;;  %1618 = vrot.lane.b32.xlu1 %v7451_v2, %s6503_s29  ;;  %12489 = vst [vmem:[#allocation118_spill] sm:$0xff] %v7469_v25 }
 0x2a9   : > { %12492 = vst [vmem:[#allocation121_spill] sm:$0xff] %v7480_v38 }
 0x2aa   : > { %v7459_v48 = vpop.permute.xlu1 %1586  ;;  %v7464_v56 = vpop.permute.xlu2 %1105 }
 0x2ab   : > { %12488 = vst [vmem:[#allocation117_spill] sm:$0xff] %v7464_v56 }
 0x2ac   : > { %1516 = vrot.lane.b32.xlu0 %v7462_v11, %s6503_s29 }
 0x2ae   : > { %v7471_v45 = vpop.permute.xlu0 %1103 }
 0x2af   : > { %12490 = vst [vmem:[#allocation119_spill] sm:$0xff] %v7471_v45  ;;  %v859_v45 = vpop.f32.mrf.mxu0 }
 0x2b0   : > { %1269 = vrot.lane.b32.xlu2 %v7469_v25, %s6504_s14  ;;  %1622 = vrot.lane.b32.xlu1 %v7469_v25, %s6503_s29  ;;  %v7495_v24 = vadd.f32 %v859_v45, %v7065_v29  ;;  %v986_v45 = vpop.f32.mrf.mxu2 }
 0x2b2   : > { %v7477_v36 = vpop.permute.xlu1 %1584  ;;  %v7482_v56 = vpop.permute.xlu2 %1241  ;;  %12495 = vst [vmem:[#allocation124_spill] sm:$0xff] %v7495_v24 }
 0x2b3   : > { %12491 = vst [vmem:[#allocation120_spill] sm:$0xff] %v7477_v36  ;;  %v921_v36 = vpop.f32.mrf.mxu1 }
 0x2b4   : > { %12493 = vst [vmem:[#allocation122_spill] sm:$0xff] %v7482_v56  ;;  %1267 = vrot.lane.b32.xlu0 %v7480_v38, %s6504_s14 }
 0x2b6   : > { %v7486_v14 = vpop.permute.xlu0 %1235 }
 0x2b7   : > { %12494 = vst [vmem:[#allocation123_spill] sm:$0xff] %v7486_v14  ;;  %v7502_v14 = vadd.f32 %v921_v36, %v7099_v9  ;;  %v7520_v36 = vadd.f32 %v986_v45, %v7099_v9  ;;  %v1054_v45 = vpop.f32.mrf.mxu3 }
 0x2b8   : > { %1620 = vrot.lane.b32.xlu2 %v7480_v38, %s6503_s29  ;;  %1115 = vrot.lane.b32.xlu1 %v7462_v11, %s6504_s14 }
 0x2b9   : > { %12497 = vst [vmem:[#allocation126_spill] sm:$0xff] %v7502_v14 }
 0x2ba   : > { %v7492_v25 = vpop.permute.xlu1 %1506  ;;  %v7497_v0 = vpop.permute.xlu2 %1598  ;;  %12502 = vst [vmem:[#allocation131_spill] sm:$0xff] %v7520_v36 }
 0x2bb   : > { %12496 = vst [vmem:[#allocation125_spill] sm:$0xff] %v7497_v0  ;;  %v924_v6 = vpop.f32.mrf.mxu1 }
 0x2bc   : > { %1628 = vrot.lane.b32.xlu0 %v7495_v24, %s6503_s29  ;;  %v7535_v54 = vadd.f32 %v924_v6, %v7065_v29 }
 0x2be   : > { %v7504_v56 = vpop.permute.xlu0 %1592  ;;  %12506 = vst [vmem:[#allocation135_spill] sm:$0xff] %v7535_v54 }
 0x2bf   : > { %12498 = vst [vmem:[#allocation127_spill] sm:$0xff] %v7504_v56 }
 0x2c0   : > { %1271 = vrot.lane.b32.xlu2 %v7502_v14, %s6504_s14  ;;  %1624 = vrot.lane.b32.xlu1 %v7502_v14, %s6503_s29 }
 0x2c2   : > { %v7510_v44 = vpop.permute.xlu1 %1237  ;;  %v7515_v31 = vpop.permute.xlu2 %1596 }
 0x2c3   : > { %12499 = vst [vmem:[#allocation128_spill] sm:$0xff] %v7510_v44 }
 0x2c4   : > { %12501 = vst [vmem:[#allocation130_spill] sm:$0xff] %v7515_v31  ;;  %1518 = vrot.lane.b32.xlu0 %v7513_v52, %s6503_s29 }
 0x2c6   : > { %v7522_v56 = vpop.permute.xlu0 %1590 }
 0x2c7   : > { %12503 = vst [vmem:[#allocation132_spill] sm:$0xff] %v7522_v56 }
 0x2c8   : > { %1626 = vrot.lane.b32.xlu2 %v7520_v36, %s6503_s29  ;;  %1275 = vrot.lane.b32.xlu1 %v7495_v24, %s6504_s14 }
 0x2ca   : > { %v7528_v44 = vpop.permute.xlu1 %1594  ;;  %v7530_v0 = vpop.permute.xlu2 %1247 }
 0x2cb   : > { %12504 = vst [vmem:[#allocation133_spill] sm:$0xff] %v7528_v44  ;;  %v989_v44 = vpop.f32.mrf.mxu2 }
 0x2cc   : > { %12505 = vst [vmem:[#allocation134_spill] sm:$0xff] %v7530_v0  ;;  %1273 = vrot.lane.b32.xlu0 %v7520_v36, %s6504_s14  ;;  %v7546_v0 = vadd.f32 %v1054_v45, %v7065_v29  ;;  %v7553_v6 = vadd.f32 %v989_v44, %v7065_v29 }
 0x2ce   : > { %v7537_v9 = vpop.permute.xlu0 %1508 }
 0x2d0   : > { %1277 = vrot.lane.b32.xlu2 %v7535_v54, %s6504_s14  ;;  %1117 = vrot.lane.b32.xlu1 %v7513_v52, %s6504_s14 }
 0x2d2   : > { %v7543_v24 = vpop.permute.xlu1 %1107  ;;  %v7548_v56 = vpop.permute.xlu2 %1602 }
 0x2d3   : > { %12507 = vst [vmem:[#allocation136_spill] sm:$0xff] %v7543_v24 }
 0x2d4   : > { %12508 = vst [vmem:[#allocation137_spill] sm:$0xff] %v7548_v56  ;;  %1520 = vrot.lane.b32.xlu0 %v7546_v0, %s6503_s29 }
 0x2d6   : > { %v7555_v31 = vpop.permute.xlu0 %1243 }
 0x2d7   : > { %12509 = vst [vmem:[#allocation138_spill] sm:$0xff] %v7555_v31 }
 0x2d8   : > { %1632 = vrot.lane.b32.xlu2 %v7553_v6, %s6503_s29  ;;  %1630 = vrot.lane.b32.xlu1 %v7535_v54, %s6503_s29  ;;  %s12941_s29 = smov 125  }
 0x2da   : > { %v7561_v24 = vpop.permute.xlu1 %1600  ;;  %v7563_v45 = vpop.permute.xlu2 %1253 }
 0x2db   : > { %12510 = vst [vmem:[#allocation139_spill] sm:$0xff] %v7563_v45  ;;  %v12533_v45 = vld [vmem:[#allocation125_spill] sm:$0xff] }
 0x2dc   : > { %1217 = vrot.lane.b32.xlu0 %v7180_v19, %s6504_s14 }
 0x2de   : > { %v7567_v56 = vpop.permute.xlu0 %1510 }
 0x2e0   : > { %1099 = vrot.lane.b32.xlu2 %v7182_v49, %s6504_s14  ;;  %1219 = vrot.lane.b32.xlu1 %v7188_v62, %s6504_s14 }
 0x2e2   : > { %v7573_v29 = vpop.permute.xlu1 %1604  ;;  %v7575_v44 = vpop.permute.xlu2 %1608 }
 0x2e4   : > { %1097 = vrot.lane.b32.xlu0 %v7169_v5, %s6504_s14 }
 0x2e6   : > { %v7579_v31 = vpop.permute.xlu0 %1249 }
 0x2e7   : > { %12511 = vst [vmem:[#allocation140_spill] sm:$0xff] %v7579_v31 }
 0x2e8   : > { %1251 = vrot.lane.b32.xlu2 %v7337_v50, %s6504_s14  ;;  %1211 = vrot.lane.b32.xlu1 %v7163_v60, %s6504_s14  ;;  %v12531_v60 = vld [vmem:[#allocation32_spill] sm:$0xff] }
 0x2ea   : > { %v7585_v19 = vpop.permute.xlu1 %1109  ;;  %v7587_v49 = vpop.permute.xlu2 %1259 }
 0x2eb   : > { %12512 = vst [vmem:[#allocation141_spill] sm:$0xff] %v7585_v19 }
 0x2ec   : > { %12513 = vst [vmem:[#allocation142_spill] sm:$0xff] %v7587_v49  ;;  %1245 = vrot.lane.b32.xlu0 %v7301_v4, %s6504_s14 }
 0x2ee   : > { %v7591_v62 = vpop.permute.xlu0 %1610 }
 0x2f0   : > { %1213 = vrot.lane.b32.xlu2 %v7167_v30, %s6504_s14  ;;  %1095 = vrot.lane.b32.xlu1 %v7151_v55, %s6504_s14 }
 0x2f2   : > { %v7597_v31 = vpop.permute.xlu1 %1606  ;;  %v7599_v5 = vpop.permute.xlu2 %1616 }
 0x2f4   : > { %1207 = vrot.lane.b32.xlu0 %v7155_v34, %s6504_s14 }
 0x2f6   : > { %v7603_v19 = vpop.permute.xlu0 %1512 }
 0x2f8   : > { %1205 = vrot.lane.b32.xlu2 %v7143_v59, %s6504_s14  ;;  %1239 = vrot.lane.b32.xlu1 %v7263_v46, %s6504_s14 }
 0x2fa   : > { %v7609_v4 = vpop.permute.xlu1 %1257  ;;  %v7611_v30 = vpop.permute.xlu2 %1614 }
 0x2fb   : > { %12514 = vst [vmem:[#allocation143_spill] sm:$0xff] %v7609_v4 }
 0x2fc   : > { %1199 = vrot.lane.b32.xlu0 %v7129_v26, %s6504_s14 }
 0x2fe   : > { %v7615_v55 = vpop.permute.xlu0 %1255 }
 0x2ff   : > { %12515 = vst [vmem:[#allocation144_spill] sm:$0xff] %v7615_v55 }
 0x300   : > { %1093 = vrot.lane.b32.xlu2 %v7131_v63, %s6504_s14  ;;  %1201 = vrot.lane.b32.xlu1 %v7139_v53, %s6504_s14 }
 0x302   : > { %v7621_v34 = vpop.permute.xlu1 %1111  ;;  %v7623_v59 = vpop.permute.xlu2 %1265 }
 0x303   : > { %12516 = vst [vmem:[#allocation145_spill] sm:$0xff] %v7621_v34 }
 0x304   : > { %12517 = vst [vmem:[#allocation146_spill] sm:$0xff] %v7623_v59  ;;  %1091 = vrot.lane.b32.xlu0 %v7115_v23, %s6504_s14  ;;  %v12535_v59 = vld [vmem:[#allocation22_spill] sm:$0xff] }
 0x306   : > { %v7627_v46 = vpop.permute.xlu0 %1263 }
 0x307   : > { %12518 = vst [vmem:[#allocation147_spill] sm:$0xff] %v7627_v46 }
 0x308   : > { %1233 = vrot.lane.b32.xlu2 %v7226_v20, %s6504_s14  ;;  %1193 = vrot.lane.b32.xlu1 %v7109_v47, %s6504_s14 }
 0x30a   : > { %v7633_v55 = vpop.permute.xlu1 %1612  ;;  %v7635_v26 = vpop.permute.xlu2 %1269 }
 0x30b   : > { %12519 = vst [vmem:[#allocation148_spill] sm:$0xff] %v7635_v26 }
 0x30c   : > { %1227 = vrot.lane.b32.xlu0 %v7205_v3, %s6504_s14 }
 0x30e   : > { %v7639_v34 = vpop.permute.xlu0 %1514 }
 0x310   : > { %1195 = vrot.lane.b32.xlu2 %v7113_v58, %s6504_s14  ;;  %1089 = vrot.lane.b32.xlu1 %v7091_v41, %s6504_s14 }
 0x312   : > { %v7645_v23 = vpop.permute.xlu1 %1113  ;;  %v7647_v20 = vpop.permute.xlu2 %1620 }
 0x313   : > { %12520 = vst [vmem:[#allocation149_spill] sm:$0xff] %v7645_v23 }
 0x314   : > { %1189 = vrot.lane.b32.xlu0 %v7095_v15, %s6504_s14 }
 0x316   : > { %v7651_v47 = vpop.permute.xlu0 %1261 }
 0x317   : > { %12521 = vst [vmem:[#allocation150_spill] sm:$0xff] %v7651_v47 }
 0x318   : > { %1187 = vrot.lane.b32.xlu2 %v7071_v42, %s6504_s14  ;;  %1221 = vrot.lane.b32.xlu1 %v7176_v18, %s6504_s14 }
 0x31a   : > { %v7657_v3 = vpop.permute.xlu1 %1618  ;;  %v7659_v58 = vpop.permute.xlu2 %1271 }
 0x31b   : > { %12522 = vst [vmem:[#allocation151_spill] sm:$0xff] %v7659_v58  ;;  %v12536_v58 = vld [vmem:[#allocation31_spill] sm:$0xff] }
 0x31c   : > { %1209 = vrot.lane.b32.xlu0 %v7145_v10, %s6504_s14 }
 0x31e   : > { %v1517_v23 = vpop.permute.xlu0 %1516 }
 0x31f   : > { %v1759_v4 = vsel %vm489_vm6, %v1517_v23, %v7599_v5 }
 0x320   : > { %1215 = vrot.lane.b32.xlu2 %v7157_v40, %s6504_s14  ;;  %1203 = vrot.lane.b32.xlu1 %v7125_v17, %s6504_s14 }
 0x322   : > { %v1623_v15 = vpop.permute.xlu1 %1622  ;;  %v1627_v47 = vpop.permute.xlu2 %1626 }
 0x324   : > { %1191 = vrot.lane.b32.xlu0 %v7085_v39, %s6504_s14 }
 0x326   : > { %v7669_v18 = vpop.permute.xlu0 %1267 }
 0x327   : > { %12523 = vst [vmem:[#allocation152_spill] sm:$0xff] %v7669_v18 }
 0x328   : > { %1197 = vrot.lane.b32.xlu2 %v7097_v28, %s6504_s14  ;;  %1185 = vrot.lane.b32.xlu1 %v7077_v51, %s6504_s14 }
 0x32a   : > { %v7675_v10 = vpop.permute.xlu1 %1115  ;;  %v7677_v42 = vpop.permute.xlu2 %1277 }
 0x32b   : > { %12524 = vst [vmem:[#allocation153_spill] sm:$0xff] %v7675_v10 }
 0x32c   : > { %2503 = vrot.lane.b32.xlu0 %v7535_v54, %s6505_s16 }
 0x32e   : > { %v1629_v17 = vpop.permute.xlu0 %1628 }
 0x330   : > { %2391 = vrot.lane.b32.xlu2 %v7513_v52, %s6505_s16  ;;  %2499 = vrot.lane.b32.xlu1 %v7520_v36, %s6505_s16  ;;  %v7726_v52 = vsel %vm489_vm6, %v7396_v37, %v7360_v22 }
 0x332   : > { %v1625_v39 = vpop.permute.xlu1 %1624  ;;  %v1633_v40 = vpop.permute.xlu2 %1632 }
 0x334   : > { %2497 = vrot.lane.b32.xlu0 %v7502_v14, %s6505_s16 }
 0x336   : > { %v1519_v51 = vpop.permute.xlu0 %1518 }
 0x338   : > { %2389 = vrot.lane.b32.xlu2 %v7462_v11, %s6505_s16  ;;  %2493 = vrot.lane.b32.xlu1 %v7480_v38, %s6505_s16  ;;  %v1747_v38 = vsel %vm489_vm6, %v7260_v7, %v7235_v43 }
 0x33a   : > { %v7691_v54 = vpop.permute.xlu1 %1275  ;;  %v7693_v28 = vpop.permute.xlu2 %1099 }
 0x33b   : > { %12525 = vst [vmem:[#allocation154_spill] sm:$0xff] %v7691_v54 }
 0x33c   : > { %12526 = vst [vmem:[#allocation155_spill] sm:$0xff] %v7693_v28  ;;  %2491 = vrot.lane.b32.xlu0 %v7451_v2, %s6505_s16  ;;  %v1750_v2 = vsel %vm489_vm6, %v7332_v8, %v7296_v12  ;;  %v7731_v28 = vsel %vm489_vm6, %v7416_v27, %v7383_v32 }
 0x33e   : > { %v7697_v36 = vpop.permute.xlu0 %1273 }
 0x33f   : > { %12527 = vst [vmem:[#allocation156_spill] sm:$0xff] %v7697_v36  ;;  %v7739_v36 = vmul.f32 %v1750_v2, %v6904_v57  ;;  %v1678_v2 = vsel %vm489_vm6, %v1627_v47, %v1519_v51 }
 0x340   : > { %2387 = vrot.lane.b32.xlu2 %v7429_v35, %s6505_s16  ;;  %2487 = vrot.lane.b32.xlu1 %v7436_v13, %s6505_s16  ;;  %v7718_v35 = vsel %vm489_vm6, %v7327_v61, %v7291_v21  ;;  %v7721_v13 = vmul.f32 %v1747_v38, %v6904_v57  ;;  %v1760_v38 = vsel %vm489_vm6, %v1519_v51, %v1623_v15 }
 0x341   : > { %v1818_v46 = vmul.f32 %v1760_v38, %v6904_v57 }
 0x342   : > { %v7703_v14 = vpop.permute.xlu1 %1117  ;;  %v7708_v11 = vpop.permute.xlu2 %1251 }
 0x343   : > { %12528 = vst [vmem:[#allocation157_spill] sm:$0xff] %v7703_v14  ;;  %v12530_v14 = vld [vmem:[#allocation130_spill] sm:$0xff] }
 0x344   : > { %12529 = vst [vmem:[#allocation158_spill] sm:$0xff] %v7708_v11  ;;  %2485 = vrot.lane.b32.xlu0 %v7403_v1, %s6505_s16  ;;  %v7736_v1 = vsel %vm489_vm6, %v7492_v25, %v7459_v48  ;;  %v7751_v53 = vsel %vm489_vm6, %v12530_v14, %v7537_v9  ;;  %v12532_v11 = vld [vmem:[#allocation137_spill] sm:$0xff] }
 0x346   : > { %v1521_v18 = vpop.permute.xlu0 %1520 }
 0x347   : > { %v1681_v10 = vsel %vm489_vm6, %v1633_v40, %v1521_v18  ;;  %v1761_v41 = vsel %vm489_vm6, %v1521_v18, %v1629_v17  ;;  %v1666_v18 = vsel %vm489_vm6, %v12532_v11, %v7567_v56 }
 0x348   : > { %2385 = vrot.lane.b32.xlu2 %v7381_v33, %s6505_s16  ;;  %2481 = vrot.lane.b32.xlu1 %v7388_v16, %s6505_s16  ;;  %v1822_v63 = vmul.f32 %v1761_v41, %v6904_v57  ;;  %v1825_v50 = vmul.f32 %v1681_v10, %v12531_v60  ;;  %v1756_v33 = vsel %vm489_vm6, %v7567_v56, %v12533_v45 }
 0x349   : > { %v1675_v16 = vsel %vm489_vm6, %v7647_v20, %v1517_v23  ;;  %v1758_v56 = vsel %vm489_vm6, %v7639_v34, %v7591_v62  ;;  %v1821_v23 = vmul.f32 %v1678_v2, %v12531_v60 }
 0x34a   : > { %v1631_v49 = vpop.permute.xlu1 %1630  ;;  %v7766_v51 = vpop.permute.xlu2 %1213  ;;  %1826 = vmatpush.msra.mxu0 %v1822_v63  ;;  %2021 = vmatpush.msra.mxu3 %v1825_v50  ;;  %v1814_v63 = vmul.f32 %v1759_v4, %v6904_v57  ;;  %v1672_v50 = vsel %vm489_vm6, %v7611_v30, %v7639_v34  ;;  %v1810_v4 = vmul.f32 %v1758_v56, %v6904_v57  ;;  %v12538_v34 = vld [vmem:[#allocation86_spill] sm:$0xff] }
 0x34b   : > { %12534 = vst [vmem:[#allocation130_spill] sm:$0xff] %v7766_v51  ;;  %v1679_v41 = vsel %vm489_vm6, %v1629_v17, %v1631_v49  ;;  %v1680_v10 = vsel %vm489_vm6, %v1631_v49, %v1633_v40  ;;  %v1676_v51 = vsel %vm489_vm6, %v1623_v15, %v1625_v39  ;;  %v1677_v17 = vsel %vm489_vm6, %v1625_v39, %v1627_v47  ;;  %v12537_v40 = vld [vmem:[#allocation95_spill] sm:$0xff] }
 0x34c   : > { %v1823_v26 = vmul.f32 %v1679_v41, %v12535_v59  ;;  %v1824_v54 = vmul.f32 %v1680_v10, %v12536_v58  ;;  %2479 = vrot.lane.b32.xlu0 %v12537_v40, %s6505_s16  ;;  %1827 = vmatpush.msra.mxu0 %v1818_v46  ;;  %v1757_v49 = vsel %vm489_vm6, %v7603_v19, %v7573_v29  ;;  %v12599_v40 = vld [vmem:[#allocation58_spill] sm:$0xff] }
 0x34d   : > { %2022 = vmatpush.msra.mxu3 %v1821_v23  ;;  %v1817_v15 = vmul.f32 %v1675_v16, %v12531_v60  ;;  %v1673_v39 = vsel %vm489_vm6, %v7599_v5, %v7657_v3  ;;  %v1674_v46 = vsel %vm489_vm6, %v7657_v3, %v7647_v20  ;;  %v1819_v5 = vmul.f32 %v1676_v51, %v12535_v59  ;;  %v12539_v51 = vld [vmem:[#allocation127_spill] sm:$0xff] }
 0x34e   : > { %1891 = vmatpush.msra.mxu1 %v1823_v26  ;;  %1828 = vmatpush.msra.mxu0 %v1814_v63  ;;  %v7795_v47 = vpop.permute.xlu0 %1217  ;;  %v1669_v26 = vsel %vm489_vm6, %v7575_v44, %v7603_v19  ;;  %v1820_v16 = vmul.f32 %v1677_v17, %v12536_v58  ;;  %v1813_v3 = vmul.f32 %v1672_v50, %v12531_v60  ;;  %v12540_v17 = vld [vmem:[#allocation132_spill] sm:$0xff] }
 0x34f   : > { %1956 = vmatpush.msra.mxu2 %v1824_v54  ;;  %2023 = vmatpush.msra.mxu3 %v1817_v15  ;;  %v1670_v54 = vsel %vm489_vm6, %v7591_v62, %v7633_v55  ;;  %v1806_v19 = vmul.f32 %v1757_v49, %v6904_v57  ;;  %v1671_v20 = vsel %vm489_vm6, %v7633_v55, %v7611_v30 }
 0x350   : > { %2383 = vrot.lane.b32.xlu2 %v12538_v34, %s6505_s16  ;;  %1119 = vrot.lane.b32.xlu1 %v7546_v0, %s6504_s14  ;;  %v1816_v38 = vmul.f32 %v1674_v46, %v12536_v58  ;;  %v1815_v62 = vmul.f32 %v1673_v39, %v12535_v59  ;;  %v1755_v41 = vsel %vm489_vm6, %v7537_v9, %v12539_v51  ;;  %v12542_v46 = vld [vmem:[#allocation133_spill] sm:$0xff]  ;;  %v12617_v34 = vld [vmem:[#allocation51_spill] sm:$0xff] }
 0x351   : > { %1829 = vmatpush.msra.mxu0 %v1810_v4  ;;  %1892 = vmatpush.msra.mxu1 %v1819_v5  ;;  %v1667_v10 = vsel %vm489_vm6, %v7573_v29, %v7597_v31  ;;  %v1809_v30 = vmul.f32 %v1669_v26, %v12531_v60  ;;  %v1668_v55 = vsel %vm489_vm6, %v7597_v31, %v7575_v44  ;;  %v12543_v26 = vld [vmem:[#allocation100_spill] sm:$0xff]  ;;  %v12544_v5 = vld [vmem:[#allocation106_spill] sm:$0xff] }
 0x352   : > { %1957 = vmatpush.msra.mxu2 %v1820_v16  ;;  %v7816_v2 = vpop.permute.xlu1 %1219  ;;  %2024 = vmatpush.msra.mxu3 %v1813_v3  ;;  %v7825_v56 = vpop.permute.xlu2 %1205  ;;  %v1802_v23 = vmul.f32 %v1756_v33, %v6904_v57  ;;  %v1811_v9 = vmul.f32 %v1670_v54, %v12535_v59  ;;  %v1660_v29 = vsel %vm489_vm6, %v12540_v17, %v7492_v25  ;;  %v12545_v54 = vld [vmem:[#allocation78_spill] sm:$0xff] }
 0x353   : > { %1830 = vmatpush.msra.mxu0 %v1806_v19  ;;  %1893 = vmatpush.msra.mxu1 %v1815_v62  ;;  %v1812_v63 = vmul.f32 %v1671_v20, %v12536_v58  ;;  %v1805_v49 = vmul.f32 %v1666_v18, %v12531_v60  ;;  %v1664_v31 = vsel %vm489_vm6, %v12533_v45, %v7561_v24  ;;  %v12541_v45 = vld [vmem:[#allocation120_spill] sm:$0xff]  ;;  %v12547_v20 = vld [vmem:[#allocation113_spill] sm:$0xff] }
 0x354   : > { %1958 = vmatpush.msra.mxu2 %v1816_v38  ;;  %2025 = vmatpush.msra.mxu3 %v1809_v30  ;;  %v1798_v33 = vmul.f32 %v1755_v41, %v6904_v57  ;;  %v1807_v44 = vmul.f32 %v1667_v10, %v12535_v59  ;;  %v1665_v25 = vsel %vm489_vm6, %v7561_v24, %v12532_v11  ;;  %v12548_v41 = vld [vmem:[#allocation101_spill] sm:$0xff] }
 0x355   : > { %1279 = vrot.lane.b32.xlu0 %v7553_v6, %s6504_s14  ;;  %1831 = vmatpush.msra.mxu0 %v1802_v23  ;;  %v1808_v50 = vmul.f32 %v1668_v55, %v12536_v58  ;;  %v1801_v18 = vmul.f32 %v7751_v53, %v12531_v60  ;;  %v1657_v39 = vsel %vm489_vm6, %v12541_v45, %v7416_v27  ;;  %v12549_v55 = vld [vmem:[#allocation115_spill] sm:$0xff]  ;;  %s13110_s14 = smov 124  }
 0x356   : > { %1894 = vmatpush.msra.mxu1 %v1811_v9  ;;  %1959 = vmatpush.msra.mxu2 %v1812_v63  ;;  %v7851_v15 = vpop.permute.xlu0 %1097  ;;  %v1661_v4 = vsel %vm489_vm6, %v12539_v51, %v12542_v46  ;;  %v1790_v11 = vmul.f32 %v7731_v28, %v6904_v57  ;;  %v1662_v24 = vsel %vm489_vm6, %v12542_v46, %v12530_v14  ;;  %v12546_v28 = vld [vmem:[#allocation90_spill] sm:$0xff]  ;;  %v12553_v46 = vld [vmem:[#allocation85_spill] sm:$0xff] }
 0x357   : > { %2026 = vmatpush.msra.mxu3 %v1805_v49  ;;  %1832 = vmatpush.msra.mxu0 %v1798_v33  ;;  %v1794_v53 = vmul.f32 %v7736_v1, %v6904_v57  ;;  %v1803_v27 = vmul.f32 %v1664_v31, %v12535_v59  ;;  %v1752_v16 = vsel %vm489_vm6, %v12544_v5, %v12543_v26  ;;  %v12551_v33 = vld [vmem:[#allocation104_spill] sm:$0xff] }
 0x358   : > { %1895 = vmatpush.msra.mxu1 %v1807_v44  ;;  %1960 = vmatpush.msra.mxu2 %v1808_v50  ;;  %v1804_v3 = vmul.f32 %v1665_v25, %v12536_v58  ;;  %v1797_v14 = vmul.f32 %v1660_v29, %v12531_v60  ;;  %v1658_v1 = vsel %vm489_vm6, %v7459_v48, %v12547_v20  ;;  %v12550_v29 = vld [vmem:[#allocation103_spill] sm:$0xff]  ;;  %v12552_v44 = vld [vmem:[#allocation84_spill] sm:$0xff] }
 0x359   : > { %2027 = vmatpush.msra.mxu3 %v1801_v18  ;;  %2381 = vrot.lane.b32.xlu2 %v12545_v54, %s6505_s16  ;;  %v1659_v38 = vsel %vm489_vm6, %v12547_v20, %v12540_v17  ;;  %v1799_v51 = vmul.f32 %v1661_v4, %v12535_v59  ;;  %v1654_v10 = vsel %vm489_vm6, %v12548_v41, %v12544_v5  ;;  %v12554_v4 = vld [vmem:[#allocation92_spill] sm:$0xff]  ;;  %v12557_v5 = vld [vmem:[#allocation91_spill] sm:$0xff]  ;;  %v12608_v54 = vld [vmem:[#allocation54_spill] sm:$0xff] }
 0x35a   : > { %2475 = vrot.lane.b32.xlu1 %v12546_v28, %s6505_s16  ;;  %v7876_v19 = vpop.permute.xlu1 %1211  ;;  %1833 = vmatpush.msra.mxu0 %v1794_v53  ;;  %v7884_v62 = vpop.permute.xlu2 %1093  ;;  %v1800_v30 = vmul.f32 %v1662_v24, %v12536_v58  ;;  %v1793_v48 = vmul.f32 %v1657_v39, %v12531_v60  ;;  %v1655_v23 = vsel %vm489_vm6, %v7383_v32, %v12549_v55  ;;  %v12555_v24 = vld [vmem:[#allocation97_spill] sm:$0xff] }
 0x35b   : > { %1896 = vmatpush.msra.mxu1 %v1803_v27  ;;  %1961 = vmatpush.msra.mxu2 %v1804_v3  ;;  %v1656_v9 = vsel %vm489_vm6, %v12549_v55, %v12541_v45  ;;  %v1786_v17 = vmul.f32 %v1752_v16, %v6904_v57  ;;  %v1651_v63 = vsel %vm489_vm6, %v12550_v29, %v7396_v37  ;;  %v12556_v27 = vld [vmem:[#allocation88_spill] sm:$0xff] }
 0x35c   : > { %2028 = vmatpush.msra.mxu3 %v1797_v14  ;;  %1834 = vmatpush.msra.mxu0 %v1790_v11  ;;  %v1795_v49 = vmul.f32 %v1658_v1, %v12535_v59  ;;  %v1796_v31 = vmul.f32 %v1659_v38, %v12536_v58  ;;  %v1652_v32 = vsel %vm489_vm6, %v12543_v26, %v12551_v33  ;;  %v12559_v1 = vld [vmem:[#allocation124_spill] sm:$0xff] }
 0x35d   : > { %1897 = vmatpush.msra.mxu1 %v1799_v51  ;;  %1962 = vmatpush.msra.mxu2 %v1800_v30  ;;  %v1789_v25 = vmul.f32 %v1654_v10, %v12531_v60  ;;  %v1782_v50 = vmul.f32 %v7726_v52, %v6904_v57  ;;  %v1653_v18 = vsel %vm489_vm6, %v12551_v33, %v12548_v41  ;;  %v12560_v51 = vld [vmem:[#allocation96_spill] sm:$0xff]  ;;  %v12561_v10 = vld [vmem:[#allocation82_spill] sm:$0xff] }
 0x35e   : > { %2029 = vmatpush.msra.mxu3 %v1793_v48  ;;  %2473 = vrot.lane.b32.xlu0 %v12552_v44, %s6505_s16  ;;  %v7912_v37 = vpop.permute.xlu0 %1245  ;;  %v1791_v45 = vmul.f32 %v1655_v23, %v12535_v59  ;;  %v1792_v39 = vmul.f32 %v1656_v9, %v12536_v58  ;;  %v1749_v11 = vsel %vm489_vm6, %v12554_v4, %v12553_v46 }
 0x35f   : > { %1835 = vmatpush.msra.mxu0 %v1786_v17  ;;  %1898 = vmatpush.msra.mxu1 %v1795_v49  ;;  %v1648_v52 = vsel %vm489_vm6, %v12555_v24, %v7332_v8  ;;  %v1785_v53 = vmul.f32 %v1651_v63, %v12531_v60  ;;  %v1642_v26 = vsel %vm489_vm6, %v12556_v27, %v7327_v61  ;;  %v12558_v8 = vld [vmem:[#allocation83_spill] sm:$0xff] }
 0x360   : > { %1963 = vmatpush.msra.mxu2 %v1796_v31  ;;  %2030 = vmatpush.msra.mxu3 %v1789_v25  ;;  %v1649_v16 = vsel %vm489_vm6, %v7360_v22, %v12557_v5  ;;  %v1650_v3 = vsel %vm489_vm6, %v12557_v5, %v12550_v29  ;;  %v1645_v20 = vsel %vm489_vm6, %v12558_v8, %v12554_v4  ;;  %v12563_v29 = vld [vmem:[#allocation89_spill] sm:$0xff]  ;;  %v12568_v4 = vld [vmem:[#allocation75_spill] sm:$0xff] }
 0x361   : > { %1836 = vmatpush.msra.mxu0 %v1782_v50  ;;  %1899 = vmatpush.msra.mxu1 %v1791_v45  ;;  %v1787_v61 = vmul.f32 %v1652_v32, %v12535_v59  ;;  %v1788_v22 = vmul.f32 %v1653_v18, %v12536_v58  ;;  %v1646_v41 = vsel %vm489_vm6, %v7296_v12, %v12560_v51  ;;  %v12562_v12 = vld [vmem:[#allocation81_spill] sm:$0xff]  ;;  %v12566_v18 = vld [vmem:[#allocation76_spill] sm:$0xff] }
 0x362   : > { %1964 = vmatpush.msra.mxu2 %v1792_v39  ;;  %v7935_v14 = vpop.permute.xlu1 %1095  ;;  %2031 = vmatpush.msra.mxu3 %v1785_v53  ;;  %v7944_v38 = vpop.permute.xlu2 %1233  ;;  %v1781_v30 = vmul.f32 %v1648_v52, %v12531_v60  ;;  %v1774_v48 = vmul.f32 %v1749_v11, %v6904_v57  ;;  %v1647_v55 = vsel %vm489_vm6, %v12560_v51, %v12555_v24  ;;  %v12564_v32 = vld [vmem:[#allocation73_spill] sm:$0xff]  ;;  %v1474_v51 = vld [vmem:[#allocation2 + $0x80] sm:$0xff] }
 0x363   : > { %2501 = vrot.lane.b32.xlu2 %v12559_v1, %s6505_s16  ;;  %2469 = vrot.lane.b32.xlu1 %v12561_v10, %s6505_s16  ;;  %v1783_v23 = vmul.f32 %v1649_v16, %v12535_v59  ;;  %v1784_v9 = vmul.f32 %v1650_v3, %v12536_v58  ;;  %v1639_v17 = vsel %vm489_vm6, %v12562_v12, %v7260_v7  ;;  %v12565_v25 = vld [vmem:[#allocation77_spill] sm:$0xff]  ;;  %v12569_v3 = vld [vmem:[#allocation80_spill] sm:$0xff] }
 0x364   : > { %1837 = vmatpush.msra.mxu0 %v7739_v36  ;;  %1900 = vmatpush.msra.mxu1 %v1787_v61  ;;  %v1643_v36 = vsel %vm489_vm6, %v12553_v46, %v12563_v29  ;;  %v1777_v63 = vmul.f32 %v1645_v20, %v12531_v60  ;;  %v1644_v49 = vsel %vm489_vm6, %v12563_v29, %v12558_v8  ;;  %v12567_v46 = vld [vmem:[#allocation68_spill] sm:$0xff]  ;;  %v12574_v29 = vld [vmem:[#allocation151_spill] sm:$0xff] }
 0x365   : > { %1965 = vmatpush.msra.mxu2 %v1788_v22  ;;  %2032 = vmatpush.msra.mxu3 %v1781_v30  ;;  %v1770_v31 = vmul.f32 %v7718_v35, %v6904_v57  ;;  %v1779_v33 = vmul.f32 %v1646_v41, %v12535_v59  ;;  %v1746_v50 = vsel %vm489_vm6, %v12565_v25, %v12564_v32  ;;  %v12570_v61 = vld [vmem:[#allocation72_spill] sm:$0xff] }
 0x366   : > { %1838 = vmatpush.msra.mxu0 %v1774_v48  ;;  %1901 = vmatpush.msra.mxu1 %v1783_v23  ;;  %v7972_v7 = vpop.permute.xlu0 %1207  ;;  %v1780_v45 = vmul.f32 %v1647_v55, %v12536_v58  ;;  %v1773_v39 = vmul.f32 %v1642_v26, %v12531_v60  ;;  %v1636_v35 = vsel %vm489_vm6, %v12567_v46, %v12565_v25 }
 0x367   : > { %1966 = vmatpush.msra.mxu2 %v1784_v9  ;;  %2033 = vmatpush.msra.mxu3 %v1777_v63  ;;  %v1640_v11 = vsel %vm489_vm6, %v7291_v21, %v12568_v4  ;;  %v1775_v24 = vmul.f32 %v1643_v36, %v12535_v59  ;;  %v1641_v52 = vsel %vm489_vm6, %v12568_v4, %v12556_v27  ;;  %v12575_v36 = vld [vmem:[#allocation148_spill] sm:$0xff]  ;;  %v12582_v4 = vld [vmem:[#allocation143_spill] sm:$0xff] }
 0x368   : > { %2467 = vrot.lane.b32.xlu0 %v12566_v18, %s6505_s16  ;;  %1839 = vmatpush.msra.mxu0 %v1770_v31  ;;  %v1776_v53 = vmul.f32 %v1644_v49, %v12536_v58  ;;  %v1769_v26 = vmul.f32 %v1639_v17, %v12531_v60  ;;  %v1762_v21 = vmul.f32 %v1746_v50, %v6904_v57  ;;  %v12576_v49 = vld [vmem:[#allocation70_spill] sm:$0xff] }
 0x369   : > { %1902 = vmatpush.msra.mxu1 %v1779_v33  ;;  %1967 = vmatpush.msra.mxu2 %v1780_v45  ;;  %v1637_v8 = vsel %vm489_vm6, %v7235_v43, %v12569_v3  ;;  %v1638_v27 = vsel %vm489_vm6, %v12569_v3, %v12562_v12  ;;  %v1771_v20 = vmul.f32 %v1640_v11, %v12535_v59  ;;  %v12572_v43 = vld [vmem:[#allocation74_spill] sm:$0xff]  ;;  %v12577_v33 = vld [vmem:[#allocation25_spill] sm:$0xff]  ;;  %v12579_v45 = vld [vmem:[#allocation147_spill] sm:$0xff] }
 0x36a   : > { %2034 = vmatpush.msra.mxu3 %v1773_v39  ;;  %v7993_v5 = vpop.permute.xlu1 %1239  ;;  %1840 = vmatpush.msra.mxu0 %v7721_v13  ;;  %v7997_v16 = vpop.permute.xlu2 %1195  ;;  %v12571_v13 = vld [vmem:[#allocation69_spill] sm:$0xff]  ;;  %v1772_v57 = vmul.f32 %v1641_v52, %v12536_v58  ;;  %v1765_v22 = vmul.f32 %v1636_v35, %v12531_v60  ;;  %v1635_v41 = vsel %vm489_vm6, %v12572_v43, %v12567_v46  ;;  %v12573_v60 = vld [vmem:[#allocation154_spill] sm:$0xff]  ;;  %v12580_v39 = vld [vmem:[#allocation64_spill] sm:$0xff] }
 0x36b   : > { %1903 = vmatpush.msra.mxu1 %v1775_v24  ;;  %1968 = vmatpush.msra.mxu2 %v1776_v53  ;;  %v1634_v30 = vsel %vm489_vm6, %v12564_v32, %v12572_v43  ;;  %v1767_v48 = vmul.f32 %v1637_v8, %v12535_v59  ;;  %v1768_v55 = vmul.f32 %v1638_v27, %v12536_v58  ;;  %v12578_v50 = vld [vmem:[#allocation146_spill] sm:$0xff]  ;;  %v1475_v46 = vld [vmem:[#allocation2 + $0x88] sm:$0xff] }
 0x36c   : > { %2035 = vmatpush.msra.mxu3 %v1769_v26  ;;  %2463 = vrot.lane.b32.xlu2 %v12570_v61, %s6505_s16  ;;  %v1326_v9 = vsel %vm463_vm7, %v12573_v60, %v7677_v42  ;;  %v1763_v12 = vmul.f32 %v1634_v30, %v12535_v59  ;;  %v1764_v17 = vmul.f32 %v1635_v41, %v12536_v58  ;;  %v12581_v35 = vld [vmem:[#allocation142_spill] sm:$0xff]  ;;  %v12584_v26 = vld [vmem:[#allocation139_spill] sm:$0xff] }
 0x36d   : > { %2461 = vrot.lane.b32.xlu1 %v12571_v13, %s6505_s16  ;;  %1841 = vmatpush.msra.mxu0 %v1762_v21  ;;  %v1323_v63 = vsel %vm463_vm7, %v12575_v36, %v12574_v29  ;;  %v1470_v32 = vmul.f32 %v1326_v9, %v12577_v33  ;;  %v1320_v59 = vsel %vm463_vm7, %v12579_v45, %v12578_v50  ;;  %v12583_v24 = vld [vmem:[#allocation66_spill] sm:$0xff]  ;;  %v12589_v9 = vld [vmem:[#allocation123_spill] sm:$0xff] }
 0x36e   : > { %1904 = vmatpush.msra.mxu1 %v1771_v20  ;;  %1969 = vmatpush.msra.mxu2 %v1772_v57  ;;  %v8020_v23 = vpop.permute.xlu0 %1199  ;;  %v1466_v58 = vmul.f32 %v1323_v63, %v12577_v33  ;;  %v1317_v11 = vsel %vm463_vm7, %v12582_v4, %v12581_v35  ;;  %v1462_v52 = vmul.f32 %v1320_v59, %v12577_v33  ;;  %v12585_v21 = vld [vmem:[#allocation158_spill] sm:$0xff]  ;;  %v12598_v13 = vld [vmem:[#allocation63_spill] sm:$0xff] }
 0x36f   : > { %2036 = vmatpush.msra.mxu3 %v1765_v22  ;;  %1842 = vmatmul.f32.vlgmr.msra.gmra.mxu0 %v1474_v51  ;;  %v1314_v3 = vsel %vm463_vm7, %v12585_v21, %v12584_v26  ;;  %v1458_v8 = vmul.f32 %v1317_v11, %v12577_v33  ;;  %v12586_v27 = vld [vmem:[#allocation134_spill] sm:$0xff]  ;;  %v12591_v11 = vld [vmem:[#allocation67_spill] sm:$0xff] }
 0x370   : > { %2037 = vmatmul.f32.vlgmr.msra.gmra.mxu3 %v1474_v51  ;;  %1905 = vmatpush.msra.mxu1 %v1767_v48  ;;  %v1311_v20 = vsel %vm463_vm7, %v7912_v37, %v12586_v27  ;;  %v12587_v57 = vld [vmem:[#allocation118_spill] sm:$0xff]  ;;  %v12606_v61 = vld [vmem:[#allocation55_spill] sm:$0xff] }
 0x371   : > { %1970 = vmatpush.msra.mxu2 %v1768_v55  ;;  %2379 = vrot.lane.b32.xlu0 %v12576_v49, %s6505_s16  ;;  %v12588_v41 = vld [vmem:[#allocation122_spill] sm:$0xff]  ;;  %v1450_v48 = vmul.f32 %v1311_v20, %v12577_v33  ;;  %v1477_v20 = vld [vmem:[#allocation2 + $0x98] sm:$0xff] }
 0x372   : > { %v8032_v31 = vpop.permute.xlu1 %1201  ;;  %1906 = vmatpush.msra.mxu1 %v1763_v12  ;;  %v8035_v25 = vpop.permute.xlu2 %1187  ;;  %v1308_v30 = vsel %vm463_vm7, %v7993_v5, %v12588_v41  ;;  %v1476_v55 = vld [vmem:[#allocation2 + $0x90] sm:$0xff]  ;;  %v1305_v12 = vsel %vm463_vm7, %v7944_v38, %v12589_v9 }
 0x373   : > { %1971 = vmatpush.msra.mxu2 %v1764_v17  ;;  %1907 = vmatmul.f32.vlgmr.msra.gmra.mxu1 %v1474_v51  ;;  %v1446_v17 = vmul.f32 %v1308_v30, %v12577_v33 }
 0x374   : > { %1972 = vmatmul.f32.vlgmr.msra.gmra.mxu2 %v1474_v51  ;;  %2151 = vmatpush.msrb.mxu1 %v1470_v32  ;;  %v1454_v51 = vmul.f32 %v1314_v3, %v12577_v33  ;;  %v12590_v32 = vld [vmem:[#allocation112_spill] sm:$0xff] }
 0x375   : > { %2455 = vrot.lane.b32.xlu2 %v12580_v39, %s6505_s16  ;;  %2377 = vrot.lane.b32.xlu1 %v12583_v24, %s6505_s16  ;;  %v12597_v39 = vld [vmem:[#allocation93_spill] sm:$0xff] }
 0x376   : > { %2152 = vmatpush.msrb.mxu1 %v1466_v58  ;;  %v8049_v53 = vpop.permute.xlu0 %1091  ;;  %v1442_v58 = vmul.f32 %v1305_v12, %v12577_v33  ;;  %v12602_v24 = vld [vmem:[#allocation57_spill] sm:$0xff] }
 0x377   : > { %1845 = vmatmul.f32.gmra.mxu0 %v1475_v46 }
 0x378   : > { %2040 = vmatmul.f32.gmra.mxu3 %v1475_v46  ;;  %2153 = vmatpush.msrb.mxu1 %v1462_v52 }
 0x379   : > { %2495 = vrot.lane.b32.xlu0 %v12587_v57, %s6505_s16 }
 0x37a   : > { %v8060_v22 = vpop.permute.xlu1 %1193  ;;  %2154 = vmatpush.msrb.mxu1 %v1458_v8  ;;  %v8063_v43 = vpop.permute.xlu2 %1215  ;;  %v12592_v8 = vld [vmem:[#allocation61_spill] sm:$0xff] }
 0x37b   : > { %1910 = vmatmul.f32.gmra.mxu1 %v1475_v46 }
 0x37c   : > { %1975 = vmatmul.f32.gmra.mxu2 %v1475_v46  ;;  %2155 = vmatpush.msrb.mxu1 %v1454_v51  ;;  %v12593_v51 = vld [vmem:[#allocation105_spill] sm:$0xff] }
 0x37d   : > { %2393 = vrot.lane.b32.xlu2 %v7546_v0, %s6505_s16  ;;  %2505 = vrot.lane.b32.xlu1 %v7553_v6, %s6505_s16 }
 0x37e   : > { %2156 = vmatpush.msrb.mxu1 %v1450_v48  ;;  %v8077_v63 = vpop.permute.xlu0 %1227  ;;  %v12594_v48 = vld [vmem:[#allocation60_spill] sm:$0xff] }
 0x37f   : > { %1848 = vmatmul.f32.gmra.mxu0 %v1476_v55  ;;  %v1302_v59 = vsel %vm463_vm7, %v8077_v63, %v12590_v32 }
 0x380   : > { %2043 = vmatmul.f32.gmra.mxu3 %v1476_v55  ;;  %2157 = vmatpush.msrb.mxu1 %v1446_v17  ;;  %v1438_v46 = vmul.f32 %v1302_v59, %v12577_v33 }
 0x381   : > { %2457 = vrot.lane.b32.xlu0 %v12591_v11, %s6505_s16 }
 0x382   : > { %v8086_v52 = vpop.permute.xlu1 %1089  ;;  %2158 = vmatpush.msrb.mxu1 %v1442_v58  ;;  %v8088_v3 = vpop.permute.xlu2 %1197  ;;  %v1296_v58 = vsel %vm463_vm7, %v8063_v43, %v7795_v47 }
 0x383   : > { %1913 = vmatmul.f32.gmra.mxu1 %v1476_v55  ;;  %v1430_v44 = vmul.f32 %v1296_v58, %v12577_v33 }
 0x384   : > { %1978 = vmatmul.f32.gmra.mxu2 %v1476_v55  ;;  %2159 = vmatpush.msrb.mxu1 %v1438_v46  ;;  %v12596_v55 = vld [vmem:[#allocation94_spill] sm:$0xff] }
 0x385   : > { %2375 = vrot.lane.b32.xlu2 %v12592_v8, %s6505_s16  ;;  %2489 = vrot.lane.b32.xlu1 %v12593_v51, %s6505_s16  ;;  %v12634_v51 = vld [vmem:[#allocation28_spill] sm:$0xff] }
 0x386   : > { %v8094_v30 = vpop.permute.xlu0 %1189 }
 0x387   : > { %1851 = vmatmul.f32.gmra.mxu0 %v1477_v20 }
 0x388   : > { %2046 = vmatmul.f32.gmra.mxu3 %v1477_v20 }
 0x389   : > { %2449 = vrot.lane.b32.xlu0 %v12594_v48, %s6505_s16  ;;  %v1478_v48 = vld [vmem:[#allocation2 + $0xa0] sm:$0xff] }
 0x38a   : > { %v8098_v12 = vpop.permute.xlu1 %1221  ;;  %v8100_v17 = vpop.permute.xlu2 %2391 }
 0x38b   : > { %12595 = vst [vmem:[#allocation32_spill] sm:$0xff] %v8100_v17  ;;  %v1299_v59 = vsel %vm463_vm7, %v8098_v12, %v12596_v55  ;;  %1916 = vmatmul.f32.gmra.mxu1 %v1477_v20 }
 0x38c   : > { %1981 = vmatmul.f32.gmra.mxu2 %v1477_v20  ;;  %v1434_v46 = vmul.f32 %v1299_v59, %v12577_v33 }
 0x38d   : > { %2483 = vrot.lane.b32.xlu2 %v12597_v39, %s6505_s16  ;;  %2451 = vrot.lane.b32.xlu1 %v12598_v13, %s6505_s16  ;;  %v12623_v39 = vld [vmem:[#allocation45_spill] sm:$0xff] }
 0x38e   : > { %2160 = vmatpush.msrb.mxu1 %v1434_v46  ;;  %v8113_v18 = vpop.permute.xlu0 %1209  ;;  %v1287_v46 = vsel %vm463_vm7, %v8088_v3, %v8020_v23 }
 0x38f   : > { %1854 = vmatmul.f32.gmra.mxu0 %v1478_v48  ;;  %v1293_v20 = vsel %vm463_vm7, %v8113_v18, %v7876_v19 }
 0x390   : > { %2049 = vmatmul.f32.gmra.mxu3 %v1478_v48  ;;  %2161 = vmatpush.msrb.mxu1 %v1430_v44  ;;  %v1426_v59 = vmul.f32 %v1293_v20, %v12577_v33  ;;  %v12601_v20 = vld [vmem:[#allocation59_spill] sm:$0xff] }
 0x391   : > { %2373 = vrot.lane.b32.xlu0 %v12599_v40, %s6505_s16  ;;  %v1479_v40 = vld [vmem:[#allocation2 + $0xa8] sm:$0xff] }
 0x392   : > { %v8122_v8 = vpop.permute.xlu1 %1203  ;;  %v8124_v13 = vpop.permute.xlu2 %2389  ;;  %2162 = vmatpush.msrb.mxu1 %v1426_v59  ;;  %v1418_v59 = vmul.f32 %v1287_v46, %v12577_v33 }
 0x393   : > { %12600 = vst [vmem:[#allocation137_spill] sm:$0xff] %v8124_v13  ;;  %v1290_v58 = vsel %vm463_vm7, %v8122_v8, %v7825_v56  ;;  %1919 = vmatmul.f32.gmra.mxu1 %v1478_v48 }
 0x394   : > { %1984 = vmatmul.f32.gmra.mxu2 %v1478_v48  ;;  %v1422_v44 = vmul.f32 %v1290_v58, %v12577_v33 }
 0x395   : > { %2445 = vrot.lane.b32.xlu2 %v12601_v20, %s6505_s16  ;;  %2443 = vrot.lane.b32.xlu1 %v12602_v24, %s6505_s16  ;;  %v12603_v20 = vld [vmem:[#allocation87_spill] sm:$0xff] }
 0x396   : > { %2163 = vmatpush.msrb.mxu1 %v1422_v44  ;;  %v8137_v11 = vpop.permute.xlu0 %1191 }
 0x397   : > { %1857 = vmatmul.f32.gmra.mxu0 %v1479_v40  ;;  %v1284_v48 = vsel %vm463_vm7, %v8137_v11, %v8060_v22 }
 0x398   : > { %2052 = vmatmul.f32.gmra.mxu3 %v1479_v40  ;;  %2164 = vmatpush.msrb.mxu1 %v1418_v59  ;;  %v1414_v58 = vmul.f32 %v1284_v48, %v12577_v33  ;;  %v12605_v59 = vld [vmem:[#allocation53_spill] sm:$0xff]  ;;  %v1480_v48 = vld [vmem:[#allocation2 + $0xb0] sm:$0xff] }
 0x399   : > { %2477 = vrot.lane.b32.xlu0 %v12603_v20, %s6505_s16  ;;  %v12619_v20 = vld [vmem:[#allocation46_spill] sm:$0xff] }
 0x39a   : > { %v8146_v49 = vpop.permute.xlu1 %1185  ;;  %v8148_v24 = vpop.permute.xlu2 %2387  ;;  %2165 = vmatpush.msrb.mxu1 %v1414_v58 }
 0x39b   : > { %12604 = vst [vmem:[#allocation125_spill] sm:$0xff] %v8148_v24  ;;  %v1281_v46 = vsel %vm463_vm7, %v8146_v49, %v8035_v25  ;;  %1922 = vmatmul.f32.gmra.mxu1 %v1479_v40 }
 0x39c   : > { %1987 = vmatmul.f32.gmra.mxu2 %v1479_v40  ;;  %v1410_v44 = vmul.f32 %v1281_v46, %v12577_v33  ;;  %v12611_v33 = vld [vmem:[#allocation50_spill] sm:$0xff]  ;;  %v1481_v46 = vld [vmem:[#allocation2 + $0xb8] sm:$0xff] }
 0x39d   : > { %2437 = vrot.lane.b32.xlu2 %v12605_v59, %s6505_s16  ;;  %2371 = vrot.lane.b32.xlu1 %v12606_v61, %s6505_s16  ;;  %v12612_v59 = vld [vmem:[#allocation79_spill] sm:$0xff]  ;;  %v12613_v61 = vld [vmem:[#allocation48_spill] sm:$0xff] }
 0x39e   : > { %2166 = vmatpush.msrb.mxu1 %v1410_v44  ;;  %v8158_v10 = vpop.permute.xlu0 %2503 }
 0x39f   : > { %12607 = vst [vmem:[#allocation22_spill] sm:$0xff] %v8158_v10  ;;  %1860 = vmatmul.f32.gmra.mxu0 %v1480_v48 }
 0x3a0   : > { %2055 = vmatmul.f32.gmra.mxu3 %v1480_v48 }
 0x3a1   : > { %2439 = vrot.lane.b32.xlu0 %v12608_v54, %s6505_s16 }
 0x3a2   : > { %v8162_v58 = vpop.permute.xlu1 %2499  ;;  %v8164_v40 = vpop.permute.xlu2 %2385 }
 0x3a3   : > { %12609 = vst [vmem:[#allocation31_spill] sm:$0xff] %v8162_v58  ;;  %1925 = vmatmul.f32.gmra.mxu1 %v1480_v48 }
 0x3a4   : > { %12610 = vst [vmem:[#allocation127_spill] sm:$0xff] %v8164_v40  ;;  %1990 = vmatmul.f32.gmra.mxu2 %v1480_v48  ;;  %v12616_v48 = vld [vmem:[#allocation71_spill] sm:$0xff]  ;;  %v12625_v40 = vld [vmem:[#allocation65_spill] sm:$0xff] }
 0x3a5   : > { %2369 = vrot.lane.b32.xlu2 %v12611_v33, %s6505_s16  ;;  %2471 = vrot.lane.b32.xlu1 %v12612_v59, %s6505_s16  ;;  %v1482_v33 = vld [vmem:[#allocation2 + $0xc0] sm:$0xff] }
 0x3a6   : > { %v8170_v44 = vpop.permute.xlu0 %2497 }
 0x3a7   : > { %1863 = vmatmul.f32.gmra.mxu0 %v1481_v46 }
 0x3a8   : > { %2058 = vmatmul.f32.gmra.mxu3 %v1481_v46 }
 0x3a9   : > { %2431 = vrot.lane.b32.xlu0 %v12613_v61, %s6505_s16 }
 0x3aa   : > { %v8174_v54 = vpop.permute.xlu1 %2493  ;;  %v8176_v28 = vpop.permute.xlu2 %2383 }
 0x3ab   : > { %12614 = vst [vmem:[#allocation132_spill] sm:$0xff] %v8174_v54  ;;  %1928 = vmatmul.f32.gmra.mxu1 %v1481_v46  ;;  %v12636_v54 = vld [vmem:[#allocation62_spill] sm:$0xff] }
 0x3ac   : > { %12615 = vst [vmem:[#allocation120_spill] sm:$0xff] %v8176_v28  ;;  %1993 = vmatmul.f32.gmra.mxu2 %v1481_v46  ;;  %v12622_v46 = vld [vmem:[#allocation47_spill] sm:$0xff] }
 0x3ad   : > { %2465 = vrot.lane.b32.xlu2 %v12616_v48, %s6505_s16  ;;  %2433 = vrot.lane.b32.xlu1 %v12617_v34, %s6505_s16  ;;  %v1483_v48 = vld [vmem:[#allocation2 + $0xc8] sm:$0xff] }
 0x3ae   : > { %v8182_v59 = vpop.permute.xlu0 %2491 }
 0x3af   : > { %12618 = vst [vmem:[#allocation133_spill] sm:$0xff] %v8182_v59  ;;  %1866 = vmatmul.f32.gmra.mxu0 %v1482_v33 }
 0x3b0   : > { %2061 = vmatmul.f32.gmra.mxu3 %v1482_v33 }
 0x3b1   : > { %2367 = vrot.lane.b32.xlu0 %v12619_v20, %s6505_s16 }
 0x3b2   : > { %v8186_v61 = vpop.permute.xlu1 %2487 }
 0x3b3   : > { %12620 = vst [vmem:[#allocation100_spill] sm:$0xff] %v8186_v61  ;;  %1931 = vmatmul.f32.gmra.mxu1 %v1482_v33  ;;  %v8188_v28 = vpop.permute.xlu2 %2381  ;;  %v12628_v61 = vld [vmem:[#allocation43_spill] sm:$0xff] }
 0x3b4   : > { %1996 = vmatmul.f32.gmra.mxu2 %v1482_v33  ;;  %12621 = vst [vmem:[#allocation106_spill] sm:$0xff] %v8188_v28  ;;  %v12627_v33 = vld [vmem:[#allocation41_spill] sm:$0xff]  ;;  %v1484_v28 = vld [vmem:[#allocation2 + $0xd0] sm:$0xff] }
 0x3b5   : > { %2427 = vrot.lane.b32.xlu2 %v12622_v46, %s6505_s16  ;;  %2425 = vrot.lane.b32.xlu1 %v12623_v39, %s6505_s16 }
 0x3b6   : > { %v8194_v34 = vpop.permute.xlu0 %2485 }
 0x3b7   : > { %12624 = vst [vmem:[#allocation113_spill] sm:$0xff] %v8194_v34  ;;  %1869 = vmatmul.f32.gmra.mxu0 %v1483_v48  ;;  %v12629_v34 = vld [vmem:[#allocation16_spill] sm:$0xff] }
 0x3b8   : > { %2064 = vmatmul.f32.gmra.mxu3 %v1483_v48 }
 0x3b9   : > { %2459 = vrot.lane.b32.xlu0 %v12625_v40, %s6505_s16 }
 0x3ba   : > { %v8198_v20 = vpop.permute.xlu1 %2481 }
 0x3bb   : > { %12626 = vst [vmem:[#allocation101_spill] sm:$0xff] %v8198_v20  ;;  %1934 = vmatmul.f32.gmra.mxu1 %v1483_v48  ;;  %v12632_v20 = vld [vmem:[#allocation157_spill] sm:$0xff] }
 0x3bc   : > { %1999 = vmatmul.f32.gmra.mxu2 %v1483_v48  ;;  %v12631_v48 = vld [vmem:[#allocation42_spill] sm:$0xff]  ;;  %v1407_v13 = vsel %vm463_vm7, %v12632_v20, %v12575_v36 }
 0x3bd   : > { %2419 = vrot.lane.b32.xlu2 %v12627_v33, %s6505_s16  ;;  %v8202_v46 = vpop.permute.xlu2 %2501  ;;  %2365 = vrot.lane.b32.xlu1 %v12628_v61, %s6505_s16  ;;  %v1465_v36 = vmul.f32 %v1407_v13, %v12634_v51 }
 0x3be   : > { %v2552_v39 = vsel %vm515_vm5, %v8202_v46, %v8158_v10  ;;  %v8210_v40 = vpop.permute.xlu0 %2479 }
 0x3bf   : > { %v2696_v24 = vmul.f32 %v2552_v39, %v12629_v34  ;;  %12630 = vst [vmem:[#allocation115_spill] sm:$0xff] %v8210_v40  ;;  %1872 = vmatmul.f32.gmra.mxu0 %v1484_v28  ;;  %v12633_v39 = vld [vmem:[#allocation38_spill] sm:$0xff]  ;;  %v1485_v40 = vld [vmem:[#allocation2 + $0xd8] sm:$0xff]  ;;  %v12639_v34 = vld [vmem:[#allocation33_spill] sm:$0xff] }
 0x3c0   : > { %2067 = vmatmul.f32.gmra.mxu3 %v1484_v28 }
 0x3c1   : > { %2764 = vmatpush.msra.mxu1 %v2696_v24  ;;  %2421 = vrot.lane.b32.xlu0 %v12631_v48, %s6505_s16  ;;  %v12635_v24 = vld [vmem:[#allocation153_spill] sm:$0xff] }
 0x3c2   : > { %v1120_v33 = vpop.permute.xlu1 %1119  ;;  %v1406_v48 = vsel %vm463_vm7, %v12635_v24, %v12579_v45 }
 0x3c3   : > { %1937 = vmatmul.f32.gmra.mxu1 %v1484_v28  ;;  %v1408_v61 = vsel %vm463_vm7, %v1120_v33, %v12573_v60 }
 0x3c4   : > { %2002 = vmatmul.f32.gmra.mxu2 %v1484_v28  ;;  %v1469_v59 = vmul.f32 %v1408_v61, %v12634_v51 }
 0x3c5   : > { %2363 = vrot.lane.b32.xlu2 %v12633_v39, %s6505_s16  ;;  %2453 = vrot.lane.b32.xlu1 %v12636_v54, %s6505_s16  ;;  %v12638_v39 = vld [vmem:[#allocation149_spill] sm:$0xff]  ;;  %v12640_v54 = vld [vmem:[#allocation34_spill] sm:$0xff] }
 0x3c6   : > { %v8227_v10 = vpop.permute.xlu2 %2463  ;;  %2086 = vmatpush.msrb.mxu0 %v1469_v59  ;;  %v1405_v45 = vsel %vm463_vm7, %v12638_v39, %v12582_v4  ;;  %v1461_v59 = vmul.f32 %v1406_v48, %v12634_v51  ;;  %v12643_v4 = vld [vmem:[#allocation152_spill] sm:$0xff] }
 0x3c7   : > { %12637 = vst [vmem:[#allocation103_spill] sm:$0xff] %v8227_v10  ;;  %v1280_v28 = vpop.permute.xlu0 %1279  ;;  %1875 = vmatmul.f32.gmra.mxu0 %v1485_v40  ;;  %v12641_v10 = vld [vmem:[#allocation156_spill] sm:$0xff] }
 0x3c8   : > { %2070 = vmatmul.f32.gmra.mxu3 %v1485_v40  ;;  %v1327_v60 = vsel %vm463_vm7, %v7677_v42, %v1280_v28  ;;  %v1328_v61 = vsel %vm463_vm7, %v1280_v28, %v1120_v33  ;;  %2087 = vmatpush.msrb.mxu0 %v1465_v36  ;;  %v1324_v13 = vsel %vm463_vm7, %v12574_v29, %v12641_v10  ;;  %v12642_v33 = vld [vmem:[#allocation35_spill] sm:$0xff]  ;;  %v12644_v36 = vld [vmem:[#allocation145_spill] sm:$0xff] }
 0x3c9   : > { %v1471_v58 = vmul.f32 %v1327_v60, %v12639_v34  ;;  %v1472_v17 = vmul.f32 %v1328_v61, %v12640_v54  ;;  %v1325_v42 = vsel %vm463_vm7, %v12641_v10, %v12632_v20  ;;  %2413 = vrot.lane.b32.xlu0 %v12642_v33, %s6505_s16  ;;  %v1321_v28 = vsel %vm463_vm7, %v12578_v50, %v12643_v4  ;;  %v12645_v20 = vld [vmem:[#allocation56_spill] sm:$0xff]  ;;  %v12648_v33 = vld [vmem:[#allocation39_spill] sm:$0xff] }
 0x3ca   : > { %2088 = vmatpush.msrb.mxu0 %v1461_v59  ;;  %v1404_v48 = vsel %vm463_vm7, %v12644_v36, %v12585_v21  ;;  %v1457_v60 = vmul.f32 %v1405_v45, %v12634_v51  ;;  %v1322_v10 = vsel %vm463_vm7, %v12643_v4, %v12635_v24  ;;  %v1467_v50 = vmul.f32 %v1324_v13, %v12639_v34  ;;  %v12646_v21 = vld [vmem:[#allocation150_spill] sm:$0xff]  ;;  %v12647_v59 = vld [vmem:[#allocation141_spill] sm:$0xff] }
 0x3cb   : > { %2216 = vmatpush.msrb.mxu2 %v1471_v58  ;;  %1940 = vmatmul.f32.gmra.mxu1 %v1485_v40  ;;  %v1486_v58 = vld [vmem:[#allocation2 + $0xe0] sm:$0xff]  ;;  %v1468_v61 = vmul.f32 %v1325_v42, %v12640_v54  ;;  %v1403_v45 = vsel %vm463_vm7, %v12647_v59, %v7912_v37  ;;  %v1463_v13 = vmul.f32 %v1321_v28, %v12639_v34 }
 0x3cc   : > { %2005 = vmatmul.f32.gmra.mxu2 %v1485_v40  ;;  %v8253_v29 = vpop.permute.xlu1 %2475  ;;  %2281 = vmatpush.msrb.mxu3 %v1472_v17  ;;  %v1318_v40 = vsel %vm463_vm7, %v12581_v35, %v12646_v21  ;;  %v1453_v17 = vmul.f32 %v1404_v48, %v12634_v51  ;;  %v1319_v35 = vsel %vm463_vm7, %v12646_v21, %v12638_v39  ;;  %v12649_v42 = vld [vmem:[#allocation136_spill] sm:$0xff] }
 0x3cd   : > { %2447 = vrot.lane.b32.xlu2 %v12645_v20, %s6505_s16  ;;  %2415 = vrot.lane.b32.xlu1 %v12648_v33, %s6505_s16  ;;  %v1464_v37 = vmul.f32 %v1322_v10, %v12640_v54  ;;  %v1402_v4 = vsel %vm463_vm7, %v12649_v42, %v7993_v5  ;;  %v1449_v48 = vmul.f32 %v1403_v45, %v12634_v51  ;;  %v12652_v21 = vld [vmem:[#allocation140_spill] sm:$0xff]  ;;  %v12653_v45 = vld [vmem:[#allocation117_spill] sm:$0xff] }
 0x3ce   : > { %2089 = vmatpush.msrb.mxu0 %v1457_v60  ;;  %2217 = vmatpush.msrb.mxu2 %v1467_v50  ;;  %v1459_v28 = vmul.f32 %v1318_v40, %v12639_v34  ;;  %v12650_v50 = vld [vmem:[#allocation144_spill] sm:$0xff]  ;;  %v1460_v5 = vmul.f32 %v1319_v35, %v12640_v54  ;;  %v1312_v40 = vsel %vm463_vm7, %v12586_v27, %v12652_v21  ;;  %v1487_v35 = vld [vmem:[#allocation2 + $0xe8] sm:$0xff] }
 0x3cf   : > { %v8271_v24 = vpop.permute.xlu2 %2455  ;;  %2282 = vmatpush.msrb.mxu3 %v1468_v61  ;;  %1878 = vmatmul.f32.gmra.mxu0 %v1486_v58  ;;  %v1315_v39 = vsel %vm463_vm7, %v12584_v26, %v12650_v50  ;;  %v1316_v10 = vsel %vm463_vm7, %v12650_v50, %v12644_v36  ;;  %v12651_v61 = vld [vmem:[#allocation52_spill] sm:$0xff]  ;;  %v1401_v26 = vsel %vm463_vm7, %v12653_v45, %v7944_v38 }
 0x3d0   : > { %2073 = vmatmul.f32.gmra.mxu3 %v1486_v58  ;;  %2090 = vmatpush.msrb.mxu0 %v1453_v17  ;;  %v8282_v60 = vpop.permute.xlu0 %2473  ;;  %v1445_v36 = vmul.f32 %v1402_v4, %v12634_v51  ;;  %v1313_v17 = vsel %vm463_vm7, %v12652_v21, %v12647_v59  ;;  %v1456_v27 = vmul.f32 %v1316_v10, %v12640_v54 }
 0x3d1   : > { %2218 = vmatpush.msrb.mxu2 %v1463_v13  ;;  %2441 = vrot.lane.b32.xlu0 %v12651_v61, %s6505_s16  ;;  %v12654_v13 = vld [vmem:[#allocation44_spill] sm:$0xff]  ;;  %v1451_v10 = vmul.f32 %v1312_v40, %v12639_v34 }
 0x3d2   : > { %2283 = vmatpush.msrb.mxu3 %v1464_v37  ;;  %2091 = vmatpush.msrb.mxu0 %v1449_v48  ;;  %v1455_v37 = vmul.f32 %v1315_v39, %v12639_v34  ;;  %v12655_v48 = vld [vmem:[#allocation138_spill] sm:$0xff]  ;;  %v1441_v39 = vmul.f32 %v1401_v26, %v12634_v51 }
 0x3d3   : > { %2219 = vmatpush.msrb.mxu2 %v1459_v28  ;;  %1943 = vmatmul.f32.gmra.mxu1 %v1486_v58  ;;  %v1309_v38 = vsel %vm463_vm7, %v12588_v41, %v12655_v48  ;;  %v12657_v28 = vld [vmem:[#allocation49_spill] sm:$0xff]  ;;  %v1310_v41 = vsel %vm463_vm7, %v12655_v48, %v12649_v42 }
 0x3d4   : > { %2008 = vmatmul.f32.gmra.mxu2 %v1486_v58  ;;  %2284 = vmatpush.msrb.mxu3 %v1460_v5  ;;  %v12656_v58 = vld [vmem:[#allocation119_spill] sm:$0xff]  ;;  %v1447_v26 = vmul.f32 %v1309_v38, %v12639_v34  ;;  %v1448_v38 = vmul.f32 %v1310_v41, %v12640_v54 }
 0x3d5   : > { %2429 = vrot.lane.b32.xlu2 %v12654_v13, %s6505_s16  ;;  %v1400_v4 = vsel %vm463_vm7, %v12656_v58, %v8077_v63  ;;  %2435 = vrot.lane.b32.xlu1 %v12657_v28, %s6505_s16  ;;  %v8317_v59 = vpop.permute.xlu1 %2469  ;;  %v1452_v63 = vmul.f32 %v1313_v17, %v12640_v54  ;;  %v12658_v5 = vld [vmem:[#allocation107_spill] sm:$0xff]  ;;  %v12660_v17 = vld [vmem:[#allocation40_spill] sm:$0xff] }
 0x3d6   : > { %2092 = vmatpush.msrb.mxu0 %v1445_v36  ;;  %2220 = vmatpush.msrb.mxu2 %v1455_v37  ;;  %v1399_v21 = vsel %vm463_vm7, %v12658_v5, %v8098_v12  ;;  %v1437_v36 = vmul.f32 %v1400_v4, %v12634_v51  ;;  %v12659_v37 = vld [vmem:[#allocation128_spill] sm:$0xff]  ;;  %v12661_v12 = vld [vmem:[#allocation111_spill] sm:$0xff]  ;;  %v12662_v4 = vld [vmem:[#allocation109_spill] sm:$0xff] }
 0x3d7   : > { %v8319_v50 = vpop.permute.xlu2 %2393  ;;  %2285 = vmatpush.msrb.mxu3 %v1456_v27  ;;  %1881 = vmatmul.f32.gmra.mxu0 %v1487_v35  ;;  %v1306_v40 = vsel %vm463_vm7, %v12589_v9, %v12659_v37  ;;  %v1307_v42 = vsel %vm463_vm7, %v12659_v37, %v12653_v45  ;;  %v1300_v48 = vsel %vm463_vm7, %v12596_v55, %v12661_v12  ;;  %v12663_v45 = vld [vmem:[#allocation155_spill] sm:$0xff] }
 0x3d8   : > { %2076 = vmatmul.f32.gmra.mxu3 %v1487_v35  ;;  %2093 = vmatpush.msrb.mxu0 %v1441_v39  ;;  %v1303_v9 = vsel %vm463_vm7, %v12590_v32, %v12662_v4  ;;  %v1398_v39 = vsel %vm463_vm7, %v12663_v45, %v8063_v43  ;;  %v1304_v55 = vsel %vm463_vm7, %v12662_v4, %v12656_v58 }
 0x3d9   : > { %2221 = vmatpush.msrb.mxu2 %v1451_v10  ;;  %2423 = vrot.lane.b32.xlu0 %v12660_v17, %s6505_s16  ;;  %v1433_v10 = vmul.f32 %v1399_v21, %v12634_v51  ;;  %v1443_v41 = vmul.f32 %v1306_v40, %v12639_v34  ;;  %v1444_v32 = vmul.f32 %v1307_v42, %v12640_v54 }
 0x3da   : > { %2286 = vmatpush.msrb.mxu3 %v1452_v63  ;;  %v8340_v27 = vpop.permute.xlu0 %2467  ;;  %2094 = vmatpush.msrb.mxu0 %v1437_v36  ;;  %v12664_v63 = vld [vmem:[#allocation36_spill] sm:$0xff]  ;;  %v1488_v36 = vld [vmem:[#allocation2 + $0xf0] sm:$0xff]  ;;  %v1397_v43 = vsel %vm463_vm7, %v7851_v15, %v8113_v18  ;;  %v1301_v58 = vsel %vm463_vm7, %v12661_v12, %v12658_v5  ;;  %v1429_v37 = vmul.f32 %v1398_v39, %v12634_v51 }
 0x3db   : > { %2222 = vmatpush.msrb.mxu2 %v1447_v26  ;;  %1946 = vmatmul.f32.gmra.mxu1 %v1487_v35  ;;  %v1439_v40 = vmul.f32 %v1303_v9, %v12639_v34  ;;  %v1396_v18 = vsel %vm463_vm7, %v7935_v14, %v8122_v8  ;;  %v1440_v42 = vmul.f32 %v1304_v55, %v12640_v54  ;;  %v12666_v9 = vld [vmem:[#allocation130_spill] sm:$0xff] }
 0x3dc   : > { %2011 = vmatmul.f32.gmra.mxu2 %v1487_v35  ;;  %2287 = vmatpush.msrb.mxu3 %v1448_v38  ;;  %v12665_v35 = vld [vmem:[#allocation37_spill] sm:$0xff]  ;;  %v1435_v5 = vmul.f32 %v1300_v48, %v12639_v34  ;;  %v1297_v12 = vsel %vm463_vm7, %v7795_v47, %v7816_v2  ;;  %v1298_v38 = vsel %vm463_vm7, %v7816_v2, %v12663_v45 }
 0x3dd   : > { %2411 = vrot.lane.b32.xlu2 %v12664_v63, %s6505_s16  ;;  %2417 = vrot.lane.b32.xlu1 %v12665_v35, %s6505_s16  ;;  %v1425_v4 = vmul.f32 %v1397_v43, %v12634_v51  ;;  %v1294_v8 = vsel %vm463_vm7, %v7876_v19, %v12666_v9  ;;  %v1436_v48 = vmul.f32 %v1301_v58, %v12640_v54  ;;  %v1489_v43 = vld [vmem:[#allocation2 + $0xf8] sm:$0xff]  ;;  %v1065_v35 = vld [vmem:[#allocation2 + $0x40] sm:$0xff] }
 0x3de   : > { %2095 = vmatpush.msrb.mxu0 %v1433_v10  ;;  %2223 = vmatpush.msrb.mxu2 %v1443_v41  ;;  %v1395_v47 = vsel %vm463_vm7, %v7884_v62, %v8088_v3  ;;  %v1421_v2 = vmul.f32 %v1396_v18, %v12634_v51  ;;  %v1295_v45 = vsel %vm463_vm7, %v12666_v9, %v7851_v15 }
 0x3df   : > { %2288 = vmatpush.msrb.mxu3 %v1444_v32  ;;  %v8368_v21 = vpop.permute.xlu2 %2375  ;;  %v8370_v26 = vpop.permute.xlu1 %2461  ;;  %1884 = vmatmul.f32.gmra.mxu0 %v1488_v36  ;;  %v1431_v19 = vmul.f32 %v1297_v12, %v12639_v34  ;;  %v1432_v39 = vmul.f32 %v1298_v38, %v12640_v54  ;;  %v1394_v3 = vsel %vm463_vm7, %v8049_v53, %v8137_v11 }
 0x3e0   : > { %2079 = vmatmul.f32.gmra.mxu3 %v1488_v36  ;;  %2096 = vmatpush.msrb.mxu0 %v1429_v37  ;;  %v1427_v55 = vmul.f32 %v1294_v8, %v12639_v34  ;;  %v1291_v15 = vsel %vm463_vm7, %v7825_v56, %v7972_v7  ;;  %v1292_v41 = vsel %vm463_vm7, %v7972_v7, %v7935_v14  ;;  %v1057_v8 = vld [vmem:[#allocation2] sm:$0xff] }
 0x3e1   : > { %2224 = vmatpush.msrb.mxu2 %v1439_v40  ;;  %2289 = vmatpush.msrb.mxu3 %v1440_v42  ;;  %v1417_v32 = vmul.f32 %v1395_v47, %v12634_v51  ;;  %v1393_v11 = vsel %vm463_vm7, %v8086_v52, %v8146_v49  ;;  %v1428_v56 = vmul.f32 %v1295_v45, %v12640_v54 }
 0x3e2   : > { %3501 = vrot.lane.b32.xlu0 %v12559_v1, %s6502_s28  ;;  %2097 = vmatpush.msrb.mxu0 %v1425_v4  ;;  %v1288_v14 = vsel %vm463_vm7, %v8020_v23, %v8032_v31  ;;  %v1289_v7 = vsel %vm463_vm7, %v8032_v31, %v7884_v62  ;;  %v1413_v58 = vmul.f32 %v1394_v3, %v12634_v51  ;;  %v12669_v4 = vld [vmem:[#allocation32_spill] sm:$0xff] }
 0x3e3   : > { %2225 = vmatpush.msrb.mxu2 %v1435_v5  ;;  %2290 = vmatpush.msrb.mxu3 %v1436_v48  ;;  %v8401_v10 = vpop.permute.xlu0 %2379  ;;  %v1285_v37 = vsel %vm463_vm7, %v8060_v22, %v7997_v16  ;;  %v1423_v40 = vmul.f32 %v1291_v15, %v12639_v34  ;;  %v1424_v23 = vmul.f32 %v1292_v41, %v12640_v54  ;;  %v12673_v41 = vld [vmem:[#allocation131_spill] sm:$0xff] }
 0x3e4   : > { %1949 = vmatmul.f32.gmra.mxu1 %v1488_v36  ;;  %2014 = vmatmul.f32.gmra.mxu2 %v1488_v36  ;;  %v2634_v62 = vsel %vm515_vm5, %v8319_v50, %v8202_v46  ;;  %v1409_v31 = vmul.f32 %v1393_v11, %v12634_v51  ;;  %v1286_v18 = vsel %vm463_vm7, %v7997_v16, %v8049_v53  ;;  %v12667_v51 = vld [vmem:[#allocation19_spill] sm:$0xff] }
 0x3e5   : > { %2098 = vmatpush.msrb.mxu0 %v1421_v2  ;;  %2226 = vmatpush.msrb.mxu2 %v1431_v19  ;;  %v1419_v22 = vmul.f32 %v1288_v14, %v12639_v34  ;;  %v1420_v42 = vmul.f32 %v1289_v7, %v12640_v54  ;;  %v1282_v5 = vsel %vm463_vm7, %v8035_v25, %v8094_v30  ;;  %v12670_v2 = vld [vmem:[#allocation31_spill] sm:$0xff]  ;;  %v12671_v19 = vld [vmem:[#allocation129_spill] sm:$0xff]  ;;  %v12677_v7 = vld [vmem:[#allocation30_spill] sm:$0xff] }
 0x3e6   : > { %2291 = vmatpush.msrb.mxu3 %v1432_v39  ;;  %3507 = vrot.lane.b32.xlu2 %v7546_v0, %s6502_s28  ;;  %v1283_v46 = vsel %vm463_vm7, %v8094_v30, %v8086_v52  ;;  %v1415_v16 = vmul.f32 %v1285_v37, %v12639_v34  ;;  %v2695_v12 = vmul.f32 %v2634_v62, %v12667_v51  ;;  %v12679_v37 = vld [vmem:[#allocation132_spill] sm:$0xff]  ;;  %v12681_v62 = vld [vmem:[#allocation105_spill] sm:$0xff] }
 0x3e7   : > { %3505 = vrot.lane.b32.xlu1 %v7553_v6, %s6502_s28  ;;  %v8422_v36 = vpop.permute.xlu2 %2483  ;;  %2099 = vmatpush.msrb.mxu0 %v1417_v32  ;;  %v8430_v49 = vpop.permute.xlu1 %2377  ;;  %v1416_v52 = vmul.f32 %v1286_v18, %v12640_v54  ;;  %v1411_v30 = vmul.f32 %v1282_v5, %v12639_v34  ;;  %v2551_v45 = vsel %vm515_vm5, %v12670_v2, %v12669_v4  ;;  %v12674_v32 = vld [vmem:[#allocation22_spill] sm:$0xff]  ;;  %v12683_v5 = vld [vmem:[#allocation125_spill] sm:$0xff] }
 0x3e8   : > { %2227 = vmatpush.msrb.mxu2 %v1427_v55  ;;  %2292 = vmatpush.msrb.mxu3 %v1428_v56  ;;  %v1412_v39 = vmul.f32 %v1283_v46, %v12640_v54  ;;  %v12672_v55 = vld [vmem:[#allocation16_spill] sm:$0xff]  ;;  %v2550_v34 = vsel %vm515_vm5, %v8170_v44, %v12670_v2  ;;  %v12676_v54 = vld [vmem:[#allocation29_spill] sm:$0xff]  ;;  %v2694_v18 = vmul.f32 %v2551_v45, %v12677_v7 }
 0x3e9   : > { %1887 = vmatmul.f32.gmra.mxu0 %v1489_v43  ;;  %2082 = vmatmul.f32.gmra.mxu3 %v1489_v43  ;;  %v12684_v46 = vld [vmem:[#allocation100_spill] sm:$0xff] }
 0x3ea   : > { %2100 = vmatpush.msrb.mxu0 %v1413_v58  ;;  %2228 = vmatpush.msrb.mxu2 %v1423_v40  ;;  %v12680_v40 = vld [vmem:[#allocation133_spill] sm:$0xff] }
 0x3eb   : > { %2293 = vmatpush.msrb.mxu3 %v1424_v23  ;;  %3493 = vrot.lane.b32.xlu0 %v12587_v57, %s6502_s28  ;;  %v2496_v53 = vpop.permute.xlu0 %2495  ;;  %v2547_v23 = vsel %vm515_vm5, %v12680_v40, %v12679_v37 }
 0x3ec   : > { %2101 = vmatpush.msrb.mxu0 %v1409_v31  ;;  %2229 = vmatpush.msrb.mxu2 %v1419_v22  ;;  %v8457_v38 = vpop.f32.mrf.mxu0  ;;  %v2549_v25 = vsel %vm515_vm5, %v2496_v53, %v8170_v44  ;;  %v2633_v9 = vsel %vm515_vm5, %v12669_v4, %v2496_v53  ;;  %v2693_v31 = vmul.f32 %v2550_v34, %v12676_v54  ;;  %v12682_v22 = vld [vmem:[#allocation137_spill] sm:$0xff] }
 0x3ed   : > { %2294 = vmatpush.msrb.mxu3 %v1420_v42  ;;  %12668 = vst [vmem:[#allocation104_spill] sm:$0xff] %v8457_v38  ;;  %1952 = vmatmul.f32.gmra.mxu1 %v1489_v43  ;;  %v2691_v47 = vmul.f32 %v2633_v9, %v12667_v51  ;;  %v2692_v15 = vmul.f32 %v2549_v25, %v12672_v55  ;;  %v12685_v53 = vld [vmem:[#allocation113_spill] sm:$0xff] }
 0x3ee   : > { %2017 = vmatmul.f32.gmra.mxu2 %v1489_v43  ;;  %2699 = vmatpush.msra.mxu0 %v2695_v12  ;;  %v2548_v42 = vsel %vm515_vm5, %v12679_v37, %v12682_v22  ;;  %v2544_v12 = vsel %vm515_vm5, %v12685_v53, %v12684_v46  ;;  %v1058_v9 = vld [vmem:[#allocation2 + $0x8] sm:$0xff] }
 0x3ef   : > { %2230 = vmatpush.msrb.mxu2 %v1415_v16  ;;  %v8465_v48 = vpop.permute.xlu2 %2445  ;;  %2295 = vmatpush.msrb.mxu3 %v1416_v52  ;;  %v2506_v3 = vpop.permute.xlu1 %2505  ;;  %v2545_v16 = vsel %vm515_vm5, %v12684_v46, %v12683_v5  ;;  %v2690_v45 = vmul.f32 %v2548_v42, %v12677_v7  ;;  %v12695_v42 = vld [vmem:[#allocation93_spill] sm:$0xff] }
 0x3f0   : > { %3499 = vrot.lane.b32.xlu2 %v12671_v19, %s6502_s28  ;;  %3497 = vrot.lane.b32.xlu1 %v12673_v41, %s6502_s28  ;;  %v2553_v43 = vsel %vm515_vm5, %v12674_v32, %v2506_v3  ;;  %v2554_v11 = vsel %vm515_vm5, %v2506_v3, %v8319_v50  ;;  %v8484_v56 = vpop.f32.mrf.mxu1  ;;  %v2686_v3 = vmul.f32 %v2545_v16, %v12677_v7  ;;  %v12691_v32 = vld [vmem:[#allocation121_spill] sm:$0xff] }
 0x3f1   : > { %2231 = vmatpush.msrb.mxu2 %v1411_v30  ;;  %12675 = vst [vmem:[#allocation85_spill] sm:$0xff] %v8484_v56  ;;  %2296 = vmatpush.msrb.mxu3 %v1412_v39  ;;  %v2697_v14 = vmul.f32 %v2553_v43, %v12676_v54  ;;  %v2698_v58 = vmul.f32 %v2554_v11, %v12677_v7 }
 0x3f2   : > { %2102 = vmatmul.f32.vlgmr.msrb.gmra.mxu0 %v1057_v8  ;;  %2297 = vmatmul.f32.vlgmr.msrb.gmra.mxu3 %v1057_v8  ;;  %v2689_v30 = vmul.f32 %v2547_v23, %v12676_v54  ;;  %v2685_v39 = vmul.f32 %v2544_v12, %v12676_v54  ;;  %v12696_v12 = vld [vmem:[#allocation120_spill] sm:$0xff] }
 0x3f3   : > { %2700 = vmatpush.msra.mxu0 %v2691_v47  ;;  %v8488_v44 = vpop.f32.mrf.mxu3  ;;  %2765 = vmatpush.msra.mxu1 %v2692_v15  ;;  %v8495_v50 = vpop.permute.xlu0 %2457  ;;  %v12688_v47 = vld [vmem:[#allocation116_spill] sm:$0xff]  ;;  %v12690_v15 = vld [vmem:[#allocation101_spill] sm:$0xff] }
 0x3f4   : > { %12678 = vst [vmem:[#allocation92_spill] sm:$0xff] %v8488_v44  ;;  %3485 = vrot.lane.b32.xlu0 %v12681_v62, %s6502_s28  ;;  %v8508_v25 = vpop.f32.mrf.mxu0  ;;  %2829 = vmatpush.msra.mxu2 %v2697_v14  ;;  %v12740_v44 = vld [vmem:[#allocation67_spill] sm:$0xff] }
 0x3f5   : > { %12686 = vst [vmem:[#allocation97_spill] sm:$0xff] %v8508_v25  ;;  %2894 = vmatpush.msra.mxu3 %v2698_v58  ;;  %2167 = vmatmul.f32.vlgmr.msrb.gmra.mxu1 %v1057_v8  ;;  %v12693_v58 = vld [vmem:[#allocation115_spill] sm:$0xff] }
 0x3f6   : > { %2232 = vmatmul.f32.vlgmr.msrb.gmra.mxu2 %v1057_v8  ;;  %v12689_v8 = vld [vmem:[#allocation127_spill] sm:$0xff]  ;;  %v2541_v37 = vsel %vm515_vm5, %v12693_v58, %v12690_v15 }
 0x3f7   : > { %v8510_v4 = vpop.f32.mrf.mxu2  ;;  %2830 = vmatpush.msra.mxu2 %v2693_v31  ;;  %2895 = vmatpush.msra.mxu3 %v2694_v18  ;;  %v8512_v52 = vpop.permute.xlu2 %2437  ;;  %v2542_v34 = vsel %vm515_vm5, %v12690_v15, %v12689_v8 }
 0x3f8   : > { %12687 = vst [vmem:[#allocation88_spill] sm:$0xff] %v8510_v4  ;;  %3491 = vrot.lane.b32.xlu2 %v12688_v47, %s6502_s28  ;;  %v2490_v2 = vpop.permute.xlu1 %2489  ;;  %3489 = vrot.lane.b32.xlu1 %v12691_v32, %s6502_s28  ;;  %v8529_v14 = vpop.f32.mrf.mxu1  ;;  %v2682_v46 = vmul.f32 %v2542_v34, %v12677_v7 }
 0x3f9   : > { %v2546_v43 = vsel %vm515_vm5, %v2490_v2, %v12680_v40  ;;  %v2632_v11 = vsel %vm515_vm5, %v12682_v22, %v2490_v2  ;;  %12692 = vst [vmem:[#allocation91_spill] sm:$0xff] %v8529_v14  ;;  %2831 = vmatpush.msra.mxu2 %v2689_v30  ;;  %2896 = vmatpush.msra.mxu3 %v2690_v45  ;;  %v12698_v45 = vld [vmem:[#allocation106_spill] sm:$0xff]  ;;  %v1060_v14 = vld [vmem:[#allocation2 + $0x18] sm:$0xff] }
 0x3fa   : > { %2105 = vmatmul.f32.gmra.mxu0 %v1058_v9  ;;  %v2687_v23 = vmul.f32 %v2632_v11, %v12667_v51  ;;  %v2688_v31 = vmul.f32 %v2546_v43, %v12672_v55  ;;  %v2631_v40 = vsel %vm515_vm5, %v12683_v5, %v8422_v36  ;;  %2300 = vmatmul.f32.gmra.mxu3 %v1058_v9 }
 0x3fb   : > { %v8539_v18 = vpop.f32.mrf.mxu3  ;;  %2832 = vmatpush.msra.mxu2 %v2685_v39  ;;  %v2543_v22 = vsel %vm515_vm5, %v8422_v36, %v12685_v53  ;;  %2897 = vmatpush.msra.mxu3 %v2686_v3  ;;  %v8547_v16 = vpop.permute.xlu0 %2449  ;;  %v2539_v5 = vsel %vm515_vm5, %v8253_v29, %v12696_v12  ;;  %v2538_v30 = vsel %vm515_vm5, %v8282_v60, %v8253_v29 }
 0x3fc   : > { %12694 = vst [vmem:[#allocation83_spill] sm:$0xff] %v8539_v18  ;;  %3477 = vrot.lane.b32.xlu0 %v12695_v42, %s6502_s28  ;;  %v8555_v2 = vpop.f32.mrf.mxu0  ;;  %2701 = vmatpush.msra.mxu0 %v2687_v23  ;;  %v2681_v36 = vmul.f32 %v2541_v37, %v12676_v54  ;;  %v2683_v53 = vmul.f32 %v2631_v40, %v12667_v51  ;;  %v1059_v37 = vld [vmem:[#allocation2 + $0x10] sm:$0xff] }
 0x3fd   : > { %12697 = vst [vmem:[#allocation96_spill] sm:$0xff] %v8555_v2  ;;  %2766 = vmatpush.msra.mxu1 %v2688_v31  ;;  %v2536_v39 = vsel %vm515_vm5, %v8317_v59, %v12698_v45  ;;  %v2535_v3 = vsel %vm515_vm5, %v8340_v27, %v8317_v59  ;;  %2898 = vmatpush.msra.mxu3 %v2682_v46  ;;  %v12701_v31 = vld [vmem:[#allocation103_spill] sm:$0xff] }
 0x3fe   : > { %2170 = vmatmul.f32.gmra.mxu1 %v1058_v9  ;;  %2235 = vmatmul.f32.gmra.mxu2 %v1058_v9  ;;  %v2684_v15 = vmul.f32 %v2543_v22, %v12672_v55  ;;  %v12700_v9 = vld [vmem:[#allocation108_spill] sm:$0xff]  ;;  %v2677_v43 = vmul.f32 %v2538_v30, %v12676_v54  ;;  %v2678_v11 = vmul.f32 %v2539_v5, %v12677_v7  ;;  %v12702_v22 = vld [vmem:[#allocation110_spill] sm:$0xff] }
 0x3ff   : > { %2833 = vmatpush.msra.mxu2 %v2681_v36  ;;  %v8565_v29 = vpop.f32.mrf.mxu2  ;;  %v8568_v34 = vpop.permute.xlu2 %2369  ;;  %2702 = vmatpush.msra.mxu0 %v2683_v53  ;;  %v2532_v59 = vsel %vm515_vm5, %v8370_v26, %v12701_v31  ;;  %v2533_v40 = vsel %vm515_vm5, %v12701_v31, %v8401_v10  ;;  %v2673_v5 = vmul.f32 %v2535_v3, %v12676_v54 }
 0x400   : > { %12699 = vst [vmem:[#allocation81_spill] sm:$0xff] %v8565_v29  ;;  %3483 = vrot.lane.b32.xlu2 %v12700_v9, %s6502_s28  ;;  %v2452_v23 = vpop.permute.xlu1 %2451  ;;  %3481 = vrot.lane.b32.xlu1 %v12702_v22, %s6502_s28  ;;  %v8582_v46 = vpop.f32.mrf.mxu1  ;;  %v2674_v30 = vmul.f32 %v2536_v39, %v12677_v7  ;;  %v2529_v36 = vsel %vm515_vm5, %v8271_v24, %v8495_v50  ;;  %v12733_v29 = vld [vmem:[#allocation70_spill] sm:$0xff] }
 0x401   : > { %2767 = vmatpush.msra.mxu1 %v2684_v15  ;;  %12703 = vst [vmem:[#allocation89_spill] sm:$0xff] %v8582_v46  ;;  %2834 = vmatpush.msra.mxu2 %v2677_v43  ;;  %v2530_v53 = vsel %vm515_vm5, %v8495_v50, %v8430_v49  ;;  %v2669_v15 = vmul.f32 %v2532_v59, %v12676_v54  ;;  %v12705_v50 = vld [vmem:[#allocation87_spill] sm:$0xff] }
 0x402   : > { %2899 = vmatpush.msra.mxu3 %v2678_v11  ;;  %2108 = vmatmul.f32.gmra.mxu0 %v1059_v37  ;;  %v2670_v3 = vmul.f32 %v2533_v40, %v12677_v7  ;;  %v2526_v39 = vsel %vm515_vm5, %v8547_v16, %v2452_v23  ;;  %v2527_v11 = vsel %vm515_vm5, %v2452_v23, %v8368_v21 }
 0x403   : > { %2303 = vmatmul.f32.gmra.mxu3 %v1059_v37  ;;  %v8592_v31 = vpop.f32.mrf.mxu3  ;;  %2835 = vmatpush.msra.mxu2 %v2673_v5  ;;  %v8596_v43 = vpop.permute.xlu0 %2373  ;;  %v2665_v59 = vmul.f32 %v2529_v36, %v12676_v54  ;;  %v2666_v40 = vmul.f32 %v2530_v53, %v12677_v7  ;;  %v2661_v2 = vmul.f32 %v2526_v39, %v12676_v54  ;;  %v12708_v36 = vld [vmem:[#allocation98_spill] sm:$0xff]  ;;  %v12709_v53 = vld [vmem:[#allocation99_spill] sm:$0xff] }
 0x404   : > { %12704 = vst [vmem:[#allocation73_spill] sm:$0xff] %v8592_v31  ;;  %2900 = vmatpush.msra.mxu3 %v2674_v30  ;;  %3469 = vrot.lane.b32.xlu0 %v12705_v50, %s6502_s28  ;;  %v8604_v46 = vpop.f32.mrf.mxu0  ;;  %v2524_v5 = vsel %vm515_vm5, %v8465_v48, %v8596_v43 }
 0x405   : > { %12706 = vst [vmem:[#allocation77_spill] sm:$0xff] %v8604_v46  ;;  %2836 = vmatpush.msra.mxu2 %v2669_v15  ;;  %v2662_v46 = vmul.f32 %v2527_v11, %v12677_v7  ;;  %v2658_v15 = vmul.f32 %v2524_v5, %v12677_v7 }
 0x406   : > { %2901 = vmatpush.msra.mxu3 %v2670_v3  ;;  %2173 = vmatmul.f32.gmra.mxu1 %v1059_v37 }
 0x407   : > { %2238 = vmatmul.f32.gmra.mxu2 %v1059_v37  ;;  %v8611_v30 = vpop.f32.mrf.mxu2  ;;  %v2466_v23 = vpop.permute.xlu2 %2465 }
 0x408   : > { %12707 = vst [vmem:[#allocation68_spill] sm:$0xff] %v8611_v30  ;;  %2837 = vmatpush.msra.mxu2 %v2665_v59  ;;  %2902 = vmatpush.msra.mxu3 %v2666_v40  ;;  %v8615_v25 = vpop.permute.xlu1 %2443  ;;  %v8625_v3 = vpop.f32.mrf.mxu1  ;;  %v12712_v59 = vld [vmem:[#allocation79_spill] sm:$0xff] }
 0x409   : > { %3475 = vrot.lane.b32.xlu2 %v12708_v36, %s6502_s28  ;;  %3473 = vrot.lane.b32.xlu1 %v12709_v53, %s6502_s28  ;;  %v2523_v37 = vsel %vm515_vm5, %v8615_v25, %v8465_v48  ;;  %12710 = vst [vmem:[#allocation75_spill] sm:$0xff] %v8625_v3  ;;  %v1061_v3 = vld [vmem:[#allocation2 + $0x20] sm:$0xff] }
 0x40a   : > { %2838 = vmatpush.msra.mxu2 %v2661_v2  ;;  %2903 = vmatpush.msra.mxu3 %v2662_v46  ;;  %v2657_v39 = vmul.f32 %v2523_v37, %v12676_v54 }
 0x40b   : > { %2111 = vmatmul.f32.gmra.mxu0 %v1060_v14  ;;  %2306 = vmatmul.f32.gmra.mxu3 %v1060_v14  ;;  %v8628_v11 = vpop.f32.mrf.mxu3  ;;  %v2478_v5 = vpop.permute.xlu0 %2477 }
 0x40c   : > { %12711 = vst [vmem:[#allocation80_spill] sm:$0xff] %v8628_v11  ;;  %2904 = vmatpush.msra.mxu3 %v2658_v15  ;;  %2839 = vmatpush.msra.mxu2 %v2657_v39  ;;  %v8632_v40 = vpop.f32.mrf.mxu0  ;;  %v2540_v48 = vsel %vm515_vm5, %v2478_v5, %v12693_v58  ;;  %v2630_v2 = vsel %vm515_vm5, %v12689_v8, %v2478_v5  ;;  %v12715_v58 = vld [vmem:[#allocation86_spill] sm:$0xff] }
 0x40d   : > { %3461 = vrot.lane.b32.xlu0 %v12712_v59, %s6502_s28  ;;  %12713 = vst [vmem:[#allocation74_spill] sm:$0xff] %v8632_v40  ;;  %v2679_v46 = vmul.f32 %v2630_v2, %v12667_v51  ;;  %v2680_v37 = vmul.f32 %v2540_v48, %v12672_v55  ;;  %v12716_v8 = vld [vmem:[#allocation90_spill] sm:$0xff]  ;;  %v12719_v2 = vld [vmem:[#allocation71_spill] sm:$0xff]  ;;  %v2534_v11 = vsel %vm515_vm5, %v2466_v23, %v8340_v27 }
 0x40e   : > { %2176 = vmatmul.f32.gmra.mxu1 %v1060_v14 }
 0x40f   : > { %2241 = vmatmul.f32.gmra.mxu2 %v1060_v14  ;;  %v8640_v15 = vpop.f32.mrf.mxu2  ;;  %v8642_v39 = vpop.permute.xlu2 %2427  ;;  %2703 = vmatpush.msra.mxu0 %v2679_v46 }
 0x410   : > { %12714 = vst [vmem:[#allocation154_spill] sm:$0xff] %v8640_v15  ;;  %v8644_v56 = vpop.permute.xlu1 %2371  ;;  %2768 = vmatpush.msra.mxu1 %v2680_v37  ;;  %v8650_v5 = vpop.f32.mrf.mxu1 }
 0x411   : > { %3467 = vrot.lane.b32.xlu2 %v12715_v58, %s6502_s28  ;;  %3465 = vrot.lane.b32.xlu1 %v12716_v8, %s6502_s28  ;;  %12717 = vst [vmem:[#allocation151_spill] sm:$0xff] %v8650_v5 }
 0x413   : > { %2114 = vmatmul.f32.gmra.mxu0 %v1061_v3  ;;  %2309 = vmatmul.f32.gmra.mxu3 %v1061_v3  ;;  %v8652_v14 = vpop.f32.mrf.mxu3  ;;  %v2440_v48 = vpop.permute.xlu0 %2439 }
 0x414   : > { %12718 = vst [vmem:[#allocation148_spill] sm:$0xff] %v8652_v14  ;;  %v8656_v40 = vpop.f32.mrf.mxu0  ;;  %v2520_v46 = vsel %vm515_vm5, %v8512_v52, %v2440_v48  ;;  %v2521_v37 = vsel %vm515_vm5, %v2440_v48, %v8644_v56  ;;  %v2628_v48 = vsel %vm515_vm5, %v12698_v45, %v2466_v23 }
 0x415   : > { %3453 = vrot.lane.b32.xlu0 %v12719_v2, %s6502_s28  ;;  %12720 = vst [vmem:[#allocation25_spill] sm:$0xff] %v8656_v40  ;;  %v2653_v38 = vmul.f32 %v2520_v46, %v12676_v54  ;;  %v2654_v5 = vmul.f32 %v2521_v37, %v12677_v7  ;;  %v1062_v40 = vld [vmem:[#allocation2 + $0x28] sm:$0xff]  ;;  %v12722_v46 = vld [vmem:[#allocation78_spill] sm:$0xff]  ;;  %v2671_v31 = vmul.f32 %v2628_v48, %v12667_v51 }
 0x416   : > { %2179 = vmatmul.f32.gmra.mxu1 %v1061_v3  ;;  %v12723_v37 = vld [vmem:[#allocation82_spill] sm:$0xff] }
 0x417   : > { %2244 = vmatmul.f32.gmra.mxu2 %v1061_v3  ;;  %v8664_v15 = vpop.f32.mrf.mxu2  ;;  %v8666_v14 = vpop.permute.xlu2 %2419  ;;  %2905 = vmatpush.msra.mxu3 %v2654_v5 }
 0x418   : > { %12721 = vst [vmem:[#allocation146_spill] sm:$0xff] %v8664_v15  ;;  %v2472_v30 = vpop.permute.xlu1 %2471  ;;  %2840 = vmatpush.msra.mxu2 %v2653_v38  ;;  %v8680_v27 = vpop.f32.mrf.mxu1 }
 0x419   : > { %3459 = vrot.lane.b32.xlu2 %v12722_v46, %s6502_s28  ;;  %3457 = vrot.lane.b32.xlu1 %v12723_v37, %s6502_s28  ;;  %v2537_v3 = vsel %vm515_vm5, %v2472_v30, %v8282_v60  ;;  %v2629_v15 = vsel %vm515_vm5, %v12696_v12, %v2472_v30  ;;  %12724 = vst [vmem:[#allocation147_spill] sm:$0xff] %v8680_v27  ;;  %v12726_v12 = vld [vmem:[#allocation135_spill] sm:$0xff]  ;;  %v12729_v27 = vld [vmem:[#allocation72_spill] sm:$0xff] }
 0x41a   : > { %v2675_v38 = vmul.f32 %v2629_v15, %v12667_v51  ;;  %v2676_v5 = vmul.f32 %v2537_v3, %v12672_v55  ;;  %v2672_v60 = vmul.f32 %v2534_v11, %v12672_v55  ;;  %v12730_v11 = vld [vmem:[#allocation65_spill] sm:$0xff] }
 0x41b   : > { %2117 = vmatmul.f32.gmra.mxu0 %v1062_v40  ;;  %2312 = vmatmul.f32.gmra.mxu3 %v1062_v40  ;;  %v8684_v45 = vpop.f32.mrf.mxu3  ;;  %v8686_v23 = vpop.permute.xlu0 %2431 }
 0x41c   : > { %12725 = vst [vmem:[#allocation142_spill] sm:$0xff] %v8684_v45  ;;  %2704 = vmatpush.msra.mxu0 %v2675_v38  ;;  %2769 = vmatpush.msra.mxu1 %v2676_v5  ;;  %v8692_v30 = vpop.f32.mrf.mxu0  ;;  %v1063_v38 = vld [vmem:[#allocation2 + $0x30] sm:$0xff] }
 0x41d   : > { %3503 = vrot.lane.b32.xlu0 %v12726_v12, %s6502_s28  ;;  %12727 = vst [vmem:[#allocation143_spill] sm:$0xff] %v8692_v30 }
 0x41e   : > { %2705 = vmatpush.msra.mxu0 %v2671_v31  ;;  %2770 = vmatpush.msra.mxu1 %v2672_v60 }
 0x41f   : > { %2182 = vmatmul.f32.gmra.mxu1 %v1062_v40  ;;  %2247 = vmatmul.f32.gmra.mxu2 %v1062_v40  ;;  %v8694_v15 = vpop.f32.mrf.mxu2  ;;  %v8696_v3 = vpop.permute.xlu2 %2363 }
 0x420   : > { %12728 = vst [vmem:[#allocation139_spill] sm:$0xff] %v8694_v15  ;;  %v2434_v5 = vpop.permute.xlu1 %2433  ;;  %v8706_v60 = vpop.f32.mrf.mxu1 }
 0x421   : > { %3449 = vrot.lane.b32.xlu2 %v12729_v27, %s6502_s28  ;;  %3445 = vrot.lane.b32.xlu1 %v12730_v11, %s6502_s28  ;;  %v2517_v48 = vsel %vm515_vm5, %v8686_v23, %v2434_v5  ;;  %v2518_v31 = vsel %vm515_vm5, %v2434_v5, %v8568_v34  ;;  %12731 = vst [vmem:[#allocation158_spill] sm:$0xff] %v8706_v60 }
 0x422   : > { %v2649_v40 = vmul.f32 %v2517_v48, %v12676_v54  ;;  %v2650_v30 = vmul.f32 %v2518_v31, %v12677_v7 }
 0x423   : > { %2120 = vmatmul.f32.gmra.mxu0 %v1063_v38  ;;  %2315 = vmatmul.f32.gmra.mxu3 %v1063_v38  ;;  %v8710_v15 = vpop.f32.mrf.mxu3  ;;  %v8712_v45 = vpop.permute.xlu0 %2367 }
 0x424   : > { %12732 = vst [vmem:[#allocation134_spill] sm:$0xff] %v8710_v15  ;;  %2841 = vmatpush.msra.mxu2 %v2649_v40  ;;  %2906 = vmatpush.msra.mxu3 %v2650_v30  ;;  %v8716_v18 = vpop.f32.mrf.mxu0  ;;  %v2515_v5 = vsel %vm515_vm5, %v8642_v39, %v8712_v45  ;;  %v1064_v40 = vld [vmem:[#allocation2 + $0x38] sm:$0xff]  ;;  %v12736_v15 = vld [vmem:[#allocation62_spill] sm:$0xff] }
 0x425   : > { %3451 = vrot.lane.b32.xlu0 %v12733_v29, %s6502_s28  ;;  %12734 = vst [vmem:[#allocation122_spill] sm:$0xff] %v8716_v18  ;;  %v2646_v48 = vmul.f32 %v2515_v5, %v12677_v7  ;;  %v12737_v18 = vld [vmem:[#allocation126_spill] sm:$0xff] }
 0x427   : > { %2185 = vmatmul.f32.gmra.mxu1 %v1063_v38  ;;  %2250 = vmatmul.f32.gmra.mxu2 %v1063_v38  ;;  %v8722_v31 = vpop.f32.mrf.mxu2  ;;  %v2448_v60 = vpop.permute.xlu2 %2447 }
 0x428   : > { %12735 = vst [vmem:[#allocation123_spill] sm:$0xff] %v8722_v31  ;;  %v8724_v30 = vpop.permute.xlu1 %2425  ;;  %2907 = vmatpush.msra.mxu3 %v2646_v48  ;;  %v8733_v5 = vpop.f32.mrf.mxu1 }
 0x429   : > { %3437 = vrot.lane.b32.xlu2 %v12736_v15, %s6502_s28  ;;  %3495 = vrot.lane.b32.xlu1 %v12737_v18, %s6502_s28  ;;  %v2514_v4 = vsel %vm515_vm5, %v8724_v30, %v8642_v39  ;;  %12738 = vst [vmem:[#allocation112_spill] sm:$0xff] %v8733_v5 }
 0x42a   : > { %v2645_v38 = vmul.f32 %v2514_v4, %v12676_v54 }
 0x42b   : > { %2123 = vmatmul.f32.gmra.mxu0 %v1064_v40  ;;  %2318 = vmatmul.f32.gmra.mxu3 %v1064_v40  ;;  %v8736_v31 = vpop.f32.mrf.mxu3  ;;  %v2460_v48 = vpop.permute.xlu0 %2459 }
 0x42c   : > { %12739 = vst [vmem:[#allocation94_spill] sm:$0xff] %v8736_v31  ;;  %2842 = vmatpush.msra.mxu2 %v2645_v38  ;;  %v8740_v63 = vpop.f32.mrf.mxu0  ;;  %v2531_v15 = vsel %vm515_vm5, %v2460_v48, %v8370_v26  ;;  %v2627_v39 = vsel %vm515_vm5, %v8401_v10, %v2460_v48  ;;  %v12743_v26 = vld [vmem:[#allocation114_spill] sm:$0xff] }
 0x42d   : > { %3441 = vrot.lane.b32.xlu0 %v12740_v44, %s6502_s28  ;;  %12741 = vst [vmem:[#allocation157_spill] sm:$0xff] %v8740_v63  ;;  %v2667_v5 = vmul.f32 %v2627_v39, %v12667_v51  ;;  %v2668_v4 = vmul.f32 %v2531_v15, %v12672_v55  ;;  %v12744_v10 = vld [vmem:[#allocation66_spill] sm:$0xff] }
 0x42f   : > { %2188 = vmatmul.f32.gmra.mxu1 %v1064_v40  ;;  %2253 = vmatmul.f32.gmra.mxu2 %v1064_v40  ;;  %v8748_v31 = vpop.f32.mrf.mxu2  ;;  %v8750_v38 = vpop.permute.xlu2 %2429 }
 0x430   : > { %12742 = vst [vmem:[#allocation28_spill] sm:$0xff] %v8748_v31  ;;  %v8752_v11 = vpop.permute.xlu1 %2365  ;;  %2706 = vmatpush.msra.mxu0 %v2667_v5  ;;  %2771 = vmatpush.msra.mxu1 %v2668_v4  ;;  %v8758_v48 = vpop.f32.mrf.mxu1 }
 0x431   : > { %3487 = vrot.lane.b32.xlu2 %v12743_v26, %s6502_s28  ;;  %3443 = vrot.lane.b32.xlu1 %v12744_v10, %s6502_s28  ;;  %12745 = vst [vmem:[#allocation153_spill] sm:$0xff] %v8758_v48 }
 0x433   : > { %2126 = vmatmul.f32.gmra.mxu0 %v1065_v35  ;;  %2321 = vmatmul.f32.gmra.mxu3 %v1065_v35  ;;  %v8760_v15 = vpop.f32.mrf.mxu3  ;;  %v2422_v40 = vpop.permute.xlu0 %2421 }
 0x434   : > { %12746 = vst [vmem:[#allocation149_spill] sm:$0xff] %v8760_v15  ;;  %v8764_v39 = vpop.f32.mrf.mxu0  ;;  %v2511_v5 = vsel %vm515_vm5, %v8666_v14, %v2422_v40  ;;  %v2512_v4 = vsel %vm515_vm5, %v2422_v40, %v8752_v11  ;;  %v2625_v40 = vsel %vm515_vm5, %v8368_v21, %v2448_v60 }
 0x435   : > { %3429 = vrot.lane.b32.xlu0 %v12645_v20, %s6502_s28  ;;  %12747 = vst [vmem:[#allocation33_spill] sm:$0xff] %v8764_v39  ;;  %v2641_v63 = vmul.f32 %v2511_v5, %v12676_v54  ;;  %v2642_v48 = vmul.f32 %v2512_v4, %v12677_v7  ;;  %v2525_v20 = vsel %vm515_vm5, %v2448_v60, %v8547_v16  ;;  %v1066_v39 = vld [vmem:[#allocation2 + $0x48] sm:$0xff]  ;;  %v12750_v4 = vld [vmem:[#allocation63_spill] sm:$0xff] }
 0x436   : > { %v12749_v5 = vld [vmem:[#allocation61_spill] sm:$0xff]  ;;  %v2659_v2 = vmul.f32 %v2625_v40, %v12667_v51 }
 0x437   : > { %2191 = vmatmul.f32.gmra.mxu1 %v1065_v35  ;;  %2256 = vmatmul.f32.gmra.mxu2 %v1065_v35  ;;  %v8772_v31 = vpop.f32.mrf.mxu2  ;;  %v8774_v15 = vpop.permute.xlu2 %2411 }
 0x438   : > { %12748 = vst [vmem:[#allocation34_spill] sm:$0xff] %v8772_v31  ;;  %v2454_v33 = vpop.permute.xlu1 %2453  ;;  %2843 = vmatpush.msra.mxu2 %v2641_v63  ;;  %2908 = vmatpush.msra.mxu3 %v2642_v48  ;;  %v8788_v16 = vpop.f32.mrf.mxu1 }
 0x439   : > { %3435 = vrot.lane.b32.xlu2 %v12749_v5, %s6502_s28  ;;  %3433 = vrot.lane.b32.xlu1 %v12750_v4, %s6502_s28  ;;  %v2528_v35 = vsel %vm515_vm5, %v2454_v33, %v8271_v24  ;;  %v2626_v31 = vsel %vm515_vm5, %v8430_v49, %v2454_v33  ;;  %12751 = vst [vmem:[#allocation156_spill] sm:$0xff] %v8788_v16  ;;  %v12753_v33 = vld [vmem:[#allocation102_spill] sm:$0xff] }
 0x43a   : > { %v2663_v63 = vmul.f32 %v2626_v31, %v12667_v51  ;;  %v2664_v48 = vmul.f32 %v2528_v35, %v12672_v55  ;;  %v2660_v24 = vmul.f32 %v2525_v20, %v12672_v55  ;;  %v1067_v35 = vld [vmem:[#allocation2 + $0x50] sm:$0xff] }
 0x43b   : > { %2129 = vmatmul.f32.gmra.mxu0 %v1066_v39  ;;  %2324 = vmatmul.f32.gmra.mxu3 %v1066_v39  ;;  %v8792_v21 = vpop.f32.mrf.mxu3  ;;  %v8794_v60 = vpop.permute.xlu0 %2413 }
 0x43c   : > { %12752 = vst [vmem:[#allocation152_spill] sm:$0xff] %v8792_v21  ;;  %2707 = vmatpush.msra.mxu0 %v2663_v63  ;;  %2772 = vmatpush.msra.mxu1 %v2664_v48  ;;  %v8800_v49 = vpop.f32.mrf.mxu0  ;;  %v12756_v48 = vld [vmem:[#allocation59_spill] sm:$0xff]  ;;  %v12760_v21 = vld [vmem:[#allocation58_spill] sm:$0xff] }
 0x43d   : > { %3479 = vrot.lane.b32.xlu0 %v12753_v33, %s6502_s28  ;;  %12754 = vst [vmem:[#allocation145_spill] sm:$0xff] %v8800_v49 }
 0x43e   : > { %2708 = vmatpush.msra.mxu0 %v2659_v2  ;;  %2773 = vmatpush.msra.mxu1 %v2660_v24 }
 0x43f   : > { %2194 = vmatmul.f32.gmra.mxu1 %v1066_v39  ;;  %2259 = vmatmul.f32.gmra.mxu2 %v1066_v39  ;;  %v8802_v31 = vpop.f32.mrf.mxu2 }
 0x440   : > { %12755 = vst [vmem:[#allocation150_spill] sm:$0xff] %v8802_v31  ;;  %v2416_v63 = vpop.permute.xlu1 %2415  ;;  %v8808_v20 = vpop.permute.xlu2 %3507 }
 0x441   : > { %3425 = vrot.lane.b32.xlu2 %v12756_v48, %s6502_s28  ;;  %3421 = vrot.lane.b32.xlu1 %v12651_v61, %s6502_s28  ;;  %12757 = vst [vmem:[#allocation141_spill] sm:$0xff] %v8808_v20  ;;  %v2508_v40 = vsel %vm515_vm5, %v8794_v60, %v2416_v63  ;;  %v2509_v2 = vsel %vm515_vm5, %v2416_v63, %v8696_v3  ;;  %v8814_v24 = vpop.f32.mrf.mxu1 }
 0x442   : > { %12758 = vst [vmem:[#allocation136_spill] sm:$0xff] %v8814_v24  ;;  %v2637_v39 = vmul.f32 %v2508_v40, %v12676_v54  ;;  %v2638_v49 = vmul.f32 %v2509_v2, %v12677_v7  ;;  %v1068_v2 = vld [vmem:[#allocation2 + $0x58] sm:$0xff] }
 0x443   : > { %2132 = vmatmul.f32.gmra.mxu0 %v1067_v35  ;;  %2327 = vmatmul.f32.gmra.mxu3 %v1067_v35  ;;  %v8818_v16 = vpop.f32.mrf.mxu3  ;;  %v2442_v31 = vpop.permute.xlu0 %2441 }
 0x444   : > { %12759 = vst [vmem:[#allocation144_spill] sm:$0xff] %v8818_v16  ;;  %2844 = vmatpush.msra.mxu2 %v2637_v39  ;;  %2909 = vmatpush.msra.mxu3 %v2638_v49  ;;  %v8822_v20 = vpop.f32.mrf.mxu0  ;;  %v2522_v63 = vsel %vm515_vm5, %v2442_v31, %v8615_v25  ;;  %v2624_v54 = vsel %vm515_vm5, %v8596_v43, %v2442_v31  ;;  %v12763_v43 = vld [vmem:[#allocation95_spill] sm:$0xff] }
 0x445   : > { %3427 = vrot.lane.b32.xlu0 %v12760_v21, %s6502_s28  ;;  %12761 = vst [vmem:[#allocation140_spill] sm:$0xff] %v8822_v20  ;;  %v2655_v7 = vmul.f32 %v2624_v54, %v12667_v51  ;;  %v2656_v49 = vmul.f32 %v2522_v63, %v12672_v55 }
 0x446   : > { %3170 = vmatpush.msrb.mxu2 %v7553_v6  ;;  %3235 = vmatpush.msrb.mxu3 %v7546_v0 }
 0x447   : > { %2197 = vmatmul.f32.gmra.mxu1 %v1067_v35  ;;  %2262 = vmatmul.f32.gmra.mxu2 %v1067_v35  ;;  %v8832_v40 = vpop.f32.mrf.mxu2 }
 0x448   : > { %12762 = vst [vmem:[#allocation117_spill] sm:$0xff] %v8832_v40  ;;  %3171 = vmatpush.msrb.mxu2 %v12673_v41  ;;  %3236 = vmatpush.msrb.mxu3 %v12671_v19  ;;  %v2436_v25 = vpop.permute.xlu1 %2435 }
 0x449   : > { %3413 = vrot.lane.b32.xlu2 %v12657_v28, %s6502_s28  ;;  %3471 = vrot.lane.b32.xlu1 %v12763_v43, %s6502_s28  ;;  %v2519_v31 = vsel %vm515_vm5, %v2436_v25, %v8512_v52  ;;  %v2623_v35 = vsel %vm515_vm5, %v8644_v56, %v2436_v25  ;;  %v8844_v39 = vpop.f32.mrf.mxu1  ;;  %v2622_v56 = vsel %vm515_vm5, %v8568_v34, %v8750_v38 }
 0x44a   : > { %12764 = vst [vmem:[#allocation138_spill] sm:$0xff] %v8844_v39  ;;  %v8846_v63 = vpop.permute.xlu2 %3499  ;;  %2709 = vmatpush.msra.mxu0 %v2655_v7  ;;  %2774 = vmatpush.msra.mxu1 %v2656_v49  ;;  %v2651_v54 = vmul.f32 %v2623_v35, %v12667_v51  ;;  %v2652_v52 = vmul.f32 %v2519_v31, %v12672_v55  ;;  %v12766_v7 = vld [vmem:[#allocation54_spill] sm:$0xff] }
 0x44b   : > { %2135 = vmatmul.f32.gmra.mxu0 %v1068_v2  ;;  %2330 = vmatmul.f32.gmra.mxu3 %v1068_v2  ;;  %v8849_v20 = vpop.f32.mrf.mxu3  ;;  %v2424_v24 = vpop.permute.xlu0 %2423  ;;  %v2516_v25 = vsel %vm515_vm5, %v8750_v38, %v8686_v23  ;;  %v1069_v23 = vld [vmem:[#allocation2 + $0x60] sm:$0xff] }
 0x44c   : > { %12765 = vst [vmem:[#allocation119_spill] sm:$0xff] %v8849_v20  ;;  %3172 = vmatpush.msrb.mxu2 %v12691_v32  ;;  %3237 = vmatpush.msrb.mxu3 %v12688_v47  ;;  %v8859_v49 = vpop.f32.mrf.mxu0  ;;  %v2621_v31 = vsel %vm515_vm5, %v8712_v45, %v2424_v24  ;;  %v2513_v34 = vsel %vm515_vm5, %v2424_v24, %v8724_v30  ;;  %v12771_v24 = vld [vmem:[#allocation55_spill] sm:$0xff] }
 0x44d   : > { %3417 = vrot.lane.b32.xlu0 %v12766_v7, %s6502_s28  ;;  %12767 = vst [vmem:[#allocation107_spill] sm:$0xff] %v8859_v49  ;;  %2710 = vmatpush.msra.mxu0 %v2651_v54  ;;  %v2647_v54 = vmul.f32 %v2622_v56, %v12667_v51  ;;  %v12769_v49 = vld [vmem:[#allocation84_spill] sm:$0xff]  ;;  %v2648_v45 = vmul.f32 %v2516_v25, %v12672_v55  ;;  %v12791_v20 = vld [vmem:[#allocation43_spill] sm:$0xff] }
 0x44e   : > { %3173 = vmatpush.msrb.mxu2 %v12702_v22  ;;  %3238 = vmatpush.msrb.mxu3 %v12700_v9  ;;  %v2643_v30 = vmul.f32 %v2621_v31, %v12667_v51  ;;  %v2644_v56 = vmul.f32 %v2513_v34, %v12672_v55 }
 0x44f   : > { %2200 = vmatmul.f32.gmra.mxu1 %v1068_v2  ;;  %2265 = vmatmul.f32.gmra.mxu2 %v1068_v2  ;;  %v8870_v35 = vpop.f32.mrf.mxu2 }
 0x450   : > { %12768 = vst [vmem:[#allocation128_spill] sm:$0xff] %v8870_v35  ;;  %2775 = vmatpush.msra.mxu1 %v2652_v52  ;;  %3174 = vmatpush.msrb.mxu2 %v12709_v53  ;;  %v2418_v38 = vpop.permute.xlu1 %2417 }
 0x451   : > { %3239 = vmatpush.msrb.mxu3 %v12708_v36  ;;  %3463 = vrot.lane.b32.xlu2 %v12769_v49, %s6502_s28  ;;  %v8878_v2 = vpop.f32.mrf.mxu1  ;;  %v2510_v39 = vsel %vm515_vm5, %v2418_v38, %v8666_v14  ;;  %v2620_v25 = vsel %vm515_vm5, %v8752_v11, %v2418_v38  ;;  %v2619_v38 = vsel %vm515_vm5, %v8696_v3, %v8774_v15 }
 0x452   : > { %12770 = vst [vmem:[#allocation111_spill] sm:$0xff] %v8878_v2  ;;  %3419 = vrot.lane.b32.xlu1 %v12771_v24, %s6502_s28  ;;  %2711 = vmatpush.msra.mxu0 %v2647_v54  ;;  %v8883_v52 = vpop.permute.xlu2 %3491  ;;  %v2639_v14 = vmul.f32 %v2620_v25, %v12667_v51  ;;  %v2640_v34 = vmul.f32 %v2510_v39, %v12672_v55  ;;  %v12777_v25 = vld [vmem:[#allocation50_spill] sm:$0xff] }
 0x453   : > { %2776 = vmatpush.msra.mxu1 %v2648_v45  ;;  %2138 = vmatmul.f32.gmra.mxu0 %v1069_v23  ;;  %v8890_v35 = vpop.f32.mrf.mxu3  ;;  %v2507_v45 = vsel %vm515_vm5, %v8774_v15, %v8794_v60  ;;  %v2635_v3 = vmul.f32 %v2619_v38, %v12667_v51  ;;  %v1070_v60 = vld [vmem:[#allocation2 + $0x68] sm:$0xff]  ;;  %v12782_v38 = vld [vmem:[#allocation76_spill] sm:$0xff] }
 0x454   : > { %12772 = vst [vmem:[#allocation109_spill] sm:$0xff] %v8890_v35  ;;  %2333 = vmatmul.f32.gmra.mxu3 %v1069_v23  ;;  %3175 = vmatpush.msrb.mxu2 %v12716_v8  ;;  %v8893_v31 = vpop.permute.xlu0 %3501  ;;  %v8896_v54 = vpop.f32.mrf.mxu0  ;;  %v2636_v15 = vmul.f32 %v2507_v45, %v12672_v55 }
 0x455   : > { %3240 = vmatpush.msrb.mxu3 %v12715_v58  ;;  %2712 = vmatpush.msra.mxu0 %v2643_v30  ;;  %12773 = vst [vmem:[#allocation155_spill] sm:$0xff] %v8896_v54 }
 0x456   : > { %2777 = vmatpush.msra.mxu1 %v2644_v56  ;;  %3176 = vmatpush.msrb.mxu2 %v12723_v37 }
 0x457   : > { %3241 = vmatpush.msrb.mxu3 %v12722_v46  ;;  %3405 = vrot.lane.b32.xlu0 %v12654_v13, %s6502_s28  ;;  %v8904_v11 = vpop.f32.mrf.mxu2 }
 0x458   : > { %12774 = vst [vmem:[#allocation130_spill] sm:$0xff] %v8904_v11  ;;  %2203 = vmatmul.f32.gmra.mxu1 %v1069_v23  ;;  %2268 = vmatmul.f32.gmra.mxu2 %v1069_v23  ;;  %v12789_v11 = vld [vmem:[#allocation42_spill] sm:$0xff] }
 0x459   : > { %3177 = vmatpush.msrb.mxu2 %v12729_v27  ;;  %3242 = vmatpush.msrb.mxu3 %v12733_v29  ;;  %v8914_v39 = vpop.permute.xlu1 %3505  ;;  %v8916_v30 = vpop.f32.mrf.mxu1 }
 0x45a   : > { %12775 = vst [vmem:[#allocation19_spill] sm:$0xff] %v8916_v30  ;;  %2713 = vmatpush.msra.mxu0 %v2639_v14  ;;  %2778 = vmatpush.msra.mxu1 %v2640_v34  ;;  %v8918_v56 = vpop.permute.xlu2 %3483  ;;  %v12778_v30 = vld [vmem:[#allocation51_spill] sm:$0xff] }
 0x45b   : > { %3178 = vmatpush.msrb.mxu2 %v12740_v44  ;;  %3243 = vmatpush.msrb.mxu3 %v12744_v10  ;;  %v8924_v23 = vpop.f32.mrf.mxu3  ;;  %v12813_v44 = vld [vmem:[#allocation48_spill] sm:$0xff] }
 0x45c   : > { %12776 = vst [vmem:[#allocation32_spill] sm:$0xff] %v8924_v23  ;;  %3411 = vrot.lane.b32.xlu2 %v12777_v25, %s6502_s28  ;;  %3409 = vrot.lane.b32.xlu1 %v12778_v30, %s6502_s28  ;;  %v8930_v14 = vpop.f32.mrf.mxu0 }
 0x45d   : > { %2714 = vmatpush.msra.mxu0 %v2635_v3  ;;  %2779 = vmatpush.msra.mxu1 %v2636_v15  ;;  %12779 = vst [vmem:[#allocation31_spill] sm:$0xff] %v8930_v14  ;;  %v8932_v34 = vpop.permute.xlu0 %3493 }
 0x45e   : > { %2141 = vmatmul.f32.gmra.mxu0 %v1070_v60  ;;  %2336 = vmatmul.f32.gmra.mxu3 %v1070_v60 }
 0x45f   : > { %3040 = vmatpush.msrb.mxu0 %v12559_v1  ;;  %3105 = vmatpush.msrb.mxu1 %v12726_v12  ;;  %v8936_v51 = vpop.f32.mrf.mxu2 }
 0x460   : > { %12780 = vst [vmem:[#allocation16_spill] sm:$0xff] %v8936_v51  ;;  %3179 = vmatpush.msrb.mxu2 %v12750_v4  ;;  %3244 = vmatpush.msrb.mxu3 %v12749_v5  ;;  %v12787_v51 = vld [vmem:[#allocation46_spill] sm:$0xff]  ;;  %v2347_v5 = vld [vmem:[#allocation2 + $0x100] sm:$0xff] }
 0x461   : > { %3041 = vmatpush.msrb.mxu0 %v12587_v57  ;;  %3106 = vmatpush.msrb.mxu1 %v12737_v18  ;;  %v8944_v55 = vpop.f32.mrf.mxu1 }
 0x462   : > { %3180 = vmatpush.msrb.mxu2 %v12756_v48  ;;  %3245 = vmatpush.msrb.mxu3 %v12760_v21  ;;  %12781 = vst [vmem:[#allocation22_spill] sm:$0xff] %v8944_v55  ;;  %v8950_v3 = vpop.permute.xlu1 %3497  ;;  %v1071_v55 = vld [vmem:[#allocation2 + $0x70] sm:$0xff]  ;;  %v12804_v21 = vld [vmem:[#allocation56_spill] sm:$0xff] }
 0x463   : > { %3455 = vrot.lane.b32.xlu0 %v12782_v38, %s6502_s28  ;;  %2206 = vmatmul.f32.gmra.mxu1 %v1070_v60  ;;  %v8948_v45 = vpop.permute.xlu2 %3475  ;;  %v8953_v15 = vpop.f32.mrf.mxu3 }
 0x464   : > { %2271 = vmatmul.f32.gmra.mxu2 %v1070_v60  ;;  %3042 = vmatpush.msrb.mxu0 %v12681_v62  ;;  %12783 = vst [vmem:[#allocation29_spill] sm:$0xff] %v8953_v15  ;;  %v12785_v60 = vld [vmem:[#allocation47_spill] sm:$0xff] }
 0x465   : > { %3107 = vmatpush.msrb.mxu1 %v12743_v26  ;;  %3181 = vmatpush.msrb.mxu2 %v12766_v7  ;;  %v12801_v7 = vld [vmem:[#allocation62_spill] sm:$0xff] }
 0x466   : > { %3246 = vmatpush.msrb.mxu3 %v12771_v24  ;;  %3043 = vmatpush.msrb.mxu0 %v12695_v42  ;;  %v8959_v14 = vpop.f32.mrf.mxu0  ;;  %v8961_v54 = vpop.permute.xlu0 %3485 }
 0x467   : > { %12784 = vst [vmem:[#allocation30_spill] sm:$0xff] %v8959_v14  ;;  %3108 = vmatpush.msrb.mxu1 %v12753_v33  ;;  %3182 = vmatpush.msrb.mxu2 %v12778_v30  ;;  %v8968_v2 = vpop.f32.mrf.mxu2  ;;  %v12797_v30 = vld [vmem:[#allocation65_spill] sm:$0xff] }
 0x468   : > { %3247 = vmatpush.msrb.mxu3 %v12777_v25  ;;  %3401 = vrot.lane.b32.xlu2 %v12785_v60, %s6502_s28  ;;  %12786 = vst [vmem:[#allocation132_spill] sm:$0xff] %v8968_v2  ;;  %v12793_v2 = vld [vmem:[#allocation71_spill] sm:$0xff] }
 0x469   : > { %3397 = vrot.lane.b32.xlu1 %v12660_v17, %s6502_s28  ;;  %2144 = vmatmul.f32.gmra.mxu0 %v1071_v55 }
 0x46a   : > { %2339 = vmatmul.f32.gmra.mxu3 %v1071_v55  ;;  %3044 = vmatpush.msrb.mxu0 %v12705_v50  ;;  %v8977_v15 = vpop.permute.xlu1 %3489  ;;  %v8981_v23 = vpop.f32.mrf.mxu1 }
 0x46b   : > { %3109 = vmatpush.msrb.mxu1 %v12763_v43  ;;  %3183 = vmatpush.msrb.mxu2 %v12785_v60  ;;  %v8975_v14 = vpop.permute.xlu2 %3467  ;;  %12788 = vst [vmem:[#allocation133_spill] sm:$0xff] %v8981_v23  ;;  %v12794_v23 = vld [vmem:[#allocation39_spill] sm:$0xff]  ;;  %v12795_v60 = vld [vmem:[#allocation38_spill] sm:$0xff] }
 0x46c   : > { %3248 = vmatpush.msrb.mxu3 %v12787_v51  ;;  %3045 = vmatpush.msrb.mxu0 %v12712_v59  ;;  %v8985_v35 = vpop.f32.mrf.mxu3 }
 0x46d   : > { %3110 = vmatpush.msrb.mxu1 %v12769_v49  ;;  %3184 = vmatpush.msrb.mxu2 %v12789_v11  ;;  %12790 = vst [vmem:[#allocation137_spill] sm:$0xff] %v8985_v35  ;;  %v1072_v35 = vld [vmem:[#allocation2 + $0x78] sm:$0xff]  ;;  %v12799_v49 = vld [vmem:[#allocation37_spill] sm:$0xff] }
 0x46e   : > { %3249 = vmatpush.msrb.mxu3 %v12791_v20  ;;  %3403 = vrot.lane.b32.xlu0 %v12787_v51, %s6502_s28  ;;  %v8990_v40 = vpop.permute.xlu0 %3477  ;;  %v12798_v51 = vld [vmem:[#allocation69_spill] sm:$0xff] }
 0x46f   : > { %2209 = vmatmul.f32.gmra.mxu1 %v1071_v55  ;;  %2274 = vmatmul.f32.gmra.mxu2 %v1071_v55  ;;  %v8992_v16 = vpop.f32.mrf.mxu0 }
 0x470   : > { %12792 = vst [vmem:[#allocation125_spill] sm:$0xff] %v8992_v16  ;;  %3046 = vmatpush.msrb.mxu0 %v12793_v2  ;;  %3111 = vmatpush.msrb.mxu1 %v12782_v38 }
 0x471   : > { %3185 = vmatpush.msrb.mxu2 %v12794_v23  ;;  %3250 = vmatpush.msrb.mxu3 %v12795_v60  ;;  %v8998_v25 = vpop.f32.mrf.mxu2 }
 0x472   : > { %12796 = vst [vmem:[#allocation100_spill] sm:$0xff] %v8998_v25  ;;  %3047 = vmatpush.msrb.mxu0 %v12797_v30  ;;  %3112 = vmatpush.msrb.mxu1 %v12798_v51  ;;  %v9008_v16 = vpop.permute.xlu1 %3481  ;;  %v9010_v38 = vpop.f32.mrf.mxu1  ;;  %v12802_v25 = vld [vmem:[#allocation64_spill] sm:$0xff] }
 0x473   : > { %3389 = vrot.lane.b32.xlu2 %v12799_v49, %s6502_s28  ;;  %3447 = vrot.lane.b32.xlu1 %v12798_v51, %s6502_s28  ;;  %v9006_v55 = vpop.permute.xlu2 %3459  ;;  %12800 = vst [vmem:[#allocation113_spill] sm:$0xff] %v9010_v38  ;;  %v12805_v51 = vld [vmem:[#allocation60_spill] sm:$0xff]  ;;  %v12807_v38 = vld [vmem:[#allocation57_spill] sm:$0xff] }
 0x474   : > { %2147 = vmatmul.f32.gmra.mxu0 %v1072_v35  ;;  %2342 = vmatmul.f32.gmra.mxu3 %v1072_v35 }
 0x475   : > { %3048 = vmatpush.msrb.mxu0 %v12801_v7  ;;  %3113 = vmatpush.msrb.mxu1 %v12802_v25  ;;  %v9016_v24 = vpop.f32.mrf.mxu3  ;;  %v12818_v7 = vld [vmem:[#allocation26_spill] sm:$0xff] }
 0x476   : > { %3393 = vrot.lane.b32.xlu0 %v12789_v11, %s6502_s28  ;;  %12803 = vst [vmem:[#allocation116_spill] sm:$0xff] %v9016_v24  ;;  %v9022_v48 = vpop.permute.xlu0 %3469  ;;  %v12809_v11 = vld [vmem:[#allocation141_spill] sm:$0xff] }
 0x477   : > { %3049 = vmatpush.msrb.mxu0 %v12804_v21  ;;  %3114 = vmatpush.msrb.mxu1 %v12805_v51  ;;  %v9020_v43 = vpop.f32.mrf.mxu0  ;;  %v3652_v24 = vsel %vm540_vm4, %v12809_v11, %v8893_v31  ;;  %v12810_v21 = vld [vmem:[#allocation53_spill] sm:$0xff]  ;;  %v3556_v26 = vsel %vm540_vm4, %v8914_v39, %v12809_v11  ;;  %v3553_v11 = vsel %vm540_vm4, %v8950_v3, %v8846_v63 }
 0x478   : > { %12806 = vst [vmem:[#allocation127_spill] sm:$0xff] %v9020_v43  ;;  %2212 = vmatmul.f32.gmra.mxu1 %v1072_v35  ;;  %2277 = vmatmul.f32.gmra.mxu2 %v1072_v35  ;;  %v3651_v35 = vsel %vm540_vm4, %v8846_v63, %v8932_v34  ;;  %v3715_v29 = vmul.f32 %v3556_v26, %v12818_v7 }
 0x479   : > { %3050 = vmatpush.msrb.mxu0 %v12651_v61  ;;  %3115 = vmatpush.msrb.mxu1 %v12807_v38  ;;  %v9026_v33 = vpop.f32.mrf.mxu2  ;;  %v12812_v61 = vld [vmem:[#allocation27_spill] sm:$0xff]  ;;  %v3550_v26 = vsel %vm540_vm4, %v8977_v15, %v8883_v52 }
 0x47a   : > { %12808 = vst [vmem:[#allocation101_spill] sm:$0xff] %v9026_v33 }
 0x47b   : > { %3051 = vmatpush.msrb.mxu0 %v12657_v28  ;;  %3116 = vmatpush.msrb.mxu1 %v12810_v21  ;;  %v9033_v43 = vpop.permute.xlu2 %3449  ;;  %v9035_v4 = vpop.permute.xlu1 %3473  ;;  %v3716_v28 = vmul.f32 %v3652_v24, %v12812_v61  ;;  %v12815_v24 = vld [vmem:[#allocation36_spill] sm:$0xff] }
 0x47c   : > { %3439 = vrot.lane.b32.xlu2 %v12802_v25, %s6502_s28  ;;  %3395 = vrot.lane.b32.xlu1 %v12791_v20, %s6502_s28  ;;  %v9044_v33 = vpop.f32.mrf.mxu1  ;;  %v3650_v25 = vsel %vm540_vm4, %v8883_v52, %v8961_v54 }
 0x47d   : > { %12811 = vst [vmem:[#allocation115_spill] sm:$0xff] %v9044_v33  ;;  %2715 = vmatmul.f32.vlgmr.msra.gmra.mxu0 %v2347_v5  ;;  %2910 = vmatmul.f32.vlgmr.msra.gmra.mxu3 %v2347_v5  ;;  %v9052_v10 = vpop.f32.mrf.mxu3  ;;  %v3712_v33 = vmul.f32 %v3651_v35, %v12812_v61  ;;  %v3708_v63 = vmul.f32 %v3650_v25, %v12812_v61 }
 0x47e   : > { %3052 = vmatpush.msrb.mxu0 %v12654_v13  ;;  %3117 = vmatpush.msrb.mxu1 %v12813_v44  ;;  %12814 = vst [vmem:[#allocation93_spill] sm:$0xff] %v9052_v10  ;;  %v12816_v13 = vld [vmem:[#allocation45_spill] sm:$0xff] }
 0x47f   : > { %3912 = vmatpush.msra.mxu3 %v3716_v28  ;;  %3381 = vrot.lane.b32.xlu0 %v12815_v24, %s6502_s28  ;;  %v9060_v20 = vpop.permute.xlu0 %3461  ;;  %v9067_v10 = vpop.f32.mrf.mxu0  ;;  %v3649_v28 = vsel %vm540_vm4, %v8918_v56, %v8990_v40 }
 0x480   : > { %3053 = vmatpush.msrb.mxu0 %v12660_v17  ;;  %3118 = vmatpush.msrb.mxu1 %v12816_v13  ;;  %12817 = vst [vmem:[#allocation120_spill] sm:$0xff] %v9067_v10  ;;  %v3648_v17 = vsel %vm540_vm4, %v8948_v45, %v9022_v48  ;;  %v12820_v10 = vld [vmem:[#allocation41_spill] sm:$0xff]  ;;  %v3704_v25 = vmul.f32 %v3649_v28, %v12812_v61 }
 0x481   : > { %3913 = vmatpush.msra.mxu3 %v3712_v33  ;;  %2780 = vmatmul.f32.vlgmr.msra.gmra.mxu1 %v2347_v5  ;;  %v9073_v35 = vpop.f32.mrf.mxu2  ;;  %v3711_v33 = vmul.f32 %v3553_v11, %v12818_v7  ;;  %v12822_v11 = vld [vmem:[#allocation35_spill] sm:$0xff]  ;;  %v3700_v28 = vmul.f32 %v3648_v17, %v12812_v61 }
 0x482   : > { %12819 = vst [vmem:[#allocation106_spill] sm:$0xff] %v9073_v35  ;;  %2845 = vmatmul.f32.vlgmr.msra.gmra.mxu2 %v2347_v5  ;;  %3054 = vmatpush.msrb.mxu0 %v12799_v49  ;;  %v2348_v35 = vld [vmem:[#allocation2 + $0x108] sm:$0xff]  ;;  %v3647_v49 = vsel %vm540_vm4, %v8975_v14, %v9060_v20 }
 0x483   : > { %3119 = vmatpush.msrb.mxu1 %v12820_v10  ;;  %3847 = vmatpush.msra.mxu2 %v3715_v29  ;;  %v9085_v18 = vpop.permute.xlu2 %3437  ;;  %v9087_v5 = vpop.permute.xlu1 %3465  ;;  %v3547_v29 = vsel %vm540_vm4, %v9008_v16, %v8918_v56 }
 0x484   : > { %3914 = vmatpush.msra.mxu3 %v3708_v63  ;;  %3055 = vmatpush.msrb.mxu0 %v12815_v24  ;;  %v9094_v52 = vpop.f32.mrf.mxu1  ;;  %v3544_v63 = vsel %vm540_vm4, %v9035_v4, %v8948_v45  ;;  %v3707_v24 = vmul.f32 %v3550_v26, %v12818_v7  ;;  %v3541_v56 = vsel %vm540_vm4, %v9087_v5, %v8975_v14 }
 0x485   : > { %12821 = vst [vmem:[#allocation103_spill] sm:$0xff] %v9094_v52  ;;  %3120 = vmatpush.msrb.mxu1 %v12822_v11  ;;  %3848 = vmatpush.msra.mxu2 %v3711_v33  ;;  %v3696_v45 = vmul.f32 %v3647_v49, %v12812_v61  ;;  %v3703_v17 = vmul.f32 %v3547_v29, %v12818_v7 }
 0x486   : > { %3915 = vmatpush.msra.mxu3 %v3704_v25  ;;  %3387 = vrot.lane.b32.xlu2 %v12795_v60, %s6502_s28  ;;  %v9107_v52 = vpop.f32.mrf.mxu3  ;;  %v3699_v26 = vmul.f32 %v3544_v63, %v12818_v7  ;;  %v3695_v14 = vmul.f32 %v3541_v56, %v12818_v7 }
 0x487   : > { %12823 = vst [vmem:[#allocation98_spill] sm:$0xff] %v9107_v52  ;;  %3385 = vrot.lane.b32.xlu1 %v12794_v23, %s6502_s28  ;;  %2718 = vmatmul.f32.gmra.mxu0 %v2348_v35  ;;  %v9115_v33 = vpop.permute.xlu0 %3453 }
 0x488   : > { %2913 = vmatmul.f32.gmra.mxu3 %v2348_v35  ;;  %3849 = vmatpush.msra.mxu2 %v3707_v24  ;;  %v9119_v25 = vpop.f32.mrf.mxu0  ;;  %v3646_v52 = vsel %vm540_vm4, %v9006_v55, %v9115_v33 }
 0x489   : > { %12824 = vst [vmem:[#allocation86_spill] sm:$0xff] %v9119_v25  ;;  %3916 = vmatpush.msra.mxu3 %v3700_v28  ;;  %3431 = vrot.lane.b32.xlu0 %v12805_v51, %s6502_s28  ;;  %v3692_v49 = vmul.f32 %v3646_v52, %v12812_v61  ;;  %v2349_v25 = vld [vmem:[#allocation2 + $0x110] sm:$0xff] }
 0x48a   : > { %3850 = vmatpush.msra.mxu2 %v3703_v17  ;;  %2783 = vmatmul.f32.gmra.mxu1 %v2348_v35  ;;  %v9128_v24 = vpop.f32.mrf.mxu2 }
 0x48b   : > { %12825 = vst [vmem:[#allocation141_spill] sm:$0xff] %v9128_v24  ;;  %2848 = vmatmul.f32.gmra.mxu2 %v2348_v35  ;;  %3917 = vmatpush.msra.mxu3 %v3696_v45  ;;  %v3488_v29 = vpop.permute.xlu2 %3487  ;;  %v9130_v63 = vpop.permute.xlu1 %3457 }
 0x48c   : > { %3851 = vmatpush.msra.mxu2 %v3699_v26  ;;  %v3538_v28 = vsel %vm540_vm4, %v9130_v63, %v9006_v55  ;;  %v9135_v51 = vpop.f32.mrf.mxu1  ;;  %v12829_v26 = vld [vmem:[#allocation11_spill] sm:$0xff] }
 0x48d   : > { %12826 = vst [vmem:[#allocation27_spill] sm:$0xff] %v9135_v51  ;;  %3918 = vmatpush.msra.mxu3 %v3692_v49  ;;  %v3691_v52 = vmul.f32 %v3538_v28, %v12818_v7 }
 0x48e   : > { %3415 = vrot.lane.b32.xlu2 %v12810_v21, %s6502_s28  ;;  %3852 = vmatpush.msra.mxu2 %v3695_v14  ;;  %v9140_v35 = vpop.f32.mrf.mxu3  ;;  %v12830_v14 = vld [vmem:[#allocation15_spill] sm:$0xff] }
 0x48f   : > { %12827 = vst [vmem:[#allocation26_spill] sm:$0xff] %v9140_v35  ;;  %3423 = vrot.lane.b32.xlu1 %v12807_v38, %s6502_s28  ;;  %2721 = vmatmul.f32.gmra.mxu0 %v2349_v25  ;;  %v3504_v56 = vpop.permute.xlu0 %3503 }
 0x490   : > { %2916 = vmatmul.f32.gmra.mxu3 %v2349_v25  ;;  %v9144_v45 = vpop.f32.mrf.mxu0  ;;  %3853 = vmatpush.msra.mxu2 %v3691_v52  ;;  %v3554_v55 = vsel %vm540_vm4, %v8893_v31, %v3504_v56  ;;  %v3555_v17 = vsel %vm540_vm4, %v3504_v56, %v8914_v39  ;;  %v2350_v31 = vld [vmem:[#allocation2 + $0x118] sm:$0xff] }
 0x491   : > { %12828 = vst [vmem:[#allocation159_spill] sm:$0xff] %v9144_v45  ;;  %3407 = vrot.lane.b32.xlu0 %v12813_v44, %s6502_s28  ;;  %v3713_v49 = vmul.f32 %v3554_v55, %v12829_v26  ;;  %v3714_v28 = vmul.f32 %v3555_v17, %v12830_v14 }
 0x492   : > { %2786 = vmatmul.f32.gmra.mxu1 %v2349_v25  ;;  %v9154_v51 = vpop.f32.mrf.mxu2 }
 0x493   : > { %12831 = vst [vmem:[#allocation11_spill] sm:$0xff] %v9154_v51  ;;  %2851 = vmatmul.f32.gmra.mxu2 %v2349_v25  ;;  %v9156_v35 = vpop.permute.xlu2 %3435  ;;  %v9158_v52 = vpop.permute.xlu1 %3445  ;;  %3717 = vmatpush.msra.mxu0 %v3713_v49  ;;  %v2351_v51 = vld [vmem:[#allocation2 + $0x120] sm:$0xff] }
 0x494   : > { %v9160_v45 = vpop.f32.mrf.mxu1  ;;  %3782 = vmatpush.msra.mxu1 %v3714_v28 }
 0x495   : > { %12832 = vst [vmem:[#allocation15_spill] sm:$0xff] %v9160_v45 }
 0x496   : > { %3391 = vrot.lane.b32.xlu2 %v12820_v10, %s6502_s28  ;;  %v9164_v39 = vpop.f32.mrf.mxu3 }
 0x497   : > { %12833 = vst [vmem:[#allocation160_spill] sm:$0xff] %v9164_v39  ;;  %3399 = vrot.lane.b32.xlu1 %v12816_v13, %s6502_s28  ;;  %2724 = vmatmul.f32.gmra.mxu0 %v2350_v31  ;;  %v3452_v56 = vpop.permute.xlu0 %3451 }
 0x498   : > { %2919 = vmatmul.f32.gmra.mxu3 %v2350_v31  ;;  %v9168_v25 = vpop.f32.mrf.mxu0  ;;  %v3535_v55 = vsel %vm540_vm4, %v9033_v43, %v3452_v56  ;;  %v3645_v17 = vsel %vm540_vm4, %v3452_v56, %v9158_v52 }
 0x499   : > { %12834 = vst [vmem:[#allocation161_spill] sm:$0xff] %v9168_v25  ;;  %3383 = vrot.lane.b32.xlu0 %v12822_v11, %s6502_s28  ;;  %v3687_v49 = vmul.f32 %v3535_v55, %v12818_v7  ;;  %v3688_v28 = vmul.f32 %v3645_v17, %v12812_v61  ;;  %v3548_v55 = vsel %vm540_vm4, %v8961_v54, %v3488_v29  ;;  %s12837_s28 = smov 126  }
 0x49a   : > { %2789 = vmatmul.f32.gmra.mxu1 %v2350_v31  ;;  %v9178_v45 = vpop.f32.mrf.mxu2 }
 0x49b   : > { %12835 = vst [vmem:[#allocation162_spill] sm:$0xff] %v9178_v45  ;;  %2854 = vmatmul.f32.gmra.mxu2 %v2350_v31  ;;  %v9180_v39 = vpop.permute.xlu2 %3425  ;;  %v3496_v25 = vpop.permute.xlu1 %3495  ;;  %3919 = vmatpush.msra.mxu3 %v3688_v28  ;;  %v3549_v28 = vsel %vm540_vm4, %v3488_v29, %v8977_v15  ;;  %v2360_v45 = vld [vmem:[#allocation2 + $0x168] sm:$0xff] }
 0x49c   : > { %v3551_v24 = vsel %vm540_vm4, %v8932_v34, %v3496_v25  ;;  %v3552_v56 = vsel %vm540_vm4, %v3496_v25, %v8950_v3  ;;  %v9186_v11 = vpop.f32.mrf.mxu1  ;;  %3854 = vmatpush.msra.mxu2 %v3687_v49  ;;  %v3706_v15 = vmul.f32 %v3549_v28, %v12830_v14  ;;  %v2352_v49 = vld [vmem:[#allocation2 + $0x128] sm:$0xff] }
 0x49d   : > { %12836 = vst [vmem:[#allocation163_spill] sm:$0xff] %v9186_v11  ;;  %v3709_v17 = vmul.f32 %v3551_v24, %v12829_v26  ;;  %v3710_v31 = vmul.f32 %v3552_v56, %v12830_v14  ;;  %v3705_v24 = vmul.f32 %v3548_v55, %v12829_v26  ;;  %v2353_v11 = vld [vmem:[#allocation2 + $0x130] sm:$0xff] }
 0x49e   : > { %4182 = vrot.lane.b32.xlu2 %v7553_v6, %s12837_s28  ;;  %v9196_v34 = vpop.f32.mrf.mxu3 }
 0x49f   : > { %12838 = vst [vmem:[#allocation164_spill] sm:$0xff] %v9196_v34  ;;  %4178 = vrot.lane.b32.xlu1 %v12559_v1, %s12837_s28  ;;  %2727 = vmatmul.f32.gmra.mxu0 %v2351_v51  ;;  %v9200_v3 = vpop.permute.xlu0 %3441 }
 0x4a0   : > { %2922 = vmatmul.f32.gmra.mxu3 %v2351_v51  ;;  %v9202_v54 = vpop.f32.mrf.mxu0  ;;  %3718 = vmatpush.msra.mxu0 %v3709_v17 }
 0x4a1   : > { %12839 = vst [vmem:[#allocation165_spill] sm:$0xff] %v9202_v54  ;;  %4184 = vrot.lane.b32.xlu0 %v7546_v0, %s12837_s28  ;;  %3783 = vmatpush.msra.mxu1 %v3710_v31 }
 0x4a2   : > { %2792 = vmatmul.f32.gmra.mxu1 %v2351_v51  ;;  %v9208_v29 = vpop.f32.mrf.mxu2  ;;  %3719 = vmatpush.msra.mxu0 %v3705_v24 }
 0x4a3   : > { %12840 = vst [vmem:[#allocation166_spill] sm:$0xff] %v9208_v29  ;;  %2857 = vmatmul.f32.gmra.mxu2 %v2351_v51  ;;  %3784 = vmatpush.msra.mxu1 %v3706_v15  ;;  %v3444_v25 = vpop.permute.xlu1 %3443  ;;  %v9216_v54 = vpop.permute.xlu2 %3413 }
 0x4a4   : > { %v3532_v56 = vsel %vm540_vm4, %v9200_v3, %v3444_v25  ;;  %v3644_v55 = vsel %vm540_vm4, %v3444_v25, %v9085_v18  ;;  %v9214_v17 = vpop.f32.mrf.mxu1 }
 0x4a5   : > { %12841 = vst [vmem:[#allocation167_spill] sm:$0xff] %v9214_v17  ;;  %v3683_v31 = vmul.f32 %v3532_v56, %v12818_v7  ;;  %v3684_v28 = vmul.f32 %v3644_v55, %v12812_v61 }
 0x4a6   : > { %4174 = vrot.lane.b32.xlu2 %v12673_v41, %s12837_s28  ;;  %v9222_v51 = vpop.f32.mrf.mxu3 }
 0x4a7   : > { %12842 = vst [vmem:[#allocation168_spill] sm:$0xff] %v9222_v51  ;;  %4170 = vrot.lane.b32.xlu1 %v12587_v57, %s12837_s28  ;;  %2730 = vmatmul.f32.gmra.mxu0 %v2352_v49  ;;  %v9226_v24 = vpop.permute.xlu0 %3429 }
 0x4a8   : > { %2925 = vmatmul.f32.gmra.mxu3 %v2352_v49  ;;  %v9228_v15 = vpop.f32.mrf.mxu0  ;;  %3855 = vmatpush.msra.mxu2 %v3683_v31  ;;  %v3643_v25 = vsel %vm540_vm4, %v9156_v35, %v9226_v24 }
 0x4a9   : > { %12843 = vst [vmem:[#allocation169_spill] sm:$0xff] %v9228_v15  ;;  %4176 = vrot.lane.b32.xlu0 %v12671_v19, %s12837_s28  ;;  %3920 = vmatpush.msra.mxu3 %v3684_v28  ;;  %v3680_v56 = vmul.f32 %v3643_v25, %v12812_v61 }
 0x4aa   : > { %2795 = vmatmul.f32.gmra.mxu1 %v2352_v49  ;;  %v9236_v55 = vpop.f32.mrf.mxu2 }
 0x4ab   : > { %12844 = vst [vmem:[#allocation170_spill] sm:$0xff] %v9236_v55  ;;  %2860 = vmatmul.f32.gmra.mxu2 %v2352_v49  ;;  %v9238_v17 = vpop.permute.xlu1 %3433  ;;  %3921 = vmatpush.msra.mxu3 %v3680_v56  ;;  %v3464_v49 = vpop.permute.xlu2 %3463 }
 0x4ac   : > { %v3529_v31 = vsel %vm540_vm4, %v9238_v17, %v9156_v35  ;;  %v9243_v15 = vpop.f32.mrf.mxu1 }
 0x4ad   : > { %12845 = vst [vmem:[#allocation171_spill] sm:$0xff] %v9243_v15  ;;  %v3679_v51 = vmul.f32 %v3529_v31, %v12818_v7 }
 0x4ae   : > { %4166 = vrot.lane.b32.xlu2 %v12691_v32, %s12837_s28  ;;  %v9248_v28 = vpop.f32.mrf.mxu3 }
 0x4af   : > { %12846 = vst [vmem:[#allocation172_spill] sm:$0xff] %v9248_v28  ;;  %4162 = vrot.lane.b32.xlu1 %v12681_v62, %s12837_s28  ;;  %2733 = vmatmul.f32.gmra.mxu0 %v2353_v11  ;;  %v3480_v25 = vpop.permute.xlu0 %3479 }
 0x4b0   : > { %2928 = vmatmul.f32.gmra.mxu3 %v2353_v11  ;;  %v9252_v56 = vpop.f32.mrf.mxu0  ;;  %3856 = vmatpush.msra.mxu2 %v3679_v51  ;;  %v3545_v35 = vsel %vm540_vm4, %v8990_v40, %v3480_v25  ;;  %v3546_v31 = vsel %vm540_vm4, %v3480_v25, %v9008_v16  ;;  %v2354_v51 = vld [vmem:[#allocation2 + $0x138] sm:$0xff] }
 0x4b1   : > { %12847 = vst [vmem:[#allocation173_spill] sm:$0xff] %v9252_v56  ;;  %4168 = vrot.lane.b32.xlu0 %v12688_v47, %s12837_s28  ;;  %v3701_v15 = vmul.f32 %v3545_v35, %v12829_v26  ;;  %v3702_v28 = vmul.f32 %v3546_v31, %v12830_v14 }
 0x4b2   : > { %2798 = vmatmul.f32.gmra.mxu1 %v2353_v11  ;;  %v9262_v55 = vpop.f32.mrf.mxu2 }
 0x4b3   : > { %12848 = vst [vmem:[#allocation174_spill] sm:$0xff] %v9262_v55  ;;  %2863 = vmatmul.f32.gmra.mxu2 %v2353_v11  ;;  %v9264_v29 = vpop.permute.xlu1 %3421  ;;  %3720 = vmatpush.msra.mxu0 %v3701_v15 }
 0x4b4   : > { %v9266_v56 = vpop.f32.mrf.mxu1  ;;  %3785 = vmatpush.msra.mxu1 %v3702_v28 }
 0x4b5   : > { %12849 = vst [vmem:[#allocation175_spill] sm:$0xff] %v9266_v56 }
 0x4b6   : > { %4158 = vrot.lane.b32.xlu2 %v12702_v22, %s12837_s28  ;;  %v9270_v16 = vpop.f32.mrf.mxu3  ;;  %v9282_v28 = vpop.permute.xlu2 %3411 }
 0x4b7   : > { %12850 = vst [vmem:[#allocation176_spill] sm:$0xff] %v9270_v16  ;;  %4154 = vrot.lane.b32.xlu1 %v12695_v42, %s12837_s28  ;;  %2736 = vmatmul.f32.gmra.mxu0 %v2354_v51  ;;  %v3428_v40 = vpop.permute.xlu0 %3427  ;;  %v2355_v16 = vld [vmem:[#allocation2 + $0x140] sm:$0xff] }
 0x4b8   : > { %2931 = vmatmul.f32.gmra.mxu3 %v2354_v51  ;;  %v9274_v25 = vpop.f32.mrf.mxu0  ;;  %v3526_v11 = vsel %vm540_vm4, %v9180_v39, %v3428_v40  ;;  %v3642_v15 = vsel %vm540_vm4, %v3428_v40, %v9264_v29 }
 0x4b9   : > { %12851 = vst [vmem:[#allocation177_spill] sm:$0xff] %v9274_v25  ;;  %4160 = vrot.lane.b32.xlu0 %v12700_v9, %s12837_s28  ;;  %v3675_v35 = vmul.f32 %v3526_v11, %v12818_v7  ;;  %v3676_v31 = vmul.f32 %v3642_v15, %v12812_v61  ;;  %v3539_v11 = vsel %vm540_vm4, %v9060_v20, %v3464_v49 }
 0x4ba   : > { %2801 = vmatmul.f32.gmra.mxu1 %v2354_v51  ;;  %v9286_v56 = vpop.f32.mrf.mxu2 }
 0x4bb   : > { %12852 = vst [vmem:[#allocation178_spill] sm:$0xff] %v9286_v56  ;;  %2866 = vmatmul.f32.gmra.mxu2 %v2354_v51  ;;  %v3472_v25 = vpop.permute.xlu1 %3471  ;;  %3922 = vmatpush.msra.mxu3 %v3676_v31  ;;  %v3540_v51 = vsel %vm540_vm4, %v3464_v49, %v9087_v5 }
 0x4bc   : > { %v3542_v55 = vsel %vm540_vm4, %v9022_v48, %v3472_v25  ;;  %v3543_v40 = vsel %vm540_vm4, %v3472_v25, %v9035_v4  ;;  %v9292_v34 = vpop.f32.mrf.mxu1  ;;  %3857 = vmatpush.msra.mxu2 %v3675_v35  ;;  %v3694_v5 = vmul.f32 %v3540_v51, %v12830_v14  ;;  %v2356_v35 = vld [vmem:[#allocation2 + $0x148] sm:$0xff] }
 0x4bd   : > { %12853 = vst [vmem:[#allocation179_spill] sm:$0xff] %v9292_v34  ;;  %v3697_v15 = vmul.f32 %v3542_v55, %v12829_v26  ;;  %v3698_v56 = vmul.f32 %v3543_v40, %v12830_v14  ;;  %v3693_v55 = vmul.f32 %v3539_v11, %v12829_v26  ;;  %v2358_v34 = vld [vmem:[#allocation2 + $0x158] sm:$0xff] }
 0x4be   : > { %4150 = vrot.lane.b32.xlu2 %v12709_v53, %s12837_s28  ;;  %v9302_v48 = vpop.f32.mrf.mxu3 }
 0x4bf   : > { %12854 = vst [vmem:[#allocation180_spill] sm:$0xff] %v9302_v48  ;;  %4146 = vrot.lane.b32.xlu1 %v12705_v50, %s12837_s28  ;;  %2739 = vmatmul.f32.gmra.mxu0 %v2355_v16  ;;  %v9306_v4 = vpop.permute.xlu0 %3417 }
 0x4c0   : > { %2934 = vmatmul.f32.gmra.mxu3 %v2355_v16  ;;  %v9308_v20 = vpop.f32.mrf.mxu0  ;;  %3721 = vmatpush.msra.mxu0 %v3697_v15 }
 0x4c1   : > { %12855 = vst [vmem:[#allocation181_spill] sm:$0xff] %v9308_v20  ;;  %4152 = vrot.lane.b32.xlu0 %v12708_v36, %s12837_s28  ;;  %3786 = vmatpush.msra.mxu1 %v3698_v56 }
 0x4c2   : > { %2804 = vmatmul.f32.gmra.mxu1 %v2355_v16  ;;  %v9314_v49 = vpop.f32.mrf.mxu2  ;;  %3722 = vmatpush.msra.mxu0 %v3693_v55  ;;  %v9316_v25 = vpop.permute.xlu2 %3401 }
 0x4c3   : > { %12856 = vst [vmem:[#allocation182_spill] sm:$0xff] %v9314_v49  ;;  %2869 = vmatmul.f32.gmra.mxu2 %v2355_v16  ;;  %3787 = vmatpush.msra.mxu1 %v3694_v5 }
 0x4c4   : > { %v3420_v31 = vpop.permute.xlu1 %3419  ;;  %v9318_v40 = vpop.f32.mrf.mxu1 }
 0x4c5   : > { %12857 = vst [vmem:[#allocation183_spill] sm:$0xff] %v9318_v40  ;;  %v3523_v11 = vsel %vm540_vm4, %v9306_v4, %v3420_v31  ;;  %v3641_v56 = vsel %vm540_vm4, %v3420_v31, %v9216_v54  ;;  %v2357_v40 = vld [vmem:[#allocation2 + $0x150] sm:$0xff] }
 0x4c6   : > { %4142 = vrot.lane.b32.xlu2 %v12716_v8, %s12837_s28  ;;  %v9326_v15 = vpop.f32.mrf.mxu3  ;;  %v3671_v16 = vmul.f32 %v3523_v11, %v12818_v7  ;;  %v3672_v51 = vmul.f32 %v3641_v56, %v12812_v61 }
 0x4c7   : > { %12858 = vst [vmem:[#allocation184_spill] sm:$0xff] %v9326_v15  ;;  %4138 = vrot.lane.b32.xlu1 %v12712_v59, %s12837_s28  ;;  %2742 = vmatmul.f32.gmra.mxu0 %v2356_v35 }
 0x4c8   : > { %2937 = vmatmul.f32.gmra.mxu3 %v2356_v35  ;;  %3858 = vmatpush.msra.mxu2 %v3671_v16  ;;  %v9334_v55 = vpop.f32.mrf.mxu0 }
 0x4c9   : > { %4144 = vrot.lane.b32.xlu0 %v12715_v58, %s12837_s28  ;;  %12859 = vst [vmem:[#allocation185_spill] sm:$0xff] %v9334_v55  ;;  %3923 = vmatpush.msra.mxu3 %v3672_v51  ;;  %v9336_v5 = vpop.permute.xlu0 %3405 }
 0x4ca   : > { %2807 = vmatmul.f32.gmra.mxu1 %v2356_v35  ;;  %v3640_v31 = vsel %vm540_vm4, %v9282_v28, %v9336_v5  ;;  %v9341_v11 = vpop.f32.mrf.mxu2 }
 0x4cb   : > { %12860 = vst [vmem:[#allocation186_spill] sm:$0xff] %v9341_v11  ;;  %2872 = vmatmul.f32.gmra.mxu2 %v2356_v35  ;;  %v3668_v56 = vmul.f32 %v3640_v31, %v12812_v61 }
 0x4cc   : > { %v9350_v55 = vpop.f32.mrf.mxu1 }
 0x4cd   : > { %v9344_v16 = vpop.permute.xlu2 %3389  ;;  %3924 = vmatpush.msra.mxu3 %v3668_v56  ;;  %12861 = vst [vmem:[#allocation187_spill] sm:$0xff] %v9350_v55 }
 0x4ce   : > { %4134 = vrot.lane.b32.xlu2 %v12723_v37, %s12837_s28  ;;  %v9348_v51 = vpop.permute.xlu1 %3409  ;;  %v9357_v31 = vpop.f32.mrf.mxu3 }
 0x4cf   : > { %4130 = vrot.lane.b32.xlu1 %v12793_v2, %s12837_s28  ;;  %2745 = vmatmul.f32.gmra.mxu0 %v2357_v40  ;;  %v3520_v35 = vsel %vm540_vm4, %v9348_v51, %v9282_v28  ;;  %12862 = vst [vmem:[#allocation188_spill] sm:$0xff] %v9357_v31 }
 0x4d0   : > { %2940 = vmatmul.f32.gmra.mxu3 %v2357_v40  ;;  %v3667_v56 = vmul.f32 %v3520_v35, %v12818_v7  ;;  %v9362_v55 = vpop.f32.mrf.mxu0 }
 0x4d1   : > { %4136 = vrot.lane.b32.xlu0 %v12722_v46, %s12837_s28  ;;  %12863 = vst [vmem:[#allocation189_spill] sm:$0xff] %v9362_v55 }
 0x4d2   : > { %2810 = vmatmul.f32.gmra.mxu1 %v2357_v40  ;;  %3859 = vmatpush.msra.mxu2 %v3667_v56  ;;  %v9364_v20 = vpop.f32.mrf.mxu2 }
 0x4d3   : > { %2875 = vmatmul.f32.gmra.mxu2 %v2357_v40  ;;  %12864 = vst [vmem:[#allocation190_spill] sm:$0xff] %v9364_v20 }
 0x4d5   : > { %v3456_v11 = vpop.permute.xlu0 %3455  ;;  %v9375_v56 = vpop.f32.mrf.mxu1 }
 0x4d6   : > { %4122 = vrot.lane.b32.xlu2 %v12797_v30, %s12837_s28  ;;  %v3440_v28 = vpop.permute.xlu2 %3439  ;;  %v3536_v31 = vsel %vm540_vm4, %v9115_v33, %v3456_v11  ;;  %v3537_v35 = vsel %vm540_vm4, %v3456_v11, %v9130_v63  ;;  %12865 = vst [vmem:[#allocation191_spill] sm:$0xff] %v9375_v56  ;;  %v2359_v63 = vld [vmem:[#allocation2 + $0x160] sm:$0xff]  ;;  %v12869_v56 = vld [vmem:[#allocation126_spill] sm:$0xff] }
 0x4d7   : > { %4180 = vrot.lane.b32.xlu1 %v12726_v12, %s12837_s28  ;;  %2748 = vmatmul.f32.gmra.mxu0 %v2358_v34  ;;  %v3689_v40 = vmul.f32 %v3536_v31, %v12829_v26  ;;  %v3690_v55 = vmul.f32 %v3537_v35, %v12830_v14  ;;  %v9380_v20 = vpop.f32.mrf.mxu3  ;;  %v12870_v35 = vld [vmem:[#allocation70_spill] sm:$0xff] }
 0x4d8   : > { %2943 = vmatmul.f32.gmra.mxu3 %v2358_v34  ;;  %12866 = vst [vmem:[#allocation192_spill] sm:$0xff] %v9380_v20 }
 0x4d9   : > { %4126 = vrot.lane.b32.xlu0 %v12729_v27, %s12837_s28  ;;  %3723 = vmatpush.msra.mxu0 %v3689_v40 }
 0x4da   : > { %2813 = vmatmul.f32.gmra.mxu1 %v2358_v34 }
 0x4db   : > { %2878 = vmatmul.f32.gmra.mxu2 %v2358_v34  ;;  %v9382_v33 = vpop.permute.xlu1 %3397  ;;  %3788 = vmatpush.msra.mxu1 %v3690_v55  ;;  %v9384_v11 = vpop.f32.mrf.mxu0  ;;  %v12871_v34 = vld [vmem:[#allocation62_spill] sm:$0xff] }
 0x4dc   : > { %12867 = vst [vmem:[#allocation193_spill] sm:$0xff] %v9384_v11  ;;  %v9386_v31 = vpop.f32.mrf.mxu2 }
 0x4dd   : > { %12868 = vst [vmem:[#allocation194_spill] sm:$0xff] %v9386_v31 }
 0x4de   : > { %4172 = vrot.lane.b32.xlu2 %v12869_v56, %s12837_s28  ;;  %v12874_v56 = vld [vmem:[#allocation66_spill] sm:$0xff] }
 0x4df   : > { %4128 = vrot.lane.b32.xlu1 %v12870_v35, %s12837_s28  ;;  %2751 = vmatmul.f32.gmra.mxu0 %v2359_v63 }
 0x4e0   : > { %2946 = vmatmul.f32.gmra.mxu3 %v2359_v63  ;;  %v9392_v40 = vpop.permute.xlu2 %3387  ;;  %v3404_v20 = vpop.permute.xlu0 %3403 }
 0x4e1   : > { %4114 = vrot.lane.b32.xlu0 %v12871_v34, %s12837_s28  ;;  %v3517_v55 = vsel %vm540_vm4, %v9316_v25, %v3404_v20  ;;  %v3639_v11 = vsel %vm540_vm4, %v3404_v20, %v9382_v33  ;;  %v9400_v31 = vpop.f32.mrf.mxu1  ;;  %v9404_v48 = vpop.f32.mrf.mxu3 }
 0x4e2   : > { %2816 = vmatmul.f32.gmra.mxu1 %v2359_v63  ;;  %12872 = vst [vmem:[#allocation195_spill] sm:$0xff] %v9400_v31  ;;  %v3663_v15 = vmul.f32 %v3517_v55, %v12818_v7  ;;  %v3664_v49 = vmul.f32 %v3639_v11, %v12812_v61  ;;  %v3530_v55 = vsel %vm540_vm4, %v9085_v18, %v3440_v28  ;;  %v12878_v18 = vld [vmem:[#allocation114_spill] sm:$0xff] }
 0x4e3   : > { %2881 = vmatmul.f32.gmra.mxu2 %v2359_v63  ;;  %12873 = vst [vmem:[#allocation196_spill] sm:$0xff] %v9404_v48  ;;  %v12875_v63 = vld [vmem:[#allocation67_spill] sm:$0xff] }
 0x4e4   : > { %3860 = vmatpush.msra.mxu2 %v3663_v15  ;;  %3925 = vmatpush.msra.mxu3 %v3664_v49 }
 0x4e5   : > { %v3448_v34 = vpop.permute.xlu1 %3447 }
 0x4e6   : > { %4120 = vrot.lane.b32.xlu2 %v12874_v56, %s12837_s28  ;;  %v3533_v20 = vsel %vm540_vm4, %v9158_v52, %v3448_v34  ;;  %v3534_v31 = vsel %vm540_vm4, %v3448_v34, %v9033_v43  ;;  %v9416_v11 = vpop.f32.mrf.mxu0  ;;  %v3531_v52 = vsel %vm540_vm4, %v3440_v28, %v9200_v3  ;;  %v12881_v28 = vld [vmem:[#allocation63_spill] sm:$0xff] }
 0x4e7   : > { %4118 = vrot.lane.b32.xlu1 %v12875_v63, %s12837_s28  ;;  %2754 = vmatmul.f32.gmra.mxu0 %v2360_v45  ;;  %12876 = vst [vmem:[#allocation197_spill] sm:$0xff] %v9416_v11  ;;  %v3685_v49 = vmul.f32 %v3533_v20, %v12829_v26  ;;  %v3686_v15 = vmul.f32 %v3534_v31, %v12830_v14  ;;  %v9420_v48 = vpop.f32.mrf.mxu2  ;;  %v2361_v20 = vld [vmem:[#allocation2 + $0x170] sm:$0xff] }
 0x4e8   : > { %12877 = vst [vmem:[#allocation198_spill] sm:$0xff] %v9420_v48  ;;  %2949 = vmatmul.f32.gmra.mxu3 %v2360_v45  ;;  %v9424_v43 = vpop.permute.xlu2 %3415  ;;  %v9426_v34 = vpop.permute.xlu0 %3393  ;;  %v3681_v11 = vmul.f32 %v3530_v55, %v12829_v26  ;;  %v3682_v31 = vmul.f32 %v3531_v52, %v12830_v14 }
 0x4e9   : > { %4164 = vrot.lane.b32.xlu0 %v12878_v18, %s12837_s28  ;;  %3724 = vmatpush.msra.mxu0 %v3685_v49  ;;  %v12882_v49 = vld [vmem:[#allocation56_spill] sm:$0xff] }
 0x4ea   : > { %2819 = vmatmul.f32.gmra.mxu1 %v2360_v45 }
 0x4eb   : > { %2884 = vmatmul.f32.gmra.mxu2 %v2360_v45  ;;  %3789 = vmatpush.msra.mxu1 %v3686_v15 }
 0x4ec   : > { %3725 = vmatpush.msra.mxu0 %v3681_v11  ;;  %v9432_v48 = vpop.f32.mrf.mxu1 }
 0x4ed   : > { %12879 = vst [vmem:[#allocation199_spill] sm:$0xff] %v9432_v48  ;;  %3790 = vmatpush.msra.mxu1 %v3682_v31  ;;  %v9434_v3 = vpop.f32.mrf.mxu3  ;;  %v12883_v31 = vld [vmem:[#allocation61_spill] sm:$0xff] }
 0x4ee   : > { %12880 = vst [vmem:[#allocation200_spill] sm:$0xff] %v9434_v3  ;;  %4110 = vrot.lane.b32.xlu2 %v12881_v28, %s12837_s28  ;;  %v3396_v56 = vpop.permute.xlu1 %3395 }
 0x4ef   : > { %4106 = vrot.lane.b32.xlu1 %v12882_v49, %s12837_s28  ;;  %2757 = vmatmul.f32.gmra.mxu0 %v2361_v20  ;;  %v3514_v45 = vsel %vm540_vm4, %v9426_v34, %v3396_v56  ;;  %v3638_v55 = vsel %vm540_vm4, %v3396_v56, %v9344_v16 }
 0x4f0   : > { %2952 = vmatmul.f32.gmra.mxu3 %v2361_v20  ;;  %v9444_v11 = vpop.permute.xlu2 %3391  ;;  %v3659_v15 = vmul.f32 %v3514_v45, %v12818_v7  ;;  %v3660_v52 = vmul.f32 %v3638_v55, %v12812_v61  ;;  %v2362_v55 = vld [vmem:[#allocation2 + $0x178] sm:$0xff] }
 0x4f1   : > { %4112 = vrot.lane.b32.xlu0 %v12883_v31, %s12837_s28  ;;  %v9450_v48 = vpop.f32.mrf.mxu0  ;;  %v9452_v3 = vpop.permute.xlu0 %3381  ;;  %v12887_v31 = vld [vmem:[#allocation102_spill] sm:$0xff] }
 0x4f2   : > { %12884 = vst [vmem:[#allocation201_spill] sm:$0xff] %v9450_v48  ;;  %2822 = vmatmul.f32.gmra.mxu1 %v2361_v20  ;;  %3861 = vmatpush.msra.mxu2 %v3659_v15  ;;  %v3637_v56 = vsel %vm540_vm4, %v9392_v40, %v9452_v3  ;;  %v9457_v28 = vpop.f32.mrf.mxu2  ;;  %v12886_v48 = vld [vmem:[#allocation52_spill] sm:$0xff] }
 0x4f3   : > { %2887 = vmatmul.f32.gmra.mxu2 %v2361_v20  ;;  %3926 = vmatpush.msra.mxu3 %v3660_v52  ;;  %v3656_v45 = vmul.f32 %v3637_v56, %v12812_v61  ;;  %v12889_v61 = vld [vmem:[#allocation59_spill] sm:$0xff] }
 0x4f5   : > { %v9460_v18 = vpop.f32.mrf.mxu1  ;;  %3927 = vmatpush.msra.mxu3 %v3656_v45 }
 0x4f6   : > { %12885 = vst [vmem:[#allocation202_spill] sm:$0xff] %v9460_v18  ;;  %4098 = vrot.lane.b32.xlu2 %v12886_v48, %s12837_s28 }
 0x4f7   : > { %4156 = vrot.lane.b32.xlu1 %v12887_v31, %s12837_s28  ;;  %2760 = vmatmul.f32.gmra.mxu0 %v2362_v55  ;;  %v9466_v15 = vpop.f32.mrf.mxu3 }
 0x4f8   : > { %12888 = vst [vmem:[#allocation203_spill] sm:$0xff] %v9466_v15  ;;  %2955 = vmatmul.f32.gmra.mxu3 %v2362_v55  ;;  %v9468_v49 = vpop.permute.xlu2 %4182 }
 0x4f9   : > { %v9470_v20 = vpop.permute.xlu1 %3385  ;;  %4102 = vrot.lane.b32.xlu0 %v12889_v61, %s12837_s28  ;;  %v3024_v61 = vld [vmem:[#allocation2 + $0x180] sm:$0xff] }
 0x4fa   : > { %v3511_v52 = vsel %vm540_vm4, %v9470_v20, %v9392_v40  ;;  %2825 = vmatmul.f32.gmra.mxu1 %v2362_v55  ;;  %v9477_v56 = vpop.f32.mrf.mxu0 }
 0x4fb   : > { %12890 = vst [vmem:[#allocation204_spill] sm:$0xff] %v9477_v56  ;;  %2890 = vmatmul.f32.gmra.mxu2 %v2362_v55  ;;  %v3655_v45 = vmul.f32 %v3511_v52, %v12818_v7  ;;  %v3432_v18 = vpop.permute.xlu0 %3431  ;;  %v9480_v15 = vpop.f32.mrf.mxu2  ;;  %v12891_v56 = vld [vmem:[#allocation95_spill] sm:$0xff]  ;;  %v12893_v7 = vld [vmem:[#allocation58_spill] sm:$0xff] }
 0x4fc   : > { %v3527_v48 = vsel %vm540_vm4, %v9226_v24, %v3432_v18  ;;  %v3528_v31 = vsel %vm540_vm4, %v3432_v18, %v9238_v17  ;;  %v12894_v18 = vld [vmem:[#allocation49_spill] sm:$0xff] }
 0x4fd   : > { %3862 = vmatpush.msra.mxu2 %v3655_v45  ;;  %v3677_v63 = vmul.f32 %v3527_v48, %v12829_v26  ;;  %v3678_v40 = vmul.f32 %v3528_v31, %v12830_v14  ;;  %v3521_v31 = vsel %vm540_vm4, %v9216_v54, %v9424_v43 }
 0x4fe   : > { %4148 = vrot.lane.b32.xlu2 %v12891_v56, %s12837_s28  ;;  %v9490_v55 = vpop.f32.mrf.mxu1 }
 0x4ff   : > { %12892 = vst [vmem:[#allocation205_spill] sm:$0xff] %v9490_v55  ;;  %4104 = vrot.lane.b32.xlu1 %v12893_v7, %s12837_s28  ;;  %3056 = vmatmul.f32.vlgmr.msrb.gmra.mxu0 %v3024_v61 }
 0x500   : > { %3251 = vmatmul.f32.vlgmr.msrb.gmra.mxu3 %v3024_v61  ;;  %v9494_v24 = vpop.permute.xlu2 %4174  ;;  %3726 = vmatpush.msra.mxu0 %v3677_v63  ;;  %v9498_v48 = vpop.f32.mrf.mxu3  ;;  %v3522_v63 = vsel %vm540_vm4, %v9424_v43, %v9306_v4  ;;  %v3669_v4 = vmul.f32 %v3521_v31, %v12829_v26  ;;  %v3025_v43 = vld [vmem:[#allocation2 + $0x188] sm:$0xff]  ;;  %v3512_v31 = vsel %vm540_vm4, %v9344_v16, %v9444_v11 }
 0x501   : > { %v3424_v17 = vpop.permute.xlu1 %3423  ;;  %3791 = vmatpush.msra.mxu1 %v3678_v40  ;;  %4090 = vrot.lane.b32.xlu0 %v12894_v18, %s12837_s28 }
 0x502   : > { %v3524_v52 = vsel %vm540_vm4, %v9264_v29, %v3424_v17  ;;  %v3525_v45 = vsel %vm540_vm4, %v3424_v17, %v9180_v39  ;;  %3121 = vmatmul.f32.vlgmr.msrb.gmra.mxu1 %v3024_v61  ;;  %v12896_v17 = vld [vmem:[#allocation55_spill] sm:$0xff] }
 0x503   : > { %3186 = vmatmul.f32.vlgmr.msrb.gmra.mxu2 %v3024_v61  ;;  %v3673_v40 = vmul.f32 %v3524_v52, %v12829_v26  ;;  %v3674_v55 = vmul.f32 %v3525_v45, %v12830_v14  ;;  %v3408_v18 = vpop.permute.xlu0 %3407  ;;  %v3670_v52 = vmul.f32 %v3522_v63, %v12830_v14 }
 0x504   : > { %v9512_v56 = vpop.f32.mrf.mxu0  ;;  %v3518_v54 = vsel %vm540_vm4, %v9336_v5, %v3408_v18  ;;  %v3519_v29 = vsel %vm540_vm4, %v3408_v18, %v9348_v51  ;;  %v12897_v5 = vld [vmem:[#allocation54_spill] sm:$0xff] }
 0x505   : > { %12895 = vst [vmem:[#allocation206_spill] sm:$0xff] %v9512_v56  ;;  %3727 = vmatpush.msra.mxu0 %v3673_v40  ;;  %3792 = vmatpush.msra.mxu1 %v3674_v55  ;;  %v9518_v39 = vpop.f32.mrf.mxu2  ;;  %v3665_v61 = vmul.f32 %v3518_v54, %v12829_v26  ;;  %v3666_v45 = vmul.f32 %v3519_v29, %v12830_v14  ;;  %v12899_v54 = vld [vmem:[#allocation84_spill] sm:$0xff] }
 0x506   : > { %4096 = vrot.lane.b32.xlu2 %v12896_v17, %s12837_s28  ;;  %v3513_v29 = vsel %vm540_vm4, %v9444_v11, %v9426_v34  ;;  %v3657_v34 = vmul.f32 %v3512_v31, %v12829_v26  ;;  %v3026_v11 = vld [vmem:[#allocation2 + $0x190] sm:$0xff] }
 0x507   : > { %4094 = vrot.lane.b32.xlu1 %v12897_v5, %s12837_s28  ;;  %3728 = vmatpush.msra.mxu0 %v3669_v4  ;;  %v9528_v51 = vpop.f32.mrf.mxu1 }
 0x508   : > { %12898 = vst [vmem:[#allocation207_spill] sm:$0xff] %v9528_v51  ;;  %3793 = vmatpush.msra.mxu1 %v3670_v52  ;;  %3059 = vmatmul.f32.gmra.mxu0 %v3025_v43  ;;  %v9530_v55 = vpop.permute.xlu2 %4166 }
 0x509   : > { %3254 = vmatmul.f32.gmra.mxu3 %v3025_v43  ;;  %v3400_v18 = vpop.permute.xlu1 %3399  ;;  %3729 = vmatpush.msra.mxu0 %v3665_v61 }
 0x50a   : > { %v3515_v63 = vsel %vm540_vm4, %v9382_v33, %v3400_v18  ;;  %v3516_v40 = vsel %vm540_vm4, %v3400_v18, %v9316_v25  ;;  %3794 = vmatpush.msra.mxu1 %v3666_v45  ;;  %4140 = vrot.lane.b32.xlu0 %v12899_v54, %s12837_s28  ;;  %v12901_v18 = vld [vmem:[#allocation51_spill] sm:$0xff] }
 0x50b   : > { %v9544_v4 = vpop.f32.mrf.mxu3  ;;  %3124 = vmatmul.f32.gmra.mxu1 %v3025_v43  ;;  %3189 = vmatmul.f32.gmra.mxu2 %v3025_v43  ;;  %v3661_v16 = vmul.f32 %v3515_v63, %v12829_v26  ;;  %v3662_v61 = vmul.f32 %v3516_v40, %v12830_v14  ;;  %v3384_v33 = vpop.permute.xlu0 %3383  ;;  %v3658_v40 = vmul.f32 %v3513_v29, %v12830_v14 }
 0x50c   : > { %v9548_v52 = vpop.f32.mrf.mxu0  ;;  %v3509_v25 = vsel %vm540_vm4, %v9452_v3, %v3384_v33  ;;  %v3510_v45 = vsel %vm540_vm4, %v3384_v33, %v9470_v20  ;;  %v12902_v3 = vld [vmem:[#allocation44_spill] sm:$0xff] }
 0x50d   : > { %12900 = vst [vmem:[#allocation208_spill] sm:$0xff] %v9548_v52  ;;  %3730 = vmatpush.msra.mxu0 %v3661_v16  ;;  %3795 = vmatpush.msra.mxu1 %v3662_v61  ;;  %v3653_v43 = vmul.f32 %v3509_v25, %v12829_v26  ;;  %v3654_v52 = vmul.f32 %v3510_v45, %v12830_v14  ;;  %v12904_v16 = vld [vmem:[#allocation50_spill] sm:$0xff]  ;;  %v12906_v45 = vld [vmem:[#allocation23_spill] sm:$0xff] }
 0x50e   : > { %4086 = vrot.lane.b32.xlu2 %v12901_v18, %s12837_s28  ;;  %v9558_v63 = vpop.f32.mrf.mxu2 }
 0x50f   : > { %4082 = vrot.lane.b32.xlu1 %v12902_v3, %s12837_s28  ;;  %3731 = vmatpush.msra.mxu0 %v3657_v34  ;;  %v9564_v20 = vpop.f32.mrf.mxu1 }
 0x510   : > { %12903 = vst [vmem:[#allocation209_spill] sm:$0xff] %v9564_v20  ;;  %3796 = vmatpush.msra.mxu1 %v3658_v40  ;;  %3062 = vmatmul.f32.gmra.mxu0 %v3026_v11  ;;  %v9566_v31 = vpop.permute.xlu2 %4158  ;;  %v3027_v40 = vld [vmem:[#allocation2 + $0x198] sm:$0xff]  ;;  %v12908_v20 = vld [vmem:[#allocation40_spill] sm:$0xff] }
 0x511   : > { %3257 = vmatmul.f32.gmra.mxu3 %v3026_v11  ;;  %v9568_v26 = vpop.permute.xlu1 %4178  ;;  %3732 = vmatpush.msra.mxu0 %v3653_v43  ;;  %v12907_v43 = vld [vmem:[#allocation24_spill] sm:$0xff] }
 0x512   : > { %3797 = vmatpush.msra.mxu1 %v3654_v52  ;;  %4088 = vrot.lane.b32.xlu0 %v12904_v16, %s12837_s28 }
 0x513   : > { %v9572_v29 = vpop.f32.mrf.mxu3  ;;  %3127 = vmatmul.f32.gmra.mxu1 %v3026_v11  ;;  %3192 = vmatmul.f32.gmra.mxu2 %v3026_v11  ;;  %v4185_v14 = vpop.permute.xlu0 %4184  ;;  %v12909_v11 = vld [vmem:[#allocation76_spill] sm:$0xff] }
 0x514   : > { %v9574_v61 = vpop.f32.mrf.mxu0  ;;  %v4233_v33 = vsel %vm566_vm3, %v9468_v49, %v4185_v14  ;;  %v4329_v25 = vsel %vm566_vm3, %v4185_v14, %v9568_v26 }
 0x515   : > { %12905 = vst [vmem:[#allocation210_spill] sm:$0xff] %v9574_v61  ;;  %v4392_v34 = vmul.f32 %v4233_v33, %v12906_v45  ;;  %v4393_v52 = vmul.f32 %v4329_v25, %v12907_v43  ;;  %v12911_v33 = vld [vmem:[#allocation47_spill] sm:$0xff] }
 0x516   : > { %4074 = vrot.lane.b32.xlu2 %v12908_v20, %s12837_s28  ;;  %v9584_v51 = vpop.f32.mrf.mxu2 }
 0x517   : > { %4132 = vrot.lane.b32.xlu1 %v12909_v11, %s12837_s28  ;;  %v9588_v61 = vpop.f32.mrf.mxu1  ;;  %4524 = vmatpush.msrb.mxu2 %v4392_v34 }
 0x518   : > { %12910 = vst [vmem:[#allocation23_spill] sm:$0xff] %v9588_v61  ;;  %3065 = vmatmul.f32.gmra.mxu0 %v3027_v40  ;;  %v9590_v56 = vpop.permute.xlu2 %4150  ;;  %4589 = vmatpush.msrb.mxu3 %v4393_v52  ;;  %v3028_v52 = vld [vmem:[#allocation2 + $0x1a0] sm:$0xff] }
 0x519   : > { %3260 = vmatmul.f32.gmra.mxu3 %v3027_v40  ;;  %v9592_v14 = vpop.permute.xlu1 %4170 }
 0x51a   : > { %4078 = vrot.lane.b32.xlu0 %v12911_v33, %s12837_s28  ;;  %v12913_v33 = vld [vmem:[#allocation69_spill] sm:$0xff] }
 0x51b   : > { %v9596_v25 = vpop.f32.mrf.mxu3  ;;  %3130 = vmatmul.f32.gmra.mxu1 %v3027_v40  ;;  %3195 = vmatmul.f32.gmra.mxu2 %v3027_v40  ;;  %v4177_v20 = vpop.permute.xlu0 %4176  ;;  %v12915_v40 = vld [vmem:[#allocation46_spill] sm:$0xff] }
 0x51c   : > { %v9598_v16 = vpop.f32.mrf.mxu0  ;;  %v4230_v34 = vsel %vm566_vm3, %v9494_v24, %v4177_v20  ;;  %v4328_v61 = vsel %vm566_vm3, %v4177_v20, %v9592_v14 }
 0x51d   : > { %12912 = vst [vmem:[#allocation24_spill] sm:$0xff] %v9598_v16  ;;  %v4388_v11 = vmul.f32 %v4230_v34, %v12906_v45  ;;  %v4389_v18 = vmul.f32 %v4328_v61, %v12907_v43  ;;  %v12917_v61 = vld [vmem:[#allocation37_spill] sm:$0xff] }
 0x51e   : > { %4124 = vrot.lane.b32.xlu2 %v12913_v33, %s12837_s28  ;;  %v9608_v54 = vpop.f32.mrf.mxu2 }
 0x51f   : > { %12914 = vst [vmem:[#allocation211_spill] sm:$0xff] %v9608_v54  ;;  %4080 = vrot.lane.b32.xlu1 %v12915_v40, %s12837_s28  ;;  %v9612_v16 = vpop.f32.mrf.mxu1  ;;  %4525 = vmatpush.msrb.mxu2 %v4388_v11 }
 0x520   : > { %12916 = vst [vmem:[#allocation212_spill] sm:$0xff] %v9612_v16  ;;  %3068 = vmatmul.f32.gmra.mxu0 %v3028_v52  ;;  %v9614_v3 = vpop.permute.xlu2 %4142  ;;  %4590 = vmatpush.msrb.mxu3 %v4389_v18  ;;  %v3029_v18 = vld [vmem:[#allocation2 + $0x1a8] sm:$0xff] }
 0x521   : > { %3263 = vmatmul.f32.gmra.mxu3 %v3028_v52  ;;  %v9616_v20 = vpop.permute.xlu1 %4162 }
 0x522   : > { %4066 = vrot.lane.b32.xlu0 %v12917_v61, %s12837_s28  ;;  %v12920_v61 = vld [vmem:[#allocation43_spill] sm:$0xff] }
 0x523   : > { %v9620_v34 = vpop.f32.mrf.mxu3  ;;  %3133 = vmatmul.f32.gmra.mxu1 %v3028_v52  ;;  %3198 = vmatmul.f32.gmra.mxu2 %v3028_v52  ;;  %v4169_v33 = vpop.permute.xlu0 %4168  ;;  %v12922_v52 = vld [vmem:[#allocation42_spill] sm:$0xff] }
 0x524   : > { %12918 = vst [vmem:[#allocation213_spill] sm:$0xff] %v9620_v34  ;;  %v9622_v17 = vpop.f32.mrf.mxu0  ;;  %v4227_v11 = vsel %vm566_vm3, %v9530_v55, %v4169_v33  ;;  %v4327_v16 = vsel %vm566_vm3, %v4169_v33, %v9616_v20 }
 0x525   : > { %12919 = vst [vmem:[#allocation214_spill] sm:$0xff] %v9622_v17  ;;  %v4384_v40 = vmul.f32 %v4227_v11, %v12906_v45  ;;  %v4385_v5 = vmul.f32 %v4327_v16, %v12907_v43  ;;  %v12924_v16 = vld [vmem:[#allocation64_spill] sm:$0xff] }
 0x526   : > { %4072 = vrot.lane.b32.xlu2 %v12920_v61, %s12837_s28  ;;  %v9632_v7 = vpop.f32.mrf.mxu2 }
 0x527   : > { %12921 = vst [vmem:[#allocation215_spill] sm:$0xff] %v9632_v7  ;;  %4070 = vrot.lane.b32.xlu1 %v12922_v52, %s12837_s28  ;;  %v9636_v17 = vpop.f32.mrf.mxu1  ;;  %4526 = vmatpush.msrb.mxu2 %v4384_v40 }
 0x528   : > { %12923 = vst [vmem:[#allocation216_spill] sm:$0xff] %v9636_v17  ;;  %3071 = vmatmul.f32.gmra.mxu0 %v3029_v18  ;;  %v9638_v34 = vpop.permute.xlu2 %4134  ;;  %4591 = vmatpush.msrb.mxu3 %v4385_v5  ;;  %v3030_v5 = vld [vmem:[#allocation2 + $0x1b0] sm:$0xff] }
 0x529   : > { %3266 = vmatmul.f32.gmra.mxu3 %v3029_v18  ;;  %v9640_v33 = vpop.permute.xlu1 %4154 }
 0x52a   : > { %4116 = vrot.lane.b32.xlu0 %v12924_v16, %s12837_s28 }
 0x52b   : > { %v9644_v11 = vpop.f32.mrf.mxu3  ;;  %3136 = vmatmul.f32.gmra.mxu1 %v3029_v18  ;;  %3201 = vmatmul.f32.gmra.mxu2 %v3029_v18  ;;  %v4161_v61 = vpop.permute.xlu0 %4160  ;;  %v12928_v18 = vld [vmem:[#allocation36_spill] sm:$0xff] }
 0x52c   : > { %12925 = vst [vmem:[#allocation217_spill] sm:$0xff] %v9644_v11  ;;  %v9646_v7 = vpop.f32.mrf.mxu0  ;;  %v4224_v40 = vsel %vm566_vm3, %v9566_v31, %v4161_v61  ;;  %v4326_v17 = vsel %vm566_vm3, %v4161_v61, %v9640_v33 }
 0x52d   : > { %12926 = vst [vmem:[#allocation218_spill] sm:$0xff] %v9646_v7  ;;  %v4380_v52 = vmul.f32 %v4224_v40, %v12906_v45  ;;  %v4381_v54 = vmul.f32 %v4326_v17, %v12907_v43 }
 0x52e   : > { %4062 = vrot.lane.b32.xlu2 %v12794_v23, %s12837_s28  ;;  %v9656_v16 = vpop.f32.mrf.mxu2 }
 0x52f   : > { %12927 = vst [vmem:[#allocation219_spill] sm:$0xff] %v9656_v16  ;;  %4058 = vrot.lane.b32.xlu1 %v12928_v18, %s12837_s28  ;;  %v9660_v7 = vpop.f32.mrf.mxu1  ;;  %4527 = vmatpush.msrb.mxu2 %v4380_v52 }
 0x530   : > { %12929 = vst [vmem:[#allocation220_spill] sm:$0xff] %v9660_v7  ;;  %3074 = vmatmul.f32.gmra.mxu0 %v3030_v5  ;;  %v9662_v11 = vpop.permute.xlu2 %4122  ;;  %4592 = vmatpush.msrb.mxu3 %v4381_v54  ;;  %v3031_v54 = vld [vmem:[#allocation2 + $0x1b8] sm:$0xff] }
 0x531   : > { %3269 = vmatmul.f32.gmra.mxu3 %v3030_v5  ;;  %v9664_v61 = vpop.permute.xlu1 %4146 }
 0x532   : > { %4064 = vrot.lane.b32.xlu0 %v12795_v60, %s12837_s28 }
 0x533   : > { %v9668_v17 = vpop.f32.mrf.mxu3  ;;  %3139 = vmatmul.f32.gmra.mxu1 %v3030_v5  ;;  %3204 = vmatmul.f32.gmra.mxu2 %v3030_v5  ;;  %v4153_v40 = vpop.permute.xlu0 %4152  ;;  %v12933_v5 = vld [vmem:[#allocation60_spill] sm:$0xff] }
 0x534   : > { %12930 = vst [vmem:[#allocation221_spill] sm:$0xff] %v9668_v17  ;;  %v9670_v23 = vpop.f32.mrf.mxu0  ;;  %v4221_v52 = vsel %vm566_vm3, %v9590_v56, %v4153_v40  ;;  %v4325_v7 = vsel %vm566_vm3, %v4153_v40, %v9664_v61 }
 0x535   : > { %12931 = vst [vmem:[#allocation222_spill] sm:$0xff] %v9670_v23  ;;  %v4376_v18 = vmul.f32 %v4221_v52, %v12906_v45  ;;  %v4377_v16 = vmul.f32 %v4325_v7, %v12907_v43 }
 0x536   : > { %4100 = vrot.lane.b32.xlu2 %v12807_v38, %s12837_s28  ;;  %v9680_v60 = vpop.f32.mrf.mxu2 }
 0x537   : > { %12932 = vst [vmem:[#allocation223_spill] sm:$0xff] %v9680_v60  ;;  %4108 = vrot.lane.b32.xlu1 %v12933_v5, %s12837_s28  ;;  %v9684_v23 = vpop.f32.mrf.mxu1  ;;  %4528 = vmatpush.msrb.mxu2 %v4376_v18 }
 0x538   : > { %12934 = vst [vmem:[#allocation224_spill] sm:$0xff] %v9684_v23  ;;  %3077 = vmatmul.f32.gmra.mxu0 %v3031_v54  ;;  %v4173_v17 = vpop.permute.xlu2 %4172  ;;  %4593 = vmatpush.msrb.mxu3 %v4377_v16  ;;  %v3032_v16 = vld [vmem:[#allocation2 + $0x1c0] sm:$0xff] }
 0x539   : > { %3272 = vmatmul.f32.gmra.mxu3 %v3031_v54  ;;  %v9686_v40 = vpop.permute.xlu1 %4138 }
 0x53a   : > { %4092 = vrot.lane.b32.xlu0 %v12810_v21, %s12837_s28 }
 0x53b   : > { %v9690_v7 = vpop.f32.mrf.mxu3  ;;  %3142 = vmatmul.f32.gmra.mxu1 %v3031_v54  ;;  %3207 = vmatmul.f32.gmra.mxu2 %v3031_v54  ;;  %v4145_v52 = vpop.permute.xlu0 %4144 }
 0x53c   : > { %12935 = vst [vmem:[#allocation225_spill] sm:$0xff] %v9690_v7  ;;  %v9692_v38 = vpop.f32.mrf.mxu0  ;;  %v4218_v23 = vsel %vm566_vm3, %v9614_v3, %v4145_v52  ;;  %v4324_v18 = vsel %vm566_vm3, %v4145_v52, %v9686_v40 }
 0x53d   : > { %12936 = vst [vmem:[#allocation226_spill] sm:$0xff] %v9692_v38  ;;  %v4372_v5 = vmul.f32 %v4218_v23, %v12906_v45  ;;  %v4373_v60 = vmul.f32 %v4324_v18, %v12907_v43 }
 0x53e   : > { %4076 = vrot.lane.b32.xlu2 %v12816_v13, %s12837_s28  ;;  %v9702_v21 = vpop.f32.mrf.mxu2 }
 0x53f   : > { %12937 = vst [vmem:[#allocation227_spill] sm:$0xff] %v9702_v21  ;;  %4084 = vrot.lane.b32.xlu1 %v12813_v44, %s12837_s28  ;;  %v9706_v54 = vpop.f32.mrf.mxu1  ;;  %4529 = vmatpush.msrb.mxu2 %v4372_v5 }
 0x540   : > { %12938 = vst [vmem:[#allocation228_spill] sm:$0xff] %v9706_v54  ;;  %3080 = vmatmul.f32.gmra.mxu0 %v3032_v16  ;;  %v9708_v38 = vpop.permute.xlu2 %4120  ;;  %4594 = vmatpush.msrb.mxu3 %v4373_v60  ;;  %v3033_v60 = vld [vmem:[#allocation2 + $0x1c8] sm:$0xff] }
 0x541   : > { %3275 = vmatmul.f32.gmra.mxu3 %v3032_v16  ;;  %v9710_v52 = vpop.permute.xlu1 %4130 }
 0x542   : > { %4068 = vrot.lane.b32.xlu0 %v12820_v10, %s12837_s28 }
 0x543   : > { %v9714_v23 = vpop.f32.mrf.mxu3  ;;  %3145 = vmatmul.f32.gmra.mxu1 %v3032_v16  ;;  %3210 = vmatmul.f32.gmra.mxu2 %v3032_v16  ;;  %v4137_v18 = vpop.permute.xlu0 %4136  ;;  %v12943_v16 = vld [vmem:[#allocation35_spill] sm:$0xff] }
 0x544   : > { %12939 = vst [vmem:[#allocation229_spill] sm:$0xff] %v9714_v23  ;;  %v9716_v13 = vpop.f32.mrf.mxu0  ;;  %v4215_v5 = vsel %vm566_vm3, %v9638_v34, %v4137_v18  ;;  %v4323_v54 = vsel %vm566_vm3, %v4137_v18, %v9710_v52 }
 0x545   : > { %12940 = vst [vmem:[#allocation230_spill] sm:$0xff] %v9716_v13  ;;  %v4368_v44 = vmul.f32 %v4215_v5, %v12906_v45  ;;  %v4369_v21 = vmul.f32 %v4323_v54, %v12907_v43  ;;  %v4228_v54 = vsel %vm566_vm3, %v9592_v14, %v4173_v17 }
 0x546   : > { %4855 = vrot.lane.b32.xlu2 %v12559_v1, %s12941_s29  ;;  %v9726_v10 = vpop.f32.mrf.mxu2 }
 0x547   : > { %12942 = vst [vmem:[#allocation231_spill] sm:$0xff] %v9726_v10  ;;  %4060 = vrot.lane.b32.xlu1 %v12943_v16, %s12837_s28  ;;  %v9730_v13 = vpop.f32.mrf.mxu1  ;;  %4530 = vmatpush.msrb.mxu2 %v4368_v44  ;;  %v4229_v44 = vsel %vm566_vm3, %v4173_v17, %v9494_v24  ;;  %s6175_s28 = scalar_lea.hbm %s12055_s9, %s6333_s22  ;;  %s6447_s22 = scalar_lea.hbm %s12055_s9, 64 }
 0x548   : > { %12944 = vst [vmem:[#allocation232_spill] sm:$0xff] %v9730_v13  ;;  %3083 = vmatmul.f32.gmra.mxu0 %v3033_v60  ;;  %v9732_v23 = vpop.permute.xlu2 %4110  ;;  %4595 = vmatpush.msrb.mxu3 %v4369_v21  ;;  %v12945_v13 = vld [vmem:[#allocation10_spill] sm:$0xff]  ;;  %s6179_s16 = sshll.u32 %s6175_s28, 4  ;;  %s6180_s16 = int_to_ptr.hbm [resolvable:$true] %s6179_s16 }
 0x549   : > { %3278 = vmatmul.f32.gmra.mxu3 %v3033_v60  ;;  %v4181_v18 = vpop.permute.xlu1 %4180  ;;  %v12946_v21 = vld [vmem:[#allocation14_spill] sm:$0xff]  ;;  %s6441_s17 = sshra.s32 %s6180_s16, 4  ;;  %s6442_s17 = int_to_ptr.hbm [resolvable:$true] %s6441_s17 }
 0x54a   : > { %v4231_v5 = vsel %vm566_vm3, %v9568_v26, %v4181_v18  ;;  %v4232_v1 = vsel %vm566_vm3, %v4181_v18, %v9468_v49  ;;  %4859 = vrot.lane.b32.xlu0 %v7553_v6, %s12941_s29  ;;  %v4386_v49 = vmul.f32 %v4228_v54, %v12945_v13  ;;  %v3034_v18 = vld [vmem:[#allocation2 + $0x1d0] sm:$0xff]  ;;  %s6443_s21 = scalar_lea.hbm %s6442_s17, 32  ;;  %p6448_p3 = scmp.lt.s32.totalorder %s6442_s17, %s12055_s9 }
 0x54b   : > { %v4390_v16 = vmul.f32 %v4231_v5, %v12945_v13  ;;  %v4391_v10 = vmul.f32 %v4232_v1, %v12946_v21  ;;  %v9746_v7 = vpop.f32.mrf.mxu3  ;;  %3148 = vmatmul.f32.gmra.mxu1 %v3033_v60  ;;  %3213 = vmatmul.f32.gmra.mxu2 %v3033_v60  ;;  %v9748_v14 = vpop.permute.xlu0 %4126  ;;  %v4387_v1 = vmul.f32 %v4229_v44, %v12946_v21  ;;  %p6444_p0 = scmp.ne.s32.totalorder %s6442_s17, %s6443_s21  ;;  %p6449_p4 = scmp.lt.s32.totalorder %s6447_s22, %s6443_s21 }
 0x54c   : > { %v9750_v26 = vpop.f32.mrf.mxu0 }
 0x54d   : > { %12947 = vst [vmem:[#allocation10_spill] sm:$0xff] %v9750_v26  ;;  %4394 = vmatpush.msrb.mxu0 %v4390_v16  ;;  %4459 = vmatpush.msrb.mxu1 %v4391_v10  ;;  %p6445_p1 = pnand %p6444_p0, %p6594_p5  ;;  %p6450_p7 = por %p6449_p4, %p6448_p3 }
 0x54e   : > { %4847 = vrot.lane.b32.xlu2 %v12587_v57, %s12941_s29  ;;  %v9755_v24 = vpop.f32.mrf.mxu2 }
 0x54f   : > { %4861 = vrot.lane.b32.xlu1 %v7546_v0, %s12941_s29  ;;  %4395 = vmatpush.msrb.mxu0 %v4386_v49  ;;  %v9760_v17 = vpop.f32.mrf.mxu1  ;;  %p6446_p2 = pneg %p6445_p1 }
 0x550   : > { %12948 = vst [vmem:[#allocation14_spill] sm:$0xff] %v9760_v17  ;;  %4460 = vmatpush.msrb.mxu1 %v4387_v1  ;;  %3086 = vmatmul.f32.gmra.mxu0 %v3034_v18  ;;  %v9762_v60 = vpop.permute.xlu2 %4098 }
 0x551   : > { %3281 = vmatmul.f32.gmra.mxu3 %v3034_v18  ;;  %v4129_v10 = vpop.permute.xlu1 %4128  ;;  %p6451_p8 = pnand %p6450_p7, %p6446_p2 }
 0x552   : > { %v4212_v16 = vsel %vm566_vm3, %v9748_v14, %v4129_v10  ;;  %v4322_v54 = vsel %vm566_vm3, %v4129_v10, %v9662_v11  ;;  %4851 = vrot.lane.b32.xlu0 %v12673_v41, %s12941_s29  ;;  %v3035_v10 = vld [vmem:[#allocation2 + $0x1d8] sm:$0xff] }
 0x553   : > { %v9770_v5 = vpop.f32.mrf.mxu3  ;;  %3151 = vmatmul.f32.gmra.mxu1 %v3034_v18  ;;  %3216 = vmatmul.f32.gmra.mxu2 %v3034_v18  ;;  %v4364_v44 = vmul.f32 %v4212_v16, %v12906_v45  ;;  %v4365_v49 = vmul.f32 %v4322_v54, %v12907_v43  ;;  %v9774_v1 = vpop.permute.xlu0 %4114 }
 0x554   : > { %v9776_v17 = vpop.f32.mrf.mxu0  ;;  %v4321_v26 = vsel %vm566_vm3, %v9708_v38, %v9774_v1 }
 0x555   : > { %12949 = vst [vmem:[#allocation233_spill] sm:$0xff] %v9776_v17  ;;  %4531 = vmatpush.msrb.mxu2 %v4364_v44  ;;  %4596 = vmatpush.msrb.mxu3 %v4365_v49  ;;  %v4361_v41 = vmul.f32 %v4321_v26, %v12907_v43 }
 0x556   : > { %4839 = vrot.lane.b32.xlu2 %v12681_v62, %s12941_s29  ;;  %v9784_v18 = vpop.f32.mrf.mxu2 }
 0x557   : > { %4853 = vrot.lane.b32.xlu1 %v12671_v19, %s12941_s29  ;;  %v9788_v16 = vpop.f32.mrf.mxu1  ;;  %4597 = vmatpush.msrb.mxu3 %v4361_v41 }
 0x558   : > { %12950 = vst [vmem:[#allocation234_spill] sm:$0xff] %v9788_v16  ;;  %3089 = vmatmul.f32.gmra.mxu0 %v3035_v10  ;;  %v4149_v54 = vpop.permute.xlu2 %4148 }
 0x559   : > { %3284 = vmatmul.f32.gmra.mxu3 %v3035_v10  ;;  %v9790_v17 = vpop.permute.xlu1 %4118 }
 0x55a   : > { %v4209_v26 = vsel %vm566_vm3, %v9790_v17, %v9708_v38  ;;  %4843 = vrot.lane.b32.xlu0 %v12691_v32, %s12941_s29  ;;  %v3036_v38 = vld [vmem:[#allocation2 + $0x1e0] sm:$0xff] }
 0x55b   : > { %v9797_v44 = vpop.f32.mrf.mxu3  ;;  %3154 = vmatmul.f32.gmra.mxu1 %v3035_v10  ;;  %3219 = vmatmul.f32.gmra.mxu2 %v3035_v10  ;;  %v4360_v49 = vmul.f32 %v4209_v26, %v12906_v45  ;;  %v4165_v16 = vpop.permute.xlu0 %4164 }
 0x55c   : > { %v9800_v41 = vpop.f32.mrf.mxu0  ;;  %v4225_v62 = vsel %vm566_vm3, %v9616_v20, %v4165_v16  ;;  %v4226_v19 = vsel %vm566_vm3, %v4165_v16, %v9530_v55 }
 0x55d   : > { %12951 = vst [vmem:[#allocation235_spill] sm:$0xff] %v9800_v41  ;;  %4532 = vmatpush.msrb.mxu2 %v4360_v49  ;;  %v4382_v57 = vmul.f32 %v4225_v62, %v12945_v13  ;;  %v4383_v32 = vmul.f32 %v4226_v19, %v12946_v21 }
 0x55e   : > { %4831 = vrot.lane.b32.xlu2 %v12695_v42, %s12941_s29  ;;  %v9810_v10 = vpop.f32.mrf.mxu2 }
 0x55f   : > { %4845 = vrot.lane.b32.xlu1 %v12688_v47, %s12941_s29  ;;  %v9814_v26 = vpop.f32.mrf.mxu1  ;;  %4396 = vmatpush.msrb.mxu0 %v4382_v57 }
 0x560   : > { %12952 = vst [vmem:[#allocation236_spill] sm:$0xff] %v9814_v26  ;;  %3092 = vmatmul.f32.gmra.mxu0 %v3036_v38  ;;  %v9816_v20 = vpop.permute.xlu2 %4096  ;;  %4461 = vmatpush.msrb.mxu1 %v4383_v32  ;;  %v3037_v32 = vld [vmem:[#allocation2 + $0x1e8] sm:$0xff] }
 0x561   : > { %3287 = vmatmul.f32.gmra.mxu3 %v3036_v38  ;;  %v9818_v55 = vpop.permute.xlu1 %4106 }
 0x562   : > { %4835 = vrot.lane.b32.xlu0 %v12702_v22, %s12941_s29 }
 0x563   : > { %v9822_v19 = vpop.f32.mrf.mxu3  ;;  %3157 = vmatmul.f32.gmra.mxu1 %v3036_v38  ;;  %3222 = vmatmul.f32.gmra.mxu2 %v3036_v38  ;;  %v4113_v62 = vpop.permute.xlu0 %4112 }
 0x564   : > { %v9824_v16 = vpop.f32.mrf.mxu0  ;;  %v4206_v57 = vsel %vm566_vm3, %v9732_v23, %v4113_v62  ;;  %v4320_v49 = vsel %vm566_vm3, %v4113_v62, %v9818_v55 }
 0x565   : > { %12953 = vst [vmem:[#allocation237_spill] sm:$0xff] %v9824_v16  ;;  %v4356_v26 = vmul.f32 %v4206_v57, %v12906_v45  ;;  %v4357_v41 = vmul.f32 %v4320_v49, %v12907_v43  ;;  %v4219_v57 = vsel %vm566_vm3, %v9664_v61, %v4149_v54 }
 0x566   : > { %4823 = vrot.lane.b32.xlu2 %v12705_v50, %s12941_s29  ;;  %v9834_v22 = vpop.f32.mrf.mxu2 }
 0x567   : > { %4837 = vrot.lane.b32.xlu1 %v12700_v9, %s12941_s29  ;;  %v9838_v38 = vpop.f32.mrf.mxu1  ;;  %4533 = vmatpush.msrb.mxu2 %v4356_v26  ;;  %v4220_v26 = vsel %vm566_vm3, %v4149_v54, %v9590_v56 }
 0x568   : > { %12954 = vst [vmem:[#allocation238_spill] sm:$0xff] %v9838_v38  ;;  %3095 = vmatmul.f32.gmra.mxu0 %v3037_v32  ;;  %v9840_v16 = vpop.permute.xlu2 %4086  ;;  %4598 = vmatpush.msrb.mxu3 %v4357_v41  ;;  %v4375_v54 = vmul.f32 %v4220_v26, %v12946_v21 }
 0x569   : > { %3290 = vmatmul.f32.gmra.mxu3 %v3037_v32  ;;  %v4157_v62 = vpop.permute.xlu1 %4156 }
 0x56a   : > { %v4222_v49 = vsel %vm566_vm3, %v9640_v33, %v4157_v62  ;;  %v4223_v50 = vsel %vm566_vm3, %v4157_v62, %v9566_v31  ;;  %4827 = vrot.lane.b32.xlu0 %v12709_v53, %s12941_s29  ;;  %v4374_v31 = vmul.f32 %v4219_v57, %v12945_v13  ;;  %v3038_v62 = vld [vmem:[#allocation2 + $0x1f0] sm:$0xff] }
 0x56b   : > { %v9852_v38 = vpop.f32.mrf.mxu3  ;;  %3160 = vmatmul.f32.gmra.mxu1 %v3037_v32  ;;  %3225 = vmatmul.f32.gmra.mxu2 %v3037_v32  ;;  %v4378_v41 = vmul.f32 %v4222_v49, %v12945_v13  ;;  %v4379_v61 = vmul.f32 %v4223_v50, %v12946_v21  ;;  %v9856_v9 = vpop.permute.xlu0 %4102 }
 0x56c   : > { %v9858_v33 = vpop.f32.mrf.mxu0 }
 0x56d   : > { %12955 = vst [vmem:[#allocation239_spill] sm:$0xff] %v9858_v33  ;;  %4397 = vmatpush.msrb.mxu0 %v4378_v41  ;;  %4462 = vmatpush.msrb.mxu1 %v4379_v61 }
 0x56e   : > { %4815 = vrot.lane.b32.xlu2 %v12712_v59, %s12941_s29  ;;  %v9863_v56 = vpop.f32.mrf.mxu2 }
 0x56f   : > { %4829 = vrot.lane.b32.xlu1 %v12708_v36, %s12941_s29  ;;  %4398 = vmatpush.msrb.mxu0 %v4374_v31  ;;  %v9868_v50 = vpop.f32.mrf.mxu1 }
 0x570   : > { %12956 = vst [vmem:[#allocation240_spill] sm:$0xff] %v9868_v50  ;;  %4463 = vmatpush.msrb.mxu1 %v4375_v54  ;;  %3098 = vmatmul.f32.gmra.mxu0 %v3038_v62  ;;  %v9870_v32 = vpop.permute.xlu2 %4074 }
 0x571   : > { %3293 = vmatmul.f32.gmra.mxu3 %v3038_v62  ;;  %v4105_v57 = vpop.permute.xlu1 %4104 }
 0x572   : > { %v4203_v49 = vsel %vm566_vm3, %v9856_v9, %v4105_v57  ;;  %v4319_v41 = vsel %vm566_vm3, %v4105_v57, %v9762_v60  ;;  %4819 = vrot.lane.b32.xlu0 %v12716_v8, %s12941_s29  ;;  %v12958_v57 = vld [vmem:[#allocation132_spill] sm:$0xff]  ;;  %v3039_v8 = vld [vmem:[#allocation2 + $0x1f8] sm:$0xff] }
 0x573   : > { %v9878_v26 = vpop.f32.mrf.mxu3  ;;  %3163 = vmatmul.f32.gmra.mxu1 %v3038_v62  ;;  %3228 = vmatmul.f32.gmra.mxu2 %v3038_v62  ;;  %v4352_v61 = vmul.f32 %v4203_v49, %v12906_v45  ;;  %v4353_v31 = vmul.f32 %v4319_v41, %v12907_v43  ;;  %v9882_v54 = vpop.permute.xlu0 %4090  ;;  %v2276_v59 = vadd.f32 %v9457_v28, %v12958_v57 }
 0x574   : > { %v9884_v50 = vpop.f32.mrf.mxu0  ;;  %v4318_v33 = vsel %vm566_vm3, %v9816_v20, %v9882_v54 }
 0x575   : > { %12957 = vst [vmem:[#allocation241_spill] sm:$0xff] %v9884_v50  ;;  %4534 = vmatpush.msrb.mxu2 %v4352_v61  ;;  %4599 = vmatpush.msrb.mxu3 %v4353_v31  ;;  %v4349_v62 = vmul.f32 %v4318_v33, %v12907_v43 }
 0x576   : > { %4807 = vrot.lane.b32.xlu2 %v12793_v2, %s12941_s29  ;;  %v2888_v49 = vpop.f32.mrf.mxu2 }
 0x577   : > { %4821 = vrot.lane.b32.xlu1 %v12715_v58, %s12941_s29  ;;  %v9896_v41 = vadd.f32 %v2888_v49, %v2276_v59  ;;  %v9898_v50 = vpop.f32.mrf.mxu1  ;;  %4600 = vmatpush.msrb.mxu3 %v4349_v62  ;;  %v12961_v62 = vld [vmem:[#allocation100_spill] sm:$0xff] }
 0x578   : > { %12959 = vst [vmem:[#allocation132_spill] sm:$0xff] %v9898_v50  ;;  %3101 = vmatmul.f32.gmra.mxu0 %v3039_v8  ;;  %v9900_v53 = vpop.permute.xlu2 %4124  ;;  %v2279_v49 = vadd.f32 %v9480_v15, %v12961_v62  ;;  %v12964_v62 = vld [vmem:[#allocation116_spill] sm:$0xff] }
 0x579   : > { %3296 = vmatmul.f32.gmra.mxu3 %v3039_v8  ;;  %v9902_v28 = vpop.permute.xlu1 %4094 }
 0x57a   : > { %v4200_v33 = vsel %vm566_vm3, %v9902_v28, %v9816_v20  ;;  %4811 = vrot.lane.b32.xlu0 %v12723_v37, %s12941_s29  ;;  %v3365_v37 = vld [vmem:[#allocation2 + $0x200] sm:$0xff] }
 0x57b   : > { %v9909_v61 = vpop.f32.mrf.mxu3  ;;  %3166 = vmatmul.f32.gmra.mxu1 %v3039_v8  ;;  %3231 = vmatmul.f32.gmra.mxu2 %v3039_v8  ;;  %v4348_v59 = vmul.f32 %v4200_v33, %v12906_v45 }
 0x57c   : > { %v9912_v31 = vpop.f32.mrf.mxu0  ;;  %v4141_v57 = vpop.permute.xlu0 %4140 }
 0x57d   : > { %12960 = vst [vmem:[#allocation242_spill] sm:$0xff] %v9912_v31  ;;  %4535 = vmatpush.msrb.mxu2 %v4348_v59  ;;  %v4216_v50 = vsel %vm566_vm3, %v9686_v40, %v4141_v57  ;;  %v4217_v20 = vsel %vm566_vm3, %v4141_v57, %v9614_v3  ;;  %v12963_v40 = vld [vmem:[#allocation92_spill] sm:$0xff] }
 0x57e   : > { %4857 = vrot.lane.b32.xlu2 %v12726_v12, %s12941_s29  ;;  %v2891_v8 = vpop.f32.mrf.mxu2  ;;  %v4370_v33 = vmul.f32 %v4216_v50, %v12945_v13  ;;  %v4371_v31 = vmul.f32 %v4217_v20, %v12946_v21  ;;  %v2299_v2 = vadd.f32 %v12964_v62, %v12963_v40  ;;  %v12966_v20 = vld [vmem:[#allocation101_spill] sm:$0xff] }
 0x57f   : > { %4813 = vrot.lane.b32.xlu1 %v12722_v46, %s12941_s29  ;;  %v9926_v15 = vadd.f32 %v2891_v8, %v2279_v49  ;;  %v9928_v59 = vpop.f32.mrf.mxu1  ;;  %v12965_v49 = vld [vmem:[#allocation88_spill] sm:$0xff] }
 0x580   : > { %12962 = vst [vmem:[#allocation100_spill] sm:$0xff] %v9928_v59  ;;  %3733 = vmatmul.f32.vlgmr.msra.gmra.mxu0 %v3365_v37  ;;  %v9932_v3 = vpop.permute.xlu2 %4072  ;;  %4464 = vmatpush.msrb.mxu1 %v4371_v31  ;;  %v2962_v50 = vadd.f32 %v9498_v48, %v2299_v2  ;;  %v2234_v8 = vadd.f32 %v12966_v20, %v12965_v49  ;;  %v3366_v48 = vld [vmem:[#allocation2 + $0x208] sm:$0xff] }
 0x581   : > { %3928 = vmatmul.f32.vlgmr.msra.gmra.mxu3 %v3365_v37  ;;  %v9934_v57 = vpop.permute.xlu1 %4082  ;;  %4399 = vmatpush.msrb.mxu0 %v4370_v33  ;;  %v12969_v20 = vld [vmem:[#allocation93_spill] sm:$0xff] }
 0x582   : > { %4799 = vrot.lane.b32.xlu0 %v12797_v30, %s12941_s29  ;;  %v2961_v31 = vadd.f32 %v9518_v39, %v2234_v8  ;;  %v12972_v30 = vld [vmem:[#allocation106_spill] sm:$0xff] }
 0x583   : > { %v3252_v59 = vpop.f32.mrf.mxu3  ;;  %3798 = vmatmul.f32.vlgmr.msra.gmra.mxu1 %v3365_v37  ;;  %3863 = vmatmul.f32.vlgmr.msra.gmra.mxu2 %v3365_v37 }
 0x584   : > { %v9941_v40 = vadd.f32 %v3252_v59, %v2962_v50  ;;  %v4089_v62 = vpop.permute.xlu0 %4088  ;;  %v12968_v50 = vld [vmem:[#allocation83_spill] sm:$0xff] }
 0x585   : > { %v9944_v12 = vpop.f32.mrf.mxu0  ;;  %v4197_v33 = vsel %vm566_vm3, %v9840_v16, %v4089_v62  ;;  %v4317_v2 = vsel %vm566_vm3, %v4089_v62, %v9934_v57  ;;  %v2302_v39 = vadd.f32 %v12969_v20, %v12968_v50  ;;  %v4210_v50 = vsel %vm566_vm3, %v9662_v11, %v9900_v53 }
 0x586   : > { %12967 = vst [vmem:[#allocation92_spill] sm:$0xff] %v9944_v12  ;;  %4805 = vrot.lane.b32.xlu2 %v12870_v35, %s12941_s29  ;;  %v3187_v49 = vpop.f32.mrf.mxu2  ;;  %v4344_v37 = vmul.f32 %v4197_v33, %v12906_v45  ;;  %v4345_v59 = vmul.f32 %v4317_v2, %v12907_v43  ;;  %v12971_v35 = vld [vmem:[#allocation81_spill] sm:$0xff] }
 0x587   : > { %4803 = vrot.lane.b32.xlu1 %v12729_v27, %s12941_s29  ;;  %v9958_v8 = vadd.f32 %v3187_v49, %v2961_v31  ;;  %v2237_v46 = vadd.f32 %v12972_v30, %v12971_v35  ;;  %v2966_v33 = vadd.f32 %v9544_v4, %v2302_v39  ;;  %v4211_v30 = vsel %vm566_vm3, %v9900_v53, %v9748_v14  ;;  %v3367_v53 = vld [vmem:[#allocation2 + $0x210] sm:$0xff] }
 0x588   : > { %3736 = vmatmul.f32.gmra.mxu0 %v3366_v48  ;;  %v9960_v12 = vpop.permute.xlu2 %4062  ;;  %v9962_v62 = vpop.f32.mrf.mxu1  ;;  %4536 = vmatpush.msrb.mxu2 %v4344_v37  ;;  %v12973_v37 = vld [vmem:[#allocation126_spill] sm:$0xff]  ;;  %v4363_v14 = vmul.f32 %v4211_v30, %v12946_v21 }
 0x589   : > { %12970 = vst [vmem:[#allocation116_spill] sm:$0xff] %v9962_v62  ;;  %3931 = vmatmul.f32.gmra.mxu3 %v3366_v48  ;;  %v4133_v2 = vpop.permute.xlu1 %4132 }
 0x58a   : > { %v4213_v31 = vsel %vm566_vm3, %v9710_v52, %v4133_v2  ;;  %v4214_v49 = vsel %vm566_vm3, %v4133_v2, %v9638_v34  ;;  %4601 = vmatpush.msrb.mxu3 %v4345_v59  ;;  %4849 = vrot.lane.b32.xlu0 %v12973_v37, %s12941_s29  ;;  %v2965_v52 = vadd.f32 %v9558_v63, %v2237_v46 }
 0x58b   : > { %3801 = vmatmul.f32.gmra.mxu1 %v3366_v48  ;;  %3866 = vmatmul.f32.gmra.mxu2 %v3366_v48  ;;  %v4366_v35 = vmul.f32 %v4213_v31, %v12945_v13  ;;  %v4367_v4 = vmul.f32 %v4214_v49, %v12946_v21  ;;  %v4362_v34 = vmul.f32 %v4210_v50, %v12945_v13  ;;  %v12975_v48 = vld [vmem:[#allocation67_spill] sm:$0xff]  ;;  %v12976_v31 = vld [vmem:[#allocation62_spill] sm:$0xff] }
 0x58c   : > { %v3255_v11 = vpop.f32.mrf.mxu3  ;;  %v9981_v20 = vpop.permute.xlu0 %4078  ;;  %v12979_v50 = vld [vmem:[#allocation98_spill] sm:$0xff] }
 0x58d   : > { %v9985_v59 = vadd.f32 %v3255_v11, %v2966_v33  ;;  %v9987_v39 = vpop.f32.mrf.mxu0  ;;  %4400 = vmatpush.msrb.mxu0 %v4366_v35  ;;  %4465 = vmatpush.msrb.mxu1 %v4367_v4  ;;  %v12978_v33 = vld [vmem:[#allocation73_spill] sm:$0xff]  ;;  %v12980_v4 = vld [vmem:[#allocation68_spill] sm:$0xff] }
 0x58e   : > { %12974 = vst [vmem:[#allocation88_spill] sm:$0xff] %v9987_v39  ;;  %4795 = vrot.lane.b32.xlu2 %v12975_v48, %s12941_s29  ;;  %v3190_v2 = vpop.f32.mrf.mxu2  ;;  %v2305_v35 = vadd.f32 %v12979_v50, %v12978_v33  ;;  %v12981_v11 = vld [vmem:[#allocation141_spill] sm:$0xff] }
 0x58f   : > { %4791 = vrot.lane.b32.xlu1 %v12976_v31, %s12941_s29  ;;  %v9994_v49 = vadd.f32 %v3190_v2, %v2965_v52  ;;  %4401 = vmatpush.msrb.mxu0 %v4362_v34  ;;  %v2240_v39 = vadd.f32 %v12981_v11, %v12980_v4  ;;  %v12982_v34 = vld [vmem:[#allocation66_spill] sm:$0xff] }
 0x590   : > { %4466 = vmatpush.msrb.mxu1 %v4363_v14  ;;  %3739 = vmatmul.f32.gmra.mxu0 %v3367_v53  ;;  %v9996_v46 = vpop.permute.xlu2 %4100  ;;  %v9998_v63 = vpop.f32.mrf.mxu1  ;;  %v2970_v14 = vadd.f32 %v9572_v29, %v2305_v35 }
 0x591   : > { %12977 = vst [vmem:[#allocation101_spill] sm:$0xff] %v9998_v63  ;;  %3934 = vmatmul.f32.gmra.mxu3 %v3367_v53  ;;  %v4081_v30 = vpop.permute.xlu1 %4080  ;;  %v2969_v4 = vadd.f32 %v9584_v51, %v2240_v39 }
 0x592   : > { %v4194_v62 = vsel %vm566_vm3, %v9981_v20, %v4081_v30  ;;  %v4316_v52 = vsel %vm566_vm3, %v4081_v30, %v9870_v32  ;;  %4797 = vrot.lane.b32.xlu0 %v12982_v34, %s12941_s29 }
 0x593   : > { %v4340_v2 = vmul.f32 %v4194_v62, %v12906_v45  ;;  %v4341_v33 = vmul.f32 %v4316_v52, %v12907_v43  ;;  %3804 = vmatmul.f32.gmra.mxu1 %v3367_v53  ;;  %3869 = vmatmul.f32.gmra.mxu2 %v3367_v53  ;;  %v3368_v62 = vld [vmem:[#allocation2 + $0x218] sm:$0xff]  ;;  %v12984_v53 = vld [vmem:[#allocation56_spill] sm:$0xff]  ;;  %v12985_v52 = vld [vmem:[#allocation114_spill] sm:$0xff] }
 0x594   : > { %v3258_v50 = vpop.f32.mrf.mxu3  ;;  %v10013_v63 = vpop.permute.xlu0 %4066 }
 0x595   : > { %v10016_v11 = vadd.f32 %v3258_v50, %v2970_v14  ;;  %v10018_v48 = vpop.f32.mrf.mxu0  ;;  %4537 = vmatpush.msrb.mxu2 %v4340_v2  ;;  %4602 = vmatpush.msrb.mxu3 %v4341_v33  ;;  %v4315_v29 = vsel %vm566_vm3, %v9932_v3, %v10013_v63  ;;  %v12987_v2 = vld [vmem:[#allocation80_spill] sm:$0xff]  ;;  %v12988_v33 = vld [vmem:[#allocation26_spill] sm:$0xff] }
 0x596   : > { %12983 = vst [vmem:[#allocation83_spill] sm:$0xff] %v10018_v48  ;;  %v4337_v35 = vmul.f32 %v4315_v29, %v12907_v43  ;;  %4783 = vrot.lane.b32.xlu2 %v12984_v53, %s12941_s29  ;;  %v3193_v30 = vpop.f32.mrf.mxu2  ;;  %v2308_v50 = vadd.f32 %v12988_v33, %v12987_v2  ;;  %v12989_v53 = vld [vmem:[#allocation63_spill] sm:$0xff] }
 0x597   : > { %4841 = vrot.lane.b32.xlu1 %v12985_v52, %s12941_s29  ;;  %v10028_v51 = vadd.f32 %v3193_v30, %v2969_v4  ;;  %v12990_v4 = vld [vmem:[#allocation154_spill] sm:$0xff]  ;;  %v12991_v30 = vld [vmem:[#allocation11_spill] sm:$0xff] }
 0x598   : > { %3742 = vmatmul.f32.gmra.mxu0 %v3368_v62  ;;  %v10030_v39 = vpop.permute.xlu2 %4076  ;;  %v10032_v14 = vpop.f32.mrf.mxu1  ;;  %4603 = vmatpush.msrb.mxu3 %v4337_v35  ;;  %v2243_v34 = vadd.f32 %v12991_v30, %v12990_v4  ;;  %v2974_v52 = vadd.f32 %v9596_v25, %v2308_v50  ;;  %v3369_v25 = vld [vmem:[#allocation2 + $0x220] sm:$0xff]  ;;  %v12994_v50 = vld [vmem:[#allocation102_spill] sm:$0xff] }
 0x599   : > { %12986 = vst [vmem:[#allocation93_spill] sm:$0xff] %v10032_v14  ;;  %3937 = vmatmul.f32.gmra.mxu3 %v3368_v62  ;;  %v10036_v29 = vpop.permute.xlu1 %4070  ;;  %v12992_v14 = vld [vmem:[#allocation211_spill] sm:$0xff] }
 0x59a   : > { %v4191_v48 = vsel %vm566_vm3, %v10036_v29, %v9932_v3  ;;  %4787 = vrot.lane.b32.xlu0 %v12989_v53, %s12941_s29  ;;  %v2973_v37 = vadd.f32 %v12992_v14, %v2243_v34 }
 0x59b   : > { %v4336_v35 = vmul.f32 %v4191_v48, %v12906_v45  ;;  %3807 = vmatmul.f32.gmra.mxu1 %v3368_v62  ;;  %3872 = vmatmul.f32.gmra.mxu2 %v3368_v62 }
 0x59c   : > { %v3261_v2 = vpop.f32.mrf.mxu3  ;;  %v4117_v33 = vpop.permute.xlu0 %4116 }
 0x59d   : > { %v10048_v31 = vadd.f32 %v3261_v2, %v2974_v52  ;;  %v10050_v27 = vpop.f32.mrf.mxu0  ;;  %4538 = vmatpush.msrb.mxu2 %v4336_v35  ;;  %v4207_v3 = vsel %vm566_vm3, %v9774_v1, %v4117_v33  ;;  %v4208_v4 = vsel %vm566_vm3, %v4117_v33, %v9790_v17  ;;  %v12995_v52 = vld [vmem:[#allocation61_spill] sm:$0xff]  ;;  %v12998_v17 = vld [vmem:[#allocation148_spill] sm:$0xff] }
 0x59e   : > { %12993 = vst [vmem:[#allocation81_spill] sm:$0xff] %v10050_v27  ;;  %v4358_v48 = vmul.f32 %v4207_v3, %v12945_v13  ;;  %v4359_v62 = vmul.f32 %v4208_v4, %v12946_v21  ;;  %4833 = vrot.lane.b32.xlu2 %v12994_v50, %s12941_s29  ;;  %v3196_v34 = vpop.f32.mrf.mxu2  ;;  %v12999_v35 = vld [vmem:[#allocation160_spill] sm:$0xff]  ;;  %v13001_v4 = vld [vmem:[#allocation146_spill] sm:$0xff] }
 0x59f   : > { %4789 = vrot.lane.b32.xlu1 %v12995_v52, %s12941_s29  ;;  %v10062_v14 = vadd.f32 %v3196_v34, %v2973_v37  ;;  %v2311_v2 = vadd.f32 %v12999_v35, %v12998_v17  ;;  %v13000_v3 = vld [vmem:[#allocation52_spill] sm:$0xff]  ;;  %v13002_v27 = vld [vmem:[#allocation162_spill] sm:$0xff]  ;;  %v13003_v34 = vld [vmem:[#allocation213_spill] sm:$0xff] }
 0x5a0   : > { %3745 = vmatmul.f32.gmra.mxu0 %v3369_v25  ;;  %v10064_v30 = vpop.permute.xlu2 %4855  ;;  %v10066_v1 = vpop.f32.mrf.mxu1  ;;  %4467 = vmatpush.msrb.mxu1 %v4359_v62  ;;  %v2246_v37 = vadd.f32 %v13002_v27, %v13001_v4  ;;  %v13004_v62 = vld [vmem:[#allocation215_spill] sm:$0xff] }
 0x5a1   : > { %12996 = vst [vmem:[#allocation106_spill] sm:$0xff] %v10062_v14  ;;  %3940 = vmatmul.f32.gmra.mxu3 %v3369_v25  ;;  %v10070_v33 = vpop.permute.xlu1 %4058  ;;  %4402 = vmatpush.msrb.mxu0 %v4358_v48  ;;  %v2978_v50 = vadd.f32 %v13003_v34, %v2311_v2  ;;  %v13009_v34 = vld [vmem:[#allocation164_spill] sm:$0xff] }
 0x5a2   : > { %12997 = vst [vmem:[#allocation73_spill] sm:$0xff] %v10066_v1  ;;  %4775 = vrot.lane.b32.xlu0 %v13000_v3, %s12941_s29  ;;  %v2977_v52 = vadd.f32 %v13004_v62, %v2246_v37  ;;  %v3370_v3 = vld [vmem:[#allocation2 + $0x228] sm:$0xff]  ;;  %v13008_v37 = vld [vmem:[#allocation142_spill] sm:$0xff] }
 0x5a3   : > { %3810 = vmatmul.f32.gmra.mxu1 %v3369_v25  ;;  %3875 = vmatmul.f32.gmra.mxu2 %v3369_v25  ;;  %v13006_v25 = vld [vmem:[#allocation58_spill] sm:$0xff]  ;;  %v2314_v62 = vadd.f32 %v13009_v34, %v13008_v37 }
 0x5a4   : > { %v3264_v53 = vpop.f32.mrf.mxu3  ;;  %v4065_v1 = vpop.permute.xlu0 %4064 }
 0x5a5   : > { %v10078_v14 = vadd.f32 %v3264_v53, %v2978_v50  ;;  %v10080_v17 = vpop.f32.mrf.mxu0  ;;  %v4188_v48 = vsel %vm566_vm3, %v9960_v12, %v4065_v1  ;;  %v4314_v35 = vsel %vm566_vm3, %v4065_v1, %v10070_v33  ;;  %v13007_v53 = vld [vmem:[#allocation59_spill] sm:$0xff] }
 0x5a6   : > { %13005 = vst [vmem:[#allocation98_spill] sm:$0xff] %v10080_v17  ;;  %v4332_v27 = vmul.f32 %v4188_v48, %v12906_v45  ;;  %v4333_v2 = vmul.f32 %v4314_v35, %v12907_v43  ;;  %4781 = vrot.lane.b32.xlu2 %v13006_v25, %s12941_s29  ;;  %v3199_v4 = vpop.f32.mrf.mxu2  ;;  %v13011_v45 = vld [vmem:[#allocation139_spill] sm:$0xff]  ;;  %v13012_v43 = vld [vmem:[#allocation166_spill] sm:$0xff]  ;;  %v4201_v35 = vsel %vm566_vm3, %v9762_v60, %v9996_v46 }
 0x5a7   : > { %4779 = vrot.lane.b32.xlu1 %v13007_v53, %s12941_s29  ;;  %v10092_v50 = vadd.f32 %v3199_v4, %v2977_v52  ;;  %v2249_v48 = vadd.f32 %v13012_v43, %v13011_v45  ;;  %v13013_v52 = vld [vmem:[#allocation217_spill] sm:$0xff]  ;;  %v4202_v45 = vsel %vm566_vm3, %v9996_v46, %v9856_v9 }
 0x5a8   : > { %3748 = vmatmul.f32.gmra.mxu0 %v3370_v3  ;;  %v10096_v17 = vpop.permute.xlu2 %4847  ;;  %v10098_v1 = vpop.f32.mrf.mxu1  ;;  %4539 = vmatpush.msrb.mxu2 %v4332_v27  ;;  %v2982_v4 = vadd.f32 %v13013_v52, %v2314_v62  ;;  %v13014_v27 = vld [vmem:[#allocation95_spill] sm:$0xff] }
 0x5a9   : > { %13010 = vst [vmem:[#allocation68_spill] sm:$0xff] %v10098_v1  ;;  %3943 = vmatmul.f32.gmra.mxu3 %v3370_v3  ;;  %v4109_v25 = vpop.permute.xlu1 %4108  ;;  %v13015_v62 = vld [vmem:[#allocation219_spill] sm:$0xff] }
 0x5aa   : > { %v4204_v37 = vsel %vm566_vm3, %v9818_v55, %v4109_v25  ;;  %v4205_v34 = vsel %vm566_vm3, %v4109_v25, %v9732_v23  ;;  %4604 = vmatpush.msrb.mxu3 %v4333_v2  ;;  %4825 = vrot.lane.b32.xlu0 %v13014_v27, %s12941_s29  ;;  %v2981_v52 = vadd.f32 %v13015_v62, %v2249_v48 }
 0x5ab   : > { %v4354_v60 = vmul.f32 %v4204_v37, %v12945_v13  ;;  %v4355_v43 = vmul.f32 %v4205_v34, %v12946_v21  ;;  %3813 = vmatmul.f32.gmra.mxu1 %v3370_v3  ;;  %3878 = vmatmul.f32.gmra.mxu2 %v3370_v3  ;;  %v4350_v55 = vmul.f32 %v4201_v35, %v12945_v13  ;;  %v3371_v37 = vld [vmem:[#allocation2 + $0x230] sm:$0xff]  ;;  %v13018_v34 = vld [vmem:[#allocation49_spill] sm:$0xff] }
 0x5ac   : > { %v3267_v1 = vpop.f32.mrf.mxu3  ;;  %v4093_v23 = vpop.permute.xlu0 %4092  ;;  %v4351_v3 = vmul.f32 %v4202_v45, %v12946_v21 }
 0x5ad   : > { %v10119_v2 = vadd.f32 %v3267_v1, %v2982_v4  ;;  %v10121_v25 = vpop.f32.mrf.mxu0  ;;  %4403 = vmatpush.msrb.mxu0 %v4354_v60  ;;  %4468 = vmatpush.msrb.mxu1 %v4355_v43  ;;  %v4198_v9 = vsel %vm566_vm3, %v9882_v54, %v4093_v23  ;;  %v4199_v46 = vsel %vm566_vm3, %v4093_v23, %v9902_v28  ;;  %v13017_v1 = vld [vmem:[#allocation54_spill] sm:$0xff]  ;;  %v13020_v43 = vld [vmem:[#allocation168_spill] sm:$0xff]  ;;  %v13022_v23 = vld [vmem:[#allocation123_spill] sm:$0xff] }
 0x5ae   : > { %13016 = vst [vmem:[#allocation141_spill] sm:$0xff] %v10121_v25  ;;  %v4346_v48 = vmul.f32 %v4198_v9, %v12945_v13  ;;  %v4347_v35 = vmul.f32 %v4199_v46, %v12946_v21  ;;  %4771 = vrot.lane.b32.xlu2 %v13017_v1, %s12941_s29  ;;  %v3202_v4 = vpop.f32.mrf.mxu2  ;;  %v13019_v54 = vld [vmem:[#allocation134_spill] sm:$0xff]  ;;  %v4192_v25 = vsel %vm566_vm3, %v9870_v32, %v10030_v39 }
 0x5af   : > { %4767 = vrot.lane.b32.xlu1 %v13018_v34, %s12941_s29  ;;  %v10134_v60 = vadd.f32 %v3202_v4, %v2981_v52  ;;  %4404 = vmatpush.msrb.mxu0 %v4350_v55  ;;  %v2317_v28 = vadd.f32 %v13020_v43, %v13019_v54  ;;  %v13023_v9 = vld [vmem:[#allocation170_spill] sm:$0xff]  ;;  %v13024_v55 = vld [vmem:[#allocation221_spill] sm:$0xff]  ;;  %v13025_v43 = vld [vmem:[#allocation55_spill] sm:$0xff] }
 0x5b0   : > { %4469 = vmatpush.msrb.mxu1 %v4351_v3  ;;  %3751 = vmatmul.f32.gmra.mxu0 %v3371_v37  ;;  %v10138_v45 = vpop.permute.xlu2 %4839  ;;  %v10140_v62 = vpop.f32.mrf.mxu1  ;;  %v2252_v46 = vadd.f32 %v13023_v9, %v13022_v23  ;;  %v4193_v23 = vsel %vm566_vm3, %v10030_v39, %v9981_v20 }
 0x5b1   : > { %13021 = vst [vmem:[#allocation80_spill] sm:$0xff] %v10140_v62  ;;  %3946 = vmatmul.f32.gmra.mxu3 %v3371_v37  ;;  %v4085_v52 = vpop.permute.xlu1 %4084  ;;  %4405 = vmatpush.msrb.mxu0 %v4346_v48  ;;  %v2986_v4 = vadd.f32 %v13024_v55, %v2317_v28  ;;  %v13026_v28 = vld [vmem:[#allocation223_spill] sm:$0xff] }
 0x5b2   : > { %v4195_v3 = vsel %vm566_vm3, %v9934_v57, %v4085_v52  ;;  %v4196_v54 = vsel %vm566_vm3, %v4085_v52, %v9840_v16  ;;  %4470 = vmatpush.msrb.mxu1 %v4347_v35  ;;  %4773 = vrot.lane.b32.xlu0 %v13025_v43, %s12941_s29  ;;  %v2985_v9 = vadd.f32 %v13026_v28, %v2252_v46  ;;  %v13032_v28 = vld [vmem:[#allocation172_spill] sm:$0xff] }
 0x5b3   : > { %v4342_v32 = vmul.f32 %v4195_v3, %v12945_v13  ;;  %v4343_v48 = vmul.f32 %v4196_v54, %v12946_v21  ;;  %3816 = vmatmul.f32.gmra.mxu1 %v3371_v37  ;;  %3881 = vmatmul.f32.gmra.mxu2 %v3371_v37  ;;  %v4338_v57 = vmul.f32 %v4192_v25, %v12945_v13  ;;  %v3372_v3 = vld [vmem:[#allocation2 + $0x238] sm:$0xff] }
 0x5b4   : > { %v3270_v55 = vpop.f32.mrf.mxu3  ;;  %v4069_v16 = vpop.permute.xlu0 %4068  ;;  %v4339_v37 = vmul.f32 %v4193_v23, %v12946_v21  ;;  %v13031_v23 = vld [vmem:[#allocation94_spill] sm:$0xff] }
 0x5b5   : > { %v10161_v35 = vadd.f32 %v3270_v55, %v2986_v4  ;;  %v10163_v52 = vpop.f32.mrf.mxu0  ;;  %4406 = vmatpush.msrb.mxu0 %v4342_v32  ;;  %4471 = vmatpush.msrb.mxu1 %v4343_v48  ;;  %v4189_v20 = vsel %vm566_vm3, %v10013_v63, %v4069_v16  ;;  %v4190_v39 = vsel %vm566_vm3, %v4069_v16, %v10036_v29  ;;  %v13028_v4 = vld [vmem:[#allocation44_spill] sm:$0xff] }
 0x5b6   : > { %13027 = vst [vmem:[#allocation26_spill] sm:$0xff] %v10163_v52  ;;  %v4334_v46 = vmul.f32 %v4189_v20, %v12945_v13  ;;  %v4335_v25 = vmul.f32 %v4190_v39, %v12946_v21  ;;  %4759 = vrot.lane.b32.xlu2 %v13028_v4, %s12941_s29  ;;  %v3205_v54 = vpop.f32.mrf.mxu2  ;;  %v13029_v32 = vld [vmem:[#allocation84_spill] sm:$0xff]  ;;  %v2320_v55 = vadd.f32 %v13032_v28, %v13031_v23  ;;  %v13034_v39 = vld [vmem:[#allocation174_spill] sm:$0xff] }
 0x5b7   : > { %4817 = vrot.lane.b32.xlu1 %v13029_v32, %s12941_s29  ;;  %v10176_v48 = vadd.f32 %v3205_v54, %v2985_v9  ;;  %4407 = vmatpush.msrb.mxu0 %v4338_v57  ;;  %v13033_v20 = vld [vmem:[#allocation28_spill] sm:$0xff]  ;;  %v13036_v54 = vld [vmem:[#allocation225_spill] sm:$0xff] }
 0x5b8   : > { %4472 = vmatpush.msrb.mxu1 %v4339_v37  ;;  %3754 = vmatmul.f32.gmra.mxu0 %v3372_v3  ;;  %v10178_v63 = vpop.permute.xlu2 %4831  ;;  %v10180_v29 = vpop.f32.mrf.mxu1  ;;  %v2255_v52 = vadd.f32 %v13034_v39, %v13033_v20  ;;  %v13035_v37 = vld [vmem:[#allocation51_spill] sm:$0xff] }
 0x5b9   : > { %13030 = vst [vmem:[#allocation154_spill] sm:$0xff] %v10180_v29  ;;  %3949 = vmatmul.f32.gmra.mxu3 %v3372_v3  ;;  %v4061_v16 = vpop.permute.xlu1 %4060  ;;  %4408 = vmatpush.msrb.mxu0 %v4334_v46  ;;  %v2990_v29 = vadd.f32 %v13036_v54, %v2320_v55  ;;  %v13037_v39 = vld [vmem:[#allocation227_spill] sm:$0xff]  ;;  %v13039_v55 = vld [vmem:[#allocation76_spill] sm:$0xff] }
 0x5ba   : > { %v4186_v9 = vsel %vm566_vm3, %v10070_v33, %v4061_v16  ;;  %v4187_v57 = vsel %vm566_vm3, %v4061_v16, %v9960_v12  ;;  %4473 = vmatpush.msrb.mxu1 %v4335_v25  ;;  %4763 = vrot.lane.b32.xlu0 %v13035_v37, %s12941_s29  ;;  %v2989_v33 = vadd.f32 %v13037_v39, %v2255_v52  ;;  %v3373_v25 = vld [vmem:[#allocation2 + $0x240] sm:$0xff] }
 0x5bb   : > { %v4330_v23 = vmul.f32 %v4186_v9, %v12945_v13  ;;  %v4331_v28 = vmul.f32 %v4187_v57, %v12946_v21  ;;  %3819 = vmatmul.f32.gmra.mxu1 %v3372_v3  ;;  %3884 = vmatmul.f32.gmra.mxu2 %v3372_v3  ;;  %v13040_v21 = vld [vmem:[#allocation50_spill] sm:$0xff]  ;;  %v13043_v9 = vld [vmem:[#allocation176_spill] sm:$0xff] }
 0x5bc   : > { %v3273_v46 = vpop.f32.mrf.mxu3  ;;  %v10195_v20 = vpop.permute.xlu0 %4859 }
 0x5bd   : > { %v10198_v62 = vadd.f32 %v3273_v46, %v2990_v29  ;;  %v10200_v12 = vpop.f32.mrf.mxu0  ;;  %4409 = vmatpush.msrb.mxu0 %v4330_v23  ;;  %4474 = vmatpush.msrb.mxu1 %v4331_v28  ;;  %v13042_v29 = vld [vmem:[#allocation149_spill] sm:$0xff]  ;;  %v13044_v23 = vld [vmem:[#allocation34_spill] sm:$0xff] }
 0x5be   : > { %13038 = vst [vmem:[#allocation11_spill] sm:$0xff] %v10200_v12  ;;  %4809 = vrot.lane.b32.xlu2 %v13039_v55, %s12941_s29  ;;  %v3208_v13 = vpop.f32.mrf.mxu2  ;;  %v2323_v57 = vadd.f32 %v13043_v9, %v13042_v29  ;;  %v13045_v28 = vld [vmem:[#allocation178_spill] sm:$0xff]  ;;  %v13047_v12 = vld [vmem:[#allocation229_spill] sm:$0xff] }
 0x5bf   : > { %4765 = vrot.lane.b32.xlu1 %v13040_v21, %s12941_s29  ;;  %v10206_v3 = vadd.f32 %v3208_v13, %v2989_v33  ;;  %v2258_v46 = vadd.f32 %v13045_v28, %v13044_v23  ;;  %v13046_v13 = vld [vmem:[#allocation40_spill] sm:$0xff]  ;;  %v13049_v21 = vld [vmem:[#allocation21_spill] sm:$0xff]  ;;  %v13050_v23 = vld [vmem:[#allocation231_spill] sm:$0xff] }
 0x5c0   : > { %3757 = vmatmul.f32.gmra.mxu0 %v3373_v25  ;;  %v10208_v16 = vpop.permute.xlu2 %4823  ;;  %v10210_v52 = vpop.f32.mrf.mxu1  ;;  %v2994_v55 = vadd.f32 %v13047_v12, %v2323_v57  ;;  %v13052_v12 = vld [vmem:[#allocation46_spill] sm:$0xff] }
 0x5c1   : > { %13041 = vst [vmem:[#allocation211_spill] sm:$0xff] %v10210_v52  ;;  %3952 = vmatmul.f32.gmra.mxu3 %v3373_v25  ;;  %v4862_v54 = vpop.permute.xlu1 %4861  ;;  %v13048_v52 = vld [vmem:[#allocation20_spill] sm:$0xff]  ;;  %v2993_v28 = vadd.f32 %v13050_v23, %v2258_v46 }
 0x5c2   : > { %v4910_v39 = vsel %vm592_vm2, %v10195_v20, %v4862_v54  ;;  %v5006_v33 = vsel %vm592_vm2, %v4862_v54, %v10064_v30  ;;  %4751 = vrot.lane.b32.xlu0 %v13046_v13, %s12941_s29  ;;  %v3374_v54 = vld [vmem:[#allocation2 + $0x248] sm:$0xff] }
 0x5c3   : > { %v5069_v37 = vmul.f32 %v4910_v39, %v13048_v52  ;;  %v5070_v29 = vmul.f32 %v5006_v33, %v13049_v21  ;;  %3822 = vmatmul.f32.gmra.mxu1 %v3373_v25  ;;  %3887 = vmatmul.f32.gmra.mxu2 %v3373_v25  ;;  %v13053_v39 = vld [vmem:[#allocation47_spill] sm:$0xff] }
 0x5c4   : > { %v3276_v9 = vpop.f32.mrf.mxu3  ;;  %v10225_v4 = vpop.permute.xlu0 %4851 }
 0x5c5   : > { %v10228_v43 = vadd.f32 %v3276_v9, %v2994_v55  ;;  %v10230_v32 = vpop.f32.mrf.mxu0  ;;  %5201 = vmatpush.msra.mxu2 %v5069_v37  ;;  %5266 = vmatpush.msra.mxu3 %v5070_v29  ;;  %v13055_v55 = vld [vmem:[#allocation152_spill] sm:$0xff]  ;;  %v13057_v29 = vld [vmem:[#allocation150_spill] sm:$0xff] }
 0x5c6   : > { %13051 = vst [vmem:[#allocation148_spill] sm:$0xff] %v10230_v32  ;;  %4757 = vrot.lane.b32.xlu2 %v13052_v12, %s12941_s29  ;;  %v3211_v57 = vpop.f32.mrf.mxu2  ;;  %v13056_v9 = vld [vmem:[#allocation180_spill] sm:$0xff]  ;;  %v13058_v32 = vld [vmem:[#allocation182_spill] sm:$0xff] }
 0x5c7   : > { %4755 = vrot.lane.b32.xlu1 %v13053_v39, %s12941_s29  ;;  %v10236_v25 = vadd.f32 %v3211_v57, %v2993_v28  ;;  %v2326_v23 = vadd.f32 %v13056_v9, %v13055_v55  ;;  %v2261_v13 = vadd.f32 %v13058_v32, %v13057_v29  ;;  %v13059_v57 = vld [vmem:[#allocation69_spill] sm:$0xff] }
 0x5c8   : > { %3760 = vmatmul.f32.gmra.mxu0 %v3374_v54  ;;  %v10238_v33 = vpop.permute.xlu2 %4815  ;;  %v10240_v46 = vpop.f32.mrf.mxu1 }
 0x5c9   : > { %13054 = vst [vmem:[#allocation160_spill] sm:$0xff] %v10240_v46  ;;  %3955 = vmatmul.f32.gmra.mxu3 %v3374_v54  ;;  %v4854_v37 = vpop.permute.xlu1 %4853  ;;  %v2998_v39 = vadd.f32 %v9746_v7, %v2326_v23  ;;  %v2997_v32 = vadd.f32 %v9755_v24, %v2261_v13  ;;  %v13061_v7 = vld [vmem:[#allocation42_spill] sm:$0xff]  ;;  %v13062_v23 = vld [vmem:[#allocation37_spill] sm:$0xff]  ;;  %v13065_v13 = vld [vmem:[#allocation144_spill] sm:$0xff] }
 0x5ca   : > { %v4907_v12 = vsel %vm592_vm2, %v10225_v4, %v4854_v37  ;;  %v5005_v28 = vsel %vm592_vm2, %v4854_v37, %v10096_v17  ;;  %4801 = vrot.lane.b32.xlu0 %v13059_v57, %s12941_s29  ;;  %v3375_v37 = vld [vmem:[#allocation2 + $0x250] sm:$0xff] }
 0x5cb   : > { %v5065_v46 = vmul.f32 %v4907_v12, %v13048_v52  ;;  %v5066_v55 = vmul.f32 %v5005_v28, %v13049_v21  ;;  %3825 = vmatmul.f32.gmra.mxu1 %v3374_v54  ;;  %3890 = vmatmul.f32.gmra.mxu2 %v3374_v54 }
 0x5cc   : > { %v3279_v9 = vpop.f32.mrf.mxu3  ;;  %v10255_v1 = vpop.permute.xlu0 %4843 }
 0x5cd   : > { %v10258_v29 = vadd.f32 %v3279_v9, %v2998_v39  ;;  %v10260_v27 = vpop.f32.mrf.mxu0  ;;  %5202 = vmatpush.msra.mxu2 %v5065_v46  ;;  %5267 = vmatpush.msra.mxu3 %v5066_v55  ;;  %v13066_v39 = vld [vmem:[#allocation184_spill] sm:$0xff]  ;;  %v13067_v55 = vld [vmem:[#allocation117_spill] sm:$0xff] }
 0x5ce   : > { %13060 = vst [vmem:[#allocation146_spill] sm:$0xff] %v10260_v27  ;;  %4747 = vrot.lane.b32.xlu2 %v13061_v7, %s12941_s29  ;;  %v3214_v12 = vpop.f32.mrf.mxu2  ;;  %v2329_v9 = vadd.f32 %v13066_v39, %v13065_v13  ;;  %v13068_v27 = vld [vmem:[#allocation186_spill] sm:$0xff] }
 0x5cf   : > { %4743 = vrot.lane.b32.xlu1 %v13062_v23, %s12941_s29  ;;  %v10266_v54 = vadd.f32 %v3214_v12, %v2997_v32  ;;  %v2264_v57 = vadd.f32 %v13068_v27, %v13067_v55  ;;  %v13069_v12 = vld [vmem:[#allocation43_spill] sm:$0xff] }
 0x5d0   : > { %3763 = vmatmul.f32.gmra.mxu0 %v3375_v37  ;;  %v10268_v28 = vpop.permute.xlu2 %4807  ;;  %v10270_v24 = vpop.f32.mrf.mxu1  ;;  %v3002_v23 = vadd.f32 %v9770_v5, %v2329_v9  ;;  %v13072_v5 = vld [vmem:[#allocation36_spill] sm:$0xff] }
 0x5d1   : > { %13063 = vst [vmem:[#allocation162_spill] sm:$0xff] %v10266_v54  ;;  %3958 = vmatmul.f32.gmra.mxu3 %v3375_v37  ;;  %v4846_v46 = vpop.permute.xlu1 %4845  ;;  %v3001_v27 = vadd.f32 %v9784_v18, %v2264_v57  ;;  %v13073_v9 = vld [vmem:[#allocation64_spill] sm:$0xff]  ;;  %v13076_v18 = vld [vmem:[#allocation119_spill] sm:$0xff] }
 0x5d2   : > { %13064 = vst [vmem:[#allocation213_spill] sm:$0xff] %v10270_v24  ;;  %v4904_v7 = vsel %vm592_vm2, %v10255_v1, %v4846_v46  ;;  %v5004_v32 = vsel %vm592_vm2, %v4846_v46, %v10138_v45  ;;  %4749 = vrot.lane.b32.xlu0 %v13069_v12, %s12941_s29  ;;  %v3376_v46 = vld [vmem:[#allocation2 + $0x258] sm:$0xff]  ;;  %v13077_v57 = vld [vmem:[#allocation188_spill] sm:$0xff] }
 0x5d3   : > { %v5061_v24 = vmul.f32 %v4904_v7, %v13048_v52  ;;  %v5062_v13 = vmul.f32 %v5004_v32, %v13049_v21  ;;  %3828 = vmatmul.f32.gmra.mxu1 %v3375_v37  ;;  %3893 = vmatmul.f32.gmra.mxu2 %v3375_v37 }
 0x5d4   : > { %v3282_v39 = vpop.f32.mrf.mxu3  ;;  %v10285_v34 = vpop.permute.xlu0 %4835 }
 0x5d5   : > { %v10288_v55 = vadd.f32 %v3282_v39, %v3002_v23  ;;  %v10290_v54 = vpop.f32.mrf.mxu0  ;;  %5203 = vmatpush.msra.mxu2 %v5061_v24  ;;  %5268 = vmatpush.msra.mxu3 %v5062_v13  ;;  %v2332_v23 = vadd.f32 %v13077_v57, %v13076_v18  ;;  %v13078_v39 = vld [vmem:[#allocation128_spill] sm:$0xff]  ;;  %v13079_v24 = vld [vmem:[#allocation190_spill] sm:$0xff]  ;;  %v13082_v57 = vld [vmem:[#allocation39_spill] sm:$0xff] }
 0x5d6   : > { %13071 = vst [vmem:[#allocation59_spill] sm:$0xff] %v10290_v54  ;;  %4735 = vrot.lane.b32.xlu2 %v13072_v5, %s12941_s29  ;;  %v3217_v7 = vpop.f32.mrf.mxu2  ;;  %v2267_v13 = vadd.f32 %v13079_v24, %v13078_v39 }
 0x5d7   : > { %13070 = vst [vmem:[#allocation215_spill] sm:$0xff] %v10288_v55  ;;  %4793 = vrot.lane.b32.xlu1 %v13073_v9, %s12941_s29  ;;  %v10296_v37 = vadd.f32 %v3217_v7, %v3001_v27  ;;  %v13080_v27 = vld [vmem:[#allocation9_spill] sm:$0xff]  ;;  %v3006_v39 = vadd.f32 %v9797_v44, %v2332_v23  ;;  %v3377_v44 = vld [vmem:[#allocation2 + $0x260] sm:$0xff] }
 0x5d8   : > { %3766 = vmatmul.f32.gmra.mxu0 %v3376_v46  ;;  %v4858_v32 = vpop.permute.xlu2 %4857  ;;  %v10298_v12 = vpop.f32.mrf.mxu1 }
 0x5d9   : > { %13074 = vst [vmem:[#allocation142_spill] sm:$0xff] %v10296_v37  ;;  %3961 = vmatmul.f32.gmra.mxu3 %v3376_v46  ;;  %v4908_v54 = vsel %vm592_vm2, %v10064_v30, %v4858_v32  ;;  %v4909_v5 = vsel %vm592_vm2, %v4858_v32, %v10195_v20  ;;  %v4838_v9 = vpop.permute.xlu1 %4837  ;;  %v13081_v37 = vld [vmem:[#allocation13_spill] sm:$0xff]  ;;  %v3005_v32 = vadd.f32 %v9810_v10, %v2267_v13 }
 0x5da   : > { %13075 = vst [vmem:[#allocation164_spill] sm:$0xff] %v10298_v12  ;;  %v5067_v7 = vmul.f32 %v4908_v54, %v13080_v27  ;;  %v5068_v55 = vmul.f32 %v4909_v5, %v13081_v37  ;;  %v4901_v12 = vsel %vm592_vm2, %v10285_v34, %v4838_v9  ;;  %v5003_v18 = vsel %vm592_vm2, %v4838_v9, %v10178_v63  ;;  %v13088_v13 = vld [vmem:[#allocation109_spill] sm:$0xff] }
 0x5db   : > { %4739 = vrot.lane.b32.xlu0 %v13082_v57, %s12941_s29  ;;  %v5057_v30 = vmul.f32 %v4901_v12, %v13048_v52  ;;  %v5058_v20 = vmul.f32 %v5003_v18, %v13049_v21  ;;  %3831 = vmatmul.f32.gmra.mxu1 %v3376_v46  ;;  %v13084_v12 = vld [vmem:[#allocation60_spill] sm:$0xff] }
 0x5dc   : > { %3896 = vmatmul.f32.gmra.mxu2 %v3376_v46  ;;  %v3285_v54 = vpop.f32.mrf.mxu3  ;;  %5071 = vmatpush.msra.mxu0 %v5067_v7  ;;  %v10319_v5 = vpop.permute.xlu0 %4827  ;;  %v13085_v46 = vld [vmem:[#allocation38_spill] sm:$0xff]  ;;  %v13089_v18 = vld [vmem:[#allocation192_spill] sm:$0xff] }
 0x5dd   : > { %5136 = vmatpush.msra.mxu1 %v5068_v55  ;;  %v10322_v24 = vadd.f32 %v3285_v54, %v3006_v39  ;;  %v10324_v9 = vpop.f32.mrf.mxu0  ;;  %5204 = vmatpush.msra.mxu2 %v5057_v30  ;;  %v2335_v39 = vadd.f32 %v13089_v18, %v13088_v13  ;;  %v13091_v54 = vld [vmem:[#allocation194_spill] sm:$0xff] }
 0x5de   : > { %13083 = vst [vmem:[#allocation139_spill] sm:$0xff] %v10324_v9  ;;  %5269 = vmatpush.msra.mxu3 %v5058_v20  ;;  %4785 = vrot.lane.b32.xlu2 %v13084_v12, %s12941_s29  ;;  %v3220_v23 = vpop.f32.mrf.mxu2  ;;  %v13090_v20 = vld [vmem:[#allocation130_spill] sm:$0xff] }
 0x5df   : > { %4741 = vrot.lane.b32.xlu1 %v13085_v46, %s12941_s29  ;;  %v10330_v7 = vadd.f32 %v3220_v23, %v3005_v32  ;;  %v2270_v9 = vadd.f32 %v13091_v54, %v13090_v20  ;;  %v13092_v23 = vld [vmem:[#allocation57_spill] sm:$0xff]  ;;  %v3010_v57 = vadd.f32 %v9822_v19, %v2335_v39  ;;  %v13095_v19 = vld [vmem:[#allocation48_spill] sm:$0xff] }
 0x5e0   : > { %3769 = vmatmul.f32.gmra.mxu0 %v3377_v44  ;;  %v10332_v55 = vpop.permute.xlu2 %4805  ;;  %v10334_v10 = vpop.f32.mrf.mxu1  ;;  %v13096_v39 = vld [vmem:[#allocation53_spill] sm:$0xff] }
 0x5e1   : > { %13086 = vst [vmem:[#allocation166_spill] sm:$0xff] %v10330_v7  ;;  %3964 = vmatmul.f32.gmra.mxu3 %v3377_v44  ;;  %v4830_v30 = vpop.permute.xlu1 %4829  ;;  %v3009_v20 = vadd.f32 %v9834_v22, %v2270_v9  ;;  %v13100_v9 = vld [vmem:[#allocation196_spill] sm:$0xff] }
 0x5e2   : > { %13087 = vst [vmem:[#allocation217_spill] sm:$0xff] %v10334_v10  ;;  %v4898_v12 = vsel %vm592_vm2, %v10319_v5, %v4830_v30  ;;  %v5002_v32 = vsel %vm592_vm2, %v4830_v30, %v10208_v16  ;;  %v3378_v30 = vld [vmem:[#allocation2 + $0x268] sm:$0xff] }
 0x5e3   : > { %4777 = vrot.lane.b32.xlu0 %v13092_v23, %s12941_s29  ;;  %v5053_v10 = vmul.f32 %v4898_v12, %v13048_v52  ;;  %v5054_v13 = vmul.f32 %v5002_v32, %v13049_v21  ;;  %3834 = vmatmul.f32.gmra.mxu1 %v3377_v44 }
 0x5e4   : > { %3899 = vmatmul.f32.gmra.mxu2 %v3377_v44  ;;  %v3288_v18 = vpop.f32.mrf.mxu3  ;;  %v10349_v46 = vpop.permute.xlu0 %4819 }
 0x5e5   : > { %v10352_v54 = vadd.f32 %v3288_v18, %v3010_v57  ;;  %v10354_v7 = vpop.f32.mrf.mxu0  ;;  %5205 = vmatpush.msra.mxu2 %v5053_v10  ;;  %5270 = vmatpush.msra.mxu3 %v5054_v13  ;;  %v13099_v57 = vld [vmem:[#allocation32_spill] sm:$0xff] }
 0x5e6   : > { %13094 = vst [vmem:[#allocation134_spill] sm:$0xff] %v10354_v7  ;;  %4761 = vrot.lane.b32.xlu2 %v13095_v19, %s12941_s29  ;;  %v3223_v12 = vpop.f32.mrf.mxu2  ;;  %v2338_v18 = vadd.f32 %v13100_v9, %v13099_v57  ;;  %v13101_v13 = vld [vmem:[#allocation16_spill] sm:$0xff]  ;;  %v13102_v7 = vld [vmem:[#allocation198_spill] sm:$0xff] }
 0x5e7   : > { %13093 = vst [vmem:[#allocation219_spill] sm:$0xff] %v10352_v54  ;;  %4769 = vrot.lane.b32.xlu1 %v13096_v39, %s12941_s29  ;;  %v10360_v44 = vadd.f32 %v3223_v12, %v3009_v20  ;;  %v2273_v23 = vadd.f32 %v13102_v7, %v13101_v13  ;;  %v13103_v12 = vld [vmem:[#allocation45_spill] sm:$0xff] }
 0x5e8   : > { %3772 = vmatmul.f32.gmra.mxu0 %v3378_v30  ;;  %v10362_v32 = vpop.permute.xlu2 %4795  ;;  %v10364_v22 = vpop.f32.mrf.mxu1  ;;  %v3014_v39 = vadd.f32 %v9852_v38, %v2338_v18  ;;  %v13105_v38 = vld [vmem:[#allocation35_spill] sm:$0xff]  ;;  %v13106_v18 = vld [vmem:[#allocation41_spill] sm:$0xff] }
 0x5e9   : > { %13097 = vst [vmem:[#allocation168_spill] sm:$0xff] %v10360_v44  ;;  %3967 = vmatmul.f32.gmra.mxu3 %v3378_v30  ;;  %v4822_v10 = vpop.permute.xlu1 %4821  ;;  %v3013_v7 = vadd.f32 %v9863_v56, %v2273_v23  ;;  %v13108_v23 = vld [vmem:[#allocation29_spill] sm:$0xff] }
 0x5ea   : > { %13098 = vst [vmem:[#allocation123_spill] sm:$0xff] %v10364_v22  ;;  %v4895_v19 = vsel %vm592_vm2, %v10349_v46, %v4822_v10  ;;  %v5001_v20 = vsel %vm592_vm2, %v4822_v10, %v10238_v33  ;;  %v3379_v10 = vld [vmem:[#allocation2 + $0x270] sm:$0xff] }
 0x5eb   : > { %4753 = vrot.lane.b32.xlu0 %v13103_v12, %s12941_s29  ;;  %v5049_v22 = vmul.f32 %v4895_v19, %v13048_v52  ;;  %v5050_v57 = vmul.f32 %v5001_v20, %v13049_v21  ;;  %3837 = vmatmul.f32.gmra.mxu1 %v3378_v30 }
 0x5ec   : > { %3902 = vmatmul.f32.gmra.mxu2 %v3378_v30  ;;  %v3291_v9 = vpop.f32.mrf.mxu3  ;;  %v10379_v44 = vpop.permute.xlu0 %4811 }
 0x5ed   : > { %v10382_v13 = vadd.f32 %v3291_v9, %v3014_v39  ;;  %v10384_v54 = vpop.f32.mrf.mxu0  ;;  %5206 = vmatpush.msra.mxu2 %v5049_v22  ;;  %5271 = vmatpush.msra.mxu3 %v5050_v57  ;;  %v13109_v39 = vld [vmem:[#allocation200_spill] sm:$0xff] }
 0x5ee   : > { %13104 = vst [vmem:[#allocation170_spill] sm:$0xff] %v10384_v54  ;;  %4737 = vrot.lane.b32.xlu2 %v13105_v38, %s12941_s29  ;;  %v3226_v19 = vpop.f32.mrf.mxu2  ;;  %v2341_v9 = vadd.f32 %v13109_v39, %v13108_v23  ;;  %v13111_v38 = vld [vmem:[#allocation124_spill] sm:$0xff] }
 0x5ef   : > { %4745 = vrot.lane.b32.xlu1 %v13106_v18, %s12941_s29  ;;  %v10390_v30 = vadd.f32 %v3226_v19, %v3013_v7  ;;  %s343_s29 = scalar_lea.vmem [#allocation5], %s6257_s27 }
 0x5f0   : > { %3775 = vmatmul.f32.gmra.mxu0 %v3379_v10  ;;  %v10392_v20 = vpop.permute.xlu2 %4783  ;;  %v10394_v56 = vpop.f32.mrf.mxu1  ;;  %v3018_v7 = vadd.f32 %v9878_v26, %v2341_v9  ;;  %v3380_v26 = vld [vmem:[#allocation2 + $0x278] sm:$0xff] }
 0x5f1   : > { %13107 = vst [vmem:[#allocation221_spill] sm:$0xff] %v10394_v56  ;;  %3970 = vmatmul.f32.gmra.mxu3 %v3379_v10  ;;  %v4814_v22 = vpop.permute.xlu1 %4813 }
 0x5f2   : > { %v4892_v57 = vsel %vm592_vm2, %v10379_v44, %v4814_v22  ;;  %v5000_v54 = vsel %vm592_vm2, %v4814_v22, %v10268_v28 }
 0x5f3   : > { %5532 = vrot.lane.b32.xlu0 %v13111_v38, %s13110_s14  ;;  %v5045_v19 = vmul.f32 %v4892_v57, %v13048_v52  ;;  %v5046_v56 = vmul.f32 %v5000_v54, %v13049_v21  ;;  %3840 = vmatmul.f32.gmra.mxu1 %v3379_v10  ;;  %v13114_v57 = vld [vmem:[#allocation137_spill] sm:$0xff] }
 0x5f4   : > { %3905 = vmatmul.f32.gmra.mxu2 %v3379_v10  ;;  %v3294_v23 = vpop.f32.mrf.mxu3  ;;  %v10407_v39 = vpop.permute.xlu0 %4799 }
 0x5f5   : > { %v10409_v12 = vadd.f32 %v3294_v23, %v3018_v7  ;;  %v10411_v18 = vpop.f32.mrf.mxu0  ;;  %5207 = vmatpush.msra.mxu2 %v5045_v19  ;;  %5272 = vmatpush.msra.mxu3 %v5046_v56  ;;  %v4999_v38 = vsel %vm592_vm2, %v10332_v55, %v10407_v39  ;;  %v13115_v7 = vld [vmem:[#allocation203_spill] sm:$0xff] }
 0x5f6   : > { %13112 = vst [vmem:[#allocation223_spill] sm:$0xff] %v10411_v18  ;;  %v5042_v9 = vmul.f32 %v4999_v38, %v13049_v21  ;;  %5538 = vrot.lane.b32.xlu2 %v7546_v0, %s13110_s14  ;;  %v3229_v54 = vpop.f32.mrf.mxu2  ;;  %v2344_v19 = vadd.f32 %v13115_v7, %v13114_v57 }
 0x5f7   : > { %5536 = vrot.lane.b32.xlu1 %v7553_v6, %s13110_s14  ;;  %v10422_v10 = vadd.f32 %v3229_v54, %v9896_v41  ;;  %v13116_v6 = vld [vmem:[#allocation118_spill] sm:$0xff] }
 0x5f8   : > { %3778 = vmatmul.f32.gmra.mxu0 %v3380_v26  ;;  %v4834_v22 = vpop.permute.xlu2 %4833  ;;  %v10424_v56 = vpop.f32.mrf.mxu1  ;;  %5273 = vmatpush.msra.mxu3 %v5042_v9  ;;  %v3022_v41 = vadd.f32 %v9909_v61, %v2344_v19 }
 0x5f9   : > { %13113 = vst [vmem:[#allocation94_spill] sm:$0xff] %v10424_v56  ;;  %3973 = vmatmul.f32.gmra.mxu3 %v3380_v26  ;;  %v10428_v23 = vpop.permute.xlu1 %4803 }
 0x5fa   : > { %v4889_v0 = vsel %vm592_vm2, %v10428_v23, %v10332_v55 }
 0x5fb   : > { %5524 = vrot.lane.b32.xlu0 %v13116_v6, %s13110_s14  ;;  %v5041_v38 = vmul.f32 %v4889_v0, %v13048_v52  ;;  %3843 = vmatmul.f32.gmra.mxu1 %v3380_v26  ;;  %v4042_v6 = vld [vmem:[#allocation2 + $0x280] sm:$0xff] }
 0x5fc   : > { %3908 = vmatmul.f32.gmra.mxu2 %v3380_v26  ;;  %v3297_v9 = vpop.f32.mrf.mxu3  ;;  %v4850_v54 = vpop.permute.xlu0 %4849  ;;  %v13118_v26 = vld [vmem:[#allocation129_spill] sm:$0xff] }
 0x5fd   : > { %v10437_v56 = vadd.f32 %v3297_v9, %v3022_v41  ;;  %v10439_v57 = vpop.f32.mrf.mxu0  ;;  %5208 = vmatpush.msra.mxu2 %v5041_v38  ;;  %v4905_v7 = vsel %vm592_vm2, %v10096_v17, %v4850_v54  ;;  %v4906_v55 = vsel %vm592_vm2, %v4850_v54, %v10225_v4  ;;  %v13119_v41 = vld [vmem:[#allocation131_spill] sm:$0xff]  ;;  %v13121_v54 = vld [vmem:[#allocation105_spill] sm:$0xff] }
 0x5fe   : > { %13117 = vst [vmem:[#allocation172_spill] sm:$0xff] %v10439_v57  ;;  %v5063_v61 = vmul.f32 %v4905_v7, %v13080_v27  ;;  %v5064_v19 = vmul.f32 %v4906_v55, %v13081_v37  ;;  %5530 = vrot.lane.b32.xlu2 %v13118_v26, %s13110_s14  ;;  %v3232_v0 = vpop.f32.mrf.mxu2  ;;  %v13225_v57 = vld [vmem:[#allocation12_spill] sm:$0xff] }
 0x5ff   : > { %5528 = vrot.lane.b32.xlu1 %v13119_v41, %s13110_s14  ;;  %v10452_v38 = vadd.f32 %v3232_v0, %v9926_v15  ;;  %v4043_v41 = vld [vmem:[#allocation2 + $0x288] sm:$0xff] }
 0x600   : > { %4410 = vmatmul.f32.vlgmr.msrb.gmra.mxu0 %v4042_v6  ;;  %v10454_v17 = vpop.permute.xlu2 %4781  ;;  %v10456_v9 = vpop.f32.mrf.mxu1  ;;  %5137 = vmatpush.msra.mxu1 %v5064_v19 }
 0x601   : > { %13120 = vst [vmem:[#allocation28_spill] sm:$0xff] %v10456_v9  ;;  %4605 = vmatmul.f32.vlgmr.msrb.gmra.mxu3 %v4042_v6  ;;  %v10458_v4 = vpop.permute.xlu1 %4791  ;;  %5072 = vmatpush.msra.mxu0 %v5063_v61 }
 0x603   : > { %5516 = vrot.lane.b32.xlu0 %v13121_v54, %s13110_s14  ;;  %4475 = vmatmul.f32.vlgmr.msrb.gmra.mxu1 %v4042_v6 }
 0x604   : > { %4540 = vmatmul.f32.vlgmr.msrb.gmra.mxu2 %v4042_v6  ;;  %v3929_v7 = vpop.f32.mrf.mxu3  ;;  %v4798_v55 = vpop.permute.xlu0 %4797 }
 0x605   : > { %v10463_v15 = vadd.f32 %v3929_v7, %v9941_v40  ;;  %v10465_v26 = vpop.f32.mrf.mxu0  ;;  %v4886_v0 = vsel %vm592_vm2, %v10362_v32, %v4798_v55  ;;  %v4998_v19 = vsel %vm592_vm2, %v4798_v55, %v10458_v4  ;;  %v13123_v40 = vld [vmem:[#allocation121_spill] sm:$0xff] }
 0x606   : > { %13122 = vst [vmem:[#allocation174_spill] sm:$0xff] %v10465_v26  ;;  %v5037_v61 = vmul.f32 %v4886_v0, %v13048_v52  ;;  %v5038_v54 = vmul.f32 %v4998_v19, %v13049_v21  ;;  %5522 = vrot.lane.b32.xlu2 %v12688_v47, %s13110_s14  ;;  %v3864_v6 = vpop.f32.mrf.mxu2  ;;  %v4899_v0 = vsel %vm592_vm2, %v10178_v63, %v4834_v22 }
 0x607   : > { %5520 = vrot.lane.b32.xlu1 %v13123_v40, %s13110_s14  ;;  %v10478_v7 = vadd.f32 %v3864_v6, %v9958_v8  ;;  %v4900_v8 = vsel %vm592_vm2, %v4834_v22, %v10285_v34  ;;  %v13126_v22 = vld [vmem:[#allocation108_spill] sm:$0xff] }
 0x608   : > { %4413 = vmatmul.f32.gmra.mxu0 %v4043_v41  ;;  %v10480_v9 = vpop.permute.xlu2 %4771  ;;  %v10482_v26 = vpop.f32.mrf.mxu1  ;;  %5209 = vmatpush.msra.mxu2 %v5037_v61  ;;  %v5056_v34 = vmul.f32 %v4900_v8, %v13081_v37 }
 0x609   : > { %13124 = vst [vmem:[#allocation225_spill] sm:$0xff] %v10482_v26  ;;  %4608 = vmatmul.f32.gmra.mxu3 %v4043_v41  ;;  %v4842_v55 = vpop.permute.xlu1 %4841 }
 0x60a   : > { %v4902_v47 = vsel %vm592_vm2, %v10138_v45, %v4842_v55  ;;  %v4903_v19 = vsel %vm592_vm2, %v4842_v55, %v10255_v1  ;;  %5274 = vmatpush.msra.mxu3 %v5038_v54  ;;  %v5055_v45 = vmul.f32 %v4899_v0, %v13080_v27 }
 0x60b   : > { %5508 = vrot.lane.b32.xlu0 %v12695_v42, %s13110_s14  ;;  %v5059_v61 = vmul.f32 %v4902_v47, %v13080_v27  ;;  %v5060_v6 = vmul.f32 %v4903_v19, %v13081_v37  ;;  %4478 = vmatmul.f32.gmra.mxu1 %v4043_v41  ;;  %v4044_v42 = vld [vmem:[#allocation2 + $0x290] sm:$0xff] }
 0x60c   : > { %4543 = vmatmul.f32.gmra.mxu2 %v4043_v41  ;;  %v3932_v63 = vpop.f32.mrf.mxu3  ;;  %v10496_v40 = vpop.permute.xlu0 %4787  ;;  %v13127_v41 = vld [vmem:[#allocation110_spill] sm:$0xff] }
 0x60d   : > { %v10500_v1 = vadd.f32 %v3932_v63, %v9985_v59  ;;  %v10502_v54 = vpop.f32.mrf.mxu0  ;;  %5073 = vmatpush.msra.mxu0 %v5059_v61  ;;  %5138 = vmatpush.msra.mxu1 %v5060_v6  ;;  %v13129_v6 = vld [vmem:[#allocation87_spill] sm:$0xff] }
 0x60e   : > { %13125 = vst [vmem:[#allocation227_spill] sm:$0xff] %v10502_v54  ;;  %5514 = vrot.lane.b32.xlu2 %v13126_v22, %s13110_s14  ;;  %v3867_v55 = vpop.f32.mrf.mxu2 }
 0x60f   : > { %5512 = vrot.lane.b32.xlu1 %v13127_v41, %s13110_s14  ;;  %v10510_v47 = vadd.f32 %v3867_v55, %v9994_v49  ;;  %5074 = vmatpush.msra.mxu0 %v5055_v45 }
 0x610   : > { %5139 = vmatpush.msra.mxu1 %v5056_v34  ;;  %4416 = vmatmul.f32.gmra.mxu0 %v4044_v42  ;;  %v10512_v59 = vpop.permute.xlu2 %4759  ;;  %v10514_v0 = vpop.f32.mrf.mxu1 }
 0x611   : > { %13128 = vst [vmem:[#allocation149_spill] sm:$0xff] %v10514_v0  ;;  %4611 = vmatmul.f32.gmra.mxu3 %v4044_v42  ;;  %v4790_v19 = vpop.permute.xlu1 %4789 }
 0x612   : > { %v4883_v8 = vsel %vm592_vm2, %v10496_v40, %v4790_v19  ;;  %v4997_v61 = vsel %vm592_vm2, %v4790_v19, %v10392_v20  ;;  %v4045_v19 = vld [vmem:[#allocation2 + $0x298] sm:$0xff] }
 0x613   : > { %5500 = vrot.lane.b32.xlu0 %v13129_v6, %s13110_s14  ;;  %v5033_v49 = vmul.f32 %v4883_v8, %v13048_v52  ;;  %v5034_v63 = vmul.f32 %v4997_v61, %v13049_v21  ;;  %4481 = vmatmul.f32.gmra.mxu1 %v4044_v42  ;;  %v13131_v61 = vld [vmem:[#allocation99_spill] sm:$0xff] }
 0x614   : > { %4546 = vmatmul.f32.gmra.mxu2 %v4044_v42  ;;  %v3935_v45 = vpop.f32.mrf.mxu3  ;;  %v10524_v34 = vpop.permute.xlu0 %4775 }
 0x615   : > { %v10527_v22 = vadd.f32 %v3935_v45, %v10016_v11  ;;  %v10529_v55 = vpop.f32.mrf.mxu0  ;;  %5210 = vmatpush.msra.mxu2 %v5033_v49  ;;  %5275 = vmatpush.msra.mxu3 %v5034_v63  ;;  %v4996_v41 = vsel %vm592_vm2, %v10454_v17, %v10524_v34 }
 0x616   : > { %13130 = vst [vmem:[#allocation176_spill] sm:$0xff] %v10529_v55  ;;  %v5030_v8 = vmul.f32 %v4996_v41, %v13049_v21  ;;  %5506 = vrot.lane.b32.xlu2 %v12708_v36, %s13110_s14  ;;  %v3870_v42 = vpop.f32.mrf.mxu2  ;;  %v13133_v36 = vld [vmem:[#allocation79_spill] sm:$0xff]  ;;  %v4046_v55 = vld [vmem:[#allocation2 + $0x2a0] sm:$0xff] }
 0x617   : > { %5504 = vrot.lane.b32.xlu1 %v13131_v61, %s13110_s14  ;;  %v10540_v11 = vadd.f32 %v3870_v42, %v10028_v51 }
 0x618   : > { %4419 = vmatmul.f32.gmra.mxu0 %v4045_v19  ;;  %v4810_v6 = vpop.permute.xlu2 %4809  ;;  %v10542_v49 = vpop.f32.mrf.mxu1  ;;  %5276 = vmatpush.msra.mxu3 %v5030_v8 }
 0x619   : > { %13132 = vst [vmem:[#allocation34_spill] sm:$0xff] %v10542_v49  ;;  %4614 = vmatmul.f32.gmra.mxu3 %v4045_v19  ;;  %v10544_v63 = vpop.permute.xlu1 %4779 }
 0x61a   : > { %v4880_v45 = vsel %vm592_vm2, %v10544_v63, %v10454_v17 }
 0x61b   : > { %5492 = vrot.lane.b32.xlu0 %v13133_v36, %s13110_s14  ;;  %v5029_v41 = vmul.f32 %v4880_v45, %v13048_v52  ;;  %4484 = vmatmul.f32.gmra.mxu1 %v4045_v19 }
 0x61c   : > { %4549 = vmatmul.f32.gmra.mxu2 %v4045_v19  ;;  %v3938_v51 = vpop.f32.mrf.mxu3  ;;  %v4826_v42 = vpop.permute.xlu0 %4825 }
 0x61d   : > { %v10553_v61 = vadd.f32 %v3938_v51, %v10048_v31  ;;  %v10555_v8 = vpop.f32.mrf.mxu0  ;;  %5211 = vmatpush.msra.mxu2 %v5029_v41  ;;  %v4896_v49 = vsel %vm592_vm2, %v10208_v16, %v4826_v42  ;;  %v4897_v17 = vsel %vm592_vm2, %v4826_v42, %v10319_v5  ;;  %v13135_v31 = vld [vmem:[#allocation90_spill] sm:$0xff] }
 0x61e   : > { %13134 = vst [vmem:[#allocation178_spill] sm:$0xff] %v10555_v8  ;;  %v5051_v36 = vmul.f32 %v4896_v49, %v13080_v27  ;;  %v5052_v45 = vmul.f32 %v4897_v17, %v13081_v37  ;;  %5498 = vrot.lane.b32.xlu2 %v12715_v58, %s13110_s14  ;;  %v3873_v19 = vpop.f32.mrf.mxu2  ;;  %v13136_v51 = vld [vmem:[#allocation106_spill] sm:$0xff]  ;;  %v13138_v49 = vld [vmem:[#allocation71_spill] sm:$0xff] }
 0x61f   : > { %5496 = vrot.lane.b32.xlu1 %v13135_v31, %s13110_s14  ;;  %v10568_v41 = vadd.f32 %v3873_v19, %v13136_v51  ;;  %v4047_v51 = vld [vmem:[#allocation2 + $0x2a8] sm:$0xff] }
 0x620   : > { %4422 = vmatmul.f32.gmra.mxu0 %v4046_v55  ;;  %v10570_v16 = vpop.permute.xlu2 %4757  ;;  %v10572_v8 = vpop.f32.mrf.mxu1  ;;  %5140 = vmatpush.msra.mxu1 %v5052_v45 }
 0x621   : > { %13137 = vst [vmem:[#allocation229_spill] sm:$0xff] %v10572_v8  ;;  %4617 = vmatmul.f32.gmra.mxu3 %v4046_v55  ;;  %v10574_v5 = vpop.permute.xlu1 %4767  ;;  %5075 = vmatpush.msra.mxu0 %v5051_v36 }
 0x623   : > { %5484 = vrot.lane.b32.xlu0 %v13138_v49, %s13110_s14  ;;  %4487 = vmatmul.f32.gmra.mxu1 %v4046_v55 }
 0x624   : > { %4552 = vmatmul.f32.gmra.mxu2 %v4046_v55  ;;  %v3941_v58 = vpop.f32.mrf.mxu3  ;;  %v4774_v42 = vpop.permute.xlu0 %4773  ;;  %v13140_v55 = vld [vmem:[#allocation78_spill] sm:$0xff] }
 0x625   : > { %v10579_v17 = vadd.f32 %v3941_v58, %v10078_v14  ;;  %v10581_v19 = vpop.f32.mrf.mxu0  ;;  %v4877_v31 = vsel %vm592_vm2, %v10480_v9, %v4774_v42  ;;  %v4995_v45 = vsel %vm592_vm2, %v4774_v42, %v10574_v5  ;;  %v13141_v14 = vld [vmem:[#allocation82_spill] sm:$0xff] }
 0x626   : > { %13139 = vst [vmem:[#allocation20_spill] sm:$0xff] %v10581_v19  ;;  %v5025_v36 = vmul.f32 %v4877_v31, %v13048_v52  ;;  %v5026_v49 = vmul.f32 %v4995_v45, %v13049_v21  ;;  %5490 = vrot.lane.b32.xlu2 %v13140_v55, %s13110_s14  ;;  %v3876_v8 = vpop.f32.mrf.mxu2  ;;  %v4890_v31 = vsel %vm592_vm2, %v10268_v28, %v4810_v6 }
 0x627   : > { %5488 = vrot.lane.b32.xlu1 %v13141_v14, %s13110_s14  ;;  %v10594_v58 = vadd.f32 %v3876_v8, %v10092_v50  ;;  %v13143_v50 = vld [vmem:[#allocation135_spill] sm:$0xff]  ;;  %v4891_v8 = vsel %vm592_vm2, %v4810_v6, %v10379_v44  ;;  %v13145_v6 = vld [vmem:[#allocation72_spill] sm:$0xff] }
 0x628   : > { %4425 = vmatmul.f32.gmra.mxu0 %v4047_v51  ;;  %v10596_v19 = vpop.permute.xlu2 %4747  ;;  %v10598_v0 = vpop.f32.mrf.mxu1  ;;  %5212 = vmatpush.msra.mxu2 %v5025_v36  ;;  %v5044_v44 = vmul.f32 %v4891_v8, %v13081_v37 }
 0x629   : > { %13142 = vst [vmem:[#allocation21_spill] sm:$0xff] %v10598_v0  ;;  %4620 = vmatmul.f32.gmra.mxu3 %v4047_v51  ;;  %v4818_v42 = vpop.permute.xlu1 %4817 }
 0x62a   : > { %v4893_v45 = vsel %vm592_vm2, %v10238_v33, %v4818_v42  ;;  %v4894_v55 = vsel %vm592_vm2, %v4818_v42, %v10349_v46  ;;  %5277 = vmatpush.msra.mxu3 %v5026_v49  ;;  %v5043_v33 = vmul.f32 %v4890_v31, %v13080_v27  ;;  %v4048_v42 = vld [vmem:[#allocation2 + $0x2b0] sm:$0xff] }
 0x62b   : > { %5534 = vrot.lane.b32.xlu0 %v13143_v50, %s13110_s14  ;;  %v5047_v36 = vmul.f32 %v4893_v45, %v13080_v27  ;;  %v5048_v14 = vmul.f32 %v4894_v55, %v13081_v37  ;;  %4490 = vmatmul.f32.gmra.mxu1 %v4047_v51 }
 0x62c   : > { %4555 = vmatmul.f32.gmra.mxu2 %v4047_v51  ;;  %v3944_v28 = vpop.f32.mrf.mxu3  ;;  %v10612_v0 = vpop.permute.xlu0 %4763  ;;  %v13146_v51 = vld [vmem:[#allocation65_spill] sm:$0xff] }
 0x62d   : > { %v10616_v46 = vadd.f32 %v3944_v28, %v10119_v2  ;;  %v10618_v49 = vpop.f32.mrf.mxu0  ;;  %5076 = vmatpush.msra.mxu0 %v5047_v36  ;;  %5141 = vmatpush.msra.mxu1 %v5048_v14  ;;  %v13148_v14 = vld [vmem:[#allocation70_spill] sm:$0xff] }
 0x62e   : > { %13144 = vst [vmem:[#allocation231_spill] sm:$0xff] %v10618_v49  ;;  %5480 = vrot.lane.b32.xlu2 %v13145_v6, %s13110_s14  ;;  %v3879_v45 = vpop.f32.mrf.mxu2 }
 0x62f   : > { %5476 = vrot.lane.b32.xlu1 %v13146_v51, %s13110_s14  ;;  %v10626_v55 = vadd.f32 %v3879_v45, %v10134_v60  ;;  %5077 = vmatpush.msra.mxu0 %v5043_v33 }
 0x630   : > { %5142 = vmatpush.msra.mxu1 %v5044_v44  ;;  %4428 = vmatmul.f32.gmra.mxu0 %v4048_v42  ;;  %v10628_v2 = vpop.permute.xlu2 %4735  ;;  %v10630_v31 = vpop.f32.mrf.mxu1 }
 0x631   : > { %13147 = vst [vmem:[#allocation152_spill] sm:$0xff] %v10630_v31  ;;  %4623 = vmatmul.f32.gmra.mxu3 %v4048_v42  ;;  %v4766_v50 = vpop.permute.xlu1 %4765  ;;  %v4050_v31 = vld [vmem:[#allocation2 + $0x2c0] sm:$0xff] }
 0x632   : > { %v4874_v8 = vsel %vm592_vm2, %v10612_v0, %v4766_v50  ;;  %v4994_v36 = vsel %vm592_vm2, %v4766_v50, %v10512_v59  ;;  %v4049_v50 = vld [vmem:[#allocation2 + $0x2b8] sm:$0xff] }
 0x633   : > { %5482 = vrot.lane.b32.xlu0 %v13148_v14, %s13110_s14  ;;  %v5021_v60 = vmul.f32 %v4874_v8, %v13048_v52  ;;  %v5022_v28 = vmul.f32 %v4994_v36, %v13049_v21  ;;  %4493 = vmatmul.f32.gmra.mxu1 %v4048_v42  ;;  %v13150_v36 = vld [vmem:[#allocation62_spill] sm:$0xff] }
 0x634   : > { %4558 = vmatmul.f32.gmra.mxu2 %v4048_v42  ;;  %v3947_v33 = vpop.f32.mrf.mxu3  ;;  %v10640_v44 = vpop.permute.xlu0 %4751  ;;  %v13151_v14 = vld [vmem:[#allocation126_spill] sm:$0xff] }
 0x635   : > { %v10643_v6 = vadd.f32 %v3947_v33, %v10161_v35  ;;  %v10645_v45 = vpop.f32.mrf.mxu0  ;;  %5213 = vmatpush.msra.mxu2 %v5021_v60  ;;  %5278 = vmatpush.msra.mxu3 %v5022_v28  ;;  %v4993_v51 = vsel %vm592_vm2, %v10570_v16, %v10640_v44 }
 0x636   : > { %13149 = vst [vmem:[#allocation180_spill] sm:$0xff] %v10645_v45  ;;  %v5018_v8 = vmul.f32 %v4993_v51, %v13049_v21  ;;  %5468 = vrot.lane.b32.xlu2 %v13150_v36, %s13110_s14  ;;  %v3882_v42 = vpop.f32.mrf.mxu2  ;;  %v13153_v36 = vld [vmem:[#allocation67_spill] sm:$0xff] }
 0x637   : > { %5526 = vrot.lane.b32.xlu1 %v13151_v14, %s13110_s14  ;;  %v10656_v35 = vadd.f32 %v3882_v42, %v10176_v48 }
 0x638   : > { %4431 = vmatmul.f32.gmra.mxu0 %v4049_v50  ;;  %v4786_v60 = vpop.permute.xlu2 %4785  ;;  %v10658_v28 = vpop.f32.mrf.mxu1  ;;  %5279 = vmatpush.msra.mxu3 %v5018_v8 }
 0x639   : > { %13152 = vst [vmem:[#allocation150_spill] sm:$0xff] %v10658_v28  ;;  %4626 = vmatmul.f32.gmra.mxu3 %v4049_v50  ;;  %v10660_v33 = vpop.permute.xlu1 %4755 }
 0x63a   : > { %v4871_v51 = vsel %vm592_vm2, %v10660_v33, %v10570_v16 }
 0x63b   : > { %5472 = vrot.lane.b32.xlu0 %v13153_v36, %s13110_s14  ;;  %v5017_v14 = vmul.f32 %v4871_v51, %v13048_v52  ;;  %4496 = vmatmul.f32.gmra.mxu1 %v4049_v50 }
 0x63c   : > { %4561 = vmatmul.f32.gmra.mxu2 %v4049_v50  ;;  %v3950_v48 = vpop.f32.mrf.mxu3  ;;  %v4802_v42 = vpop.permute.xlu0 %4801  ;;  %v13155_v50 = vld [vmem:[#allocation114_spill] sm:$0xff] }
 0x63d   : > { %v10669_v45 = vadd.f32 %v3950_v48, %v10198_v62  ;;  %v10671_v8 = vpop.f32.mrf.mxu0  ;;  %5214 = vmatpush.msra.mxu2 %v5017_v14  ;;  %v4887_v28 = vsel %vm592_vm2, %v10407_v39, %v4802_v42  ;;  %v4888_v16 = vsel %vm592_vm2, %v4802_v42, %v10428_v23  ;;  %v13156_v62 = vld [vmem:[#allocation66_spill] sm:$0xff] }
 0x63e   : > { %13154 = vst [vmem:[#allocation182_spill] sm:$0xff] %v10671_v8  ;;  %v5039_v36 = vmul.f32 %v4887_v28, %v13080_v27  ;;  %v5040_v51 = vmul.f32 %v4888_v16, %v13081_v37  ;;  %5518 = vrot.lane.b32.xlu2 %v13155_v50, %s13110_s14  ;;  %v3885_v49 = vpop.f32.mrf.mxu2  ;;  %v13158_v28 = vld [vmem:[#allocation56_spill] sm:$0xff] }
 0x63f   : > { %5474 = vrot.lane.b32.xlu1 %v13156_v62, %s13110_s14  ;;  %v10684_v14 = vadd.f32 %v3885_v49, %v10206_v3  ;;  %v4051_v62 = vld [vmem:[#allocation2 + $0x2c8] sm:$0xff] }
 0x640   : > { %4434 = vmatmul.f32.gmra.mxu0 %v4050_v31  ;;  %v10686_v39 = vpop.permute.xlu2 %4761  ;;  %v10688_v48 = vpop.f32.mrf.mxu1  ;;  %5143 = vmatpush.msra.mxu1 %v5040_v51 }
 0x641   : > { %13157 = vst [vmem:[#allocation144_spill] sm:$0xff] %v10688_v48  ;;  %4629 = vmatmul.f32.gmra.mxu3 %v4050_v31  ;;  %v10690_v23 = vpop.permute.xlu1 %4743  ;;  %5078 = vmatpush.msra.mxu0 %v5039_v36 }
 0x643   : > { %5460 = vrot.lane.b32.xlu0 %v13158_v28, %s13110_s14  ;;  %4499 = vmatmul.f32.gmra.mxu1 %v4050_v31 }
 0x644   : > { %4564 = vmatmul.f32.gmra.mxu2 %v4050_v31  ;;  %v3953_v42 = vpop.f32.mrf.mxu3  ;;  %v4750_v16 = vpop.permute.xlu0 %4749  ;;  %v13160_v31 = vld [vmem:[#allocation61_spill] sm:$0xff] }
 0x645   : > { %v10695_v3 = vadd.f32 %v3953_v42, %v10228_v43  ;;  %v10697_v49 = vpop.f32.mrf.mxu0  ;;  %v4868_v50 = vsel %vm592_vm2, %v10596_v19, %v4750_v16  ;;  %v4992_v51 = vsel %vm592_vm2, %v4750_v16, %v10690_v23  ;;  %v13161_v43 = vld [vmem:[#allocation63_spill] sm:$0xff] }
 0x646   : > { %13159 = vst [vmem:[#allocation184_spill] sm:$0xff] %v10697_v49  ;;  %v5013_v36 = vmul.f32 %v4868_v50, %v13048_v52  ;;  %v5014_v28 = vmul.f32 %v4992_v51, %v13049_v21  ;;  %5466 = vrot.lane.b32.xlu2 %v13160_v31, %s13110_s14  ;;  %v3888_v48 = vpop.f32.mrf.mxu2  ;;  %v4881_v50 = vsel %vm592_vm2, %v10392_v20, %v4786_v60 }
 0x647   : > { %5464 = vrot.lane.b32.xlu1 %v13161_v43, %s13110_s14  ;;  %v10710_v42 = vadd.f32 %v3888_v48, %v10236_v25  ;;  %v13163_v25 = vld [vmem:[#allocation102_spill] sm:$0xff]  ;;  %v4882_v48 = vsel %vm592_vm2, %v4786_v60, %v10496_v40 }
 0x648   : > { %4437 = vmatmul.f32.gmra.mxu0 %v4051_v62  ;;  %v10712_v49 = vpop.permute.xlu2 %4737  ;;  %v10714_v8 = vpop.f32.mrf.mxu1  ;;  %5215 = vmatpush.msra.mxu2 %v5013_v36  ;;  %v5032_v40 = vmul.f32 %v4882_v48, %v13081_v37 }
 0x649   : > { %13162 = vst [vmem:[#allocation117_spill] sm:$0xff] %v10714_v8  ;;  %4632 = vmatmul.f32.gmra.mxu3 %v4051_v62  ;;  %v4794_v16 = vpop.permute.xlu1 %4793 }
 0x64a   : > { %v4884_v51 = vsel %vm592_vm2, %v10458_v4, %v4794_v16  ;;  %v4885_v31 = vsel %vm592_vm2, %v4794_v16, %v10362_v32  ;;  %5280 = vmatpush.msra.mxu3 %v5014_v28  ;;  %v5031_v4 = vmul.f32 %v4881_v50, %v13080_v27  ;;  %v4052_v16 = vld [vmem:[#allocation2 + $0x2d0] sm:$0xff] }
 0x64b   : > { %5510 = vrot.lane.b32.xlu0 %v13163_v25, %s13110_s14  ;;  %v5035_v36 = vmul.f32 %v4884_v51, %v13080_v27  ;;  %v5036_v43 = vmul.f32 %v4885_v31, %v13081_v37  ;;  %4502 = vmatmul.f32.gmra.mxu1 %v4051_v62  ;;  %v13166_v51 = vld [vmem:[#allocation162_spill] sm:$0xff] }
 0x64c   : > { %4567 = vmatmul.f32.gmra.mxu2 %v4051_v62  ;;  %v3956_v20 = vpop.f32.mrf.mxu3  ;;  %v13165_v62 = vld [vmem:[#allocation52_spill] sm:$0xff] }
 0x64d   : > { %v10728_v8 = vpop.permute.xlu0 %4739  ;;  %v10732_v32 = vadd.f32 %v3956_v20, %v10258_v29  ;;  %v10734_v28 = vpop.f32.mrf.mxu0  ;;  %5079 = vmatpush.msra.mxu0 %v5035_v36  ;;  %5144 = vmatpush.msra.mxu1 %v5036_v43  ;;  %v13168_v36 = vld [vmem:[#allocation58_spill] sm:$0xff] }
 0x64e   : > { %13164 = vst [vmem:[#allocation186_spill] sm:$0xff] %v10734_v28  ;;  %5456 = vrot.lane.b32.xlu2 %v13007_v53, %s13110_s14  ;;  %v3891_v60 = vpop.f32.mrf.mxu2  ;;  %v13219_v28 = vld [vmem:[#allocation45_spill] sm:$0xff] }
 0x64f   : > { %5452 = vrot.lane.b32.xlu1 %v13165_v62, %s13110_s14  ;;  %v10742_v31 = vadd.f32 %v3891_v60, %v13166_v51  ;;  %5080 = vmatpush.msra.mxu0 %v5031_v4  ;;  %v13169_v60 = vld [vmem:[#allocation215_spill] sm:$0xff] }
 0x650   : > { %5145 = vmatpush.msra.mxu1 %v5032_v40  ;;  %4440 = vmatmul.f32.gmra.mxu0 %v4052_v16  ;;  %v10744_v29 = vpop.permute.xlu2 %5538  ;;  %v10746_v50 = vpop.f32.mrf.mxu1 }
 0x651   : > { %13167 = vst [vmem:[#allocation119_spill] sm:$0xff] %v10746_v50  ;;  %4635 = vmatmul.f32.gmra.mxu3 %v4052_v16  ;;  %v4742_v25 = vpop.permute.xlu1 %4741  ;;  %v4722_v50 = vld [vmem:[#allocation2 + $0x318] sm:$0xff] }
 0x652   : > { %v4865_v48 = vsel %vm592_vm2, %v10728_v8, %v4742_v25  ;;  %v4991_v53 = vsel %vm592_vm2, %v4742_v25, %v10628_v2 }
 0x653   : > { %5458 = vrot.lane.b32.xlu0 %v13168_v36, %s13110_s14  ;;  %v5009_v43 = vmul.f32 %v4865_v48, %v13048_v52  ;;  %v5010_v20 = vmul.f32 %v4991_v53, %v13049_v21  ;;  %4505 = vmatmul.f32.gmra.mxu1 %v4052_v16  ;;  %v4053_v52 = vld [vmem:[#allocation2 + $0x2d8] sm:$0xff]  ;;  %v13171_v48 = vld [vmem:[#allocation49_spill] sm:$0xff] }
 0x654   : > { %4570 = vmatmul.f32.gmra.mxu2 %v4052_v16  ;;  %v3959_v4 = vpop.f32.mrf.mxu3 }
 0x655   : > { %v4778_v40 = vpop.permute.xlu0 %4777  ;;  %v10757_v62 = vadd.f32 %v3959_v4, %v13169_v60  ;;  %v10759_v51 = vpop.f32.mrf.mxu0  ;;  %5216 = vmatpush.msra.mxu2 %v5009_v43  ;;  %5281 = vmatpush.msra.mxu3 %v5010_v20  ;;  %v13172_v4 = vld [vmem:[#allocation95_spill] sm:$0xff]  ;;  %v13173_v43 = vld [vmem:[#allocation142_spill] sm:$0xff] }
 0x656   : > { %13170 = vst [vmem:[#allocation188_spill] sm:$0xff] %v10759_v51  ;;  %v4878_v25 = vsel %vm592_vm2, %v10524_v34, %v4778_v40  ;;  %v4879_v36 = vsel %vm592_vm2, %v4778_v40, %v10544_v63  ;;  %5444 = vrot.lane.b32.xlu2 %v13171_v48, %s13110_s14  ;;  %v3894_v53 = vpop.f32.mrf.mxu2  ;;  %v4872_v63 = vsel %vm592_vm2, %v10512_v59, %v10686_v39  ;;  %v13175_v48 = vld [vmem:[#allocation54_spill] sm:$0xff]  ;;  %v13213_v51 = vld [vmem:[#allocation57_spill] sm:$0xff] }
 0x657   : > { %v5027_v21 = vmul.f32 %v4878_v25, %v13080_v27  ;;  %v5028_v16 = vmul.f32 %v4879_v36, %v13081_v37  ;;  %5502 = vrot.lane.b32.xlu1 %v13172_v4, %s13110_s14  ;;  %v10772_v20 = vadd.f32 %v3894_v53, %v13173_v43 }
 0x658   : > { %4443 = vmatmul.f32.gmra.mxu0 %v4053_v52  ;;  %v10774_v34 = vpop.permute.xlu2 %5530  ;;  %v10776_v60 = vpop.f32.mrf.mxu1 }
 0x659   : > { %13174 = vst [vmem:[#allocation128_spill] sm:$0xff] %v10776_v60  ;;  %5146 = vmatpush.msra.mxu1 %v5028_v16  ;;  %4638 = vmatmul.f32.gmra.mxu3 %v4053_v52  ;;  %v4770_v40 = vpop.permute.xlu1 %4769  ;;  %v4873_v16 = vsel %vm592_vm2, %v10686_v39, %v10612_v0  ;;  %v4721_v60 = vld [vmem:[#allocation2 + $0x310] sm:$0xff] }
 0x65a   : > { %5081 = vmatpush.msra.mxu0 %v5027_v21  ;;  %v4875_v25 = vsel %vm592_vm2, %v10574_v5, %v4770_v40  ;;  %v4876_v36 = vsel %vm592_vm2, %v4770_v40, %v10480_v9  ;;  %v5019_v21 = vmul.f32 %v4872_v63, %v13080_v27  ;;  %v4054_v40 = vld [vmem:[#allocation2 + $0x2e0] sm:$0xff] }
 0x65b   : > { %5448 = vrot.lane.b32.xlu0 %v13175_v48, %s13110_s14  ;;  %v5023_v53 = vmul.f32 %v4875_v25, %v13080_v27  ;;  %v5024_v59 = vmul.f32 %v4876_v36, %v13081_v37  ;;  %4508 = vmatmul.f32.gmra.mxu1 %v4053_v52  ;;  %v13178_v48 = vld [vmem:[#allocation55_spill] sm:$0xff] }
 0x65c   : > { %4573 = vmatmul.f32.gmra.mxu2 %v4053_v52  ;;  %v3962_v4 = vpop.f32.mrf.mxu3  ;;  %v5020_v52 = vmul.f32 %v4873_v16, %v13081_v37 }
 0x65d   : > { %v4754_v5 = vpop.permute.xlu0 %4753  ;;  %v10794_v43 = vadd.f32 %v3962_v4, %v10322_v24  ;;  %v10796_v9 = vpop.f32.mrf.mxu0  ;;  %5082 = vmatpush.msra.mxu0 %v5023_v53  ;;  %5147 = vmatpush.msra.mxu1 %v5024_v59  ;;  %v13177_v24 = vld [vmem:[#allocation84_spill] sm:$0xff]  ;;  %v13179_v53 = vld [vmem:[#allocation166_spill] sm:$0xff]  ;;  %v4863_v4 = vsel %vm592_vm2, %v10628_v2, %v10712_v49 }
 0x65e   : > { %13176 = vst [vmem:[#allocation190_spill] sm:$0xff] %v10796_v9  ;;  %v4869_v0 = vsel %vm592_vm2, %v10640_v44, %v4754_v5  ;;  %v4870_v39 = vsel %vm592_vm2, %v4754_v5, %v10660_v33  ;;  %5494 = vrot.lane.b32.xlu2 %v13177_v24, %s13110_s14  ;;  %v13208_v9 = vld [vmem:[#allocation39_spill] sm:$0xff] }
 0x65f   : > { %v5015_v63 = vmul.f32 %v4869_v0, %v13080_v27  ;;  %v5016_v25 = vmul.f32 %v4870_v39, %v13081_v37  ;;  %v3897_v36 = vpop.f32.mrf.mxu2  ;;  %5450 = vrot.lane.b32.xlu1 %v13178_v48, %s13110_s14  ;;  %5083 = vmatpush.msra.mxu0 %v5019_v21  ;;  %v13181_v21 = vld [vmem:[#allocation44_spill] sm:$0xff]  ;;  %v4864_v39 = vsel %vm592_vm2, %v10712_v49, %v10728_v8  ;;  %v4055_v49 = vld [vmem:[#allocation2 + $0x2e8] sm:$0xff] }
 0x660   : > { %v10810_v59 = vadd.f32 %v3897_v36, %v13179_v53  ;;  %5148 = vmatpush.msra.mxu1 %v5020_v52  ;;  %4446 = vmatmul.f32.gmra.mxu0 %v4054_v40  ;;  %v10812_v44 = vpop.permute.xlu2 %5522  ;;  %v10814_v33 = vpop.f32.mrf.mxu1  ;;  %v5008_v48 = vmul.f32 %v4864_v39, %v13081_v37 }
 0x661   : > { %13180 = vst [vmem:[#allocation9_spill] sm:$0xff] %v10814_v33  ;;  %4641 = vmatmul.f32.gmra.mxu3 %v4054_v40  ;;  %v4746_v16 = vpop.permute.xlu1 %4745  ;;  %5084 = vmatpush.msra.mxu0 %v5015_v63  ;;  %v4720_v33 = vld [vmem:[#allocation2 + $0x308] sm:$0xff] }
 0x662   : > { %v4866_v5 = vsel %vm592_vm2, %v10690_v23, %v4746_v16  ;;  %v4867_v0 = vsel %vm592_vm2, %v4746_v16, %v10596_v19  ;;  %5149 = vmatpush.msra.mxu1 %v5016_v25  ;;  %v5007_v23 = vmul.f32 %v4863_v4, %v13080_v27  ;;  %v13182_v19 = vld [vmem:[#allocation219_spill] sm:$0xff]  ;;  %v13185_v16 = vld [vmem:[#allocation50_spill] sm:$0xff] }
 0x663   : > { %5436 = vrot.lane.b32.xlu0 %v13181_v21, %s13110_s14  ;;  %v5011_v52 = vmul.f32 %v4866_v5, %v13080_v27  ;;  %v5012_v63 = vmul.f32 %v4867_v0, %v13081_v37  ;;  %4511 = vmatmul.f32.gmra.mxu1 %v4054_v40  ;;  %v13186_v4 = vld [vmem:[#allocation51_spill] sm:$0xff]  ;;  %v13187_v5 = vld [vmem:[#allocation168_spill] sm:$0xff] }
 0x664   : > { %4576 = vmatmul.f32.gmra.mxu2 %v4054_v40  ;;  %v3965_v2 = vpop.f32.mrf.mxu3  ;;  %v13184_v40 = vld [vmem:[#allocation18_spill] sm:$0xff] }
 0x665   : > { %v10830_v24 = vpop.permute.xlu0 %5532  ;;  %v10834_v25 = vadd.f32 %v3965_v2, %v13182_v19  ;;  %v10836_v36 = vpop.f32.mrf.mxu0  ;;  %5085 = vmatpush.msra.mxu0 %v5011_v52  ;;  %5150 = vmatpush.msra.mxu1 %v5012_v63  ;;  %v13189_v63 = vld [vmem:[#allocation76_spill] sm:$0xff]  ;;  %v13190_v2 = vld [vmem:[#allocation17_spill] sm:$0xff] }
 0x666   : > { %13183 = vst [vmem:[#allocation13_spill] sm:$0xff] %v10836_v36  ;;  %v5683_v8 = vsel %vm618_vm1, %v10744_v29, %v10830_v24  ;;  %5442 = vrot.lane.b32.xlu2 %v13185_v16, %s13110_s14  ;;  %v13203_v36 = vld [vmem:[#allocation43_spill] sm:$0xff] }
 0x667   : > { %v5747_v53 = vmul.f32 %v5683_v8, %v13184_v40  ;;  %v3900_v27 = vpop.f32.mrf.mxu2  ;;  %5440 = vrot.lane.b32.xlu1 %v13186_v4, %s13110_s14  ;;  %5086 = vmatpush.msra.mxu0 %v5007_v23  ;;  %v13192_v4 = vld [vmem:[#allocation47_spill] sm:$0xff] }
 0x668   : > { %v10848_v0 = vadd.f32 %v3900_v27, %v13187_v5  ;;  %5151 = vmatpush.msra.mxu1 %v5008_v48  ;;  %4449 = vmatmul.f32.gmra.mxu0 %v4055_v49  ;;  %v10850_v21 = vpop.permute.xlu2 %5514  ;;  %v10852_v52 = vpop.f32.mrf.mxu1  ;;  %v13193_v5 = vld [vmem:[#allocation40_spill] sm:$0xff] }
 0x669   : > { %13188 = vst [vmem:[#allocation109_spill] sm:$0xff] %v10852_v52  ;;  %4644 = vmatmul.f32.gmra.mxu3 %v4055_v49  ;;  %v10854_v37 = vpop.permute.xlu1 %5536 }
 0x66a   : > { %v5587_v39 = vsel %vm618_vm1, %v10854_v37, %v10744_v29  ;;  %5943 = vmatpush.msrb.mxu3 %v5747_v53  ;;  %v4056_v53 = vld [vmem:[#allocation2 + $0x2f0] sm:$0xff] }
 0x66b   : > { %5486 = vrot.lane.b32.xlu0 %v13189_v63, %s13110_s14  ;;  %v5746_v19 = vmul.f32 %v5587_v39, %v13190_v2  ;;  %4514 = vmatmul.f32.gmra.mxu1 %v4055_v49 }
 0x66c   : > { %4579 = vmatmul.f32.gmra.mxu2 %v4055_v49  ;;  %v3968_v23 = vpop.f32.mrf.mxu3 }
 0x66d   : > { %v10862_v8 = vpop.permute.xlu0 %5524  ;;  %v10865_v48 = vadd.f32 %v3968_v23, %v10382_v13  ;;  %v10867_v16 = vpop.f32.mrf.mxu0  ;;  %5878 = vmatpush.msrb.mxu2 %v5746_v19 }
 0x66e   : > { %13191 = vst [vmem:[#allocation192_spill] sm:$0xff] %v10867_v16  ;;  %v5682_v29 = vsel %vm618_vm1, %v10774_v34, %v10862_v8  ;;  %5432 = vrot.lane.b32.xlu2 %v13192_v4, %s13110_s14  ;;  %v13198_v16 = vld [vmem:[#allocation69_spill] sm:$0xff] }
 0x66f   : > { %v5743_v27 = vmul.f32 %v5682_v29, %v13184_v40  ;;  %v3903_v49 = vpop.f32.mrf.mxu2  ;;  %5428 = vrot.lane.b32.xlu1 %v13193_v5, %s13110_s14  ;;  %v13195_v29 = vld [vmem:[#allocation46_spill] sm:$0xff] }
 0x670   : > { %v10878_v13 = vadd.f32 %v3903_v49, %v10390_v30  ;;  %4452 = vmatmul.f32.gmra.mxu0 %v4056_v53  ;;  %v10880_v39 = vpop.permute.xlu2 %5506  ;;  %v10882_v63 = vpop.f32.mrf.mxu1 }
 0x671   : > { %13194 = vst [vmem:[#allocation130_spill] sm:$0xff] %v10882_v63  ;;  %5944 = vmatpush.msrb.mxu3 %v5743_v27  ;;  %v10884_v19 = vpop.permute.xlu1 %5528  ;;  %v4057_v63 = vld [vmem:[#allocation2 + $0x2f8] sm:$0xff] }
 0x672   : > { %4647 = vmatmul.f32.gmra.mxu3 %v4056_v53  ;;  %v5584_v23 = vsel %vm618_vm1, %v10884_v19, %v10774_v34 }
 0x673   : > { %5434 = vrot.lane.b32.xlu0 %v13195_v29, %s13110_s14  ;;  %v5742_v4 = vmul.f32 %v5584_v23, %v13190_v2  ;;  %4517 = vmatmul.f32.gmra.mxu1 %v4056_v53  ;;  %v13197_v23 = vld [vmem:[#allocation37_spill] sm:$0xff] }
 0x674   : > { %4582 = vmatmul.f32.gmra.mxu2 %v4056_v53  ;;  %v3971_v30 = vpop.f32.mrf.mxu3 }
 0x675   : > { %v10892_v49 = vpop.permute.xlu0 %5516  ;;  %v10895_v5 = vadd.f32 %v3971_v30, %v10409_v12  ;;  %v10897_v27 = vpop.f32.mrf.mxu0  ;;  %5879 = vmatpush.msrb.mxu2 %v5742_v4 }
 0x676   : > { %13196 = vst [vmem:[#allocation194_spill] sm:$0xff] %v10897_v27  ;;  %v5681_v34 = vsel %vm618_vm1, %v10812_v44, %v10892_v49  ;;  %5420 = vrot.lane.b32.xlu2 %v13197_v23, %s13110_s14  ;;  %v13200_v23 = vld [vmem:[#allocation42_spill] sm:$0xff]  ;;  %v4719_v27 = vld [vmem:[#allocation2 + $0x300] sm:$0xff] }
 0x677   : > { %v5739_v29 = vmul.f32 %v5681_v34, %v13184_v40  ;;  %v3906_v53 = vpop.f32.mrf.mxu2  ;;  %5478 = vrot.lane.b32.xlu1 %v13198_v16, %s13110_s14 }
 0x678   : > { %v10908_v12 = vadd.f32 %v3906_v53, %v10422_v10  ;;  %4455 = vmatmul.f32.gmra.mxu0 %v4057_v63  ;;  %v10910_v30 = vpop.permute.xlu2 %5498  ;;  %v10912_v4 = vpop.f32.mrf.mxu1 }
 0x679   : > { %13199 = vst [vmem:[#allocation32_spill] sm:$0xff] %v10912_v4  ;;  %5945 = vmatpush.msrb.mxu3 %v5739_v29  ;;  %v10914_v52 = vpop.permute.xlu1 %5520 }
 0x67a   : > { %4650 = vmatmul.f32.gmra.mxu3 %v4057_v63  ;;  %v5581_v34 = vsel %vm618_vm1, %v10914_v52, %v10812_v44 }
 0x67b   : > { %5424 = vrot.lane.b32.xlu0 %v13200_v23, %s13110_s14  ;;  %v5738_v16 = vmul.f32 %v5581_v34, %v13190_v2  ;;  %4520 = vmatmul.f32.gmra.mxu1 %v4057_v63  ;;  %v13202_v34 = vld [vmem:[#allocation64_spill] sm:$0xff] }
 0x67c   : > { %4585 = vmatmul.f32.gmra.mxu2 %v4057_v63  ;;  %v3974_v10 = vpop.f32.mrf.mxu3 }
 0x67d   : > { %v10922_v53 = vpop.permute.xlu0 %5508  ;;  %v10925_v4 = vadd.f32 %v3974_v10, %v10437_v56  ;;  %v10927_v29 = vpop.f32.mrf.mxu0  ;;  %5880 = vmatpush.msrb.mxu2 %v5738_v16 }
 0x67e   : > { %13201 = vst [vmem:[#allocation196_spill] sm:$0xff] %v10927_v29  ;;  %v5680_v44 = vsel %vm618_vm1, %v10850_v21, %v10922_v53  ;;  %5470 = vrot.lane.b32.xlu2 %v13202_v34, %s13110_s14  ;;  %v13205_v34 = vld [vmem:[#allocation36_spill] sm:$0xff] }
 0x67f   : > { %v5735_v23 = vmul.f32 %v5680_v44, %v13184_v40  ;;  %v3909_v63 = vpop.f32.mrf.mxu2  ;;  %5426 = vrot.lane.b32.xlu1 %v13203_v36, %s13110_s14 }
 0x680   : > { %v10938_v56 = vadd.f32 %v3909_v63, %v10452_v38  ;;  %5087 = vmatmul.f32.vlgmr.msra.gmra.mxu0 %v4719_v27  ;;  %v10940_v10 = vpop.permute.xlu2 %5490  ;;  %v10942_v16 = vpop.f32.mrf.mxu1 }
 0x681   : > { %13204 = vst [vmem:[#allocation16_spill] sm:$0xff] %v10942_v16  ;;  %5946 = vmatpush.msrb.mxu3 %v5735_v23  ;;  %v10944_v29 = vpop.permute.xlu1 %5512 }
 0x682   : > { %5282 = vmatmul.f32.vlgmr.msra.gmra.mxu3 %v4719_v27  ;;  %v5578_v44 = vsel %vm618_vm1, %v10944_v29, %v10850_v21 }
 0x683   : > { %5412 = vrot.lane.b32.xlu0 %v13205_v34, %s13110_s14  ;;  %v5734_v36 = vmul.f32 %v5578_v44, %v13190_v2  ;;  %5152 = vmatmul.f32.vlgmr.msra.gmra.mxu1 %v4719_v27  ;;  %v13207_v44 = vld [vmem:[#allocation38_spill] sm:$0xff] }
 0x684   : > { %5217 = vmatmul.f32.vlgmr.msra.gmra.mxu2 %v4719_v27  ;;  %v4606_v38 = vpop.f32.mrf.mxu3 }
 0x685   : > { %v10952_v63 = vpop.permute.xlu0 %5500  ;;  %v10955_v16 = vadd.f32 %v4606_v38, %v10463_v15  ;;  %v10957_v23 = vpop.f32.mrf.mxu0  ;;  %5881 = vmatpush.msrb.mxu2 %v5734_v36 }
 0x686   : > { %13206 = vst [vmem:[#allocation198_spill] sm:$0xff] %v10957_v23  ;;  %v5679_v21 = vsel %vm618_vm1, %v10880_v39, %v10952_v63  ;;  %5418 = vrot.lane.b32.xlu2 %v13207_v44, %s13110_s14  ;;  %v13210_v44 = vld [vmem:[#allocation60_spill] sm:$0xff] }
 0x687   : > { %v5731_v34 = vmul.f32 %v5679_v21, %v13184_v40  ;;  %v4541_v27 = vpop.f32.mrf.mxu2  ;;  %5416 = vrot.lane.b32.xlu1 %v13208_v9, %s13110_s14 }
 0x688   : > { %v10968_v15 = vadd.f32 %v4541_v27, %v10478_v7  ;;  %5090 = vmatmul.f32.gmra.mxu0 %v4720_v33  ;;  %v10970_v38 = vpop.permute.xlu2 %5480  ;;  %v10972_v36 = vpop.f32.mrf.mxu1 }
 0x689   : > { %13209 = vst [vmem:[#allocation29_spill] sm:$0xff] %v10972_v36  ;;  %5947 = vmatpush.msrb.mxu3 %v5731_v34  ;;  %v10974_v23 = vpop.permute.xlu1 %5504 }
 0x68a   : > { %5285 = vmatmul.f32.gmra.mxu3 %v4720_v33  ;;  %v5575_v21 = vsel %vm618_vm1, %v10974_v23, %v10880_v39 }
 0x68b   : > { %5462 = vrot.lane.b32.xlu0 %v13210_v44, %s13110_s14  ;;  %v5730_v9 = vmul.f32 %v5575_v21, %v13190_v2  ;;  %5155 = vmatmul.f32.gmra.mxu1 %v4720_v33  ;;  %v13212_v21 = vld [vmem:[#allocation53_spill] sm:$0xff] }
 0x68c   : > { %5220 = vmatmul.f32.gmra.mxu2 %v4720_v33  ;;  %v4609_v7 = vpop.f32.mrf.mxu3 }
 0x68d   : > { %v10982_v27 = vpop.permute.xlu0 %5492  ;;  %v10985_v36 = vadd.f32 %v4609_v7, %v10500_v1  ;;  %v10987_v34 = vpop.f32.mrf.mxu0  ;;  %5882 = vmatpush.msrb.mxu2 %v5730_v9 }
 0x68e   : > { %13211 = vst [vmem:[#allocation200_spill] sm:$0xff] %v10987_v34  ;;  %v5678_v39 = vsel %vm618_vm1, %v10910_v30, %v10982_v27  ;;  %5446 = vrot.lane.b32.xlu2 %v13212_v21, %s13110_s14  ;;  %v13215_v21 = vld [vmem:[#allocation48_spill] sm:$0xff] }
 0x68f   : > { %v5727_v44 = vmul.f32 %v5678_v39, %v13184_v40  ;;  %v4544_v33 = vpop.f32.mrf.mxu2  ;;  %5454 = vrot.lane.b32.xlu1 %v13213_v51, %s13110_s14 }
 0x690   : > { %v10998_v1 = vadd.f32 %v4544_v33, %v10510_v47  ;;  %5093 = vmatmul.f32.gmra.mxu0 %v4721_v60  ;;  %v11000_v7 = vpop.permute.xlu2 %5468  ;;  %v11002_v9 = vpop.f32.mrf.mxu1 }
 0x691   : > { %13214 = vst [vmem:[#allocation124_spill] sm:$0xff] %v11002_v9  ;;  %5948 = vmatpush.msrb.mxu3 %v5727_v44  ;;  %v11004_v34 = vpop.permute.xlu1 %5496 }
 0x692   : > { %5288 = vmatmul.f32.gmra.mxu3 %v4721_v60  ;;  %v5572_v39 = vsel %vm618_vm1, %v11004_v34, %v10910_v30 }
 0x693   : > { %5438 = vrot.lane.b32.xlu0 %v13215_v21, %s13110_s14  ;;  %v5726_v51 = vmul.f32 %v5572_v39, %v13190_v2  ;;  %5158 = vmatmul.f32.gmra.mxu1 %v4721_v60  ;;  %v13218_v39 = vld [vmem:[#allocation41_spill] sm:$0xff] }
 0x694   : > { %5223 = vmatmul.f32.gmra.mxu2 %v4721_v60  ;;  %v4612_v47 = vpop.f32.mrf.mxu3 }
 0x695   : > { %v11012_v33 = vpop.permute.xlu0 %5484  ;;  %v11015_v9 = vadd.f32 %v4612_v47, %v10527_v22  ;;  %v11017_v44 = vpop.f32.mrf.mxu0  ;;  %5883 = vmatpush.msrb.mxu2 %v5726_v51 }
 0x696   : > { %13217 = vst [vmem:[#allocation203_spill] sm:$0xff] %v11017_v44  ;;  %v5677_v30 = vsel %vm618_vm1, %v10940_v10, %v11012_v33  ;;  %5422 = vrot.lane.b32.xlu2 %v13218_v39, %s13110_s14  ;;  %v13222_v39 = vld [vmem:[#allocation35_spill] sm:$0xff] }
 0x697   : > { %13216 = vst [vmem:[#allocation137_spill] sm:$0xff] %v11015_v9  ;;  %v5723_v21 = vmul.f32 %v5677_v30, %v13184_v40  ;;  %v4547_v60 = vpop.f32.mrf.mxu2  ;;  %5430 = vrot.lane.b32.xlu1 %v13219_v28, %s13110_s14 }
 0x698   : > { %v11028_v22 = vadd.f32 %v4547_v60, %v10540_v11  ;;  %5096 = vmatmul.f32.gmra.mxu0 %v4722_v50  ;;  %v5519_v47 = vpop.permute.xlu2 %5518  ;;  %v11030_v51 = vpop.f32.mrf.mxu1 }
 0x699   : > { %13221 = vst [vmem:[#allocation129_spill] sm:$0xff] %v11030_v51  ;;  %5949 = vmatpush.msrb.mxu3 %v5723_v21  ;;  %v11032_v44 = vpop.permute.xlu1 %5488  ;;  %v6073_v21 = vld [vmem:[%s12053_s7] sm:$0xff] }
 0x69a   : > { %13220 = vst [vmem:[#allocation118_spill] sm:$0xff] %v11028_v22  ;;  %5291 = vmatmul.f32.gmra.mxu3 %v4722_v50  ;;  %v5569_v30 = vsel %vm618_vm1, %v11032_v44, %v10940_v10 }
 0x69b   : > { %5414 = vrot.lane.b32.xlu0 %v13222_v39, %s13110_s14  ;;  %v5722_v28 = vmul.f32 %v5569_v30, %v13190_v2  ;;  %5161 = vmatmul.f32.gmra.mxu1 %v4722_v50  ;;  %v4723_v39 = vld [vmem:[#allocation2 + $0x320] sm:$0xff]  ;;  %s6177_s14 = sshll.u32 %s343_s29, 4  ;;  %s6178_s14 = int_to_ptr.vmem [resolvable:$true] %s6177_s14 }
 0x69c   : > { %5226 = vmatmul.f32.gmra.mxu2 %v4722_v50  ;;  %v4615_v11 = vpop.f32.mrf.mxu3  ;;  %v13224_v50 = vld [vmem:[#allocation8_spill] sm:$0xff] }
 0x69d   : > { %v5535_v60 = vpop.permute.xlu0 %5534  ;;  %v11044_v51 = vadd.f32 %v4615_v11, %v10553_v61  ;;  %v11046_v54 = vpop.f32.mrf.mxu0  ;;  %5884 = vmatpush.msrb.mxu2 %v5722_v28 }
 0x69e   : > { %13223 = vst [vmem:[#allocation131_spill] sm:$0xff] %v11046_v54  ;;  %v5585_v10 = vsel %vm618_vm1, %v10830_v24, %v5535_v60  ;;  %v5586_v30 = vsel %vm618_vm1, %v5535_v60, %v10854_v37 }
 0x69f   : > { %v5744_v26 = vmul.f32 %v5585_v10, %v13224_v50  ;;  %v5745_v18 = vmul.f32 %v5586_v30, %v13225_v57  ;;  %v4550_v22 = vpop.f32.mrf.mxu2  ;;  %6076 = vperm.xlu1 %6396, %v6073_v21  }
 0x6a0   : > { %v11055_v9 = vadd.f32 %v4550_v22, %v10568_v41  ;;  %5099 = vmatmul.f32.gmra.mxu0 %v4723_v39  ;;  %v11057_v61 = vpop.f32.mrf.mxu1  ;;  %v11059_v28 = vpop.permute.xlu2 %5466  ;;  %v4724_v22 = vld [vmem:[#allocation2 + $0x328] sm:$0xff] }
 0x6a1   : > { %13226 = vst [vmem:[#allocation105_spill] sm:$0xff] %v11057_v61  ;;  %5813 = vmatpush.msrb.mxu1 %v5745_v18  ;;  %v11061_v24 = vpop.permute.xlu1 %5476  ;;  %5748 = vmatpush.msrb.mxu0 %v5744_v26  ;;  %v5579_v61 = vsel %vm618_vm1, %v10892_v49, %v5519_v47 }
 0x6a2   : > { %5294 = vmatmul.f32.gmra.mxu3 %v4723_v39 }
 0x6a3   : > { %5164 = vmatmul.f32.gmra.mxu1 %v4723_v39 }
 0x6a4   : > { %5229 = vmatmul.f32.gmra.mxu2 %v4723_v39  ;;  %v4618_v37 = vpop.f32.mrf.mxu3 }
 0x6a5   : > { %v5483_v11 = vpop.permute.xlu0 %5482  ;;  %v11064_v60 = vadd.f32 %v4618_v37, %v10579_v17  ;;  %v11066_v21 = vpop.f32.mrf.mxu0 }
 0x6a6   : > { %13227 = vst [vmem:[#allocation121_spill] sm:$0xff] %v11066_v21  ;;  %v5566_v41 = vsel %vm618_vm1, %v10970_v38, %v5483_v11  ;;  %v5676_v18 = vsel %vm618_vm1, %v5483_v11, %v11061_v24  ;;  %v5580_v11 = vsel %vm618_vm1, %v5519_v47, %v10914_v52  ;;  %v5736_v52 = vmul.f32 %v5579_v61, %v13224_v50 }
 0x6a7   : > { %v5718_v10 = vmul.f32 %v5566_v41, %v13190_v2  ;;  %v5719_v26 = vmul.f32 %v5676_v18, %v13184_v40  ;;  %v4553_v30 = vpop.f32.mrf.mxu2  ;;  %v5737_v47 = vmul.f32 %v5580_v11, %v13225_v57 }
 0x6a8   : > { %v11075_v39 = vadd.f32 %v4553_v30, %v10594_v58  ;;  %5102 = vmatmul.f32.gmra.mxu0 %v4724_v22  ;;  %v11077_v17 = vpop.f32.mrf.mxu1  ;;  %v11087_v58 = vpop.permute.xlu2 %5456 }
 0x6a9   : > { %13228 = vst [vmem:[#allocation108_spill] sm:$0xff] %v11077_v17  ;;  %5885 = vmatpush.msrb.mxu2 %v5718_v10  ;;  %v5527_v37 = vpop.permute.xlu1 %5526  ;;  %5950 = vmatpush.msrb.mxu3 %v5719_v26  ;;  %v4725_v26 = vld [vmem:[#allocation2 + $0x330] sm:$0xff] }
 0x6aa   : > { %5297 = vmatmul.f32.gmra.mxu3 %v4724_v22  ;;  %v5582_v41 = vsel %vm618_vm1, %v10862_v8, %v5527_v37  ;;  %v5583_v18 = vsel %vm618_vm1, %v5527_v37, %v10884_v19 }
 0x6ab   : > { %v5740_v30 = vmul.f32 %v5582_v41, %v13224_v50  ;;  %v5741_v10 = vmul.f32 %v5583_v18, %v13225_v57  ;;  %5167 = vmatmul.f32.gmra.mxu1 %v4724_v22 }
 0x6ac   : > { %5232 = vmatmul.f32.gmra.mxu2 %v4724_v22  ;;  %v4621_v54 = vpop.f32.mrf.mxu3 }
 0x6ad   : > { %v11091_v49 = vpop.permute.xlu0 %5472  ;;  %v11096_v8 = vadd.f32 %v4621_v54, %v10616_v46  ;;  %v11098_v19 = vpop.f32.mrf.mxu0  ;;  %5749 = vmatpush.msrb.mxu0 %v5740_v30  ;;  %5814 = vmatpush.msrb.mxu1 %v5741_v10 }
 0x6ae   : > { %13229 = vst [vmem:[#allocation110_spill] sm:$0xff] %v11098_v19 }
 0x6af   : > { %v4556_v37 = vpop.f32.mrf.mxu2  ;;  %5750 = vmatpush.msrb.mxu0 %v5736_v52  ;;  %5815 = vmatpush.msrb.mxu1 %v5737_v47 }
 0x6b0   : > { %v11101_v41 = vadd.f32 %v4556_v37, %v10626_v55  ;;  %5105 = vmatmul.f32.gmra.mxu0 %v4725_v26  ;;  %v11103_v22 = vpop.f32.mrf.mxu1  ;;  %v11113_v10 = vpop.permute.xlu2 %5444 }
 0x6b1   : > { %13230 = vst [vmem:[#allocation87_spill] sm:$0xff] %v11103_v22  ;;  %v5475_v61 = vpop.permute.xlu1 %5474  ;;  %v4727_v22 = vld [vmem:[#allocation2 + $0x340] sm:$0xff] }
 0x6b2   : > { %5300 = vmatmul.f32.gmra.mxu3 %v4725_v26  ;;  %v5563_v54 = vsel %vm618_vm1, %v11091_v49, %v5475_v61  ;;  %v5675_v46 = vsel %vm618_vm1, %v5475_v61, %v11000_v7  ;;  %v4726_v61 = vld [vmem:[#allocation2 + $0x338] sm:$0xff] }
 0x6b3   : > { %v5714_v11 = vmul.f32 %v5563_v54, %v13190_v2  ;;  %v5715_v18 = vmul.f32 %v5675_v46, %v13184_v40  ;;  %5170 = vmatmul.f32.gmra.mxu1 %v4725_v26 }
 0x6b4   : > { %5235 = vmatmul.f32.gmra.mxu2 %v4725_v26  ;;  %v4624_v55 = vpop.f32.mrf.mxu3 }
 0x6b5   : > { %v11111_v30 = vpop.permute.xlu0 %5460  ;;  %v11116_v52 = vadd.f32 %v4624_v55, %v10643_v6  ;;  %v11118_v47 = vpop.f32.mrf.mxu0  ;;  %5886 = vmatpush.msrb.mxu2 %v5714_v11  ;;  %5951 = vmatpush.msrb.mxu3 %v5715_v18 }
 0x6b6   : > { %13231 = vst [vmem:[#allocation99_spill] sm:$0xff] %v11118_v47  ;;  %v5674_v37 = vsel %vm618_vm1, %v11059_v28, %v11111_v30 }
 0x6b7   : > { %v5711_v54 = vmul.f32 %v5674_v37, %v13184_v40  ;;  %v4559_v26 = vpop.f32.mrf.mxu2 }
 0x6b8   : > { %v11125_v46 = vadd.f32 %v4559_v26, %v10656_v35  ;;  %5108 = vmatmul.f32.gmra.mxu0 %v4726_v61  ;;  %v11127_v17 = vpop.f32.mrf.mxu1  ;;  %v5495_v19 = vpop.permute.xlu2 %5494 }
 0x6b9   : > { %13232 = vst [vmem:[#allocation79_spill] sm:$0xff] %v11127_v17  ;;  %5952 = vmatpush.msrb.mxu3 %v5711_v54  ;;  %v11129_v6 = vpop.permute.xlu1 %5464 }
 0x6ba   : > { %5303 = vmatmul.f32.gmra.mxu3 %v4726_v61  ;;  %v5560_v11 = vsel %vm618_vm1, %v11129_v6, %v11059_v28 }
 0x6bb   : > { %v5710_v18 = vmul.f32 %v5560_v11, %v13190_v2  ;;  %5173 = vmatmul.f32.gmra.mxu1 %v4726_v61 }
 0x6bc   : > { %5238 = vmatmul.f32.gmra.mxu2 %v4726_v61  ;;  %v4627_v55 = vpop.f32.mrf.mxu3 }
 0x6bd   : > { %v5511_v37 = vpop.permute.xlu0 %5510  ;;  %v11136_v35 = vadd.f32 %v4627_v55, %v10669_v45  ;;  %v11138_v26 = vpop.f32.mrf.mxu0  ;;  %5887 = vmatpush.msrb.mxu2 %v5710_v18 }
 0x6be   : > { %13233 = vst [vmem:[#allocation90_spill] sm:$0xff] %v11138_v26  ;;  %v5576_v54 = vsel %vm618_vm1, %v10922_v53, %v5511_v37  ;;  %v5577_v21 = vsel %vm618_vm1, %v5511_v37, %v10944_v29 }
 0x6bf   : > { %v5732_v28 = vmul.f32 %v5576_v54, %v13224_v50  ;;  %v5733_v11 = vmul.f32 %v5577_v21, %v13225_v57  ;;  %v4562_v61 = vpop.f32.mrf.mxu2  ;;  %v4728_v54 = vld [vmem:[#allocation2 + $0x348] sm:$0xff] }
 0x6c0   : > { %v11147_v17 = vadd.f32 %v4562_v61, %v10684_v14  ;;  %5111 = vmatmul.f32.gmra.mxu0 %v4727_v22  ;;  %v11149_v45 = vpop.f32.mrf.mxu1 }
 0x6c1   : > { %13234 = vst [vmem:[#allocation106_spill] sm:$0xff] %v11149_v45  ;;  %5816 = vmatpush.msrb.mxu1 %v5733_v11  ;;  %v11151_v18 = vpop.permute.xlu1 %5452  ;;  %5751 = vmatpush.msrb.mxu0 %v5732_v28  ;;  %v5570_v45 = vsel %vm618_vm1, %v10982_v27, %v5495_v19 }
 0x6c2   : > { %5306 = vmatmul.f32.gmra.mxu3 %v4727_v22  ;;  %v5724_v27 = vmul.f32 %v5570_v45, %v13224_v50 }
 0x6c3   : > { %5176 = vmatmul.f32.gmra.mxu1 %v4727_v22 }
 0x6c4   : > { %5241 = vmatmul.f32.gmra.mxu2 %v4727_v22  ;;  %v4630_v53 = vpop.f32.mrf.mxu3 }
 0x6c5   : > { %v5459_v29 = vpop.permute.xlu0 %5458  ;;  %v11154_v55 = vadd.f32 %v4630_v53, %v10695_v3  ;;  %v11156_v21 = vpop.f32.mrf.mxu0 }
 0x6c6   : > { %13235 = vst [vmem:[#allocation71_spill] sm:$0xff] %v11156_v21  ;;  %v5557_v14 = vsel %vm618_vm1, %v11087_v58, %v5459_v29  ;;  %v5673_v37 = vsel %vm618_vm1, %v5459_v29, %v11151_v18  ;;  %v5443_v53 = vpop.permute.xlu2 %5442  ;;  %v5571_v29 = vsel %vm618_vm1, %v5495_v19, %v11004_v34  ;;  %v4731_v21 = vld [vmem:[#allocation2 + $0x360] sm:$0xff] }
 0x6c7   : > { %v5706_v11 = vmul.f32 %v5557_v14, %v13190_v2  ;;  %v5707_v28 = vmul.f32 %v5673_v37, %v13184_v40  ;;  %v4565_v61 = vpop.f32.mrf.mxu2  ;;  %v5725_v34 = vmul.f32 %v5571_v29, %v13225_v57 }
 0x6c8   : > { %v11165_v22 = vadd.f32 %v4565_v61, %v10710_v42  ;;  %5114 = vmatmul.f32.gmra.mxu0 %v4728_v54  ;;  %v11167_v3 = vpop.f32.mrf.mxu1 }
 0x6c9   : > { %13236 = vst [vmem:[#allocation78_spill] sm:$0xff] %v11167_v3  ;;  %5888 = vmatpush.msrb.mxu2 %v5706_v11  ;;  %v5503_v47 = vpop.permute.xlu1 %5502  ;;  %5953 = vmatpush.msrb.mxu3 %v5707_v28 }
 0x6ca   : > { %5309 = vmatmul.f32.gmra.mxu3 %v4728_v54  ;;  %v5573_v14 = vsel %vm618_vm1, %v10952_v63, %v5503_v47  ;;  %v5574_v42 = vsel %vm618_vm1, %v5503_v47, %v10974_v23  ;;  %v4729_v23 = vld [vmem:[#allocation2 + $0x350] sm:$0xff] }
 0x6cb   : > { %v5728_v37 = vmul.f32 %v5573_v14, %v13224_v50  ;;  %v5729_v11 = vmul.f32 %v5574_v42, %v13225_v57  ;;  %5179 = vmatmul.f32.gmra.mxu1 %v4728_v54 }
 0x6cc   : > { %5244 = vmatmul.f32.gmra.mxu2 %v4728_v54  ;;  %v4633_v61 = vpop.f32.mrf.mxu3 }
 0x6cd   : > { %v11179_v26 = vpop.permute.xlu0 %5448  ;;  %v11184_v19 = vadd.f32 %v4633_v61, %v10732_v32  ;;  %v11186_v63 = vpop.f32.mrf.mxu0  ;;  %5752 = vmatpush.msrb.mxu0 %v5728_v37  ;;  %5817 = vmatpush.msrb.mxu1 %v5729_v11 }
 0x6ce   : > { %13237 = vst [vmem:[#allocation82_spill] sm:$0xff] %v11186_v63  ;;  %v11197_v14 = vpop.permute.xlu2 %5432 }
 0x6cf   : > { %v4568_v47 = vpop.f32.mrf.mxu2  ;;  %5753 = vmatpush.msrb.mxu0 %v5724_v27  ;;  %5818 = vmatpush.msrb.mxu1 %v5725_v34 }
 0x6d0   : > { %v11189_v28 = vadd.f32 %v4568_v47, %v10742_v31  ;;  %5117 = vmatmul.f32.gmra.mxu0 %v4729_v23  ;;  %v11191_v54 = vpop.f32.mrf.mxu1  ;;  %v4730_v47 = vld [vmem:[#allocation2 + $0x358] sm:$0xff] }
 0x6d1   : > { %13238 = vst [vmem:[#allocation135_spill] sm:$0xff] %v11191_v54  ;;  %v5451_v45 = vpop.permute.xlu1 %5450 }
 0x6d2   : > { %5312 = vmatmul.f32.gmra.mxu3 %v4729_v23  ;;  %v5554_v32 = vsel %vm618_vm1, %v11179_v26, %v5451_v45  ;;  %v5672_v29 = vsel %vm618_vm1, %v5451_v45, %v11113_v10 }
 0x6d3   : > { %v5702_v42 = vmul.f32 %v5554_v32, %v13190_v2  ;;  %v5703_v31 = vmul.f32 %v5672_v29, %v13184_v40  ;;  %5182 = vmatmul.f32.gmra.mxu1 %v4729_v23 }
 0x6d4   : > { %5247 = vmatmul.f32.gmra.mxu2 %v4729_v23  ;;  %v4636_v37 = vpop.f32.mrf.mxu3 }
 0x6d5   : > { %v11201_v11 = vpop.permute.xlu0 %5436  ;;  %v11204_v61 = vadd.f32 %v4636_v37, %v10757_v62  ;;  %v11206_v27 = vpop.f32.mrf.mxu0  ;;  %5889 = vmatpush.msrb.mxu2 %v5702_v42  ;;  %5954 = vmatpush.msrb.mxu3 %v5703_v31 }
 0x6d6   : > { %13239 = vst [vmem:[#allocation72_spill] sm:$0xff] %v11206_v27  ;;  %v5671_v34 = vsel %vm618_vm1, %v5443_v53, %v11201_v11  ;;  %v11221_v3 = vpop.permute.xlu2 %5420 }
 0x6d7   : > { %v5699_v45 = vmul.f32 %v5671_v34, %v13184_v40  ;;  %v4571_v32 = vpop.f32.mrf.mxu2 }
 0x6d8   : > { %v11212_v29 = vadd.f32 %v4571_v32, %v10772_v20  ;;  %5120 = vmatmul.f32.gmra.mxu0 %v4730_v47  ;;  %v11214_v23 = vpop.f32.mrf.mxu1 }
 0x6d9   : > { %13240 = vst [vmem:[#allocation65_spill] sm:$0xff] %v11214_v23  ;;  %5955 = vmatpush.msrb.mxu3 %v5699_v45  ;;  %v11216_v62 = vpop.permute.xlu1 %5440 }
 0x6da   : > { %5315 = vmatmul.f32.gmra.mxu3 %v4730_v47  ;;  %v5551_v42 = vsel %vm618_vm1, %v11216_v62, %v5443_v53 }
 0x6db   : > { %v5698_v31 = vmul.f32 %v5551_v42, %v13190_v2  ;;  %5185 = vmatmul.f32.gmra.mxu1 %v4730_v47 }
 0x6dc   : > { %5250 = vmatmul.f32.gmra.mxu2 %v4730_v47  ;;  %v4639_v37 = vpop.f32.mrf.mxu3 }
 0x6dd   : > { %v5487_v34 = vpop.permute.xlu0 %5486  ;;  %v11224_v20 = vadd.f32 %v4639_v37, %v10794_v43  ;;  %v11226_v32 = vpop.f32.mrf.mxu0  ;;  %5890 = vmatpush.msrb.mxu2 %v5698_v31 }
 0x6de   : > { %13241 = vst [vmem:[#allocation70_spill] sm:$0xff] %v11226_v32  ;;  %v5567_v45 = vsel %vm618_vm1, %v11012_v33, %v5487_v34  ;;  %v5568_v53 = vsel %vm618_vm1, %v5487_v34, %v11032_v44 }
 0x6df   : > { %v5720_v42 = vmul.f32 %v5567_v45, %v13224_v50  ;;  %v5721_v47 = vmul.f32 %v5568_v53, %v13225_v57  ;;  %v4574_v54 = vpop.f32.mrf.mxu2  ;;  %v4732_v45 = vld [vmem:[#allocation2 + $0x368] sm:$0xff] }
 0x6e0   : > { %v11235_v63 = vadd.f32 %v4574_v54, %v10810_v59  ;;  %5123 = vmatmul.f32.gmra.mxu0 %v4731_v21  ;;  %v11237_v43 = vpop.f32.mrf.mxu1 }
 0x6e1   : > { %13242 = vst [vmem:[#allocation62_spill] sm:$0xff] %v11237_v43  ;;  %5819 = vmatpush.msrb.mxu1 %v5721_v47  ;;  %v11239_v31 = vpop.permute.xlu1 %5428  ;;  %5754 = vmatpush.msrb.mxu0 %v5720_v42 }
 0x6e2   : > { %5318 = vmatmul.f32.gmra.mxu3 %v4731_v21 }
 0x6e3   : > { %5188 = vmatmul.f32.gmra.mxu1 %v4731_v21 }
 0x6e4   : > { %5253 = vmatmul.f32.gmra.mxu2 %v4731_v21  ;;  %v4642_v33 = vpop.f32.mrf.mxu3  ;;  %v5471_v21 = vpop.permute.xlu2 %5470 }
 0x6e5   : > { %v5435_v44 = vpop.permute.xlu0 %5434  ;;  %v11242_v37 = vadd.f32 %v4642_v33, %v10834_v25  ;;  %v11244_v34 = vpop.f32.mrf.mxu0  ;;  %v5561_v43 = vsel %vm618_vm1, %v11000_v7, %v5471_v21 }
 0x6e6   : > { %13243 = vst [vmem:[#allocation126_spill] sm:$0xff] %v11244_v34  ;;  %v5548_v59 = vsel %vm618_vm1, %v11197_v14, %v5435_v44  ;;  %v5670_v54 = vsel %vm618_vm1, %v5435_v44, %v11239_v31  ;;  %v5562_v44 = vsel %vm618_vm1, %v5471_v21, %v11091_v49  ;;  %v5712_v7 = vmul.f32 %v5561_v43, %v13224_v50 }
 0x6e7   : > { %v5694_v53 = vmul.f32 %v5548_v59, %v13190_v2  ;;  %v5695_v42 = vmul.f32 %v5670_v54, %v13184_v40  ;;  %v4577_v47 = vpop.f32.mrf.mxu2  ;;  %v5713_v49 = vmul.f32 %v5562_v44, %v13225_v57 }
 0x6e8   : > { %v11253_v23 = vadd.f32 %v4577_v47, %v10848_v0  ;;  %5126 = vmatmul.f32.gmra.mxu0 %v4732_v45  ;;  %v11255_v25 = vpop.f32.mrf.mxu1 }
 0x6e9   : > { %13244 = vst [vmem:[#allocation67_spill] sm:$0xff] %v11255_v25  ;;  %5891 = vmatpush.msrb.mxu2 %v5694_v53  ;;  %v5479_v33 = vpop.permute.xlu1 %5478  ;;  %5956 = vmatpush.msrb.mxu3 %v5695_v42 }
 0x6ea   : > { %5321 = vmatmul.f32.gmra.mxu3 %v4732_v45  ;;  %v5564_v59 = vsel %vm618_vm1, %v11061_v24, %v5479_v33  ;;  %v5565_v54 = vsel %vm618_vm1, %v5479_v33, %v10970_v38  ;;  %v4733_v38 = vld [vmem:[#allocation2 + $0x370] sm:$0xff] }
 0x6eb   : > { %v5716_v0 = vmul.f32 %v5564_v59, %v13224_v50  ;;  %v5717_v47 = vmul.f32 %v5565_v54, %v13225_v57  ;;  %5191 = vmatmul.f32.gmra.mxu1 %v4732_v45 }
 0x6ec   : > { %5256 = vmatmul.f32.gmra.mxu2 %v4732_v45  ;;  %v4645_v53 = vpop.f32.mrf.mxu3  ;;  %v5419_v43 = vpop.permute.xlu2 %5418 }
 0x6ed   : > { %v11267_v32 = vpop.permute.xlu0 %5424  ;;  %v11272_v21 = vadd.f32 %v4645_v53, %v10865_v48  ;;  %v11274_v24 = vpop.f32.mrf.mxu0  ;;  %5755 = vmatpush.msrb.mxu0 %v5716_v0  ;;  %5820 = vmatpush.msrb.mxu1 %v5717_v47 }
 0x6ee   : > { %13245 = vst [vmem:[#allocation114_spill] sm:$0xff] %v11274_v24  ;;  %v13405_v24 = vld [vmem:[#allocation207_spill] sm:$0xff] }
 0x6ef   : > { %v4580_v42 = vpop.f32.mrf.mxu2  ;;  %5756 = vmatpush.msrb.mxu0 %v5712_v7  ;;  %5821 = vmatpush.msrb.mxu1 %v5713_v49 }
 0x6f0   : > { %v11277_v33 = vadd.f32 %v4580_v42, %v10878_v13  ;;  %5129 = vmatmul.f32.gmra.mxu0 %v4733_v38  ;;  %v11279_v45 = vpop.f32.mrf.mxu1  ;;  %v4734_v42 = vld [vmem:[#allocation2 + $0x378] sm:$0xff] }
 0x6f1   : > { %13246 = vst [vmem:[#allocation66_spill] sm:$0xff] %v11279_v45  ;;  %v5427_v44 = vpop.permute.xlu1 %5426 }
 0x6f2   : > { %5324 = vmatmul.f32.gmra.mxu3 %v4733_v38  ;;  %v5545_v48 = vsel %vm618_vm1, %v11267_v32, %v5427_v44  ;;  %v5669_v59 = vsel %vm618_vm1, %v5427_v44, %v11221_v3 }
 0x6f3   : > { %v5690_v54 = vmul.f32 %v5545_v48, %v13190_v2  ;;  %v5691_v0 = vmul.f32 %v5669_v59, %v13184_v40  ;;  %5194 = vmatmul.f32.gmra.mxu1 %v4733_v38 }
 0x6f4   : > { %5259 = vmatmul.f32.gmra.mxu2 %v4733_v38 }
 0x6f5   : > { %v4648_v13 = vpop.f32.mrf.mxu3  ;;  %v11287_v47 = vpop.permute.xlu0 %5412  ;;  %5892 = vmatpush.msrb.mxu2 %v5690_v54  ;;  %5957 = vmatpush.msrb.mxu3 %v5691_v0 }
 0x6f6   : > { %v11290_v53 = vadd.f32 %v4648_v13, %v10895_v5  ;;  %v11292_v7 = vpop.f32.mrf.mxu0  ;;  %v5668_v49 = vsel %vm618_vm1, %v5419_v43, %v11287_v47  ;;  %v5447_v0 = vpop.permute.xlu2 %5446 }
 0x6f7   : > { %v5687_v44 = vmul.f32 %v5668_v49, %v13184_v40  ;;  %v4583_v48 = vpop.f32.mrf.mxu2 }
 0x6f8   : > { %v11298_v59 = vadd.f32 %v4583_v48, %v10908_v12  ;;  %5132 = vmatmul.f32.gmra.mxu0 %v4734_v42  ;;  %v11300_v38 = vpop.f32.mrf.mxu1 }
 0x6f9   : > { %13247 = vst [vmem:[#allocation56_spill] sm:$0xff] %v11300_v38  ;;  %5958 = vmatpush.msrb.mxu3 %v5687_v44  ;;  %v11302_v5 = vpop.permute.xlu1 %5416 }
 0x6fa   : > { %5327 = vmatmul.f32.gmra.mxu3 %v4734_v42  ;;  %v5542_v54 = vsel %vm618_vm1, %v11302_v5, %v5419_v43 }
 0x6fb   : > { %v5686_v13 = vmul.f32 %v5542_v54, %v13190_v2  ;;  %5197 = vmatmul.f32.gmra.mxu1 %v4734_v42 }
 0x6fc   : > { %5262 = vmatmul.f32.gmra.mxu2 %v4734_v42  ;;  %v11318_v42 = vld [vmem:[#allocation2 + $0x380] sm:$0xff] }
 0x6fd   : > { %v4651_v40 = vpop.f32.mrf.mxu3  ;;  %v5463_v49 = vpop.permute.xlu0 %5462  ;;  %5893 = vmatpush.msrb.mxu2 %v5686_v13 }
 0x6fe   : > { %v11308_v12 = vadd.f32 %v4651_v40, %v10925_v4  ;;  %v11310_v48 = vpop.f32.mrf.mxu0  ;;  %v5558_v44 = vsel %vm618_vm1, %v11111_v30, %v5463_v49  ;;  %v5559_v25 = vsel %vm618_vm1, %v5463_v49, %v11129_v6  ;;  %v5552_v30 = vsel %vm618_vm1, %v11113_v10, %v5447_v0 }
 0x6ff   : > { %13248 = vst [vmem:[#allocation61_spill] sm:$0xff] %v11310_v48  ;;  %v5708_v43 = vmul.f32 %v5558_v44, %v13224_v50  ;;  %v5709_v2 = vmul.f32 %v5559_v25, %v13225_v57  ;;  %v4586_v54 = vpop.f32.mrf.mxu2  ;;  %v5553_v6 = vsel %vm618_vm1, %v5447_v0, %v11179_v26  ;;  %v5700_v10 = vmul.f32 %v5552_v30, %v13224_v50 }
 0x700   : > { %v11321_v34 = vadd.f32 %v4586_v54, %v10938_v56  ;;  %v11323_v4 = vpop.f32.mrf.mxu1  ;;  %v5701_v44 = vmul.f32 %v5553_v6, %v13225_v57  ;;  %v5423_v54 = vpop.permute.xlu2 %5422 }
 0x701   : > { %13249 = vst [vmem:[#allocation63_spill] sm:$0xff] %v11323_v4  ;;  %5757 = vmatpush.msrb.mxu0 %v5708_v43  ;;  %5822 = vmatpush.msrb.mxu1 %v5709_v2  ;;  %v5455_v13 = vpop.permute.xlu1 %5454  ;;  %v5405_v4 = vld [vmem:[#allocation2 + $0x3c8] sm:$0xff] }
 0x702   : > { %5959 = vmatmul.f32.vlgmr.msrb.gmra.mxu3 %v11318_v42  ;;  %v5555_v25 = vsel %vm618_vm1, %v11151_v18, %v5455_v13  ;;  %v5556_v56 = vsel %vm618_vm1, %v5455_v13, %v11087_v58 }
 0x703   : > { %v5704_v40 = vmul.f32 %v5555_v25, %v13224_v50  ;;  %v5705_v49 = vmul.f32 %v5556_v56, %v13225_v57  ;;  %v5397_v25 = vld [vmem:[#allocation2 + $0x388] sm:$0xff] }
 0x704   : > { %5894 = vmatmul.f32.vlgmr.msrb.gmra.mxu2 %v11318_v42 }
 0x705   : > { %v5283_v26 = vpop.f32.mrf.mxu3  ;;  %v5439_v0 = vpop.permute.xlu0 %5438  ;;  %5758 = vmatpush.msrb.mxu0 %v5704_v40  ;;  %5823 = vmatpush.msrb.mxu1 %v5705_v49 }
 0x706   : > { %v11340_v43 = vadd.f32 %v5283_v26, %v10955_v16  ;;  %v11342_v2 = vpop.f32.mrf.mxu0  ;;  %v5549_v58 = vsel %vm618_vm1, %v11201_v11, %v5439_v0  ;;  %v5550_v18 = vsel %vm618_vm1, %v5439_v0, %v11216_v62  ;;  %v5543_v11 = vsel %vm618_vm1, %v11221_v3, %v5423_v54 }
 0x707   : > { %13250 = vst [vmem:[#allocation102_spill] sm:$0xff] %v11342_v2  ;;  %v5696_v30 = vmul.f32 %v5549_v58, %v13224_v50  ;;  %v5697_v6 = vmul.f32 %v5550_v18, %v13225_v57  ;;  %v5218_v13 = vpop.f32.mrf.mxu2  ;;  %5759 = vmatpush.msrb.mxu0 %v5700_v10  ;;  %5824 = vmatpush.msrb.mxu1 %v5701_v44 }
 0x708   : > { %v11351_v16 = vadd.f32 %v5218_v13, %v10968_v15  ;;  %v11353_v56 = vpop.f32.mrf.mxu1  ;;  %v5544_v62 = vsel %vm618_vm1, %v5423_v54, %v11267_v32  ;;  %v5688_v3 = vmul.f32 %v5543_v11, %v13224_v50  ;;  %v5398_v13 = vld [vmem:[#allocation2 + $0x390] sm:$0xff] }
 0x709   : > { %13251 = vst [vmem:[#allocation52_spill] sm:$0xff] %v11353_v56  ;;  %v5431_v40 = vpop.permute.xlu1 %5430  ;;  %5760 = vmatpush.msrb.mxu0 %v5696_v30  ;;  %5825 = vmatpush.msrb.mxu1 %v5697_v6  ;;  %v5689_v26 = vmul.f32 %v5544_v62, %v13225_v57  ;;  %v5399_v62 = vld [vmem:[#allocation2 + $0x398] sm:$0xff] }
 0x70a   : > { %5962 = vmatmul.f32.gmra.mxu3 %v5397_v25  ;;  %v5546_v49 = vsel %vm618_vm1, %v11239_v31, %v5431_v40  ;;  %v5547_v15 = vsel %vm618_vm1, %v5431_v40, %v11197_v14  ;;  %v13256_v40 = vld [vmem:[#allocation118_spill] sm:$0xff] }
 0x70b   : > { %v5692_v10 = vmul.f32 %v5546_v49, %v13224_v50  ;;  %v5693_v44 = vmul.f32 %v5547_v15, %v13225_v57 }
 0x70c   : > { %5897 = vmatmul.f32.gmra.mxu2 %v5397_v25 }
 0x70d   : > { %v5286_v32 = vpop.f32.mrf.mxu3  ;;  %v5415_v0 = vpop.permute.xlu0 %5414  ;;  %5761 = vmatpush.msrb.mxu0 %v5692_v10  ;;  %5826 = vmatpush.msrb.mxu1 %v5693_v44 }
 0x70e   : > { %v11368_v58 = vadd.f32 %v5286_v32, %v10985_v36  ;;  %v11370_v18 = vpop.f32.mrf.mxu0  ;;  %v5540_v14 = vsel %vm618_vm1, %v11287_v47, %v5415_v0  ;;  %v5541_v31 = vsel %vm618_vm1, %v5415_v0, %v11302_v5  ;;  %v13254_v47 = vld [vmem:[#allocation137_spill] sm:$0xff] }
 0x70f   : > { %13252 = vst [vmem:[#allocation162_spill] sm:$0xff] %v11370_v18  ;;  %v5684_v54 = vmul.f32 %v5540_v14, %v13224_v50  ;;  %v5685_v30 = vmul.f32 %v5541_v31, %v13225_v57  ;;  %v5221_v6 = vpop.f32.mrf.mxu2  ;;  %5762 = vmatpush.msrb.mxu0 %v5688_v3  ;;  %5827 = vmatpush.msrb.mxu1 %v5689_v26  ;;  %v5400_v26 = vld [vmem:[#allocation2 + $0x3a0] sm:$0xff] }
 0x710   : > { %v11379_v11 = vadd.f32 %v5221_v6, %v10998_v1  ;;  %v11381_v36 = vpop.f32.mrf.mxu1 }
 0x711   : > { %13253 = vst [vmem:[#allocation58_spill] sm:$0xff] %v11381_v36  ;;  %5763 = vmatpush.msrb.mxu0 %v5684_v54  ;;  %5828 = vmatpush.msrb.mxu1 %v5685_v30  ;;  %v5401_v54 = vld [vmem:[#allocation2 + $0x3a8] sm:$0xff] }
 0x712   : > { %5965 = vmatmul.f32.gmra.mxu3 %v5398_v13  ;;  %5764 = vmatmul.f32.vlgmr.msrb.gmra.mxu0 %v11318_v42 }
 0x713   : > { %5829 = vmatmul.f32.vlgmr.msrb.gmra.mxu1 %v11318_v42 }
 0x714   : > { %5900 = vmatmul.f32.gmra.mxu2 %v5398_v13 }
 0x715   : > { %v5289_v50 = vpop.f32.mrf.mxu3 }
 0x716   : > { %v11386_v57 = vadd.f32 %v5289_v50, %v13254_v47  ;;  %v11388_v5 = vpop.f32.mrf.mxu0  ;;  %v5402_v47 = vld [vmem:[#allocation2 + $0x3b0] sm:$0xff] }
 0x717   : > { %13255 = vst [vmem:[#allocation215_spill] sm:$0xff] %v11388_v5  ;;  %v5224_v1 = vpop.f32.mrf.mxu2  ;;  %v5408_v5 = vld [vmem:[#allocation2 + $0x3e0] sm:$0xff] }
 0x718   : > { %v11391_v49 = vadd.f32 %v5224_v1, %v13256_v40  ;;  %v11393_v15 = vpop.f32.mrf.mxu1 }
 0x719   : > { %13257 = vst [vmem:[#allocation49_spill] sm:$0xff] %v11393_v15 }
 0x71a   : > { %5968 = vmatmul.f32.gmra.mxu3 %v5399_v62  ;;  %5767 = vmatmul.f32.gmra.mxu0 %v5397_v25 }
 0x71b   : > { %5832 = vmatmul.f32.gmra.mxu1 %v5397_v25 }
 0x71c   : > { %5903 = vmatmul.f32.gmra.mxu2 %v5399_v62 }
 0x71d   : > { %v5292_v10 = vpop.f32.mrf.mxu3 }
 0x71e   : > { %v11396_v42 = vadd.f32 %v5292_v10, %v11044_v51  ;;  %v11398_v44 = vpop.f32.mrf.mxu0 }
 0x71f   : > { %13258 = vst [vmem:[#allocation95_spill] sm:$0xff] %v11398_v44  ;;  %v5227_v3 = vpop.f32.mrf.mxu2 }
 0x720   : > { %v11401_v32 = vadd.f32 %v5227_v3, %v11055_v9  ;;  %v11403_v0 = vpop.f32.mrf.mxu1 }
 0x721   : > { %13259 = vst [vmem:[#allocation142_spill] sm:$0xff] %v11403_v0 }
 0x722   : > { %5971 = vmatmul.f32.gmra.mxu3 %v5400_v26  ;;  %5770 = vmatmul.f32.gmra.mxu0 %v5398_v13 }
 0x723   : > { %5835 = vmatmul.f32.gmra.mxu1 %v5398_v13 }
 0x724   : > { %5906 = vmatmul.f32.gmra.mxu2 %v5400_v26 }
 0x725   : > { %v5295_v14 = vpop.f32.mrf.mxu3 }
 0x726   : > { %v11406_v25 = vadd.f32 %v5295_v14, %v11064_v60  ;;  %v11408_v31 = vpop.f32.mrf.mxu0 }
 0x727   : > { %13260 = vst [vmem:[#allocation54_spill] sm:$0xff] %v11408_v31  ;;  %v5230_v51 = vpop.f32.mrf.mxu2 }
 0x728   : > { %v11411_v30 = vadd.f32 %v5230_v51, %v11075_v39  ;;  %v11413_v6 = vpop.f32.mrf.mxu1 }
 0x729   : > { %13261 = vst [vmem:[#allocation84_spill] sm:$0xff] %v11413_v6 }
 0x72a   : > { %5974 = vmatmul.f32.gmra.mxu3 %v5401_v54  ;;  %5773 = vmatmul.f32.gmra.mxu0 %v5399_v62 }
 0x72b   : > { %5838 = vmatmul.f32.gmra.mxu1 %v5399_v62 }
 0x72c   : > { %5909 = vmatmul.f32.gmra.mxu2 %v5401_v54 }
 0x72d   : > { %v5298_v9 = vpop.f32.mrf.mxu3 }
 0x72e   : > { %v11416_v13 = vadd.f32 %v5298_v9, %v11096_v8  ;;  %v11418_v50 = vpop.f32.mrf.mxu0  ;;  %v5403_v8 = vld [vmem:[#allocation2 + $0x3b8] sm:$0xff] }
 0x72f   : > { %13262 = vst [vmem:[#allocation55_spill] sm:$0xff] %v11418_v50  ;;  %v5233_v60 = vpop.f32.mrf.mxu2 }
 0x730   : > { %v11421_v1 = vadd.f32 %v5233_v60, %v11101_v41  ;;  %v11423_v40 = vpop.f32.mrf.mxu1 }
 0x731   : > { %13263 = vst [vmem:[#allocation166_spill] sm:$0xff] %v11423_v40 }
 0x732   : > { %5977 = vmatmul.f32.gmra.mxu3 %v5402_v47  ;;  %5776 = vmatmul.f32.gmra.mxu0 %v5400_v26 }
 0x733   : > { %5841 = vmatmul.f32.gmra.mxu1 %v5400_v26 }
 0x734   : > { %5912 = vmatmul.f32.gmra.mxu2 %v5402_v47 }
 0x735   : > { %v5301_v39 = vpop.f32.mrf.mxu3 }
 0x736   : > { %v11426_v62 = vadd.f32 %v5301_v39, %v11116_v52  ;;  %v11428_v3 = vpop.f32.mrf.mxu0  ;;  %v5404_v52 = vld [vmem:[#allocation2 + $0x3c0] sm:$0xff] }
 0x737   : > { %v5236_v10 = vpop.f32.mrf.mxu2  ;;  %13264 = vst [vmem:[#allocation44_spill] sm:$0xff] %v11428_v3 }
 0x738   : > { %v11431_v14 = vadd.f32 %v5236_v10, %v11125_v46  ;;  %v11433_v51 = vpop.f32.mrf.mxu1 }
 0x739   : > { %13265 = vst [vmem:[#allocation219_spill] sm:$0xff] %v11433_v51 }
 0x73a   : > { %5980 = vmatmul.f32.gmra.mxu3 %v5403_v8  ;;  %5779 = vmatmul.f32.gmra.mxu0 %v5401_v54 }
 0x73b   : > { %5844 = vmatmul.f32.gmra.mxu1 %v5401_v54 }
 0x73c   : > { %5915 = vmatmul.f32.gmra.mxu2 %v5403_v8 }
 0x73d   : > { %v5304_v41 = vpop.f32.mrf.mxu3 }
 0x73e   : > { %v11436_v26 = vadd.f32 %v5304_v41, %v11136_v35  ;;  %v11441_v39 = vpop.f32.mrf.mxu0 }
 0x73f   : > { %v5239_v9 = vpop.f32.mrf.mxu2  ;;  %13266 = vst [vmem:[#allocation18_spill] sm:$0xff] %v11441_v39  ;;  %v13346_v39 = vld [vmem:[#allocation103_spill] sm:$0xff] }
 0x740   : > { %v11439_v60 = vadd.f32 %v5239_v9, %v11147_v17  ;;  %v11443_v46 = vpop.f32.mrf.mxu1 }
 0x741   : > { %13267 = vst [vmem:[#allocation50_spill] sm:$0xff] %v11443_v46  ;;  %v13344_v46 = vld [vmem:[#allocation120_spill] sm:$0xff] }
 0x742   : > { %5983 = vmatmul.f32.gmra.mxu3 %v5404_v52  ;;  %5782 = vmatmul.f32.gmra.mxu0 %v5402_v47 }
 0x743   : > { %5847 = vmatmul.f32.gmra.mxu1 %v5402_v47  ;;  %v5406_v47 = vld [vmem:[#allocation2 + $0x3d0] sm:$0xff] }
 0x744   : > { %5918 = vmatmul.f32.gmra.mxu2 %v5404_v52 }
 0x745   : > { %v11445_v10 = vpop.f32.mrf.mxu3 }
 0x746   : > { %v11449_v35 = vpop.f32.mrf.mxu0 }
 0x747   : > { %v11447_v54 = vpop.f32.mrf.mxu2  ;;  %13268 = vst [vmem:[#allocation51_spill] sm:$0xff] %v11449_v35  ;;  %v13351_v35 = vld [vmem:[#allocation74_spill] sm:$0xff] }
 0x748   : > { %v11451_v17 = vpop.f32.mrf.mxu1 }
 0x749   : > { %13269 = vst [vmem:[#allocation168_spill] sm:$0xff] %v11451_v17  ;;  %v13347_v17 = vld [vmem:[#allocation77_spill] sm:$0xff] }
 0x74a   : > { %5986 = vmatmul.f32.gmra.mxu3 %v5405_v4  ;;  %5785 = vmatmul.f32.gmra.mxu0 %v5403_v8 }
 0x74b   : > { %5850 = vmatmul.f32.gmra.mxu1 %v5403_v8 }
 0x74c   : > { %5921 = vmatmul.f32.gmra.mxu2 %v5405_v4 }
 0x74d   : > { %v5310_v41 = vpop.f32.mrf.mxu3 }
 0x74e   : > { %v11454_v9 = vadd.f32 %v5310_v41, %v11184_v19  ;;  %v11459_v36 = vpop.f32.mrf.mxu0  ;;  %v5407_v19 = vld [vmem:[#allocation2 + $0x3d8] sm:$0xff] }
 0x74f   : > { %v5245_v48 = vpop.f32.mrf.mxu2  ;;  %13272 = vst [vmem:[#allocation47_spill] sm:$0xff] %v11459_v36  ;;  %v13360_v36 = vld [vmem:[#allocation165_spill] sm:$0xff] }
 0x750   : > { %13270 = vst [vmem:[#allocation76_spill] sm:$0xff] %v11454_v9  ;;  %v11457_v56 = vadd.f32 %v5245_v48, %v11189_v28  ;;  %v11464_v18 = vpop.f32.mrf.mxu1  ;;  %v13386_v9 = vld [vmem:[#allocation189_spill] sm:$0xff] }
 0x751   : > { %13274 = vst [vmem:[#allocation46_spill] sm:$0xff] %v11464_v18  ;;  %v13356_v18 = vld [vmem:[#allocation161_spill] sm:$0xff] }
 0x752   : > { %13271 = vst [vmem:[#allocation17_spill] sm:$0xff] %v11457_v56  ;;  %5989 = vmatmul.f32.gmra.mxu3 %v5406_v47  ;;  %5788 = vmatmul.f32.gmra.mxu0 %v5404_v52  ;;  %v13373_v56 = vld [vmem:[#allocation177_spill] sm:$0xff] }
 0x753   : > { %5853 = vmatmul.f32.gmra.mxu1 %v5404_v52 }
 0x754   : > { %5924 = vmatmul.f32.gmra.mxu2 %v5406_v47 }
 0x755   : > { %v5313_v2 = vpop.f32.mrf.mxu3 }
 0x756   : > { %v11462_v8 = vadd.f32 %v5313_v2, %v11204_v61  ;;  %v11472_v0 = vpop.f32.mrf.mxu0 }
 0x757   : > { %v5248_v15 = vpop.f32.mrf.mxu2  ;;  %13277 = vst [vmem:[#allocation42_spill] sm:$0xff] %v11472_v0  ;;  %v13366_v0 = vld [vmem:[#allocation171_spill] sm:$0xff] }
 0x758   : > { %13273 = vst [vmem:[#allocation40_spill] sm:$0xff] %v11462_v8  ;;  %v11467_v41 = vadd.f32 %v5248_v15, %v11212_v29  ;;  %v11477_v2 = vpop.f32.mrf.mxu1  ;;  %v13399_v8 = vld [vmem:[#allocation201_spill] sm:$0xff] }
 0x759   : > { %13279 = vst [vmem:[#allocation43_spill] sm:$0xff] %v11477_v2  ;;  %v13364_v2 = vld [vmem:[#allocation169_spill] sm:$0xff] }
 0x75a   : > { %13275 = vst [vmem:[#allocation37_spill] sm:$0xff] %v11467_v41  ;;  %5992 = vmatmul.f32.gmra.mxu3 %v5407_v19  ;;  %5791 = vmatmul.f32.gmra.mxu0 %v5405_v4 }
 0x75b   : > { %5856 = vmatmul.f32.gmra.mxu1 %v5405_v4 }
 0x75c   : > { %5927 = vmatmul.f32.gmra.mxu2 %v5407_v19 }
 0x75d   : > { %v5316_v28 = vpop.f32.mrf.mxu3 }
 0x75e   : > { %v11470_v48 = vadd.f32 %v5316_v28, %v11224_v20  ;;  %v5409_v20 = vld [vmem:[#allocation2 + $0x3e8] sm:$0xff]  ;;  %v11485_v44 = vpop.f32.mrf.mxu0 }
 0x75f   : > { %v5251_v52 = vpop.f32.mrf.mxu2  ;;  %13281 = vst [vmem:[#allocation38_spill] sm:$0xff] %v11485_v44  ;;  %v13375_v44 = vld [vmem:[#allocation179_spill] sm:$0xff] }
 0x760   : > { %13276 = vst [vmem:[#allocation69_spill] sm:$0xff] %v11470_v48  ;;  %v11475_v61 = vadd.f32 %v5251_v52, %v11235_v63  ;;  %v11487_v63 = vpop.f32.mrf.mxu1  ;;  %v13434_v48 = vld [vmem:[#allocation241_spill] sm:$0xff] }
 0x761   : > { %13282 = vst [vmem:[#allocation39_spill] sm:$0xff] %v11487_v63  ;;  %v13367_v63 = vld [vmem:[#allocation157_spill] sm:$0xff] }
 0x762   : > { %13278 = vst [vmem:[#allocation64_spill] sm:$0xff] %v11475_v61  ;;  %5995 = vmatmul.f32.gmra.mxu3 %v5408_v5  ;;  %5794 = vmatmul.f32.gmra.mxu0 %v5406_v47  ;;  %v13395_v61 = vld [vmem:[#allocation197_spill] sm:$0xff] }
 0x763   : > { %5859 = vmatmul.f32.gmra.mxu1 %v5406_v47 }
 0x764   : > { %5930 = vmatmul.f32.gmra.mxu2 %v5408_v5 }
 0x765   : > { %v5319_v29 = vpop.f32.mrf.mxu3 }
 0x766   : > { %v11480_v4 = vadd.f32 %v5319_v29, %v11242_v37  ;;  %v5410_v37 = vld [vmem:[#allocation2 + $0x3f0] sm:$0xff] }
 0x767   : > { %v5254_v15 = vpop.f32.mrf.mxu2 }
 0x768   : > { %v11483_v28 = vadd.f32 %v5254_v15, %v11253_v23  ;;  %v11495_v23 = vpop.f32.mrf.mxu0  ;;  %v11497_v15 = vpop.f32.mrf.mxu1 }
 0x769   : > { %13283 = vst [vmem:[#allocation60_spill] sm:$0xff] %v11495_v23  ;;  %v13383_v23 = vld [vmem:[#allocation138_spill] sm:$0xff] }
 0x76a   : > { %13280 = vst [vmem:[#allocation36_spill] sm:$0xff] %v11483_v28  ;;  %5998 = vmatmul.f32.gmra.mxu3 %v5409_v20  ;;  %5797 = vmatmul.f32.gmra.mxu0 %v5407_v19 }
 0x76b   : > { %5862 = vmatmul.f32.gmra.mxu1 %v5407_v19  ;;  %13284 = vst [vmem:[#allocation53_spill] sm:$0xff] %v11497_v15  ;;  %v13377_v15 = vld [vmem:[#allocation181_spill] sm:$0xff] }
 0x76c   : > { %5933 = vmatmul.f32.gmra.mxu2 %v5409_v20 }
 0x76d   : > { %v5322_v52 = vpop.f32.mrf.mxu3 }
 0x76e   : > { %v11490_v47 = vadd.f32 %v5322_v52, %v11272_v21  ;;  %v5411_v21 = vld [vmem:[#allocation2 + $0x3f8] sm:$0xff] }
 0x76f   : > { %v5257_v6 = vpop.f32.mrf.mxu2 }
 0x770   : > { %v11493_v29 = vadd.f32 %v5257_v6, %v11277_v33  ;;  %v11505_v6 = vpop.f32.mrf.mxu0  ;;  %v11510_v50 = vpop.f32.mrf.mxu1 }
 0x771   : > { %13285 = vst [vmem:[#allocation57_spill] sm:$0xff] %v11505_v6  ;;  %v13392_v6 = vld [vmem:[#allocation19_spill] sm:$0xff] }
 0x772   : > { %6001 = vmatmul.f32.gmra.mxu3 %v5410_v37  ;;  %5800 = vmatmul.f32.gmra.mxu0 %v5408_v5  ;;  %13286 = vst [vmem:[#allocation48_spill] sm:$0xff] %v11510_v50 }
 0x773   : > { %5865 = vmatmul.f32.gmra.mxu1 %v5408_v5 }
 0x774   : > { %5936 = vmatmul.f32.gmra.mxu2 %v5410_v37 }
 0x775   : > { %v5325_v31 = vpop.f32.mrf.mxu3 }
 0x776   : > { %v11500_v19 = vadd.f32 %v5325_v31, %v11290_v53 }
 0x777   : > { %v5260_v40 = vpop.f32.mrf.mxu2 }
 0x778   : > { %v11503_v52 = vadd.f32 %v5260_v40, %v11298_v59 }
 0x77a   : > { %6004 = vmatmul.f32.gmra.mxu3 %v5411_v21  ;;  %5803 = vmatmul.f32.gmra.mxu0 %v5409_v20 }
 0x77b   : > { %5868 = vmatmul.f32.gmra.mxu1 %v5409_v20  ;;  %v11518_v20 = vpop.f32.mrf.mxu0 }
 0x77c   : > { %5939 = vmatmul.f32.gmra.mxu2 %v5411_v21  ;;  %13288 = vst [vmem:[#allocation45_spill] sm:$0xff] %v11518_v20  ;;  %v13402_v20 = vld [vmem:[#allocation204_spill] sm:$0xff] }
 0x77d   : > { %v5328_v33 = vpop.f32.mrf.mxu3 }
 0x77e   : > { %v11508_v5 = vadd.f32 %v5328_v33, %v11308_v12  ;;  %v11523_v12 = vpop.f32.mrf.mxu1 }
 0x77f   : > { %v5263_v51 = vpop.f32.mrf.mxu2  ;;  %13290 = vst [vmem:[#allocation8_spill] sm:$0xff] %v11523_v12 }
 0x780   : > { %v11513_v53 = vadd.f32 %v5263_v51, %v11321_v34 }
 0x782   : > { %5806 = vmatmul.f32.gmra.mxu0 %v5410_v37 }
 0x783   : > { %5871 = vmatmul.f32.gmra.mxu1 %v5410_v37 }
 0x785   : > { %v5960_v59 = vpop.f32.mrf.mxu3 }
 0x786   : > { %v11516_v31 = vadd.f32 %v5960_v59, %v11340_v43 }
 0x787   : > { %v5895_v40 = vpop.f32.mrf.mxu2 }
 0x788   : > { %13287 = vst [vmem:[#allocation41_spill] sm:$0xff] %v11516_v31  ;;  %v11521_v3 = vadd.f32 %v5895_v40, %v11351_v16 }
 0x78a   : > { %13289 = vst [vmem:[#allocation35_spill] sm:$0xff] %v11521_v3  ;;  %5809 = vmatmul.f32.gmra.mxu0 %v5411_v21 }
 0x78b   : > { %5874 = vmatmul.f32.gmra.mxu1 %v5411_v21 }
 0x78d   : > { %v5963_v33 = vpop.f32.mrf.mxu3 }
 0x78e   : > { %v11526_v34 = vadd.f32 %v5963_v33, %v11368_v58 }
 0x78f   : > { %v5898_v51 = vpop.f32.mrf.mxu2  ;;  %v11528_v37 = vpop.f32.mrf.mxu0 }
 0x790   : > { %13291 = vst [vmem:[#allocation12_spill] sm:$0xff] %v11526_v34  ;;  %v11531_v43 = vadd.f32 %v5898_v51, %v11379_v11  ;;  %v11533_v59 = vpop.f32.mrf.mxu1 }
 0x791   : > { %13292 = vst [vmem:[#allocation137_spill] sm:$0xff] %v11528_v37 }
 0x792   : > { %13293 = vst [vmem:[#allocation118_spill] sm:$0xff] %v11531_v43 }
 0x793   : > { %13294 = vst [vmem:[#allocation243_spill] sm:$0xff] %v11533_v59 }
 0x795   : > { %v5966_v31 = vpop.f32.mrf.mxu3 }
 0x796   : > { %v11536_v16 = vadd.f32 %v5966_v31, %v11386_v57 }
 0x797   : > { %v5901_v40 = vpop.f32.mrf.mxu2  ;;  %v11538_v3 = vpop.f32.mrf.mxu0 }
 0x798   : > { %13295 = vst [vmem:[#allocation244_spill] sm:$0xff] %v11536_v16  ;;  %v11541_v21 = vadd.f32 %v5901_v40, %v11391_v49  ;;  %v11543_v58 = vpop.f32.mrf.mxu1  ;;  %v13337_v16 = vld [vmem:[#allocation85_spill] sm:$0xff] }
 0x799   : > { %13296 = vst [vmem:[#allocation245_spill] sm:$0xff] %v11538_v3 }
 0x79a   : > { %13297 = vst [vmem:[#allocation246_spill] sm:$0xff] %v11541_v21 }
 0x79b   : > { %13298 = vst [vmem:[#allocation247_spill] sm:$0xff] %v11543_v58 }
 0x79d   : > { %v5969_v33 = vpop.f32.mrf.mxu3 }
 0x79e   : > { %v11546_v37 = vadd.f32 %v5969_v33, %v11396_v42 }
 0x79f   : > { %v5904_v11 = vpop.f32.mrf.mxu2  ;;  %v11548_v51 = vpop.f32.mrf.mxu0 }
 0x7a0   : > { %13299 = vst [vmem:[#allocation248_spill] sm:$0xff] %v11546_v37  ;;  %v11551_v59 = vadd.f32 %v5904_v11, %v11401_v32  ;;  %v11553_v57 = vpop.f32.mrf.mxu1  ;;  %v13340_v37 = vld [vmem:[#allocation127_spill] sm:$0xff] }
 0x7a1   : > { %13300 = vst [vmem:[#allocation249_spill] sm:$0xff] %v11548_v51 }
 0x7a2   : > { %13301 = vst [vmem:[#allocation250_spill] sm:$0xff] %v11551_v59  ;;  %v13336_v59 = vld [vmem:[#allocation125_spill] sm:$0xff] }
 0x7a3   : > { %13302 = vst [vmem:[#allocation251_spill] sm:$0xff] %v11553_v57 }
 0x7a5   : > { %v5972_v31 = vpop.f32.mrf.mxu3 }
 0x7a6   : > { %v11556_v3 = vadd.f32 %v5972_v31, %v11406_v25 }
 0x7a7   : > { %v5907_v49 = vpop.f32.mrf.mxu2  ;;  %v11558_v40 = vpop.f32.mrf.mxu0 }
 0x7a8   : > { %13303 = vst [vmem:[#allocation252_spill] sm:$0xff] %v11556_v3  ;;  %v11561_v58 = vadd.f32 %v5907_v49, %v11411_v30  ;;  %v11563_v42 = vpop.f32.mrf.mxu1 }
 0x7a9   : > { %13304 = vst [vmem:[#allocation253_spill] sm:$0xff] %v11558_v40 }
 0x7aa   : > { %13305 = vst [vmem:[#allocation254_spill] sm:$0xff] %v11561_v58 }
 0x7ab   : > { %13306 = vst [vmem:[#allocation255_spill] sm:$0xff] %v11563_v42 }
 0x7ad   : > { %v5975_v33 = vpop.f32.mrf.mxu3 }
 0x7ae   : > { %v11566_v51 = vadd.f32 %v5975_v33, %v11416_v13 }
 0x7af   : > { %v5910_v32 = vpop.f32.mrf.mxu2  ;;  %v11568_v11 = vpop.f32.mrf.mxu0 }
 0x7b0   : > { %13307 = vst [vmem:[#allocation256_spill] sm:$0xff] %v11566_v51  ;;  %v11571_v57 = vadd.f32 %v5910_v32, %v11421_v1  ;;  %v11573_v25 = vpop.f32.mrf.mxu1 }
 0x7b1   : > { %13308 = vst [vmem:[#allocation257_spill] sm:$0xff] %v11568_v11 }
 0x7b2   : > { %13309 = vst [vmem:[#allocation258_spill] sm:$0xff] %v11571_v57  ;;  %v13341_v57 = vld [vmem:[#allocation91_spill] sm:$0xff] }
 0x7b3   : > { %13310 = vst [vmem:[#allocation259_spill] sm:$0xff] %v11573_v25 }
 0x7b5   : > { %v5978_v31 = vpop.f32.mrf.mxu3 }
 0x7b6   : > { %v11576_v40 = vadd.f32 %v5978_v31, %v11426_v62  ;;  %v5366_v31 = vadd.f32 %v11445_v10, %v11154_v55 }
 0x7b7   : > { %v5913_v30 = vpop.f32.mrf.mxu2  ;;  %v11578_v49 = vpop.f32.mrf.mxu0 }
 0x7b8   : > { %13311 = vst [vmem:[#allocation260_spill] sm:$0xff] %v11576_v40  ;;  %v11581_v42 = vadd.f32 %v5913_v30, %v11431_v14  ;;  %v11583_v13 = vpop.f32.mrf.mxu1  ;;  %v5365_v14 = vadd.f32 %v11447_v54, %v11165_v22 }
 0x7b9   : > { %13312 = vst [vmem:[#allocation261_spill] sm:$0xff] %v11578_v49 }
 0x7ba   : > { %13313 = vst [vmem:[#allocation262_spill] sm:$0xff] %v11581_v42 }
 0x7bb   : > { %13314 = vst [vmem:[#allocation263_spill] sm:$0xff] %v11583_v13 }
 0x7bd   : > { %v5981_v33 = vpop.f32.mrf.mxu3 }
 0x7be   : > { %v11586_v43 = vadd.f32 %v5981_v33, %v11436_v26 }
 0x7bf   : > { %v5916_v1 = vpop.f32.mrf.mxu2  ;;  %v11588_v32 = vpop.f32.mrf.mxu0 }
 0x7c0   : > { %13315 = vst [vmem:[#allocation264_spill] sm:$0xff] %v11586_v43  ;;  %v11591_v25 = vadd.f32 %v5916_v1, %v11439_v60  ;;  %v11593_v62 = vpop.f32.mrf.mxu1  ;;  %v13362_v43 = vld [vmem:[#allocation167_spill] sm:$0xff] }
 0x7c1   : > { %13316 = vst [vmem:[#allocation265_spill] sm:$0xff] %v11588_v32 }
 0x7c2   : > { %13317 = vst [vmem:[#allocation266_spill] sm:$0xff] %v11591_v25 }
 0x7c3   : > { %13318 = vst [vmem:[#allocation267_spill] sm:$0xff] %v11593_v62  ;;  %v13335_v62 = vld [vmem:[#allocation104_spill] sm:$0xff] }
 0x7c4   : > { %v2104_v32 = vadd.f32 %v13336_v59, %v13335_v62  ;;  %v13350_v59 = vld [vmem:[#allocation27_spill] sm:$0xff] }
 0x7c5   : > { %v5984_v11 = vpop.f32.mrf.mxu3 }
 0x7c6   : > { %v11599_v30 = vadd.f32 %v5984_v11, %v5366_v31 }
 0x7c7   : > { %v5919_v13 = vpop.f32.mrf.mxu2  ;;  %v11601_v26 = vpop.f32.mrf.mxu0 }
 0x7c8   : > { %13319 = vst [vmem:[#allocation268_spill] sm:$0xff] %v11599_v30  ;;  %v11603_v33 = vadd.f32 %v5919_v13, %v5365_v14  ;;  %v11605_v21 = vpop.f32.mrf.mxu1 }
 0x7c9   : > { %13320 = vst [vmem:[#allocation269_spill] sm:$0xff] %v11601_v26  ;;  %v13339_v26 = vld [vmem:[#allocation97_spill] sm:$0xff] }
 0x7ca   : > { %13321 = vst [vmem:[#allocation270_spill] sm:$0xff] %v11603_v33  ;;  %v13358_v33 = vld [vmem:[#allocation163_spill] sm:$0xff] }
 0x7cb   : > { %13322 = vst [vmem:[#allocation271_spill] sm:$0xff] %v11605_v21  ;;  %v13338_v21 = vld [vmem:[#allocation113_spill] sm:$0xff] }
 0x7cc   : > { %v2169_v58 = vadd.f32 %v13338_v21, %v13337_v16  ;;  %v13352_v16 = vld [vmem:[#allocation159_spill] sm:$0xff] }
 0x7cd   : > { %v11607_v60 = vpop.f32.mrf.mxu3  ;;  %v2116_v21 = vadd.f32 %v13352_v16, %v13351_v35  ;;  %v13365_v16 = vld [vmem:[#allocation112_spill] sm:$0xff] }
 0x7ce   : > { %13323 = vst [vmem:[#allocation272_spill] sm:$0xff] %v11607_v60  ;;  %v2190_v30 = vadd.f32 %v13366_v0, %v13365_v16  ;;  %v13379_v0 = vld [vmem:[#allocation136_spill] sm:$0xff]  ;;  %v13380_v16 = vld [vmem:[#allocation183_spill] sm:$0xff] }
 0x7cf   : > { %v11609_v1 = vpop.f32.mrf.mxu2  ;;  %v11611_v49 = vpop.f32.mrf.mxu0  ;;  %v13384_v60 = vld [vmem:[#allocation187_spill] sm:$0xff] }
 0x7d0   : > { %13324 = vst [vmem:[#allocation273_spill] sm:$0xff] %v11609_v1  ;;  %v11613_v55 = vpop.f32.mrf.mxu1 }
 0x7d1   : > { %13325 = vst [vmem:[#allocation274_spill] sm:$0xff] %v11611_v49  ;;  %v13342_v49 = vld [vmem:[#allocation115_spill] sm:$0xff] }
 0x7d2   : > { %13326 = vst [vmem:[#allocation275_spill] sm:$0xff] %v11613_v55  ;;  %v2107_v55 = vadd.f32 %v13340_v37, %v13339_v26  ;;  %v2172_v3 = vadd.f32 %v13342_v49, %v13341_v57  ;;  %v13353_v37 = vld [vmem:[#allocation151_spill] sm:$0xff]  ;;  %v13355_v49 = vld [vmem:[#allocation25_spill] sm:$0xff] }
 0x7d3   : > { %v13354_v26 = vld [vmem:[#allocation15_spill] sm:$0xff] }
 0x7d4   : > { %v2181_v57 = vadd.f32 %v13354_v26, %v13353_v37  ;;  %v13368_v37 = vld [vmem:[#allocation173_spill] sm:$0xff] }
 0x7d5   : > { %v11615_v10 = vpop.f32.mrf.mxu3  ;;  %v2128_v26 = vadd.f32 %v13368_v37, %v13367_v63  ;;  %v13381_v63 = vld [vmem:[#allocation140_spill] sm:$0xff]  ;;  %v13382_v37 = vld [vmem:[#allocation185_spill] sm:$0xff] }
 0x7d6   : > { %13327 = vst [vmem:[#allocation276_spill] sm:$0xff] %v11615_v10  ;;  %v2137_v41 = vadd.f32 %v13382_v37, %v13381_v63  ;;  %v13396_v37 = vld [vmem:[#allocation22_spill] sm:$0xff]  ;;  %v13397_v10 = vld [vmem:[#allocation199_spill] sm:$0xff] }
 0x7d7   : > { %v11617_v22 = vpop.f32.mrf.mxu2  ;;  %v11619_v54 = vpop.f32.mrf.mxu0 }
 0x7d8   : > { %13328 = vst [vmem:[#allocation277_spill] sm:$0xff] %v11617_v22  ;;  %v11621_v11 = vpop.f32.mrf.mxu1  ;;  %v2199_v22 = vadd.f32 %v13380_v16, %v13379_v0  ;;  %v13394_v16 = vld [vmem:[#allocation31_spill] sm:$0xff] }
 0x7d9   : > { %13329 = vst [vmem:[#allocation278_spill] sm:$0xff] %v11619_v54  ;;  %v13345_v54 = vld [vmem:[#allocation89_spill] sm:$0xff]  ;;  %v2146_v63 = vadd.f32 %v13395_v61, %v13394_v16 }
 0x7da   : > { %13330 = vst [vmem:[#allocation279_spill] sm:$0xff] %v11621_v11  ;;  %v13343_v11 = vld [vmem:[#allocation96_spill] sm:$0xff]  ;;  %v2175_v51 = vadd.f32 %v13346_v39, %v13345_v54  ;;  %v13359_v54 = vld [vmem:[#allocation143_spill] sm:$0xff]  ;;  %v13407_v61 = vld [vmem:[#allocation209_spill] sm:$0xff] }
 0x7db   : > { %v2110_v42 = vadd.f32 %v13344_v46, %v13343_v11  ;;  %v2119_v46 = vadd.f32 %v13356_v18, %v13355_v49  ;;  %v13357_v11 = vld [vmem:[#allocation147_spill] sm:$0xff]  ;;  %v13370_v18 = vld [vmem:[#allocation153_spill] sm:$0xff] }
 0x7dc   : > { %v2184_v39 = vadd.f32 %v13358_v33, %v13357_v11  ;;  %v13371_v49 = vld [vmem:[#allocation175_spill] sm:$0xff]  ;;  %v13372_v11 = vld [vmem:[#allocation33_spill] sm:$0xff]  ;;  %v2968_v16 = vadd.f32 %v13407_v61, %v2175_v51 }
 0x7dd   : > { %v11623_v13 = vpop.f32.mrf.mxu3  ;;  %v2193_v33 = vadd.f32 %v13371_v49, %v13370_v18  ;;  %v2202_v18 = vadd.f32 %v13384_v60, %v13383_v23  ;;  %v13385_v49 = vld [vmem:[#allocation107_spill] sm:$0xff]  ;;  %v2211_v23 = vadd.f32 %v13397_v10, %v13396_v37  ;;  %v13398_v60 = vld [vmem:[#allocation30_spill] sm:$0xff] }
 0x7de   : > { %13331 = vst [vmem:[#allocation280_spill] sm:$0xff] %v11623_v13  ;;  %v13409_v37 = vld [vmem:[#allocation23_spill] sm:$0xff] }
 0x7df   : > { %v11625_v31 = vpop.f32.mrf.mxu2  ;;  %v11627_v14 = vpop.f32.mrf.mxu0 }
 0x7e0   : > { %13332 = vst [vmem:[#allocation281_spill] sm:$0xff] %v11625_v31  ;;  %v11629_v34 = vpop.f32.mrf.mxu1  ;;  %v13393_v31 = vld [vmem:[#allocation195_spill] sm:$0xff] }
 0x7e1   : > { %13333 = vst [vmem:[#allocation282_spill] sm:$0xff] %v11627_v14  ;;  %v13349_v14 = vld [vmem:[#allocation75_spill] sm:$0xff]  ;;  %v2208_v0 = vadd.f32 %v13393_v31, %v13392_v6  ;;  %v2964_v6 = vadd.f32 %v13405_v24, %v2172_v3  ;;  %v13406_v31 = vld [vmem:[#allocation208_spill] sm:$0xff] }
 0x7e2   : > { %13334 = vst [vmem:[#allocation283_spill] sm:$0xff] %v11629_v34  ;;  %v13348_v34 = vld [vmem:[#allocation86_spill] sm:$0xff]  ;;  %v2178_v62 = vadd.f32 %v13350_v59, %v13349_v14  ;;  %v2967_v27 = vadd.f32 %v13406_v31, %v2110_v42  ;;  %v13415_v3 = vld [vmem:[#allocation220_spill] sm:$0xff] }
 0x7e3   : > { %v2113_v25 = vadd.f32 %v13348_v34, %v13347_v17  ;;  %v2122_v17 = vadd.f32 %v13360_v36, %v13359_v54  ;;  %v13361_v34 = vld [vmem:[#allocation158_spill] sm:$0xff]  ;;  %v2131_v36 = vadd.f32 %v13373_v56, %v13372_v11  ;;  %v13374_v54 = vld [vmem:[#allocation156_spill] sm:$0xff]  ;;  %v2140_v56 = vadd.f32 %v13386_v9, %v13385_v49  ;;  %v13400_v49 = vld [vmem:[#allocation133_spill] sm:$0xff] }
 0x7e4   : > { %v2187_v14 = vadd.f32 %v13362_v43, %v13361_v34  ;;  %v13363_v59 = vld [vmem:[#allocation122_spill] sm:$0xff]  ;;  %v2196_v43 = vadd.f32 %v13375_v44, %v13374_v54  ;;  %v13376_v34 = vld [vmem:[#allocation145_spill] sm:$0xff]  ;;  %v13388_v44 = vld [vmem:[#allocation111_spill] sm:$0xff]  ;;  %v2149_v9 = vadd.f32 %v13399_v8, %v13398_v60  ;;  %v2972_v28 = vadd.f32 %v13409_v37, %v2178_v62 }
 0x7e5   : > { %v11649_v40 = vpop.f32.mrf.mxu3  ;;  %v2125_v35 = vadd.f32 %v13364_v2, %v13363_v59  ;;  %v2134_v2 = vadd.f32 %v13377_v15, %v13376_v34  ;;  %v13389_v54 = vld [vmem:[#allocation191_spill] sm:$0xff]  ;;  %v13391_v34 = vld [vmem:[#allocation193_spill] sm:$0xff]  ;;  %v13410_v8 = vld [vmem:[#allocation24_spill] sm:$0xff] }
 0x7e6   : > { %v2205_v50 = vadd.f32 %v13389_v54, %v13388_v44  ;;  %v13390_v15 = vld [vmem:[#allocation155_spill] sm:$0xff]  ;;  %v2959_v44 = vadd.f32 %v13402_v20, %v2104_v32  ;;  %v13403_v54 = vld [vmem:[#allocation205_spill] sm:$0xff]  ;;  %v2975_v60 = vadd.f32 %v13410_v8, %v2116_v21  ;;  %v13412_v32 = vld [vmem:[#allocation214_spill] sm:$0xff]  ;;  %v2984_v42 = vadd.f32 %v13415_v3, %v2187_v14 }
 0x7e7   : > { %v11667_v1 = vpop.f32.mrf.mxu2  ;;  %v11677_v59 = vpop.f32.mrf.mxu0  ;;  %v2960_v45 = vadd.f32 %v13403_v54, %v2169_v58  ;;  %v2979_v58 = vadd.f32 %v13412_v32, %v2119_v46  ;;  %v13414_v54 = vld [vmem:[#allocation218_spill] sm:$0xff]  ;;  %v13417_v31 = vld [vmem:[#allocation224_spill] sm:$0xff] }
 0x7e8   : > { %13369 = vst [vmem:[#allocation104_spill] sm:$0xff] %v11667_v1  ;;  %v11687_v11 = vpop.f32.mrf.mxu1  ;;  %v13408_v1 = vld [vmem:[#allocation210_spill] sm:$0xff]  ;;  %v2983_v24 = vadd.f32 %v13414_v54, %v2122_v17  ;;  %v13419_v21 = vld [vmem:[#allocation228_spill] sm:$0xff]  ;;  %v13425_v54 = vld [vmem:[#allocation233_spill] sm:$0xff] }
 0x7e9   : > { %13378 = vst [vmem:[#allocation125_spill] sm:$0xff] %v11677_v59  ;;  %v2143_v59 = vadd.f32 %v13391_v34, %v13390_v15  ;;  %v13404_v15 = vld [vmem:[#allocation206_spill] sm:$0xff]  ;;  %v2971_v10 = vadd.f32 %v13408_v1, %v2113_v25  ;;  %v2988_v25 = vadd.f32 %v13417_v31, %v2190_v30  ;;  %v2992_v37 = vadd.f32 %v13419_v21, %v2193_v33  ;;  %v13430_v21 = vld [vmem:[#allocation237_spill] sm:$0xff] }
 0x7ea   : > { %13387 = vst [vmem:[#allocation85_spill] sm:$0xff] %v11687_v11  ;;  %v13401_v11 = vld [vmem:[#allocation202_spill] sm:$0xff]  ;;  %v2963_v34 = vadd.f32 %v13404_v15, %v2107_v55 }
 0x7eb   : > { %v2214_v12 = vadd.f32 %v13401_v11, %v13400_v49  ;;  %v13411_v11 = vld [vmem:[#allocation212_spill] sm:$0xff]  ;;  %v13416_v15 = vld [vmem:[#allocation222_spill] sm:$0xff] }
 0x7ec   : > { %v2976_v20 = vadd.f32 %v13411_v11, %v2181_v57  ;;  %v13413_v49 = vld [vmem:[#allocation216_spill] sm:$0xff]  ;;  %v2987_v51 = vadd.f32 %v13416_v15, %v2125_v35  ;;  %v13418_v1 = vld [vmem:[#allocation226_spill] sm:$0xff]  ;;  %v3003_v35 = vadd.f32 %v13425_v54, %v2137_v41  ;;  %v13427_v15 = vld [vmem:[#allocation235_spill] sm:$0xff] }
 0x7ed   : > { %v11712_v13 = vpop.f32.mrf.mxu3  ;;  %v2980_v55 = vadd.f32 %v13413_v49, %v2184_v39  ;;  %v2991_v62 = vadd.f32 %v13418_v1, %v2128_v26  ;;  %v13420_v8 = vld [vmem:[#allocation230_spill] sm:$0xff]  ;;  %v13421_v11 = vld [vmem:[#allocation232_spill] sm:$0xff]  ;;  %v3007_v26 = vadd.f32 %v13427_v15, %v2140_v56 }
 0x7ee   : > { %v2995_v57 = vadd.f32 %v13420_v8, %v2131_v36  ;;  %v2996_v46 = vadd.f32 %v13421_v11, %v2196_v43  ;;  %v13422_v32 = vld [vmem:[#allocation10_spill] sm:$0xff]  ;;  %v13429_v1 = vld [vmem:[#allocation236_spill] sm:$0xff]  ;;  %v3011_v36 = vadd.f32 %v13430_v21, %v2143_v59  ;;  %v13432_v11 = vld [vmem:[#allocation239_spill] sm:$0xff] }
 0x7ef   : > { %v11722_v61 = vpop.f32.mrf.mxu2  ;;  %v2999_v39 = vadd.f32 %v13422_v32, %v2134_v2  ;;  %v11728_v49 = vpop.f32.mrf.mxu0  ;;  %v13424_v17 = vld [vmem:[#allocation14_spill] sm:$0xff]  ;;  %v3008_v33 = vadd.f32 %v13429_v1, %v2205_v50  ;;  %v3015_v2 = vadd.f32 %v13432_v11, %v2146_v63  ;;  %v13433_v32 = vld [vmem:[#allocation240_spill] sm:$0xff]  ;;  %v13443_v63 = vld [vmem:[#allocation83_spill] sm:$0xff] }
 0x7f0   : > { %13423 = vst [vmem:[#allocation113_spill] sm:$0xff] %v11728_v49  ;;  %v3000_v14 = vadd.f32 %v13424_v17, %v2199_v22  ;;  %v13426_v3 = vld [vmem:[#allocation234_spill] sm:$0xff]  ;;  %v11734_v31 = vpop.f32.mrf.mxu1  ;;  %v3016_v49 = vadd.f32 %v13433_v32, %v2211_v23  ;;  %v3019_v22 = vadd.f32 %v13434_v48, %v2149_v9  ;;  %v13435_v17 = vld [vmem:[#allocation132_spill] sm:$0xff]  ;;  %v3312_v11 = vadd.f32 %v13443_v63, %v2971_v10  ;;  %v13444_v23 = vld [vmem:[#allocation93_spill] sm:$0xff] }
 0x7f1   : > { %v3004_v30 = vadd.f32 %v13426_v3, %v2202_v18  ;;  %13428 = vst [vmem:[#allocation97_spill] sm:$0xff] %v11734_v31  ;;  %v13431_v8 = vld [vmem:[#allocation238_spill] sm:$0xff]  ;;  %v3020_v41 = vadd.f32 %v13435_v17, %v2214_v12  ;;  %v13437_v3 = vld [vmem:[#allocation100_spill] sm:$0xff]  ;;  %v3313_v32 = vadd.f32 %v13444_v23, %v2972_v28  ;;  %v13445_v48 = vld [vmem:[#allocation81_spill] sm:$0xff] }
 0x7f2   : > { %v3012_v43 = vadd.f32 %v13431_v8, %v2208_v0  ;;  %v13436_v54 = vld [vmem:[#allocation242_spill] sm:$0xff]  ;;  %v11745_v56 = vadd.f32 %v13437_v3, %v2960_v45  ;;  %v13439_v15 = vld [vmem:[#allocation92_spill] sm:$0xff]  ;;  %v13442_v0 = vld [vmem:[#allocation101_spill] sm:$0xff]  ;;  %v3316_v9 = vadd.f32 %v13445_v48, %v2975_v60 }
 0x7f3   : > { %v3300_v18 = vadd.f32 %v13436_v54, %v2959_v44  ;;  %v3304_v31 = vadd.f32 %v13439_v15, %v2963_v34  ;;  %v13440_v50 = vld [vmem:[#allocation116_spill] sm:$0xff]  ;;  %v3309_v8 = vadd.f32 %v13442_v0, %v2968_v16  ;;  %v13446_v17 = vld [vmem:[#allocation73_spill] sm:$0xff]  ;;  %v13447_v54 = vld [vmem:[#allocation98_spill] sm:$0xff] }
 0x7f4   : > { %13438 = vst [vmem:[#allocation127_spill] sm:$0xff] %v11745_v56  ;;  %v3305_v1 = vadd.f32 %v13440_v50, %v2964_v6  ;;  %v13441_v59 = vld [vmem:[#allocation88_spill] sm:$0xff]  ;;  %v3317_v44 = vadd.f32 %v13446_v17, %v2976_v20  ;;  %v3320_v45 = vadd.f32 %v13447_v54, %v2979_v58  ;;  %v13449_v34 = vld [vmem:[#allocation141_spill] sm:$0xff]  ;;  %v13452_v16 = vld [vmem:[#allocation154_spill] sm:$0xff] }
 0x7f5   : > { %v3308_v21 = vadd.f32 %v13441_v59, %v2967_v27  ;;  %v6002_v12 = vpop.f32.mrf.mxu3  ;;  %v13448_v3 = vld [vmem:[#allocation68_spill] sm:$0xff]  ;;  %v3324_v15 = vadd.f32 %v13449_v34, %v2983_v24  ;;  %v13451_v27 = vld [vmem:[#allocation26_spill] sm:$0xff]  ;;  %v3329_v0 = vadd.f32 %v13452_v16, %v2988_v25  ;;  %v13453_v10 = vld [vmem:[#allocation11_spill] sm:$0xff] }
 0x7f6   : > { %v3321_v56 = vadd.f32 %v13448_v3, %v2980_v55  ;;  %v13450_v6 = vld [vmem:[#allocation80_spill] sm:$0xff]  ;;  %v3328_v59 = vadd.f32 %v13451_v27, %v2987_v51  ;;  %v3332_v63 = vadd.f32 %v13453_v10, %v2991_v62  ;;  %v13454_v23 = vld [vmem:[#allocation211_spill] sm:$0xff]  ;;  %v13457_v58 = vld [vmem:[#allocation146_spill] sm:$0xff] }
 0x7f7   : > { %v3325_v50 = vadd.f32 %v13450_v6, %v2984_v42  ;;  %v5937_v28 = vpop.f32.mrf.mxu2  ;;  %v3333_v60 = vadd.f32 %v13454_v23, %v2992_v37  ;;  %v13455_v48 = vld [vmem:[#allocation148_spill] sm:$0xff]  ;;  %v3340_v54 = vadd.f32 %v13457_v58, %v2999_v39  ;;  %v11766_v55 = vpop.f32.mrf.mxu0  ;;  %v13459_v24 = vld [vmem:[#allocation213_spill] sm:$0xff]  ;;  %v13460_v42 = vld [vmem:[#allocation59_spill] sm:$0xff] }
 0x7f8   : > { %v3336_v38 = vadd.f32 %v13455_v48, %v2995_v57  ;;  %v13456_v20 = vld [vmem:[#allocation160_spill] sm:$0xff]  ;;  %13458 = vst [vmem:[#allocation91_spill] sm:$0xff] %v11766_v55  ;;  %v3341_v3 = vadd.f32 %v13459_v24, %v3000_v14  ;;  %v3344_v34 = vadd.f32 %v13460_v42, %v3003_v35  ;;  %v13462_v25 = vld [vmem:[#allocation139_spill] sm:$0xff]  ;;  %v11772_v62 = vpop.f32.mrf.mxu1  ;;  %v13463_v16 = vld [vmem:[#allocation217_spill] sm:$0xff] }
 0x7f9   : > { %v3337_v17 = vadd.f32 %v13456_v20, %v2996_v46  ;;  %v13461_v51 = vld [vmem:[#allocation164_spill] sm:$0xff]  ;;  %v3348_v27 = vadd.f32 %v13462_v25, %v3007_v26  ;;  %v3349_v37 = vadd.f32 %v13463_v16, %v3008_v33  ;;  %v13464_v10 = vld [vmem:[#allocation134_spill] sm:$0xff]  ;;  %v13465_v23 = vld [vmem:[#allocation123_spill] sm:$0xff] }
 0x7fa   : > { %v3345_v6 = vadd.f32 %v13461_v51, %v3004_v30  ;;  %v3352_v57 = vadd.f32 %v13464_v10, %v3011_v36  ;;  %v3353_v46 = vadd.f32 %v13465_v23, %v3012_v43  ;;  %v13466_v48 = vld [vmem:[#allocation170_spill] sm:$0xff]  ;;  %v13467_v20 = vld [vmem:[#allocation221_spill] sm:$0xff]  ;;  %v13468_v55 = vld [vmem:[#allocation223_spill] sm:$0xff] }
 0x7fb   : > { %v3356_v39 = vadd.f32 %v13466_v48, %v3015_v2  ;;  %v3357_v58 = vadd.f32 %v13467_v20, %v3016_v49  ;;  %v3360_v14 = vadd.f32 %v13468_v55, %v3019_v22  ;;  %v13469_v24 = vld [vmem:[#allocation94_spill] sm:$0xff]  ;;  %v13470_v42 = vld [vmem:[#allocation172_spill] sm:$0xff]  ;;  %v13472_v25 = vld [vmem:[#allocation225_spill] sm:$0xff] }
 0x7fc   : > { %v3361_v35 = vadd.f32 %v13469_v24, %v3020_v41  ;;  %v11782_v30 = vadd.f32 %v13470_v42, %v3300_v18  ;;  %v13471_v26 = vld [vmem:[#allocation174_spill] sm:$0xff]  ;;  %v11788_v33 = vadd.f32 %v13472_v25, %v3305_v1  ;;  %v13473_v36 = vld [vmem:[#allocation227_spill] sm:$0xff]  ;;  %v13474_v43 = vld [vmem:[#allocation149_spill] sm:$0xff] }
 0x7fd   : > { %v11785_v51 = vadd.f32 %v13471_v26, %v3304_v31  ;;  %v11791_v16 = vadd.f32 %v13473_v36, %v3308_v21  ;;  %v11794_v2 = vadd.f32 %v13474_v43, %v3309_v8  ;;  %v13475_v49 = vld [vmem:[#allocation176_spill] sm:$0xff]  ;;  %v13476_v22 = vld [vmem:[#allocation34_spill] sm:$0xff]  ;;  %v13478_v31 = vld [vmem:[#allocation229_spill] sm:$0xff]  ;;  %v6005_v1 = vpop.f32.mrf.mxu3 }
 0x7fe   : > { %v11797_v10 = vadd.f32 %v13475_v49, %v3312_v11  ;;  %v11800_v41 = vadd.f32 %v13476_v22, %v3313_v32  ;;  %v13477_v18 = vld [vmem:[#allocation178_spill] sm:$0xff]  ;;  %v11806_v23 = vadd.f32 %v13478_v31, %v3317_v44  ;;  %v13479_v48 = vld [vmem:[#allocation20_spill] sm:$0xff]  ;;  %v13480_v21 = vld [vmem:[#allocation21_spill] sm:$0xff]  ;;  %v6071_v11 = vadd.f32 %v6005_v1, %v11508_v5 }
 0x7ff   : > { %v11803_v55 = vadd.f32 %v13477_v18, %v3316_v9  ;;  %v11809_v20 = vadd.f32 %v13479_v48, %v3320_v45  ;;  %v11812_v24 = vadd.f32 %v13480_v21, %v3321_v56  ;;  %v13481_v8 = vld [vmem:[#allocation231_spill] sm:$0xff]  ;;  %v13482_v32 = vld [vmem:[#allocation152_spill] sm:$0xff]  ;;  %v13484_v44 = vld [vmem:[#allocation150_spill] sm:$0xff]  ;;  %v5940_v49 = vpop.f32.mrf.mxu2  ;;  %v6067_v5 = vadd.f32 %v6002_v12, %v11500_v19 }
 0x800   : > { %v11815_v42 = vadd.f32 %v13481_v8, %v3324_v15  ;;  %v11819_v26 = vadd.f32 %v13482_v32, %v3325_v50  ;;  %v13483_v9 = vld [vmem:[#allocation180_spill] sm:$0xff]  ;;  %v11825_v36 = vadd.f32 %v13484_v44, %v3329_v0  ;;  %v13485_v43 = vld [vmem:[#allocation182_spill] sm:$0xff]  ;;  %6139 = vmatpush.msra.mxu3 %v6071_v11  ;;  %v5807_v50 = vpop.f32.mrf.mxu0  ;;  %v13488_v31 = vld [vmem:[#allocation117_spill] sm:$0xff]  ;;  %v5872_v32 = vpop.f32.mrf.mxu1  ;;  %v6063_v19 = vadd.f32 %v11712_v13, %v11490_v47 }
 0x801   : > { %v11822_v25 = vadd.f32 %v13483_v9, %v3328_v59  ;;  %v11828_v45 = vadd.f32 %v13485_v43, %v3332_v63  ;;  %v13486_v56 = vld [vmem:[#allocation144_spill] sm:$0xff]  ;;  %v6070_v59 = vadd.f32 %v5940_v49, %v11513_v53  ;;  %v11839_v1 = vadd.f32 %v13488_v31, %v3337_v17  ;;  %v13489_v0 = vld [vmem:[#allocation186_spill] sm:$0xff]  ;;  %v13490_v63 = vld [vmem:[#allocation119_spill] sm:$0xff] }
 0x802   : > { %v11831_v22 = vadd.f32 %v13486_v56, %v3333_v60  ;;  %v13487_v15 = vld [vmem:[#allocation184_spill] sm:$0xff]  ;;  %v11842_v48 = vadd.f32 %v13489_v0, %v3340_v54  ;;  %v11845_v21 = vadd.f32 %v13490_v63, %v3341_v3  ;;  %v6066_v12 = vadd.f32 %v5937_v28, %v11503_v52  ;;  %6140 = vmatpush.msra.mxu3 %v6067_v5  ;;  %v13493_v53 = vld [vmem:[#allocation190_spill] sm:$0xff]  ;;  %v13494_v11 = vld [vmem:[#allocation9_spill] sm:$0xff] }
 0x803   : > { %v11834_v18 = vadd.f32 %v13487_v15, %v3336_v38  ;;  %v13491_v60 = vld [vmem:[#allocation188_spill] sm:$0xff]  ;;  %6119 = vmatpush.msra.mxu2 %v6070_v59  ;;  %v4025_v17 = vadd.f32 %v13493_v53, %v3348_v27  ;;  %v4026_v54 = vadd.f32 %v13494_v11, %v3349_v37  ;;  %v13495_v44 = vld [vmem:[#allocation13_spill] sm:$0xff]  ;;  %v13496_v3 = vld [vmem:[#allocation194_spill] sm:$0xff]  ;;  %v6062_v47 = vadd.f32 %v11722_v61, %v11493_v29 }
 0x804   : > { %v4021_v8 = vadd.f32 %v13491_v60, %v3344_v34  ;;  %v13492_v38 = vld [vmem:[#allocation128_spill] sm:$0xff]  ;;  %v4029_v43 = vadd.f32 %v13495_v44, %v3352_v57  ;;  %v4037_v49 = vadd.f32 %v13496_v3, %v3360_v14  ;;  %6141 = vmatpush.msra.mxu3 %v6063_v19  ;;  %v13498_v52 = vld [vmem:[#allocation109_spill] sm:$0xff]  ;;  %v13500_v15 = vld [vmem:[#allocation130_spill] sm:$0xff] }
 0x805   : > { %v4022_v9 = vadd.f32 %v13492_v38, %v3345_v6  ;;  %v13497_v56 = vld [vmem:[#allocation32_spill] sm:$0xff]  ;;  %v6059_v6 = vadd.f32 %v11649_v40, %v11480_v4  ;;  %6120 = vmatpush.msra.mxu2 %v6066_v12  ;;  %v4030_v13 = vadd.f32 %v13498_v52, %v3353_v46  ;;  %v4034_v37 = vadd.f32 %v13500_v15, %v3357_v58  ;;  %v13502_v59 = vld [vmem:[#allocation69_spill] sm:$0xff]  ;;  %v13507_v63 = vld [vmem:[#allocation114_spill] sm:$0xff] }
 0x806   : > { %v4038_v34 = vadd.f32 %v13497_v56, %v3361_v35  ;;  %v13499_v28 = vld [vmem:[#allocation192_spill] sm:$0xff]  ;;  %v4714_v57 = vadd.f32 %v11292_v7, %v4037_v49  ;;  %v13508_v60 = vld [vmem:[#allocation66_spill] sm:$0xff]  ;;  %v13509_v38 = vld [vmem:[#allocation45_spill] sm:$0xff] }
 0x807   : > { %v4033_v27 = vadd.f32 %v13499_v28, %v3356_v39  ;;  %v13501_v5 = vld [vmem:[#allocation56_spill] sm:$0xff]  ;;  %6142 = vmatpush.msra.mxu3 %v6059_v6  ;;  %6121 = vmatpush.msra.mxu2 %v6062_v47  ;;  %v4711_v39 = vadd.f32 %v13508_v60, %v4034_v37  ;;  %v13514_v3 = vld [vmem:[#allocation281_spill] sm:$0xff] }
 0x808   : > { %v4715_v14 = vadd.f32 %v13501_v5, %v4038_v34  ;;  %v13503_v35 = vld [vmem:[#allocation280_spill] sm:$0xff]  ;;  %v5391_v58 = vadd.f32 %v13509_v38, %v4714_v57  ;;  %v5810_v56 = vpop.f32.mrf.mxu0  ;;  %v13515_v34 = vld [vmem:[#allocation126_spill] sm:$0xff]  ;;  %v13517_v52 = vld [vmem:[#allocation57_spill] sm:$0xff]  ;;  %v5875_v15 = vpop.f32.mrf.mxu1 }
 0x809   : > { %v6055_v31 = vadd.f32 %v13503_v35, %v13502_v59  ;;  %v13504_v0 = vld [vmem:[#allocation36_spill] sm:$0xff]  ;;  %v4710_v46 = vadd.f32 %v13507_v63, %v4033_v27  ;;  %v4706_v6 = vadd.f32 %v13515_v34, %v4029_v43  ;;  %v13524_v43 = vld [vmem:[#allocation277_spill] sm:$0xff] }
 0x80a   : > { %v13505_v4 = vld [vmem:[#allocation104_spill] sm:$0xff]  ;;  %v6068_v27 = vadd.f32 %v5810_v56, %v5391_v58  ;;  %v13526_v38 = vld [vmem:[#allocation53_spill] sm:$0xff] }
 0x80b   : > { %v6058_v40 = vadd.f32 %v13505_v4, %v13504_v0  ;;  %v13506_v29 = vld [vmem:[#allocation72_spill] sm:$0xff]  ;;  %6143 = vmatpush.msra.mxu3 %v6055_v31  ;;  %v5387_v28 = vadd.f32 %v13517_v52, %v4710_v46  ;;  %v13521_v0 = vld [vmem:[#allocation70_spill] sm:$0xff]  ;;  %v13536_v52 = vld [vmem:[#allocation113_spill] sm:$0xff] }
 0x80c   : > { %v4698_v61 = vadd.f32 %v13506_v29, %v4021_v8  ;;  %v13510_v19 = vld [vmem:[#allocation8_spill] sm:$0xff]  ;;  %v13516_v8 = vld [vmem:[#allocation67_spill] sm:$0xff]  ;;  %v4702_v31 = vadd.f32 %v13521_v0, %v4025_v17  ;;  %v13523_v29 = vld [vmem:[#allocation37_spill] sm:$0xff]  ;;  %6079 = vmatpush.msra.mxu0 %v6068_v27 }
 0x80d   : > { %v5392_v7 = vadd.f32 %v13510_v19, %v4715_v14  ;;  %v13511_v12 = vld [vmem:[#allocation40_spill] sm:$0xff]  ;;  %6122 = vmatpush.msra.mxu2 %v6058_v40  ;;  %v4707_v47 = vadd.f32 %v13516_v8, %v4030_v13  ;;  %v6050_v63 = vadd.f32 %v13524_v43, %v13523_v29  ;;  %v6064_v13 = vadd.f32 %v5807_v50, %v5387_v28  ;;  %v13525_v46 = vld [vmem:[#allocation62_spill] sm:$0xff]  ;;  %v13530_v17 = vld [vmem:[#allocation91_spill] sm:$0xff] }
 0x80e   : > { %v13512_v53 = vld [vmem:[#allocation276_spill] sm:$0xff]  ;;  %v4703_v60 = vadd.f32 %v13525_v46, %v4026_v54  ;;  %v13527_v19 = vld [vmem:[#allocation38_spill] sm:$0xff]  ;;  %v13532_v50 = vld [vmem:[#allocation39_spill] sm:$0xff] }
 0x80f   : > { %v6051_v11 = vadd.f32 %v13512_v53, %v13511_v12  ;;  %v13513_v44 = vld [vmem:[#allocation64_spill] sm:$0xff]  ;;  %v6069_v35 = vadd.f32 %v5875_v15, %v5392_v7  ;;  %v5384_v58 = vadd.f32 %v13526_v38, %v4707_v47  ;;  %v5379_v7 = vadd.f32 %v13527_v19, %v4702_v31  ;;  %v13528_v12 = vld [vmem:[#allocation17_spill] sm:$0xff]  ;;  %6080 = vmatpush.msra.mxu0 %v6064_v13  ;;  %v13535_v8 = vld [vmem:[#allocation42_spill] sm:$0xff] }
 0x810   : > { %v6054_v49 = vadd.f32 %v13514_v3, %v13513_v44  ;;  %v13518_v37 = vld [vmem:[#allocation48_spill] sm:$0xff]  ;;  %v13529_v53 = vld [vmem:[#allocation273_spill] sm:$0xff]  ;;  %v5380_v56 = vadd.f32 %v13532_v50, %v4703_v60  ;;  %v5375_v47 = vadd.f32 %v13535_v8, %v4698_v61  ;;  %v13537_v27 = vld [vmem:[#allocation135_spill] sm:$0xff] }
 0x811   : > { %v5388_v57 = vadd.f32 %v13518_v37, %v4711_v39  ;;  %v13519_v5 = vld [vmem:[#allocation76_spill] sm:$0xff]  ;;  %6144 = vmatpush.msra.mxu3 %v6051_v11  ;;  %6099 = vmatpush.msra.mxu1 %v6069_v35  ;;  %v6046_v11 = vadd.f32 %v13529_v53, %v13528_v12  ;;  %v13531_v3 = vld [vmem:[#allocation65_spill] sm:$0xff]  ;;  %v6061_v54 = vadd.f32 %v11772_v62, %v5384_v58  ;;  %v13544_v31 = vld [vmem:[#allocation270_spill] sm:$0xff] }
 0x812   : > { %v13520_v14 = vld [vmem:[#allocation272_spill] sm:$0xff]  ;;  %6123 = vmatpush.msra.mxu2 %v6054_v49  ;;  %v4699_v49 = vadd.f32 %v13531_v3, %v4022_v9  ;;  %v6056_v28 = vadd.f32 %v13536_v52, %v5379_v7  ;;  %v4695_v15 = vadd.f32 %v13537_v27, %v11845_v21  ;;  %v13538_v9 = vld [vmem:[#allocation43_spill] sm:$0xff]  ;;  %v13543_v61 = vld [vmem:[#allocation125_spill] sm:$0xff] }
 0x813   : > { %v6047_v59 = vadd.f32 %v13520_v14, %v13519_v5  ;;  %v13522_v4 = vld [vmem:[#allocation60_spill] sm:$0xff]  ;;  %v6065_v39 = vadd.f32 %v5872_v32, %v5388_v57  ;;  %v13534_v32 = vld [vmem:[#allocation82_spill] sm:$0xff]  ;;  %v13539_v57 = vld [vmem:[#allocation97_spill] sm:$0xff]  ;;  %v6052_v0 = vadd.f32 %v13543_v61, %v5375_v47 }
 0x814   : > { %v5383_v40 = vadd.f32 %v13522_v4, %v4706_v6  ;;  %6124 = vmatpush.msra.mxu2 %v6050_v63  ;;  %v13533_v34 = vld [vmem:[#allocation268_spill] sm:$0xff]  ;;  %v4694_v6 = vadd.f32 %v13534_v32, %v11842_v48  ;;  %v5376_v37 = vadd.f32 %v13538_v9, %v4699_v49  ;;  %v6057_v5 = vadd.f32 %v13539_v57, %v5380_v56  ;;  %v13541_v14 = vld [vmem:[#allocation71_spill] sm:$0xff]  ;;  %v13545_v4 = vld [vmem:[#allocation78_spill] sm:$0xff] }
 0x815   : > { %6145 = vmatpush.msra.mxu3 %v6047_v59  ;;  %6100 = vmatpush.msra.mxu1 %v6065_v39  ;;  %v13540_v62 = vld [vmem:[#allocation264_spill] sm:$0xff]  ;;  %v4690_v59 = vadd.f32 %v13541_v14, %v11834_v18  ;;  %v13542_v48 = vld [vmem:[#allocation47_spill] sm:$0xff]  ;;  %v4691_v21 = vadd.f32 %v13545_v4, %v11839_v1  ;;  %v13547_v43 = vld [vmem:[#allocation85_spill] sm:$0xff] }
 0x816   : > { %v6060_v44 = vadd.f32 %v13530_v17, %v5383_v40  ;;  %6125 = vmatpush.msra.mxu2 %v6046_v11  ;;  %v5371_v35 = vadd.f32 %v13542_v48, %v4694_v6  ;;  %v13546_v40 = vld [vmem:[#allocation46_spill] sm:$0xff]  ;;  %v6053_v63 = vadd.f32 %v13547_v43, %v5376_v37  ;;  %v13548_v13 = vld [vmem:[#allocation260_spill] sm:$0xff]  ;;  %v13550_v60 = vld [vmem:[#allocation51_spill] sm:$0xff] }
 0x817   : > { %6146 = vmatpush.msra.mxu3 %v13533_v34  ;;  %6101 = vmatpush.msra.mxu1 %v6061_v54  ;;  %v5372_v29 = vadd.f32 %v13546_v40, %v4695_v15  ;;  %v13549_v46 = vld [vmem:[#allocation90_spill] sm:$0xff]  ;;  %v5367_v38 = vadd.f32 %v13550_v60, %v4690_v59  ;;  %v13554_v12 = vld [vmem:[#allocation168_spill] sm:$0xff]  ;;  %v13555_v11 = vld [vmem:[#allocation283_spill] sm:$0xff] }
 0x818   : > { %6081 = vmatpush.msra.mxu0 %v6060_v44  ;;  %6126 = vmatpush.msra.mxu2 %v13544_v31  ;;  %v4686_v18 = vadd.f32 %v13549_v46, %v11828_v45  ;;  %v13551_v58 = vld [vmem:[#allocation282_spill] sm:$0xff]  ;;  %v5368_v53 = vadd.f32 %v13554_v12, %v4691_v21  ;;  %v13556_v44 = vld [vmem:[#allocation256_spill] sm:$0xff]  ;;  %v13557_v3 = vld [vmem:[#allocation99_spill] sm:$0xff] }
 0x819   : > { %6147 = vmatpush.msra.mxu3 %v13540_v62  ;;  %6102 = vmatpush.msra.mxu1 %v6057_v5  ;;  %v6048_v39 = vadd.f32 %v13551_v58, %v5371_v35  ;;  %v13552_v19 = vld [vmem:[#allocation266_spill] sm:$0xff]  ;;  %v6049_v17 = vadd.f32 %v13555_v11, %v5372_v29  ;;  %v4682_v45 = vadd.f32 %v13557_v3, %v11822_v25  ;;  %v13561_v32 = vld [vmem:[#allocation79_spill] sm:$0xff]  ;;  %v13566_v15 = vld [vmem:[#allocation44_spill] sm:$0xff] }
 0x81a   : > { %6082 = vmatpush.msra.mxu0 %v6056_v28  ;;  %6127 = vmatpush.msra.mxu2 %v13552_v19  ;;  %v13553_v7 = vld [vmem:[#allocation106_spill] sm:$0xff]  ;;  %v13563_v47 = vld [vmem:[#allocation279_spill] sm:$0xff]  ;;  %v13564_v28 = vld [vmem:[#allocation252_spill] sm:$0xff] }
 0x81b   : > { %6148 = vmatpush.msra.mxu3 %v13548_v13  ;;  %v4687_v1 = vadd.f32 %v13553_v7, %v11831_v22  ;;  %6103 = vmatpush.msra.mxu1 %v6053_v63  ;;  %v13558_v49 = vld [vmem:[#allocation18_spill] sm:$0xff]  ;;  %v4683_v22 = vadd.f32 %v13561_v32, %v11825_v36  ;;  %v6045_v52 = vadd.f32 %v13563_v47, %v5368_v53  ;;  %v13569_v62 = vld [vmem:[#allocation87_spill] sm:$0xff]  ;;  %v13572_v61 = vld [vmem:[#allocation248_spill] sm:$0xff] }
 0x81c   : > { %6083 = vmatpush.msra.mxu0 %v6052_v0  ;;  %v5363_v50 = vadd.f32 %v13558_v49, %v4686_v18  ;;  %v13559_v56 = vld [vmem:[#allocation278_spill] sm:$0xff]  ;;  %v5359_v9 = vadd.f32 %v13566_v15, %v4682_v45  ;;  %v4679_v36 = vadd.f32 %v13569_v62, %v11819_v26  ;;  %v13570_v14 = vld [vmem:[#allocation219_spill] sm:$0xff]  ;;  %v13573_v0 = vld [vmem:[#allocation121_spill] sm:$0xff] }
 0x81d   : > { %6149 = vmatpush.msra.mxu3 %v13556_v44  ;;  %v6044_v54 = vadd.f32 %v13559_v56, %v5367_v38  ;;  %v13560_v34 = vld [vmem:[#allocation262_spill] sm:$0xff]  ;;  %6104 = vmatpush.msra.mxu1 %v6049_v17  ;;  %v5360_v59 = vadd.f32 %v13570_v14, %v4683_v22  ;;  %v13571_v48 = vld [vmem:[#allocation275_spill] sm:$0xff]  ;;  %v13575_v21 = vld [vmem:[#allocation269_spill] sm:$0xff] }
 0x81e   : > { %6084 = vmatpush.msra.mxu0 %v6048_v39  ;;  %6128 = vmatpush.msra.mxu2 %v13560_v34  ;;  %v13562_v6 = vld [vmem:[#allocation50_spill] sm:$0xff]  ;;  %v13574_v31 = vld [vmem:[#allocation55_spill] sm:$0xff]  ;;  %v6036_v40 = vadd.f32 %v13575_v21, %v5359_v9  ;;  %v13577_v43 = vld [vmem:[#allocation108_spill] sm:$0xff] }
 0x81f   : > { %v5364_v8 = vadd.f32 %v13562_v6, %v4687_v1  ;;  %6150 = vmatpush.msra.mxu3 %v13564_v28  ;;  %v13565_v27 = vld [vmem:[#allocation110_spill] sm:$0xff]  ;;  %6105 = vmatpush.msra.mxu1 %v6045_v52  ;;  %v4675_v26 = vadd.f32 %v13577_v43, %v11812_v24  ;;  %v13579_v46 = vld [vmem:[#allocation271_spill] sm:$0xff]  ;;  %v13580_v60 = vld [vmem:[#allocation244_spill] sm:$0xff] }
 0x820   : > { %v4678_v25 = vadd.f32 %v13565_v27, %v11815_v42  ;;  %v13567_v37 = vld [vmem:[#allocation274_spill] sm:$0xff]  ;;  %6085 = vmatpush.msra.mxu0 %v6044_v54  ;;  %v4674_v42 = vadd.f32 %v13573_v0, %v11809_v20  ;;  %v6037_v18 = vadd.f32 %v13579_v46, %v5360_v59  ;;  %v13581_v38 = vld [vmem:[#allocation131_spill] sm:$0xff]  ;;  %v13583_v19 = vld [vmem:[#allocation265_spill] sm:$0xff] }
 0x821   : > { %v6040_v57 = vadd.f32 %v13567_v37, %v5363_v50  ;;  %v13568_v5 = vld [vmem:[#allocation258_spill] sm:$0xff]  ;;  %v6041_v35 = vadd.f32 %v13571_v48, %v5364_v8  ;;  %6151 = vmatpush.msra.mxu3 %v13572_v61  ;;  %v4670_v20 = vadd.f32 %v13581_v38, %v11803_v55  ;;  %v13585_v12 = vld [vmem:[#allocation105_spill] sm:$0xff]  ;;  %v13586_v53 = vld [vmem:[#allocation84_spill] sm:$0xff] }
 0x822   : > { %6129 = vmatpush.msra.mxu2 %v13568_v5  ;;  %v5355_v4 = vadd.f32 %v13574_v31, %v4678_v25  ;;  %v13576_v29 = vld [vmem:[#allocation254_spill] sm:$0xff]  ;;  %v4671_v24 = vadd.f32 %v13585_v12, %v11806_v23  ;;  %v5352_v11 = vadd.f32 %v13586_v53, %v4675_v26  ;;  %v13587_v17 = vld [vmem:[#allocation267_spill] sm:$0xff]  ;;  %v13588_v3 = vld [vmem:[#allocation12_spill] sm:$0xff] }
 0x823   : > { %6086 = vmatpush.msra.mxu0 %v6040_v57  ;;  %v13578_v63 = vld [vmem:[#allocation166_spill] sm:$0xff]  ;;  %6106 = vmatpush.msra.mxu1 %v6041_v35  ;;  %v6072_v55 = vld [vmem:[%s12052_s6] sm:$0xff]  ;;  %v13589_v45 = vld [vmem:[#allocation203_spill] sm:$0xff] }
 0x824   : > { %6130 = vmatpush.msra.mxu2 %v13576_v29  ;;  %v5356_v13 = vadd.f32 %v13578_v63, %v4679_v36  ;;  %6152 = vmatpush.msra.mxu3 %v13580_v60  ;;  %v13582_v58 = vld [vmem:[#allocation54_spill] sm:$0xff]  ;;  %v6032_v7 = vadd.f32 %v13583_v19, %v5355_v4  ;;  %v4666_v49 = vadd.f32 %v13589_v45, %v11797_v10  ;;  %v13590_v50 = vld [vmem:[#allocation95_spill] sm:$0xff]  ;;  %v13591_v54 = vld [vmem:[#allocation261_spill] sm:$0xff] }
 0x825   : > { %v5351_v39 = vadd.f32 %v13582_v58, %v4674_v42  ;;  %6087 = vmatpush.msra.mxu0 %v6036_v40  ;;  %v13584_v1 = vld [vmem:[#allocation250_spill] sm:$0xff]  ;;  %6107 = vmatpush.msra.mxu1 %v6037_v18  ;;  %v5347_v56 = vadd.f32 %v13590_v50, %v4670_v20  ;;  %v13593_v32 = vld [vmem:[#allocation129_spill] sm:$0xff]  ;;  %v13595_v47 = vld [vmem:[#allocation263_spill] sm:$0xff] }
 0x826   : > { %6131 = vmatpush.msra.mxu2 %v13584_v1  ;;  %v6033_v44 = vadd.f32 %v13587_v17, %v5356_v13  ;;  %6153 = vmatpush.msra.mxu3 %v13588_v3  ;;  %v13592_v23 = vld [vmem:[#allocation246_spill] sm:$0xff]  ;;  %v4667_v22 = vadd.f32 %v13593_v32, %v11800_v41  ;;  %v6029_v52 = vadd.f32 %v13595_v47, %v5352_v11  ;;  %v13596_v28 = vld [vmem:[#allocation41_spill] sm:$0xff]  ;;  %v13597_v27 = vld [vmem:[#allocation200_spill] sm:$0xff] }
 0x827   : > { %v6028_v34 = vadd.f32 %v13591_v54, %v5351_v39  ;;  %6088 = vmatpush.msra.mxu0 %v6032_v7  ;;  %v13594_v6 = vld [vmem:[#allocation142_spill] sm:$0xff]  ;;  %v4662_v10 = vadd.f32 %v13597_v27, %v11791_v16  ;;  %v13598_v25 = vld [vmem:[#allocation215_spill] sm:$0xff]  ;;  %v13599_v9 = vld [vmem:[#allocation257_spill] sm:$0xff]  ;;  %v6077_v54 = vpop.permute.xlu1 %6076 }
 0x828   : > { %6132 = vmatpush.msra.mxu2 %v13592_v23  ;;  %v5348_v8 = vadd.f32 %v13594_v6, %v4671_v24  ;;  %6108 = vmatpush.msra.mxu1 %v6033_v44  ;;  %v5343_v15 = vadd.f32 %v13598_v25, %v4666_v49  ;;  %v6024_v37 = vadd.f32 %v13599_v9, %v5347_v56  ;;  %v13600_v57 = vld [vmem:[#allocation124_spill] sm:$0xff]  ;;  %v13601_v41 = vld [vmem:[#allocation49_spill] sm:$0xff]  ;;  %v13602_v36 = vld [vmem:[#allocation259_spill] sm:$0xff] }
 0x829   : > { %6154 = vmatpush.msra.mxu3 %v13596_v28  ;;  %6089 = vmatpush.msra.mxu0 %v6028_v34  ;;  %v4663_v5 = vadd.f32 %v13600_v57, %v11794_v2  ;;  %v5344_v62 = vadd.f32 %v13601_v41, %v4667_v22  ;;  %v13603_v59 = vld [vmem:[#allocation118_spill] sm:$0xff]  ;;  %v13604_v48 = vld [vmem:[#allocation127_spill] sm:$0xff]  ;;  %v13605_v35 = vld [vmem:[#allocation28_spill] sm:$0xff] }
 0x82a   : > { %6155 = vmatmul.f32.vlgmr.msra.gmra.mxu3 %v6072_v55  ;;  %v6025_v14 = vadd.f32 %v13602_v36, %v5348_v8  ;;  %6109 = vmatpush.msra.mxu1 %v6029_v52  ;;  %v3978_v61 = vadd.f32 %v13605_v35, %v13604_v48  ;;  %v13606_v16 = vld [vmem:[#allocation198_spill] sm:$0xff]  ;;  %v13608_v4 = vld [vmem:[#allocation253_spill] sm:$0xff]  ;;  %v13611_v26 = vld [vmem:[#allocation255_spill] sm:$0xff] }
 0x82b   : > { %6133 = vmatpush.msra.mxu2 %v13603_v59  ;;  %v4658_v0 = vadd.f32 %v13606_v16, %v11785_v51  ;;  %v13607_v42 = vld [vmem:[#allocation162_spill] sm:$0xff]  ;;  %v6020_v21 = vadd.f32 %v13608_v4, %v5343_v15  ;;  %6090 = vmatpush.msra.mxu0 %v6024_v37  ;;  %v13609_v2 = vld [vmem:[#allocation29_spill] sm:$0xff]  ;;  %v6021_v63 = vadd.f32 %v13611_v26, %v5344_v62  ;;  %v13612_v13 = vld [vmem:[#allocation35_spill] sm:$0xff] }
 0x82c   : > { %v5339_v31 = vadd.f32 %v13607_v42, %v4662_v10  ;;  %v4659_v40 = vadd.f32 %v13609_v2, %v11788_v33  ;;  %v13610_v29 = vld [vmem:[#allocation58_spill] sm:$0xff]  ;;  %6110 = vmatpush.msra.mxu1 %v6025_v14  ;;  %v13613_v46 = vld [vmem:[#allocation196_spill] sm:$0xff]  ;;  %v13615_v38 = vld [vmem:[#allocation249_spill] sm:$0xff] }
 0x82d   : > { %v5340_v43 = vadd.f32 %v13610_v29, %v4663_v5  ;;  %6134 = vmatpush.msra.mxu2 %v13612_v13  ;;  %v4654_v18 = vadd.f32 %v13613_v46, %v11782_v30  ;;  %v13614_v60 = vld [vmem:[#allocation102_spill] sm:$0xff]  ;;  %6091 = vmatpush.msra.mxu0 %v6020_v21  ;;  %v13616_v58 = vld [vmem:[#allocation16_spill] sm:$0xff]  ;;  %v13618_v7 = vld [vmem:[#allocation251_spill] sm:$0xff] }
 0x82e   : > { %v5335_v51 = vadd.f32 %v13614_v60, %v4658_v0  ;;  %v6016_v20 = vadd.f32 %v13615_v38, %v5339_v31  ;;  %6135 = vmatmul.f32.vlgmr.msra.gmra.mxu2 %v6072_v55  ;;  %v4655_v39 = vadd.f32 %v13616_v58, %v3978_v61  ;;  %v13617_v19 = vld [vmem:[#allocation52_spill] sm:$0xff]  ;;  %6111 = vmatpush.msra.mxu1 %v6021_v63  ;;  %v13619_v12 = vld [vmem:[#allocation61_spill] sm:$0xff]  ;;  %v13621_v30 = vld [vmem:[#allocation63_spill] sm:$0xff] }
 0x82f   : > { %v5336_v33 = vadd.f32 %v13617_v19, %v4659_v40  ;;  %v6017_v1 = vadd.f32 %v13618_v7, %v5340_v43  ;;  %v5331_v24 = vadd.f32 %v13619_v12, %v4654_v18  ;;  %v13620_v53 = vld [vmem:[#allocation245_spill] sm:$0xff]  ;;  %v13622_v44 = vld [vmem:[#allocation247_spill] sm:$0xff] }
 0x830   : > { %v6012_v11 = vadd.f32 %v13620_v53, %v5335_v51  ;;  %6092 = vmatpush.msra.mxu0 %v6016_v20  ;;  %v5332_v17 = vadd.f32 %v13621_v30, %v4655_v39  ;;  %v13623_v45 = vld [vmem:[#allocation137_spill] sm:$0xff]  ;;  %v13624_v50 = vld [vmem:[#allocation243_spill] sm:$0xff] }
 0x831   : > { %v6013_v3 = vadd.f32 %v13622_v44, %v5336_v33  ;;  %6112 = vmatpush.msra.mxu1 %v6017_v1  ;;  %v6008_v49 = vadd.f32 %v13623_v45, %v5331_v24 }
 0x832   : > { %6093 = vmatpush.msra.mxu0 %v6012_v11  ;;  %v6009_v56 = vadd.f32 %v13624_v50, %v5332_v17 }
 0x833   : > { %6113 = vmatpush.msra.mxu1 %v6013_v3 }
 0x834   : > { %6094 = vmatpush.msra.mxu0 %v6008_v49 }
 0x835   : > { %6114 = vmatpush.msra.mxu1 %v6009_v56  ;;  %6095 = vmatmul.f32.vlgmr.msra.gmra.mxu0 %v6072_v55 }
 0x836   : > { %6115 = vmatmul.f32.vlgmr.msra.gmra.mxu1 %v6072_v55 }
 0x8ad   : > { %v6156_v34 = vpop.f32.mrf.mxu3 }
 0x8ae   : > { %v6157_v23 = vadd.f32 %v6156_v34, %v6077_v54 }
 0x8b0   : > { %6162 = vst [vmem:[%s343_s29 + $0x18] sm:$0xff] %v6157_v23 }
 0x8b1   : > { %v6136_v32 = vpop.f32.mrf.mxu2 }
 0x8b2   : > { %v6137_v22 = vadd.f32 %v6136_v32, %v6077_v54  ;;  %v6096_v6 = vpop.f32.mrf.mxu0 }
 0x8b3   : > { %v6097_v8 = vadd.f32 %v6096_v6, %v6077_v54  ;;  %v6116_v55 = vpop.f32.mrf.mxu1 }
 0x8b4   : > { %6161 = vst [vmem:[%s343_s29 + $0x10] sm:$0xff] %v6137_v22  ;;  %v6117_v47 = vadd.f32 %v6116_v55, %v6077_v54 }
 0x8b5   : > { %6159 = vst [vmem:[%s343_s29] sm:$0xff] %v6097_v8 }
 0x8b6   : > { %6160 = vst [vmem:[%s343_s29 + $0x8] sm:$0xff] %v6117_v47 }
 0x8b7   : > { %6454 = shalt.err (!%p6451_p8)
}
 0x8b8   : > { %6338 = dma.vmem_to_hbm [thread:$0]  (%p6594_p5), %s6178_s14, 512, %s6180_s16, %s6164_s13  }
 0x8b9 PF: > { %p6350_p9 = scmp.ge.s32.totalorder %s6493_s12, 2  ;;  %s6191_s26 = sand.u32 1, %s6481_s30  }
 0x8ba   : > { %s6192_s28 = scalar_lea.sflag [#allocation4], %s6191_s26 }
 0x8bb   : > { %p6345_p10 = pnand %p6350_p9, %p6598_p6 }
 0x8bd   : > { %p6346_p11 = pneg %p6345_p10 }
 0x8bf   : > { %6476 = dma.done.wait (%p6346_p11), %s6192_s28, 512  }
 0x8c0   : > { %6478 = vsyncadd (%p6346_p11), %s6192_s28, 4294966784  ;;  %p20_p12 = scmp.ge.s32.totalorder %s6581_s15, 4   ;;  %s13625_s30 = smov %s6485_s10 }
 0x8c1   : > { %s13626_s10 = smov %s6489_s11  ;;  %s13627_s11 = smov %s6592_s18 }
 0x8c2   : > { %s13628_s12 = smov %s6581_s15  ;;  %22 = sbr.rel (!%p20_p12) target bundleno = 4 (0x4), region = 103 }
 0x8c7   :  { %6198 = vsyncpa [#allocation3], 1 }
 0x8c8   :  { %6200 = vsyncpa [#allocation3 + $0x1], 1 }
 0x8c9   :  { %6201 = vsyncpa [#allocation4], 1 }
 0x8ca   :  { %6203 = vsyncpa [#allocation4 + $0x1], 1 }

</bundles_post_ra>
